<compile_context>
chip_gen: v7x
topology: tpu7x:2x2x1
jax: 0.10.0
libtpu: 0.0.40
codegen_flags: <defaults>
</compile_context>

<pallas_src>
import functools

import jax
import jax.numpy as jnp
from jax.experimental import pallas as pl
from jax.experimental.pallas import tpu as pltpu

VOCAB = 129   # nn.Embedding(129, H) / nn.Linear(H, 129)
PADV = 256    # lane-aligned padded vocab for the dense output
LANE = 128    # TPU lane width


def _lstm_cell(gates, c_prev, hp):
    """PyTorch gate order (i, f, g, o); each gate occupies a full hp-lane slot."""
    i_g = jax.nn.sigmoid(gates[:, 0 * hp:1 * hp])
    f_g = jax.nn.sigmoid(gates[:, 1 * hp:2 * hp])
    g_g = jnp.tanh(gates[:, 2 * hp:3 * hp])
    o_g = jax.nn.sigmoid(gates[:, 3 * hp:4 * hp])
    c_new = f_g * c_prev + i_g * g_g
    h_new = o_g * jnp.tanh(c_new)
    return h_new, c_new


def rnn_seq_kernel(toks_ref,                 # SMEM scalar prefetch: int32 [Tp]
                   emb_ref,                  # f32  [VOCAB, HP]       (resident)
                   w_cat_ref,                # bf16 [L, 2*HP, 4*HP]   ([W_ih_T ; W_hh_T])
                   b_ref,                    # f32  [L, 1, 4*HP]
                   h0_ref, c0_ref,           # f32  [L, 1, HP]
                   dw_ref,                   # bf16 [HP, PADV]
                   db_ref,                   # f32  [1, PADV]
                   logits_ref,               # f32  [Tp, PADV]
                   h_out_ref, c_out_ref,     # f32  [L, 1, HP]
                   x_sc,                     # VMEM f32 [Tp, HP]    relu(emb[tok])
                   gih0_sc,                  # VMEM f32 [Tp, 4*HP]  precomputed layer-0 ih gates
                   h_top_sc,                 # VMEM f32 [Tp, HP]    top-layer h per step
                   xh_sc,                    # VMEM f32 [1, 2*HP]   fused [x ; h] staging
                   *, seq_len, unroll):
    L = h_out_ref.shape[0]
    HP = h_out_ref.shape[2]

    # ---- init recurrent state + scratch ---------------------------------
    h_out_ref[...] = h0_ref[...]
    c_out_ref[...] = c0_ref[...]
    x_sc[...] = jnp.zeros_like(x_sc)
    h_top_sc[...] = jnp.zeros_like(h_top_sc)

    # ---- gather embeddings + ReLU for all steps (row gather, no one-hot) --
    def gather(i, carry):
        tok = toks_ref[i]
        tok = jnp.minimum(jnp.maximum(tok, 0), VOCAB - 1)   # no VMEM OOB check
        x_sc[pl.ds(i, 1), :] = jnp.maximum(emb_ref[pl.ds(tok, 1), :], 0.0)
        return carry

    jax.lax.fori_loop(0, seq_len, gather, 0, unroll=unroll)

    # ---- layer-0 input->hidden gates, batched over T (off the serial path),
    #      bias folded in ---------------------------------------------------
    gih0_sc[...] = (
        jnp.dot(x_sc[...].astype(jnp.bfloat16), w_cat_ref[0, 0:HP, :],
                preferred_element_type=jnp.float32)
        + b_ref[0])

    # ---- serial recurrence over time --------------------------------------
    def step(t, carry):
        # layer 0: precomputed ih gates + h_prev @ W_hh[0]
        h_prev = h_out_ref[0]
        c_prev = c_out_ref[0]
        gates = (gih0_sc[pl.ds(t, 1), :]
                 + jnp.dot(h_prev.astype(jnp.bfloat16),
                           w_cat_ref[0, HP:2 * HP, :],
                           preferred_element_type=jnp.float32))
        h_new, c_new = _lstm_cell(gates, c_prev, HP)
        h_out_ref[0] = h_new
        c_out_ref[0] = c_new
        x = h_new

        # layers 1..L-1: fused [x ; h_prev] @ W_cat[l]  (one MXU push per layer)
        for l in range(1, L):
            h_prev = h_out_ref[l]
            c_prev = c_out_ref[l]
            xh_sc[:, 0:HP] = x
            xh_sc[:, HP:2 * HP] = h_prev
            gates = (jnp.dot(xh_sc[...].astype(jnp.bfloat16), w_cat_ref[l],
                             preferred_element_type=jnp.float32)
                     + b_ref[l])
            h_new, c_new = _lstm_cell(gates, c_prev, HP)
            h_out_ref[l] = h_new
            c_out_ref[l] = c_new
            x = h_new

        h_top_sc[pl.ds(t, 1), :] = x
        return carry

    jax.lax.fori_loop(0, seq_len, step, 0, unroll=unroll)

    # ---- deferred vocab projection: one batched, lane-dense matmul + store --
    logits_ref[...] = (
        jnp.dot(h_top_sc[...].astype(jnp.bfloat16), dw_ref[...],
                preferred_element_type=jnp.float32)
        + db_ref[...])


def prepare_params(emb, w_ih, w_hh, b_ih, b_hh, dw, db):
    """One-time weight prep (runs at model init, NOT per step).

    PyTorch conventions in: w_ih/w_hh (L, 4H, H), b_* (L, 4H), dw (129, H), db (129,).
    Gate g (i,f,g,o) is placed at columns [g*HP : g*HP+H]; rows/cols beyond H are zero.
    """
    L, four_h, H = w_ih.shape
    HP = ((H + LANE - 1) // LANE) * LANE

    def pad_gate_cols(w_t):                         # (H, 4H) -> (HP, 4*HP)
        parts = jnp.split(w_t, 4, axis=1)
        parts = [jnp.pad(p, ((0, HP - H), (0, HP - H))) for p in parts]
        return jnp.concatenate(parts, axis=1)

    def pad_gate_vec(v):                            # (4H,) -> (4*HP,)
        parts = jnp.split(v, 4)
        parts = [jnp.pad(p, (0, HP - H)) for p in parts]
        return jnp.concatenate(parts)

    w_cat = []
    for l in range(L):
        wi = pad_gate_cols(w_ih[l].astype(jnp.float32).T)   # (HP, 4HP)
        wh = pad_gate_cols(w_hh[l].astype(jnp.float32).T)   # (HP, 4HP)
        w_cat.append(jnp.concatenate([wi, wh], axis=0))     # (2HP, 4HP)
    w_cat = jnp.stack(w_cat).astype(jnp.bfloat16)           # (L, 2HP, 4HP)

    b = jnp.stack([pad_gate_vec(b_ih[l].astype(jnp.float32)
                                + b_hh[l].astype(jnp.float32))
                   for l in range(L)])[:, None, :]           # (L, 1, 4HP)

    emb_p = jnp.pad(emb.astype(jnp.float32), ((0, 0), (0, HP - H)))          # (VOCAB, HP)
    dw_t = jnp.pad(dw.T.astype(jnp.bfloat16),
                   ((0, HP - H), (0, PADV - VOCAB)))                          # (HP, PADV)
    db_p = jnp.pad(db.astype(jnp.float32)[None, :], ((0, 0), (0, PADV - VOCAB)))  # (1, PADV)
    return dict(emb=emb_p, w_cat=w_cat, b=b, dw=dw_t, db=db_p)


def rnn_forward(tokens, params, h0, c0):
    """Run T fused RNN steps. tokens: int (scalar) or int32 [T].

    Returns (logits [T, 129], (h_out [L,1,H], c_out [L,1,H])).
    With T == 1 this is exactly the PyTorch module's forward(x, hidden).
    """
    tokens = jnp.asarray(tokens, jnp.int32).reshape(-1)
    T = int(tokens.shape[0])
    Tp = max(8, ((T + 7) // 8) * 8)                 # sublane-aligned scratch/output rows
    toks = jnp.pad(tokens, (0, Tp - T))

    emb, w_cat, b, dw, db = (params["emb"], params["w_cat"], params["b"],
                             params["dw"], params["db"])
    L = w_cat.shape[0]
    HP = emb.shape[1]
    GP = 4 * HP
    H = h0.shape[2]

    h0p = jnp.pad(h0.astype(jnp.float32), ((0, 0), (0, 0), (0, HP - H)))
    c0p = jnp.pad(c0.astype(jnp.float32), ((0, 0), (0, 0), (0, HP - H)))

    unroll = True if T <= 16 else 8
    kernel = functools.partial(rnn_seq_kernel, seq_len=T, unroll=unroll)

    grid_spec = pltpu.PrefetchScalarGridSpec(
        num_scalar_prefetch=1,
        grid=(1,),                                   # whole sequence in one invocation
        in_specs=[
            pl.BlockSpec((VOCAB, HP), lambda i, toks: (0, 0)),          # emb
            pl.BlockSpec((L, 2 * HP, GP), lambda i, toks: (0, 0, 0)),   # w_cat
            pl.BlockSpec((L, 1, GP), lambda i, toks: (0, 0, 0)),        # bias
            pl.BlockSpec((L, 1, HP), lambda i, toks: (0, 0, 0)),        # h0
            pl.BlockSpec((L, 1, HP), lambda i, toks: (0, 0, 0)),        # c0
            pl.BlockSpec((HP, PADV), lambda i, toks: (0, 0)),           # dense w
            pl.BlockSpec((1, PADV), lambda i, toks: (0, 0)),            # dense b
        ],
        out_specs=(
            pl.BlockSpec((Tp, PADV), lambda i, toks: (0, 0)),           # logits
            pl.BlockSpec((L, 1, HP), lambda i, toks: (0, 0, 0)),        # h state/out
            pl.BlockSpec((L, 1, HP), lambda i, toks: (0, 0, 0)),        # c state/out
        ),
        scratch_shapes=[
            pltpu.VMEM((Tp, HP), jnp.float32),      # x_sc
            pltpu.VMEM((Tp, GP), jnp.float32),      # gih0_sc
            pltpu.VMEM((Tp, HP), jnp.float32),      # h_top_sc
            pltpu.VMEM((1, 2 * HP), jnp.float32),   # xh_sc
        ],
    )

    logits_pad, h_out_p, c_out_p = pl.pallas_call(
        kernel,
        grid_spec=grid_spec,
        out_shape=(
            jax.ShapeDtypeStruct((Tp, PADV), jnp.float32),
            jax.ShapeDtypeStruct((L, 1, HP), jnp.float32),
            jax.ShapeDtypeStruct((L, 1, HP), jnp.float32),
        ),
        compiler_params=pltpu.CompilerParams(
            dimension_semantics=("arbitrary",)),
    )(toks, emb, w_cat, b, h0p, c0p, dw, db)

    logits = logits_pad[:T, :VOCAB]                 # drop time + lane padding
    h_out = h_out_p[:, :, :H]
    c_out = c_out_p[:, :, :H]
    return logits, (h_out, c_out)


def rnn_forward_ref(tokens, emb, w_ih, w_hh, b_ih, b_hh, h0, c0, dw, db):
    """Pure-JAX reference mirroring the PyTorch forward applied per token
    (same bf16 weight storage / f32 accumulation as the kernel)."""
    L = w_ih.shape[0]
    w_ih_b = w_ih.astype(jnp.bfloat16)
    w_hh_b = w_hh.astype(jnp.bfloat16)
    dw_b = dw.astype(jnp.bfloat16)
    b = (b_ih.astype(jnp.float32) + b_hh.astype(jnp.float32))
    h = h0.astype(jnp.float32)
    c = c0.astype(jnp.float32)
    logits_all = []
    for tok in tokens:
        x = jnp.maximum(emb[tok].astype(jnp.float32), 0.0)[None, :]     # (1, H)
        hs, cs = [], []
        for l in range(L):
            gates = (jnp.dot(x.astype(jnp.bfloat16), w_ih_b[l].T,
                             preferred_element_type=jnp.float32)
                     + jnp.dot(h[l].astype(jnp.bfloat16), w_hh_b[l].T,
                               preferred_element_type=jnp.float32)
                     + b[l][None, :])
            i_g, f_g, g_g, o_g = jnp.split(gates, 4, axis=-1)
            cn = jax.nn.sigmoid(f_g) * c[l] + jax.nn.sigmoid(i_g) * jnp.tanh(g_g)
            hn = jax.nn.sigmoid(o_g) * jnp.tanh(cn)
            hs.append(hn)
            cs.append(cn)
            x = hn
        h = jnp.stack(hs)
        c = jnp.stack(cs)
        logits_all.append(jnp.dot(x.astype(jnp.bfloat16), dw_b.T,
                                  preferred_element_type=jnp.float32)
                          + db.astype(jnp.float32)[None, :])
    return jnp.concatenate(logits_all, axis=0), (h, c)


if __name__ == "__main__":
    H = 32          # hiddenSize
    L = 2           # lstmlayers
    T = 8           # decode sequence length for the fused kernel
    key = jax.random.PRNGKey(0)
    ks = jax.random.split(key, 8)
    scale = 1.0 / jnp.sqrt(H)

    emb = jax.random.normal(ks[0], (VOCAB, H), jnp.float32)                      # Embedding weight
    w_ih = jax.random.uniform(ks[1], (L, 4 * H, H), jnp.float32, -scale, scale)  # LSTM weight_ih
    w_hh = jax.random.uniform(ks[2], (L, 4 * H, H), jnp.float32, -scale, scale)  # LSTM weight_hh
    b_ih = jax.random.uniform(ks[3], (L, 4 * H), jnp.float32, -scale, scale)
    b_hh = jax.random.uniform(ks[4], (L, 4 * H), jnp.float32, -scale, scale)
    dw = jax.random.uniform(ks[5], (VOCAB, H), jnp.float32, -scale, scale)       # Linear weight
    db = jax.random.uniform(ks[6], (VOCAB,), jnp.float32, -scale, scale)         # Linear bias

    # init_hidden(): zeros of shape (lstmlayers, 1, hiddenSize)
    h0 = jnp.zeros((L, 1, H), jnp.float32)
    c0 = jnp.zeros((L, 1, H), jnp.float32)

    # One-time weight prep (hoisted out of the per-step path).
    params = prepare_params(emb, w_ih, w_hh, b_ih, b_hh, dw, db)

    tokens = jax.random.randint(ks[7], (T,), 0, VOCAB, jnp.int32)

    # Fused T-step decode: one launch, in-kernel time loop, weights resident.
    logits_seq, (h_seq, c_seq) = rnn_forward(tokens, params, h0, c0)
    # Single step == the PyTorch module's forward(x, hidden).
    logits_1, (h_1, c_1) = rnn_forward(tokens[:1], params, h0, c0)
    jax.block_until_ready((logits_seq, h_seq, c_seq, logits_1, h_1, c_1))

    tok_list = [int(t) for t in tokens]
    logits_ref, (h_ref, c_ref) = rnn_forward_ref(
        tok_list, emb, w_ih, w_hh, b_ih, b_hh, h0, c0, dw, db)
    logits1_ref, (h1_ref, c1_ref) = rnn_forward_ref(
        tok_list[:1], emb, w_ih, w_hh, b_ih, b_hh, h0, c0, dw, db)

    assert logits_seq.shape == (T, VOCAB)
    assert h_seq.shape == (L, 1, H) and c_seq.shape == (L, 1, H)
    assert jnp.allclose(logits_seq, logits_ref, rtol=1e-4, atol=2e-4)
    assert jnp.allclose(h_seq, h_ref, rtol=1e-4, atol=2e-4)
    assert jnp.allclose(c_seq, c_ref, rtol=1e-4, atol=2e-4)

    assert logits_1.shape == (1, VOCAB)
    assert jnp.allclose(logits_1, logits1_ref, rtol=1e-4, atol=2e-4)
    assert jnp.allclose(h_1, h1_ref, rtol=1e-4, atol=2e-4)
    assert jnp.allclose(c_1, c1_ref, rtol=1e-4, atol=2e-4)
    print("KERNEL_OK")
</pallas_src>

<mosaic_0001>
module attributes {stable_mosaic.version = 11 : i64} {
  func.func @rnn_seq_kernel(%arg0: i32, %arg1: memref<8xi32, #tpu.memory_space<smem>>, %arg2: memref<129x128xf32, #tpu.memory_space<vmem>>, %arg3: memref<2x256x512xbf16, #tpu.memory_space<vmem>>, %arg4: memref<2x1x512xf32, #tpu.memory_space<vmem>>, %arg5: memref<2x1x128xf32, #tpu.memory_space<vmem>>, %arg6: memref<2x1x128xf32, #tpu.memory_space<vmem>>, %arg7: memref<128x256xbf16, #tpu.memory_space<vmem>>, %arg8: memref<1x256xf32, #tpu.memory_space<vmem>>, %arg9: memref<8x256xf32, #tpu.memory_space<vmem>>, %arg10: memref<2x1x128xf32, #tpu.memory_space<vmem>>, %arg11: memref<2x1x128xf32, #tpu.memory_space<vmem>>, %arg12: memref<8x128xf32, #tpu.memory_space<vmem>>, %arg13: memref<8x512xf32, #tpu.memory_space<vmem>>, %arg14: memref<8x128xf32, #tpu.memory_space<vmem>>, %arg15: memref<1x256xf32, #tpu.memory_space<vmem>>) attributes {dimension_semantics = [#tpu.dimension_semantics<arbitrary>], iteration_bounds = array<i64: 1>, scalar_prefetch = 1 : i64, scratch_operands = 4 : i64, tpu.core_type = #tpu.core_type<tc>, window_params = [{pipeline_mode = #tpu.pipeline_mode<synchronous>, transform_indices = @transform_0, window_bounds = array<i64: 129, 128>}, {pipeline_mode = #tpu.pipeline_mode<synchronous>, transform_indices = @transform_1, window_bounds = array<i64: 2, 256, 512>}, {pipeline_mode = #tpu.pipeline_mode<synchronous>, transform_indices = @transform_2, window_bounds = array<i64: 2, 1, 512>}, {pipeline_mode = #tpu.pipeline_mode<synchronous>, transform_indices = @transform_3, window_bounds = array<i64: 2, 1, 128>}, {pipeline_mode = #tpu.pipeline_mode<synchronous>, transform_indices = @transform_4, window_bounds = array<i64: 2, 1, 128>}, {pipeline_mode = #tpu.pipeline_mode<synchronous>, transform_indices = @transform_5, window_bounds = array<i64: 128, 256>}, {pipeline_mode = #tpu.pipeline_mode<synchronous>, transform_indices = @transform_6, window_bounds = array<i64: 1, 256>}, {pipeline_mode = #tpu.pipeline_mode<synchronous>, transform_indices = @transform_7, window_bounds = array<i64: 8, 256>}, {pipeline_mode = #tpu.pipeline_mode<synchronous>, transform_indices = @transform_8, window_bounds = array<i64: 2, 1, 128>}, {pipeline_mode = #tpu.pipeline_mode<synchronous>, transform_indices = @transform_9, window_bounds = array<i64: 2, 1, 128>}]} {
    %c0 = arith.constant 0 : index
    %c0_0 = arith.constant 0 : index
    %c0_1 = arith.constant 0 : index
    %0 = vector.load %arg5[%c0, %c0_0, %c0_1] : memref<2x1x128xf32, #tpu.memory_space<vmem>>, vector<2x1x128xf32>
    %c0_2 = arith.constant 0 : index
    %c0_3 = arith.constant 0 : index
    %c0_4 = arith.constant 0 : index
    %1 = vector.load %arg10[%c0_2, %c0_3, %c0_4] : memref<2x1x128xf32, #tpu.memory_space<vmem>>, vector<2x1x128xf32>
    tpu.vector_store %arg10[%c0_2, %c0_3, %c0_4], %0 {strides = array<i32>} : memref<2x1x128xf32, #tpu.memory_space<vmem>>, vector<2x1x128xf32>,
    %c0_5 = arith.constant 0 : index
    %c0_6 = arith.constant 0 : index
    %c0_7 = arith.constant 0 : index
    %2 = vector.load %arg6[%c0_5, %c0_6, %c0_7] : memref<2x1x128xf32, #tpu.memory_space<vmem>>, vector<2x1x128xf32>
    %c0_8 = arith.constant 0 : index
    %c0_9 = arith.constant 0 : index
    %c0_10 = arith.constant 0 : index
    %3 = vector.load %arg11[%c0_8, %c0_9, %c0_10] : memref<2x1x128xf32, #tpu.memory_space<vmem>>, vector<2x1x128xf32>
    tpu.vector_store %arg11[%c0_8, %c0_9, %c0_10], %2 {strides = array<i32>} : memref<2x1x128xf32, #tpu.memory_space<vmem>>, vector<2x1x128xf32>,
    %cst = arith.constant 0.000000e+00 : f32
    %4 = vector.broadcast %cst : f32 to vector<8x128xf32>
    %c0_11 = arith.constant 0 : index
    %c0_12 = arith.constant 0 : index
    %5 = vector.load %arg12[%c0_11, %c0_12] : memref<8x128xf32, #tpu.memory_space<vmem>>, vector<8x128xf32>
    tpu.vector_store %arg12[%c0_11, %c0_12], %4 {strides = array<i32>} : memref<8x128xf32, #tpu.memory_space<vmem>>, vector<8x128xf32>,
    %cst_13 = arith.constant 0.000000e+00 : f32
    %6 = vector.broadcast %cst_13 : f32 to vector<8x128xf32>
    %c0_14 = arith.constant 0 : index
    %c0_15 = arith.constant 0 : index
    %7 = vector.load %arg14[%c0_14, %c0_15] : memref<8x128xf32, #tpu.memory_space<vmem>>, vector<8x128xf32>
    tpu.vector_store %arg14[%c0_14, %c0_15], %6 {strides = array<i32>} : memref<8x128xf32, #tpu.memory_space<vmem>>, vector<8x128xf32>,
    %c0_i32 = arith.constant 0 : i32
    %8 = arith.index_cast %c0_i32 : i32 to index
    %9 = memref.load %arg1[%8] : memref<8xi32, #tpu.memory_space<smem>>
    %c0_i32_16 = arith.constant 0 : i32
    %10 = arith.maxsi %9, %c0_i32_16 : i32
    %c128_i32 = arith.constant 128 : i32
    %11 = arith.minsi %10, %c128_i32 : i32
    %12 = arith.index_cast %11 : i32 to index
    %c0_17 = arith.constant 0 : index
    %13 = vector.load %arg2[%12, %c0_17] : memref<129x128xf32, #tpu.memory_space<vmem>>, vector<1x128xf32>
    %cst_18 = arith.constant 0.000000e+00 : f32
    %14 = vector.broadcast %cst_18 : f32 to vector<1x128xf32>
    %15 = arith.maximumf %13, %14 : vector<1x128xf32>
    %16 = arith.index_cast %c0_i32 : i32 to index
    %c0_19 = arith.constant 0 : index
    %17 = vector.load %arg12[%16, %c0_19] : memref<8x128xf32, #tpu.memory_space<vmem>>, vector<1x128xf32>
    tpu.vector_store %arg12[%16, %c0_19], %15 {strides = array<i32>} : memref<8x128xf32, #tpu.memory_space<vmem>>, vector<1x128xf32>,
    %c1_i32 = arith.constant 1 : i32
    %18 = arith.index_cast %c1_i32 : i32 to index
    %19 = memref.load %arg1[%18] : memref<8xi32, #tpu.memory_space<smem>>
    %c0_i32_20 = arith.constant 0 : i32
    %20 = arith.maxsi %19, %c0_i32_20 : i32
    %c128_i32_21 = arith.constant 128 : i32
    %21 = arith.minsi %20, %c128_i32_21 : i32
    %22 = arith.index_cast %21 : i32 to index
    %c0_22 = arith.constant 0 : index
    %23 = vector.load %arg2[%22, %c0_22] : memref<129x128xf32, #tpu.memory_space<vmem>>, vector<1x128xf32>
    %cst_23 = arith.constant 0.000000e+00 : f32
    %24 = vector.broadcast %cst_23 : f32 to vector<1x128xf32>
    %25 = arith.maximumf %23, %24 : vector<1x128xf32>
    %26 = arith.index_cast %c1_i32 : i32 to index
    %c0_24 = arith.constant 0 : index
    %27 = vector.load %arg12[%26, %c0_24] : memref<8x128xf32, #tpu.memory_space<vmem>>, vector<1x128xf32>
    tpu.vector_store %arg12[%26, %c0_24], %25 {strides = array<i32>} : memref<8x128xf32, #tpu.memory_space<vmem>>, vector<1x128xf32>,
    %c2_i32 = arith.constant 2 : i32
    %28 = arith.index_cast %c2_i32 : i32 to index
    %29 = memref.load %arg1[%28] : memref<8xi32, #tpu.memory_space<smem>>
    %c0_i32_25 = arith.constant 0 : i32
    %30 = arith.maxsi %29, %c0_i32_25 : i32
    %c128_i32_26 = arith.constant 128 : i32
    %31 = arith.minsi %30, %c128_i32_26 : i32
    %32 = arith.index_cast %31 : i32 to index
    %c0_27 = arith.constant 0 : index
    %33 = vector.load %arg2[%32, %c0_27] : memref<129x128xf32, #tpu.memory_space<vmem>>, vector<1x128xf32>
    %cst_28 = arith.constant 0.000000e+00 : f32
    %34 = vector.broadcast %cst_28 : f32 to vector<1x128xf32>
    %35 = arith.maximumf %33, %34 : vector<1x128xf32>
    %36 = arith.index_cast %c2_i32 : i32 to index
    %c0_29 = arith.constant 0 : index
    %37 = vector.load %arg12[%36, %c0_29] : memref<8x128xf32, #tpu.memory_space<vmem>>, vector<1x128xf32>
    tpu.vector_store %arg12[%36, %c0_29], %35 {strides = array<i32>} : memref<8x128xf32, #tpu.memory_space<vmem>>, vector<1x128xf32>,
    %c3_i32 = arith.constant 3 : i32
    %38 = arith.index_cast %c3_i32 : i32 to index
    %39 = memref.load %arg1[%38] : memref<8xi32, #tpu.memory_space<smem>>
    %c0_i32_30 = arith.constant 0 : i32
    %40 = arith.maxsi %39, %c0_i32_30 : i32
    %c128_i32_31 = arith.constant 128 : i32
    %41 = arith.minsi %40, %c128_i32_31 : i32
    %42 = arith.index_cast %41 : i32 to index
    %c0_32 = arith.constant 0 : index
    %43 = vector.load %arg2[%42, %c0_32] : memref<129x128xf32, #tpu.memory_space<vmem>>, vector<1x128xf32>
    %cst_33 = arith.constant 0.000000e+00 : f32
    %44 = vector.broadcast %cst_33 : f32 to vector<1x128xf32>
    %45 = arith.maximumf %43, %44 : vector<1x128xf32>
    %46 = arith.index_cast %c3_i32 : i32 to index
    %c0_34 = arith.constant 0 : index
    %47 = vector.load %arg12[%46, %c0_34] : memref<8x128xf32, #tpu.memory_space<vmem>>, vector<1x128xf32>
    tpu.vector_store %arg12[%46, %c0_34], %45 {strides = array<i32>} : memref<8x128xf32, #tpu.memory_space<vmem>>, vector<1x128xf32>,
    %c4_i32 = arith.constant 4 : i32
    %48 = arith.index_cast %c4_i32 : i32 to index
    %49 = memref.load %arg1[%48] : memref<8xi32, #tpu.memory_space<smem>>
    %c0_i32_35 = arith.constant 0 : i32
    %50 = arith.maxsi %49, %c0_i32_35 : i32
    %c128_i32_36 = arith.constant 128 : i32
    %51 = arith.minsi %50, %c128_i32_36 : i32
    %52 = arith.index_cast %51 : i32 to index
    %c0_37 = arith.constant 0 : index
    %53 = vector.load %arg2[%52, %c0_37] : memref<129x128xf32, #tpu.memory_space<vmem>>, vector<1x128xf32>
    %cst_38 = arith.constant 0.000000e+00 : f32
    %54 = vector.broadcast %cst_38 : f32 to vector<1x128xf32>
    %55 = arith.maximumf %53, %54 : vector<1x128xf32>
    %56 = arith.index_cast %c4_i32 : i32 to index
    %c0_39 = arith.constant 0 : index
    %57 = vector.load %arg12[%56, %c0_39] : memref<8x128xf32, #tpu.memory_space<vmem>>, vector<1x128xf32>
    tpu.vector_store %arg12[%56, %c0_39], %55 {strides = array<i32>} : memref<8x128xf32, #tpu.memory_space<vmem>>, vector<1x128xf32>,
    %c5_i32 = arith.constant 5 : i32
    %58 = arith.index_cast %c5_i32 : i32 to index
    %59 = memref.load %arg1[%58] : memref<8xi32, #tpu.memory_space<smem>>
    %c0_i32_40 = arith.constant 0 : i32
    %60 = arith.maxsi %59, %c0_i32_40 : i32
    %c128_i32_41 = arith.constant 128 : i32
    %61 = arith.minsi %60, %c128_i32_41 : i32
    %62 = arith.index_cast %61 : i32 to index
    %c0_42 = arith.constant 0 : index
    %63 = vector.load %arg2[%62, %c0_42] : memref<129x128xf32, #tpu.memory_space<vmem>>, vector<1x128xf32>
    %cst_43 = arith.constant 0.000000e+00 : f32
    %64 = vector.broadcast %cst_43 : f32 to vector<1x128xf32>
    %65 = arith.maximumf %63, %64 : vector<1x128xf32>
    %66 = arith.index_cast %c5_i32 : i32 to index
    %c0_44 = arith.constant 0 : index
    %67 = vector.load %arg12[%66, %c0_44] : memref<8x128xf32, #tpu.memory_space<vmem>>, vector<1x128xf32>
    tpu.vector_store %arg12[%66, %c0_44], %65 {strides = array<i32>} : memref<8x128xf32, #tpu.memory_space<vmem>>, vector<1x128xf32>,
    %c6_i32 = arith.constant 6 : i32
    %68 = arith.index_cast %c6_i32 : i32 to index
    %69 = memref.load %arg1[%68] : memref<8xi32, #tpu.memory_space<smem>>
    %c0_i32_45 = arith.constant 0 : i32
    %70 = arith.maxsi %69, %c0_i32_45 : i32
    %c128_i32_46 = arith.constant 128 : i32
    %71 = arith.minsi %70, %c128_i32_46 : i32
    %72 = arith.index_cast %71 : i32 to index
    %c0_47 = arith.constant 0 : index
    %73 = vector.load %arg2[%72, %c0_47] : memref<129x128xf32, #tpu.memory_space<vmem>>, vector<1x128xf32>
    %cst_48 = arith.constant 0.000000e+00 : f32
    %74 = vector.broadcast %cst_48 : f32 to vector<1x128xf32>
    %75 = arith.maximumf %73, %74 : vector<1x128xf32>
    %76 = arith.index_cast %c6_i32 : i32 to index
    %c0_49 = arith.constant 0 : index
    %77 = vector.load %arg12[%76, %c0_49] : memref<8x128xf32, #tpu.memory_space<vmem>>, vector<1x128xf32>
    tpu.vector_store %arg12[%76, %c0_49], %75 {strides = array<i32>} : memref<8x128xf32, #tpu.memory_space<vmem>>, vector<1x128xf32>,
    %c7_i32 = arith.constant 7 : i32
    %78 = arith.index_cast %c7_i32 : i32 to index
    %79 = memref.load %arg1[%78] : memref<8xi32, #tpu.memory_space<smem>>
    %c0_i32_50 = arith.constant 0 : i32
    %80 = arith.maxsi %79, %c0_i32_50 : i32
    %c128_i32_51 = arith.constant 128 : i32
    %81 = arith.minsi %80, %c128_i32_51 : i32
    %82 = arith.index_cast %81 : i32 to index
    %c0_52 = arith.constant 0 : index
    %83 = vector.load %arg2[%82, %c0_52] : memref<129x128xf32, #tpu.memory_space<vmem>>, vector<1x128xf32>
    %cst_53 = arith.constant 0.000000e+00 : f32
    %84 = vector.broadcast %cst_53 : f32 to vector<1x128xf32>
    %85 = arith.maximumf %83, %84 : vector<1x128xf32>
    %86 = arith.index_cast %c7_i32 : i32 to index
    %c0_54 = arith.constant 0 : index
    %87 = vector.load %arg12[%86, %c0_54] : memref<8x128xf32, #tpu.memory_space<vmem>>, vector<1x128xf32>
    tpu.vector_store %arg12[%86, %c0_54], %85 {strides = array<i32>} : memref<8x128xf32, #tpu.memory_space<vmem>>, vector<1x128xf32>,
    %c8_i32 = arith.constant 8 : i32
    %c0_55 = arith.constant 0 : index
    %c0_56 = arith.constant 0 : index
    %88 = vector.load %arg12[%c0_55, %c0_56] : memref<8x128xf32, #tpu.memory_space<vmem>>, vector<8x128xf32>
    %89 = arith.truncf %88 : vector<8x128xf32> to vector<8x128xbf16>
    %c0_57 = arith.constant 0 : index
    %c0_58 = arith.constant 0 : index
    %c0_59 = arith.constant 0 : index
    %90 = vector.load %arg3[%c0_57, %c0_58, %c0_59] : memref<2x256x512xbf16, #tpu.memory_space<vmem>>, vector<1x128x512xbf16>
    %91 = vector.shape_cast %90 : vector<1x128x512xbf16> to vector<128x512xbf16>
    %cst_60 = arith.constant dense<0.000000e+00> : vector<8x512xf32>
    %92 = tpu.matmul %89, %91, %cst_60 {dimension_numbers = #tpu.dot_dimension_numbers<[1], [0], [0], [1], [0, 0, 1, 1], [], []>} : vector<8x128xbf16>, vector<128x512xbf16>, vector<8x512xf32> -> vector<8x512xf32>
    %c0_61 = arith.constant 0 : index
    %c0_62 = arith.constant 0 : index
    %c0_63 = arith.constant 0 : index
    %93 = vector.load %arg4[%c0_61, %c0_62, %c0_63] : memref<2x1x512xf32, #tpu.memory_space<vmem>>, vector<1x1x512xf32>
    %94 = vector.shape_cast %93 : vector<1x1x512xf32> to vector<1x512xf32>
    %95 = vector.broadcast %94 : vector<1x512xf32> to vector<8x512xf32>
    %96 = arith.addf %92, %95 : vector<8x512xf32>
    %c0_64 = arith.constant 0 : index
    %c0_65 = arith.constant 0 : index
    %97 = vector.load %arg13[%c0_64, %c0_65] : memref<8x512xf32, #tpu.memory_space<vmem>>, vector<8x512xf32>
    tpu.vector_store %arg13[%c0_64, %c0_65], %96 {strides = array<i32>} : memref<8x512xf32, #tpu.memory_space<vmem>>, vector<8x512xf32>,
    %c0_i32_66 = arith.constant 0 : i32
    %c0_67 = arith.constant 0 : index
    %c0_68 = arith.constant 0 : index
    %c0_69 = arith.constant 0 : index
    %98 = vector.load %arg10[%c0_67, %c0_68, %c0_69] : memref<2x1x128xf32, #tpu.memory_space<vmem>>, vector<1x1x128xf32>
    %99 = vector.shape_cast %98 : vector<1x1x128xf32> to vector<1x128xf32>
    %c0_70 = arith.constant 0 : index
    %c0_71 = arith.constant 0 : index
    %c0_72 = arith.constant 0 : index
    %100 = vector.load %arg11[%c0_70, %c0_71, %c0_72] : memref<2x1x128xf32, #tpu.memory_space<vmem>>, vector<1x1x128xf32>
    %101 = vector.shape_cast %100 : vector<1x1x128xf32> to vector<1x128xf32>
    %102 = arith.index_cast %c0_i32_66 : i32 to index
    %c0_73 = arith.constant 0 : index
    %103 = vector.load %arg13[%102, %c0_73] : memref<8x512xf32, #tpu.memory_space<vmem>>, vector<1x512xf32>
    %104 = arith.truncf %99 : vector<1x128xf32> to vector<1x128xbf16>
    %c0_74 = arith.constant 0 : index
    %c128 = arith.constant 128 : index
    %c0_75 = arith.constant 0 : index
    %105 = vector.load %arg3[%c0_74, %c128, %c0_75] : memref<2x256x512xbf16, #tpu.memory_space<vmem>>, vector<1x128x512xbf16>
    %106 = vector.shape_cast %105 : vector<1x128x512xbf16> to vector<128x512xbf16>
    %cst_76 = arith.constant dense<0.000000e+00> : vector<1x512xf32>
    %107 = tpu.matmul %104, %106, %cst_76 {dimension_numbers = #tpu.dot_dimension_numbers<[1], [0], [0], [1], [0, 0, 1, 1], [], []>} : vector<1x128xbf16>, vector<128x512xbf16>, vector<1x512xf32> -> vector<1x512xf32>
    %108 = arith.addf %103, %107 : vector<1x512xf32>
    %109 = vector.extract_strided_slice %108 {offsets = [0, 0], sizes = [1, 128], strides = [1, 1]} : vector<1x512xf32> to vector<1x128xf32>
    %110 = arith.negf %109 : vector<1x128xf32>
    %111 = math.exp %110 : vector<1x128xf32>
    %cst_77 = arith.constant 1.000000e+00 : f32
    %112 = vector.broadcast %cst_77 : f32 to vector<1x128xf32>
    %113 = arith.addf %112, %111 : vector<1x128xf32>
    %114 = arith.divf %112, %113 : vector<1x128xf32>
    %115 = vector.extract_strided_slice %108 {offsets = [0, 128], sizes = [1, 128], strides = [1, 1]} : vector<1x512xf32> to vector<1x128xf32>
    %116 = arith.negf %115 : vector<1x128xf32>
    %117 = math.exp %116 : vector<1x128xf32>
    %cst_78 = arith.constant 1.000000e+00 : f32
    %118 = vector.broadcast %cst_78 : f32 to vector<1x128xf32>
    %119 = arith.addf %118, %117 : vector<1x128xf32>
    %120 = arith.divf %118, %119 : vector<1x128xf32>
    %121 = vector.extract_strided_slice %108 {offsets = [0, 256], sizes = [1, 128], strides = [1, 1]} : vector<1x512xf32> to vector<1x128xf32>
    %122 = math.tanh %121 : vector<1x128xf32>
    %123 = vector.extract_strided_slice %108 {offsets = [0, 384], sizes = [1, 128], strides = [1, 1]} : vector<1x512xf32> to vector<1x128xf32>
    %124 = arith.negf %123 : vector<1x128xf32>
    %125 = math.exp %124 : vector<1x128xf32>
    %cst_79 = arith.constant 1.000000e+00 : f32
    %126 = vector.broadcast %cst_79 : f32 to vector<1x128xf32>
    %127 = arith.addf %126, %125 : vector<1x128xf32>
    %128 = arith.divf %126, %127 : vector<1x128xf32>
    %129 = arith.mulf %120, %101 : vector<1x128xf32>
    %130 = arith.mulf %114, %122 : vector<1x128xf32>
    %131 = arith.addf %129, %130 : vector<1x128xf32>
    %132 = math.tanh %131 : vector<1x128xf32>
    %133 = arith.mulf %128, %132 : vector<1x128xf32>
    %c0_80 = arith.constant 0 : index
    %c0_81 = arith.constant 0 : index
    %c0_82 = arith.constant 0 : index
    %134 = vector.load %arg10[%c0_80, %c0_81, %c0_82] : memref<2x1x128xf32, #tpu.memory_space<vmem>>, vector<1x1x128xf32>
    %135 = vector.shape_cast %134 : vector<1x1x128xf32> to vector<1x128xf32>
    %136 = vector.shape_cast %133 : vector<1x128xf32> to vector<1x1x128xf32>
    tpu.vector_store %arg10[%c0_80, %c0_81, %c0_82], %136 {strides = array<i32>} : memref<2x1x128xf32, #tpu.memory_space<vmem>>, vector<1x1x128xf32>,
    %c0_83 = arith.constant 0 : index
    %c0_84 = arith.constant 0 : index
    %c0_85 = arith.constant 0 : index
    %137 = vector.load %arg11[%c0_83, %c0_84, %c0_85] : memref<2x1x128xf32, #tpu.memory_space<vmem>>, vector<1x1x128xf32>
    %138 = vector.shape_cast %137 : vector<1x1x128xf32> to vector<1x128xf32>
    %139 = vector.shape_cast %131 : vector<1x128xf32> to vector<1x1x128xf32>
    tpu.vector_store %arg11[%c0_83, %c0_84, %c0_85], %139 {strides = array<i32>} : memref<2x1x128xf32, #tpu.memory_space<vmem>>, vector<1x1x128xf32>,
    %c1 = arith.constant 1 : index
    %c0_86 = arith.constant 0 : index
    %c0_87 = arith.constant 0 : index
    %140 = vector.load %arg10[%c1, %c0_86, %c0_87] : memref<2x1x128xf32, #tpu.memory_space<vmem>>, vector<1x1x128xf32>
    %141 = vector.shape_cast %140 : vector<1x1x128xf32> to vector<1x128xf32>
    %c1_88 = arith.constant 1 : index
    %c0_89 = arith.constant 0 : index
    %c0_90 = arith.constant 0 : index
    %142 = vector.load %arg11[%c1_88, %c0_89, %c0_90] : memref<2x1x128xf32, #tpu.memory_space<vmem>>, vector<1x1x128xf32>
    %143 = vector.shape_cast %142 : vector<1x1x128xf32> to vector<1x128xf32>
    %c0_91 = arith.constant 0 : index
    %c0_92 = arith.constant 0 : index
    %144 = vector.load %arg15[%c0_91, %c0_92] : memref<1x256xf32, #tpu.memory_space<vmem>>, vector<1x128xf32>
    tpu.vector_store %arg15[%c0_91, %c0_92], %133 {strides = array<i32>} : memref<1x256xf32, #tpu.memory_space<vmem>>, vector<1x128xf32>,
    %c0_93 = arith.constant 0 : index
    %c128_94 = arith.constant 128 : index
    %145 = vector.load %arg15[%c0_93, %c128_94] : memref<1x256xf32, #tpu.memory_space<vmem>>, vector<1x128xf32>
    tpu.vector_store %arg15[%c0_93, %c128_94], %141 {strides = array<i32>} : memref<1x256xf32, #tpu.memory_space<vmem>>, vector<1x128xf32>,
    %c0_95 = arith.constant 0 : index
    %c0_96 = arith.constant 0 : index
    %146 = vector.load %arg15[%c0_95, %c0_96] : memref<1x256xf32, #tpu.memory_space<vmem>>, vector<1x256xf32>
    %147 = arith.truncf %146 : vector<1x256xf32> to vector<1x256xbf16>
    %c1_97 = arith.constant 1 : index
    %c0_98 = arith.constant 0 : index
    %c0_99 = arith.constant 0 : index
    %148 = vector.load %arg3[%c1_97, %c0_98, %c0_99] : memref<2x256x512xbf16, #tpu.memory_space<vmem>>, vector<1x256x512xbf16>
    %149 = vector.shape_cast %148 : vector<1x256x512xbf16> to vector<256x512xbf16>
    %cst_100 = arith.constant dense<0.000000e+00> : vector<1x512xf32>
    %150 = tpu.matmul %147, %149, %cst_100 {dimension_numbers = #tpu.dot_dimension_numbers<[1], [0], [0], [1], [0, 0, 1, 1], [], []>} : vector<1x256xbf16>, vector<256x512xbf16>, vector<1x512xf32> -> vector<1x512xf32>
    %c1_101 = arith.constant 1 : index
    %c0_102 = arith.constant 0 : index
    %c0_103 = arith.constant 0 : index
    %151 = vector.load %arg4[%c1_101, %c0_102, %c0_103] : memref<2x1x512xf32, #tpu.memory_space<vmem>>, vector<1x1x512xf32>
    %152 = vector.shape_cast %151 : vector<1x1x512xf32> to vector<1x512xf32>
    %153 = arith.addf %150, %152 : vector<1x512xf32>
    %154 = vector.extract_strided_slice %153 {offsets = [0, 0], sizes = [1, 128], strides = [1, 1]} : vector<1x512xf32> to vector<1x128xf32>
    %155 = arith.negf %154 : vector<1x128xf32>
    %156 = math.exp %155 : vector<1x128xf32>
    %cst_104 = arith.constant 1.000000e+00 : f32
    %157 = vector.broadcast %cst_104 : f32 to vector<1x128xf32>
    %158 = arith.addf %157, %156 : vector<1x128xf32>
    %159 = arith.divf %157, %158 : vector<1x128xf32>
    %160 = vector.extract_strided_slice %153 {offsets = [0, 128], sizes = [1, 128], strides = [1, 1]} : vector<1x512xf32> to vector<1x128xf32>
    %161 = arith.negf %160 : vector<1x128xf32>
    %162 = math.exp %161 : vector<1x128xf32>
    %cst_105 = arith.constant 1.000000e+00 : f32
    %163 = vector.broadcast %cst_105 : f32 to vector<1x128xf32>
    %164 = arith.addf %163, %162 : vector<1x128xf32>
    %165 = arith.divf %163, %164 : vector<1x128xf32>
    %166 = vector.extract_strided_slice %153 {offsets = [0, 256], sizes = [1, 128], strides = [1, 1]} : vector<1x512xf32> to vector<1x128xf32>
    %167 = math.tanh %166 : vector<1x128xf32>
    %168 = vector.extract_strided_slice %153 {offsets = [0, 384], sizes = [1, 128], strides = [1, 1]} : vector<1x512xf32> to vector<1x128xf32>
    %169 = arith.negf %168 : vector<1x128xf32>
    %170 = math.exp %169 : vector<1x128xf32>
    %cst_106 = arith.constant 1.000000e+00 : f32
    %171 = vector.broadcast %cst_106 : f32 to vector<1x128xf32>
    %172 = arith.addf %171, %170 : vector<1x128xf32>
    %173 = arith.divf %171, %172 : vector<1x128xf32>
    %174 = arith.mulf %165, %143 : vector<1x128xf32>
    %175 = arith.mulf %159, %167 : vector<1x128xf32>
    %176 = arith.addf %174, %175 : vector<1x128xf32>
    %177 = math.tanh %176 : vector<1x128xf32>
    %178 = arith.mulf %173, %177 : vector<1x128xf32>
    %c1_107 = arith.constant 1 : index
    %c0_108 = arith.constant 0 : index
    %c0_109 = arith.constant 0 : index
    %179 = vector.load %arg10[%c1_107, %c0_108, %c0_109] : memref<2x1x128xf32, #tpu.memory_space<vmem>>, vector<1x1x128xf32>
    %180 = vector.shape_cast %179 : vector<1x1x128xf32> to vector<1x128xf32>
    %181 = vector.shape_cast %178 : vector<1x128xf32> to vector<1x1x128xf32>
    tpu.vector_store %arg10[%c1_107, %c0_108, %c0_109], %181 {strides = array<i32>} : memref<2x1x128xf32, #tpu.memory_space<vmem>>, vector<1x1x128xf32>,
    %c1_110 = arith.constant 1 : index
    %c0_111 = arith.constant 0 : index
    %c0_112 = arith.constant 0 : index
    %182 = vector.load %arg11[%c1_110, %c0_111, %c0_112] : memref<2x1x128xf32, #tpu.memory_space<vmem>>, vector<1x1x128xf32>
    %183 = vector.shape_cast %182 : vector<1x1x128xf32> to vector<1x128xf32>
    %184 = vector.shape_cast %176 : vector<1x128xf32> to vector<1x1x128xf32>
    tpu.vector_store %arg11[%c1_110, %c0_111, %c0_112], %184 {strides = array<i32>} : memref<2x1x128xf32, #tpu.memory_space<vmem>>, vector<1x1x128xf32>,
    %185 = arith.index_cast %c0_i32_66 : i32 to index
    %c0_113 = arith.constant 0 : index
    %186 = vector.load %arg14[%185, %c0_113] : memref<8x128xf32, #tpu.memory_space<vmem>>, vector<1x128xf32>
    tpu.vector_store %arg14[%185, %c0_113], %178 {strides = array<i32>} : memref<8x128xf32, #tpu.memory_space<vmem>>, vector<1x128xf32>,
    %c1_i32_114 = arith.constant 1 : i32
    %c0_115 = arith.constant 0 : index
    %c0_116 = arith.constant 0 : index
    %c0_117 = arith.constant 0 : index
    %187 = vector.load %arg10[%c0_115, %c0_116, %c0_117] : memref<2x1x128xf32, #tpu.memory_space<vmem>>, vector<1x1x128xf32>
    %188 = vector.shape_cast %187 : vector<1x1x128xf32> to vector<1x128xf32>
    %c0_118 = arith.constant 0 : index
    %c0_119 = arith.constant 0 : index
    %c0_120 = arith.constant 0 : index
    %189 = vector.load %arg11[%c0_118, %c0_119, %c0_120] : memref<2x1x128xf32, #tpu.memory_space<vmem>>, vector<1x1x128xf32>
    %190 = vector.shape_cast %189 : vector<1x1x128xf32> to vector<1x128xf32>
    %191 = arith.index_cast %c1_i32_114 : i32 to index
    %c0_121 = arith.constant 0 : index
    %192 = vector.load %arg13[%191, %c0_121] : memref<8x512xf32, #tpu.memory_space<vmem>>, vector<1x512xf32>
    %193 = arith.truncf %188 : vector<1x128xf32> to vector<1x128xbf16>
    %c0_122 = arith.constant 0 : index
    %c128_123 = arith.constant 128 : index
    %c0_124 = arith.constant 0 : index
    %194 = vector.load %arg3[%c0_122, %c128_123, %c0_124] : memref<2x256x512xbf16, #tpu.memory_space<vmem>>, vector<1x128x512xbf16>
    %195 = vector.shape_cast %194 : vector<1x128x512xbf16> to vector<128x512xbf16>
    %cst_125 = arith.constant dense<0.000000e+00> : vector<1x512xf32>
    %196 = tpu.matmul %193, %195, %cst_125 {dimension_numbers = #tpu.dot_dimension_numbers<[1], [0], [0], [1], [0, 0, 1, 1], [], []>} : vector<1x128xbf16>, vector<128x512xbf16>, vector<1x512xf32> -> vector<1x512xf32>
    %197 = arith.addf %192, %196 : vector<1x512xf32>
    %198 = vector.extract_strided_slice %197 {offsets = [0, 0], sizes = [1, 128], strides = [1, 1]} : vector<1x512xf32> to vector<1x128xf32>
    %199 = arith.negf %198 : vector<1x128xf32>
    %200 = math.exp %199 : vector<1x128xf32>
    %cst_126 = arith.constant 1.000000e+00 : f32
    %201 = vector.broadcast %cst_126 : f32 to vector<1x128xf32>
    %202 = arith.addf %201, %200 : vector<1x128xf32>
    %203 = arith.divf %201, %202 : vector<1x128xf32>
    %204 = vector.extract_strided_slice %197 {offsets = [0, 128], sizes = [1, 128], strides = [1, 1]} : vector<1x512xf32> to vector<1x128xf32>
    %205 = arith.negf %204 : vector<1x128xf32>
    %206 = math.exp %205 : vector<1x128xf32>
    %cst_127 = arith.constant 1.000000e+00 : f32
    %207 = vector.broadcast %cst_127 : f32 to vector<1x128xf32>
    %208 = arith.addf %207, %206 : vector<1x128xf32>
    %209 = arith.divf %207, %208 : vector<1x128xf32>
    %210 = vector.extract_strided_slice %197 {offsets = [0, 256], sizes = [1, 128], strides = [1, 1]} : vector<1x512xf32> to vector<1x128xf32>
    %211 = math.tanh %210 : vector<1x128xf32>
    %212 = vector.extract_strided_slice %197 {offsets = [0, 384], sizes = [1, 128], strides = [1, 1]} : vector<1x512xf32> to vector<1x128xf32>
    %213 = arith.negf %212 : vector<1x128xf32>
    %214 = math.exp %213 : vector<1x128xf32>
    %cst_128 = arith.constant 1.000000e+00 : f32
    %215 = vector.broadcast %cst_128 : f32 to vector<1x128xf32>
    %216 = arith.addf %215, %214 : vector<1x128xf32>
    %217 = arith.divf %215, %216 : vector<1x128xf32>
    %218 = arith.mulf %209, %190 : vector<1x128xf32>
    %219 = arith.mulf %203, %211 : vector<1x128xf32>
    %220 = arith.addf %218, %219 : vector<1x128xf32>
    %221 = math.tanh %220 : vector<1x128xf32>
    %222 = arith.mulf %217, %221 : vector<1x128xf32>
    %c0_129 = arith.constant 0 : index
    %c0_130 = arith.constant 0 : index
    %c0_131 = arith.constant 0 : index
    %223 = vector.load %arg10[%c0_129, %c0_130, %c0_131] : memref<2x1x128xf32, #tpu.memory_space<vmem>>, vector<1x1x128xf32>
    %224 = vector.shape_cast %223 : vector<1x1x128xf32> to vector<1x128xf32>
    %225 = vector.shape_cast %222 : vector<1x128xf32> to vector<1x1x128xf32>
    tpu.vector_store %arg10[%c0_129, %c0_130, %c0_131], %225 {strides = array<i32>} : memref<2x1x128xf32, #tpu.memory_space<vmem>>, vector<1x1x128xf32>,
    %c0_132 = arith.constant 0 : index
    %c0_133 = arith.constant 0 : index
    %c0_134 = arith.constant 0 : index
    %226 = vector.load %arg11[%c0_132, %c0_133, %c0_134] : memref<2x1x128xf32, #tpu.memory_space<vmem>>, vector<1x1x128xf32>
    %227 = vector.shape_cast %226 : vector<1x1x128xf32> to vector<1x128xf32>
    %228 = vector.shape_cast %220 : vector<1x128xf32> to vector<1x1x128xf32>
    tpu.vector_store %arg11[%c0_132, %c0_133, %c0_134], %228 {strides = array<i32>} : memref<2x1x128xf32, #tpu.memory_space<vmem>>, vector<1x1x128xf32>,
    %c1_135 = arith.constant 1 : index
    %c0_136 = arith.constant 0 : index
    %c0_137 = arith.constant 0 : index
    %229 = vector.load %arg10[%c1_135, %c0_136, %c0_137] : memref<2x1x128xf32, #tpu.memory_space<vmem>>, vector<1x1x128xf32>
    %230 = vector.shape_cast %229 : vector<1x1x128xf32> to vector<1x128xf32>
    %c1_138 = arith.constant 1 : index
    %c0_139 = arith.constant 0 : index
    %c0_140 = arith.constant 0 : index
    %231 = vector.load %arg11[%c1_138, %c0_139, %c0_140] : memref<2x1x128xf32, #tpu.memory_space<vmem>>, vector<1x1x128xf32>
    %232 = vector.shape_cast %231 : vector<1x1x128xf32> to vector<1x128xf32>
    %c0_141 = arith.constant 0 : index
    %c0_142 = arith.constant 0 : index
    %233 = vector.load %arg15[%c0_141, %c0_142] : memref<1x256xf32, #tpu.memory_space<vmem>>, vector<1x128xf32>
    tpu.vector_store %arg15[%c0_141, %c0_142], %222 {strides = array<i32>} : memref<1x256xf32, #tpu.memory_space<vmem>>, vector<1x128xf32>,
    %c0_143 = arith.constant 0 : index
    %c128_144 = arith.constant 128 : index
    %234 = vector.load %arg15[%c0_143, %c128_144] : memref<1x256xf32, #tpu.memory_space<vmem>>, vector<1x128xf32>
    tpu.vector_store %arg15[%c0_143, %c128_144], %230 {strides = array<i32>} : memref<1x256xf32, #tpu.memory_space<vmem>>, vector<1x128xf32>,
    %c0_145 = arith.constant 0 : index
    %c0_146 = arith.constant 0 : index
    %235 = vector.load %arg15[%c0_145, %c0_146] : memref<1x256xf32, #tpu.memory_space<vmem>>, vector<1x256xf32>
    %236 = arith.truncf %235 : vector<1x256xf32> to vector<1x256xbf16>
    %c1_147 = arith.constant 1 : index
    %c0_148 = arith.constant 0 : index
    %c0_149 = arith.constant 0 : index
    %237 = vector.load %arg3[%c1_147, %c0_148, %c0_149] : memref<2x256x512xbf16, #tpu.memory_space<vmem>>, vector<1x256x512xbf16>
    %238 = vector.shape_cast %237 : vector<1x256x512xbf16> to vector<256x512xbf16>
    %cst_150 = arith.constant dense<0.000000e+00> : vector<1x512xf32>
    %239 = tpu.matmul %236, %238, %cst_150 {dimension_numbers = #tpu.dot_dimension_numbers<[1], [0], [0], [1], [0, 0, 1, 1], [], []>} : vector<1x256xbf16>, vector<256x512xbf16>, vector<1x512xf32> -> vector<1x512xf32>
    %c1_151 = arith.constant 1 : index
    %c0_152 = arith.constant 0 : index
    %c0_153 = arith.constant 0 : index
    %240 = vector.load %arg4[%c1_151, %c0_152, %c0_153] : memref<2x1x512xf32, #tpu.memory_space<vmem>>, vector<1x1x512xf32>
    %241 = vector.shape_cast %240 : vector<1x1x512xf32> to vector<1x512xf32>
    %242 = arith.addf %239, %241 : vector<1x512xf32>
    %243 = vector.extract_strided_slice %242 {offsets = [0, 0], sizes = [1, 128], strides = [1, 1]} : vector<1x512xf32> to vector<1x128xf32>
    %244 = arith.negf %243 : vector<1x128xf32>
    %245 = math.exp %244 : vector<1x128xf32>
    %cst_154 = arith.constant 1.000000e+00 : f32
    %246 = vector.broadcast %cst_154 : f32 to vector<1x128xf32>
    %247 = arith.addf %246, %245 : vector<1x128xf32>
    %248 = arith.divf %246, %247 : vector<1x128xf32>
    %249 = vector.extract_strided_slice %242 {offsets = [0, 128], sizes = [1, 128], strides = [1, 1]} : vector<1x512xf32> to vector<1x128xf32>
    %250 = arith.negf %249 : vector<1x128xf32>
    %251 = math.exp %250 : vector<1x128xf32>
    %cst_155 = arith.constant 1.000000e+00 : f32
    %252 = vector.broadcast %cst_155 : f32 to vector<1x128xf32>
    %253 = arith.addf %252, %251 : vector<1x128xf32>
    %254 = arith.divf %252, %253 : vector<1x128xf32>
    %255 = vector.extract_strided_slice %242 {offsets = [0, 256], sizes = [1, 128], strides = [1, 1]} : vector<1x512xf32> to vector<1x128xf32>
    %256 = math.tanh %255 : vector<1x128xf32>
    %257 = vector.extract_strided_slice %242 {offsets = [0, 384], sizes = [1, 128], strides = [1, 1]} : vector<1x512xf32> to vector<1x128xf32>
    %258 = arith.negf %257 : vector<1x128xf32>
    %259 = math.exp %258 : vector<1x128xf32>
    %cst_156 = arith.constant 1.000000e+00 : f32
    %260 = vector.broadcast %cst_156 : f32 to vector<1x128xf32>
    %261 = arith.addf %260, %259 : vector<1x128xf32>
    %262 = arith.divf %260, %261 : vector<1x128xf32>
    %263 = arith.mulf %254, %232 : vector<1x128xf32>
    %264 = arith.mulf %248, %256 : vector<1x128xf32>
    %265 = arith.addf %263, %264 : vector<1x128xf32>
    %266 = math.tanh %265 : vector<1x128xf32>
    %267 = arith.mulf %262, %266 : vector<1x128xf32>
    %c1_157 = arith.constant 1 : index
    %c0_158 = arith.constant 0 : index
    %c0_159 = arith.constant 0 : index
    %268 = vector.load %arg10[%c1_157, %c0_158, %c0_159] : memref<2x1x128xf32, #tpu.memory_space<vmem>>, vector<1x1x128xf32>
    %269 = vector.shape_cast %268 : vector<1x1x128xf32> to vector<1x128xf32>
    %270 = vector.shape_cast %267 : vector<1x128xf32> to vector<1x1x128xf32>
    tpu.vector_store %arg10[%c1_157, %c0_158, %c0_159], %270 {strides = array<i32>} : memref<2x1x128xf32, #tpu.memory_space<vmem>>, vector<1x1x128xf32>,
    %c1_160 = arith.constant 1 : index
    %c0_161 = arith.constant 0 : index
    %c0_162 = arith.constant 0 : index
    %271 = vector.load %arg11[%c1_160, %c0_161, %c0_162] : memref<2x1x128xf32, #tpu.memory_space<vmem>>, vector<1x1x128xf32>
    %272 = vector.shape_cast %271 : vector<1x1x128xf32> to vector<1x128xf32>
    %273 = vector.shape_cast %265 : vector<1x128xf32> to vector<1x1x128xf32>
    tpu.vector_store %arg11[%c1_160, %c0_161, %c0_162], %273 {strides = array<i32>} : memref<2x1x128xf32, #tpu.memory_space<vmem>>, vector<1x1x128xf32>,
    %274 = arith.index_cast %c1_i32_114 : i32 to index
    %c0_163 = arith.constant 0 : index
    %275 = vector.load %arg14[%274, %c0_163] : memref<8x128xf32, #tpu.memory_space<vmem>>, vector<1x128xf32>
    tpu.vector_store %arg14[%274, %c0_163], %267 {strides = array<i32>} : memref<8x128xf32, #tpu.memory_space<vmem>>, vector<1x128xf32>,
    %c2_i32_164 = arith.constant 2 : i32
    %c0_165 = arith.constant 0 : index
    %c0_166 = arith.constant 0 : index
    %c0_167 = arith.constant 0 : index
    %276 = vector.load %arg10[%c0_165, %c0_166, %c0_167] : memref<2x1x128xf32, #tpu.memory_space<vmem>>, vector<1x1x128xf32>
    %277 = vector.shape_cast %276 : vector<1x1x128xf32> to vector<1x128xf32>
    %c0_168 = arith.constant 0 : index
    %c0_169 = arith.constant 0 : index
    %c0_170 = arith.constant 0 : index
    %278 = vector.load %arg11[%c0_168, %c0_169, %c0_170] : memref<2x1x128xf32, #tpu.memory_space<vmem>>, vector<1x1x128xf32>
    %279 = vector.shape_cast %278 : vector<1x1x128xf32> to vector<1x128xf32>
    %280 = arith.index_cast %c2_i32_164 : i32 to index
    %c0_171 = arith.constant 0 : index
    %281 = vector.load %arg13[%280, %c0_171] : memref<8x512xf32, #tpu.memory_space<vmem>>, vector<1x512xf32>
    %282 = arith.truncf %277 : vector<1x128xf32> to vector<1x128xbf16>
    %c0_172 = arith.constant 0 : index
    %c128_173 = arith.constant 128 : index
    %c0_174 = arith.constant 0 : index
    %283 = vector.load %arg3[%c0_172, %c128_173, %c0_174] : memref<2x256x512xbf16, #tpu.memory_space<vmem>>, vector<1x128x512xbf16>
    %284 = vector.shape_cast %283 : vector<1x128x512xbf16> to vector<128x512xbf16>
    %cst_175 = arith.constant dense<0.000000e+00> : vector<1x512xf32>
    %285 = tpu.matmul %282, %284, %cst_175 {dimension_numbers = #tpu.dot_dimension_numbers<[1], [0], [0], [1], [0, 0, 1, 1], [], []>} : vector<1x128xbf16>, vector<128x512xbf16>, vector<1x512xf32> -> vector<1x512xf32>
    %286 = arith.addf %281, %285 : vector<1x512xf32>
    %287 = vector.extract_strided_slice %286 {offsets = [0, 0], sizes = [1, 128], strides = [1, 1]} : vector<1x512xf32> to vector<1x128xf32>
    %288 = arith.negf %287 : vector<1x128xf32>
    %289 = math.exp %288 : vector<1x128xf32>
    %cst_176 = arith.constant 1.000000e+00 : f32
    %290 = vector.broadcast %cst_176 : f32 to vector<1x128xf32>
    %291 = arith.addf %290, %289 : vector<1x128xf32>
    %292 = arith.divf %290, %291 : vector<1x128xf32>
    %293 = vector.extract_strided_slice %286 {offsets = [0, 128], sizes = [1, 128], strides = [1, 1]} : vector<1x512xf32> to vector<1x128xf32>
    %294 = arith.negf %293 : vector<1x128xf32>
    %295 = math.exp %294 : vector<1x128xf32>
    %cst_177 = arith.constant 1.000000e+00 : f32
    %296 = vector.broadcast %cst_177 : f32 to vector<1x128xf32>
    %297 = arith.addf %296, %295 : vector<1x128xf32>
    %298 = arith.divf %296, %297 : vector<1x128xf32>
    %299 = vector.extract_strided_slice %286 {offsets = [0, 256], sizes = [1, 128], strides = [1, 1]} : vector<1x512xf32> to vector<1x128xf32>
    %300 = math.tanh %299 : vector<1x128xf32>
    %301 = vector.extract_strided_slice %286 {offsets = [0, 384], sizes = [1, 128], strides = [1, 1]} : vector<1x512xf32> to vector<1x128xf32>
    %302 = arith.negf %301 : vector<1x128xf32>
    %303 = math.exp %302 : vector<1x128xf32>
    %cst_178 = arith.constant 1.000000e+00 : f32
    %304 = vector.broadcast %cst_178 : f32 to vector<1x128xf32>
    %305 = arith.addf %304, %303 : vector<1x128xf32>
    %306 = arith.divf %304, %305 : vector<1x128xf32>
    %307 = arith.mulf %298, %279 : vector<1x128xf32>
    %308 = arith.mulf %292, %300 : vector<1x128xf32>
    %309 = arith.addf %307, %308 : vector<1x128xf32>
    %310 = math.tanh %309 : vector<1x128xf32>
    %311 = arith.mulf %306, %310 : vector<1x128xf32>
    %c0_179 = arith.constant 0 : index
    %c0_180 = arith.constant 0 : index
    %c0_181 = arith.constant 0 : index
    %312 = vector.load %arg10[%c0_179, %c0_180, %c0_181] : memref<2x1x128xf32, #tpu.memory_space<vmem>>, vector<1x1x128xf32>
    %313 = vector.shape_cast %312 : vector<1x1x128xf32> to vector<1x128xf32>
    %314 = vector.shape_cast %311 : vector<1x128xf32> to vector<1x1x128xf32>
    tpu.vector_store %arg10[%c0_179, %c0_180, %c0_181], %314 {strides = array<i32>} : memref<2x1x128xf32, #tpu.memory_space<vmem>>, vector<1x1x128xf32>,
    %c0_182 = arith.constant 0 : index
    %c0_183 = arith.constant 0 : index
    %c0_184 = arith.constant 0 : index
    %315 = vector.load %arg11[%c0_182, %c0_183, %c0_184] : memref<2x1x128xf32, #tpu.memory_space<vmem>>, vector<1x1x128xf32>
    %316 = vector.shape_cast %315 : vector<1x1x128xf32> to vector<1x128xf32>
    %317 = vector.shape_cast %309 : vector<1x128xf32> to vector<1x1x128xf32>
    tpu.vector_store %arg11[%c0_182, %c0_183, %c0_184], %317 {strides = array<i32>} : memref<2x1x128xf32, #tpu.memory_space<vmem>>, vector<1x1x128xf32>,
    %c1_185 = arith.constant 1 : index
    %c0_186 = arith.constant 0 : index
    %c0_187 = arith.constant 0 : index
    %318 = vector.load %arg10[%c1_185, %c0_186, %c0_187] : memref<2x1x128xf32, #tpu.memory_space<vmem>>, vector<1x1x128xf32>
    %319 = vector.shape_cast %318 : vector<1x1x128xf32> to vector<1x128xf32>
    %c1_188 = arith.constant 1 : index
    %c0_189 = arith.constant 0 : index
    %c0_190 = arith.constant 0 : index
    %320 = vector.load %arg11[%c1_188, %c0_189, %c0_190] : memref<2x1x128xf32, #tpu.memory_space<vmem>>, vector<1x1x128xf32>
    %321 = vector.shape_cast %320 : vector<1x1x128xf32> to vector<1x128xf32>
    %c0_191 = arith.constant 0 : index
    %c0_192 = arith.constant 0 : index
    %322 = vector.load %arg15[%c0_191, %c0_192] : memref<1x256xf32, #tpu.memory_space<vmem>>, vector<1x128xf32>
    tpu.vector_store %arg15[%c0_191, %c0_192], %311 {strides = array<i32>} : memref<1x256xf32, #tpu.memory_space<vmem>>, vector<1x128xf32>,
    %c0_193 = arith.constant 0 : index
    %c128_194 = arith.constant 128 : index
    %323 = vector.load %arg15[%c0_193, %c128_194] : memref<1x256xf32, #tpu.memory_space<vmem>>, vector<1x128xf32>
    tpu.vector_store %arg15[%c0_193, %c128_194], %319 {strides = array<i32>} : memref<1x256xf32, #tpu.memory_space<vmem>>, vector<1x128xf32>,
    %c0_195 = arith.constant 0 : index
    %c0_196 = arith.constant 0 : index
    %324 = vector.load %arg15[%c0_195, %c0_196] : memref<1x256xf32, #tpu.memory_space<vmem>>, vector<1x256xf32>
    %325 = arith.truncf %324 : vector<1x256xf32> to vector<1x256xbf16>
    %c1_197 = arith.constant 1 : index
    %c0_198 = arith.constant 0 : index
    %c0_199 = arith.constant 0 : index
    %326 = vector.load %arg3[%c1_197, %c0_198, %c0_199] : memref<2x256x512xbf16, #tpu.memory_space<vmem>>, vector<1x256x512xbf16>
    %327 = vector.shape_cast %326 : vector<1x256x512xbf16> to vector<256x512xbf16>
    %cst_200 = arith.constant dense<0.000000e+00> : vector<1x512xf32>
    %328 = tpu.matmul %325, %327, %cst_200 {dimension_numbers = #tpu.dot_dimension_numbers<[1], [0], [0], [1], [0, 0, 1, 1], [], []>} : vector<1x256xbf16>, vector<256x512xbf16>, vector<1x512xf32> -> vector<1x512xf32>
    %c1_201 = arith.constant 1 : index
    %c0_202 = arith.constant 0 : index
    %c0_203 = arith.constant 0 : index
    %329 = vector.load %arg4[%c1_201, %c0_202, %c0_203] : memref<2x1x512xf32, #tpu.memory_space<vmem>>, vector<1x1x512xf32>
    %330 = vector.shape_cast %329 : vector<1x1x512xf32> to vector<1x512xf32>
    %331 = arith.addf %328, %330 : vector<1x512xf32>
    %332 = vector.extract_strided_slice %331 {offsets = [0, 0], sizes = [1, 128], strides = [1, 1]} : vector<1x512xf32> to vector<1x128xf32>
    %333 = arith.negf %332 : vector<1x128xf32>
    %334 = math.exp %333 : vector<1x128xf32>
    %cst_204 = arith.constant 1.000000e+00 : f32
    %335 = vector.broadcast %cst_204 : f32 to vector<1x128xf32>
    %336 = arith.addf %335, %334 : vector<1x128xf32>
    %337 = arith.divf %335, %336 : vector<1x128xf32>
    %338 = vector.extract_strided_slice %331 {offsets = [0, 128], sizes = [1, 128], strides = [1, 1]} : vector<1x512xf32> to vector<1x128xf32>
    %339 = arith.negf %338 : vector<1x128xf32>
    %340 = math.exp %339 : vector<1x128xf32>
    %cst_205 = arith.constant 1.000000e+00 : f32
    %341 = vector.broadcast %cst_205 : f32 to vector<1x128xf32>
    %342 = arith.addf %341, %340 : vector<1x128xf32>
    %343 = arith.divf %341, %342 : vector<1x128xf32>
    %344 = vector.extract_strided_slice %331 {offsets = [0, 256], sizes = [1, 128], strides = [1, 1]} : vector<1x512xf32> to vector<1x128xf32>
    %345 = math.tanh %344 : vector<1x128xf32>
    %346 = vector.extract_strided_slice %331 {offsets = [0, 384], sizes = [1, 128], strides = [1, 1]} : vector<1x512xf32> to vector<1x128xf32>
    %347 = arith.negf %346 : vector<1x128xf32>
    %348 = math.exp %347 : vector<1x128xf32>
    %cst_206 = arith.constant 1.000000e+00 : f32
    %349 = vector.broadcast %cst_206 : f32 to vector<1x128xf32>
    %350 = arith.addf %349, %348 : vector<1x128xf32>
    %351 = arith.divf %349, %350 : vector<1x128xf32>
    %352 = arith.mulf %343, %321 : vector<1x128xf32>
    %353 = arith.mulf %337, %345 : vector<1x128xf32>
    %354 = arith.addf %352, %353 : vector<1x128xf32>
    %355 = math.tanh %354 : vector<1x128xf32>
    %356 = arith.mulf %351, %355 : vector<1x128xf32>
    %c1_207 = arith.constant 1 : index
    %c0_208 = arith.constant 0 : index
    %c0_209 = arith.constant 0 : index
    %357 = vector.load %arg10[%c1_207, %c0_208, %c0_209] : memref<2x1x128xf32, #tpu.memory_space<vmem>>, vector<1x1x128xf32>
    %358 = vector.shape_cast %357 : vector<1x1x128xf32> to vector<1x128xf32>
    %359 = vector.shape_cast %356 : vector<1x128xf32> to vector<1x1x128xf32>
    tpu.vector_store %arg10[%c1_207, %c0_208, %c0_209], %359 {strides = array<i32>} : memref<2x1x128xf32, #tpu.memory_space<vmem>>, vector<1x1x128xf32>,
    %c1_210 = arith.constant 1 : index
    %c0_211 = arith.constant 0 : index
    %c0_212 = arith.constant 0 : index
    %360 = vector.load %arg11[%c1_210, %c0_211, %c0_212] : memref<2x1x128xf32, #tpu.memory_space<vmem>>, vector<1x1x128xf32>
    %361 = vector.shape_cast %360 : vector<1x1x128xf32> to vector<1x128xf32>
    %362 = vector.shape_cast %354 : vector<1x128xf32> to vector<1x1x128xf32>
    tpu.vector_store %arg11[%c1_210, %c0_211, %c0_212], %362 {strides = array<i32>} : memref<2x1x128xf32, #tpu.memory_space<vmem>>, vector<1x1x128xf32>,
    %363 = arith.index_cast %c2_i32_164 : i32 to index
    %c0_213 = arith.constant 0 : index
    %364 = vector.load %arg14[%363, %c0_213] : memref<8x128xf32, #tpu.memory_space<vmem>>, vector<1x128xf32>
    tpu.vector_store %arg14[%363, %c0_213], %356 {strides = array<i32>} : memref<8x128xf32, #tpu.memory_space<vmem>>, vector<1x128xf32>,
    %c3_i32_214 = arith.constant 3 : i32
    %c0_215 = arith.constant 0 : index
    %c0_216 = arith.constant 0 : index
    %c0_217 = arith.constant 0 : index
    %365 = vector.load %arg10[%c0_215, %c0_216, %c0_217] : memref<2x1x128xf32, #tpu.memory_space<vmem>>, vector<1x1x128xf32>
    %366 = vector.shape_cast %365 : vector<1x1x128xf32> to vector<1x128xf32>
    %c0_218 = arith.constant 0 : index
    %c0_219 = arith.constant 0 : index
    %c0_220 = arith.constant 0 : index
    %367 = vector.load %arg11[%c0_218, %c0_219, %c0_220] : memref<2x1x128xf32, #tpu.memory_space<vmem>>, vector<1x1x128xf32>
    %368 = vector.shape_cast %367 : vector<1x1x128xf32> to vector<1x128xf32>
    %369 = arith.index_cast %c3_i32_214 : i32 to index
    %c0_221 = arith.constant 0 : index
    %370 = vector.load %arg13[%369, %c0_221] : memref<8x512xf32, #tpu.memory_space<vmem>>, vector<1x512xf32>
    %371 = arith.truncf %366 : vector<1x128xf32> to vector<1x128xbf16>
    %c0_222 = arith.constant 0 : index
    %c128_223 = arith.constant 128 : index
    %c0_224 = arith.constant 0 : index
    %372 = vector.load %arg3[%c0_222, %c128_223, %c0_224] : memref<2x256x512xbf16, #tpu.memory_space<vmem>>, vector<1x128x512xbf16>
    %373 = vector.shape_cast %372 : vector<1x128x512xbf16> to vector<128x512xbf16>
    %cst_225 = arith.constant dense<0.000000e+00> : vector<1x512xf32>
    %374 = tpu.matmul %371, %373, %cst_225 {dimension_numbers = #tpu.dot_dimension_numbers<[1], [0], [0], [1], [0, 0, 1, 1], [], []>} : vector<1x128xbf16>, vector<128x512xbf16>, vector<1x512xf32> -> vector<1x512xf32>
    %375 = arith.addf %370, %374 : vector<1x512xf32>
    %376 = vector.extract_strided_slice %375 {offsets = [0, 0], sizes = [1, 128], strides = [1, 1]} : vector<1x512xf32> to vector<1x128xf32>
    %377 = arith.negf %376 : vector<1x128xf32>
    %378 = math.exp %377 : vector<1x128xf32>
    %cst_226 = arith.constant 1.000000e+00 : f32
    %379 = vector.broadcast %cst_226 : f32 to vector<1x128xf32>
    %380 = arith.addf %379, %378 : vector<1x128xf32>
    %381 = arith.divf %379, %380 : vector<1x128xf32>
    %382 = vector.extract_strided_slice %375 {offsets = [0, 128], sizes = [1, 128], strides = [1, 1]} : vector<1x512xf32> to vector<1x128xf32>
    %383 = arith.negf %382 : vector<1x128xf32>
    %384 = math.exp %383 : vector<1x128xf32>
    %cst_227 = arith.constant 1.000000e+00 : f32
    %385 = vector.broadcast %cst_227 : f32 to vector<1x128xf32>
    %386 = arith.addf %385, %384 : vector<1x128xf32>
    %387 = arith.divf %385, %386 : vector<1x128xf32>
    %388 = vector.extract_strided_slice %375 {offsets = [0, 256], sizes = [1, 128], strides = [1, 1]} : vector<1x512xf32> to vector<1x128xf32>
    %389 = math.tanh %388 : vector<1x128xf32>
    %390 = vector.extract_strided_slice %375 {offsets = [0, 384], sizes = [1, 128], strides = [1, 1]} : vector<1x512xf32> to vector<1x128xf32>
    %391 = arith.negf %390 : vector<1x128xf32>
    %392 = math.exp %391 : vector<1x128xf32>
    %cst_228 = arith.constant 1.000000e+00 : f32
    %393 = vector.broadcast %cst_228 : f32 to vector<1x128xf32>
    %394 = arith.addf %393, %392 : vector<1x128xf32>
    %395 = arith.divf %393, %394 : vector<1x128xf32>
    %396 = arith.mulf %387, %368 : vector<1x128xf32>
    %397 = arith.mulf %381, %389 : vector<1x128xf32>
    %398 = arith.addf %396, %397 : vector<1x128xf32>
    %399 = math.tanh %398 : vector<1x128xf32>
    %400 = arith.mulf %395, %399 : vector<1x128xf32>
    %c0_229 = arith.constant 0 : index
    %c0_230 = arith.constant 0 : index
    %c0_231 = arith.constant 0 : index
    %401 = vector.load %arg10[%c0_229, %c0_230, %c0_231] : memref<2x1x128xf32, #tpu.memory_space<vmem>>, vector<1x1x128xf32>
    %402 = vector.shape_cast %401 : vector<1x1x128xf32> to vector<1x128xf32>
    %403 = vector.shape_cast %400 : vector<1x128xf32> to vector<1x1x128xf32>
    tpu.vector_store %arg10[%c0_229, %c0_230, %c0_231], %403 {strides = array<i32>} : memref<2x1x128xf32, #tpu.memory_space<vmem>>, vector<1x1x128xf32>,
    %c0_232 = arith.constant 0 : index
    %c0_233 = arith.constant 0 : index
    %c0_234 = arith.constant 0 : index
    %404 = vector.load %arg11[%c0_232, %c0_233, %c0_234] : memref<2x1x128xf32, #tpu.memory_space<vmem>>, vector<1x1x128xf32>
    %405 = vector.shape_cast %404 : vector<1x1x128xf32> to vector<1x128xf32>
    %406 = vector.shape_cast %398 : vector<1x128xf32> to vector<1x1x128xf32>
    tpu.vector_store %arg11[%c0_232, %c0_233, %c0_234], %406 {strides = array<i32>} : memref<2x1x128xf32, #tpu.memory_space<vmem>>, vector<1x1x128xf32>,
    %c1_235 = arith.constant 1 : index
    %c0_236 = arith.constant 0 : index
    %c0_237 = arith.constant 0 : index
    %407 = vector.load %arg10[%c1_235, %c0_236, %c0_237] : memref<2x1x128xf32, #tpu.memory_space<vmem>>, vector<1x1x128xf32>
    %408 = vector.shape_cast %407 : vector<1x1x128xf32> to vector<1x128xf32>
    %c1_238 = arith.constant 1 : index
    %c0_239 = arith.constant 0 : index
    %c0_240 = arith.constant 0 : index
    %409 = vector.load %arg11[%c1_238, %c0_239, %c0_240] : memref<2x1x128xf32, #tpu.memory_space<vmem>>, vector<1x1x128xf32>
    %410 = vector.shape_cast %409 : vector<1x1x128xf32> to vector<1x128xf32>
    %c0_241 = arith.constant 0 : index
    %c0_242 = arith.constant 0 : index
    %411 = vector.load %arg15[%c0_241, %c0_242] : memref<1x256xf32, #tpu.memory_space<vmem>>, vector<1x128xf32>
    tpu.vector_store %arg15[%c0_241, %c0_242], %400 {strides = array<i32>} : memref<1x256xf32, #tpu.memory_space<vmem>>, vector<1x128xf32>,
    %c0_243 = arith.constant 0 : index
    %c128_244 = arith.constant 128 : index
    %412 = vector.load %arg15[%c0_243, %c128_244] : memref<1x256xf32, #tpu.memory_space<vmem>>, vector<1x128xf32>
    tpu.vector_store %arg15[%c0_243, %c128_244], %408 {strides = array<i32>} : memref<1x256xf32, #tpu.memory_space<vmem>>, vector<1x128xf32>,
    %c0_245 = arith.constant 0 : index
    %c0_246 = arith.constant 0 : index
    %413 = vector.load %arg15[%c0_245, %c0_246] : memref<1x256xf32, #tpu.memory_space<vmem>>, vector<1x256xf32>
    %414 = arith.truncf %413 : vector<1x256xf32> to vector<1x256xbf16>
    %c1_247 = arith.constant 1 : index
    %c0_248 = arith.constant 0 : index
    %c0_249 = arith.constant 0 : index
    %415 = vector.load %arg3[%c1_247, %c0_248, %c0_249] : memref<2x256x512xbf16, #tpu.memory_space<vmem>>, vector<1x256x512xbf16>
    %416 = vector.shape_cast %415 : vector<1x256x512xbf16> to vector<256x512xbf16>
    %cst_250 = arith.constant dense<0.000000e+00> : vector<1x512xf32>
    %417 = tpu.matmul %414, %416, %cst_250 {dimension_numbers = #tpu.dot_dimension_numbers<[1], [0], [0], [1], [0, 0, 1, 1], [], []>} : vector<1x256xbf16>, vector<256x512xbf16>, vector<1x512xf32> -> vector<1x512xf32>
    %c1_251 = arith.constant 1 : index
    %c0_252 = arith.constant 0 : index
    %c0_253 = arith.constant 0 : index
    %418 = vector.load %arg4[%c1_251, %c0_252, %c0_253] : memref<2x1x512xf32, #tpu.memory_space<vmem>>, vector<1x1x512xf32>
    %419 = vector.shape_cast %418 : vector<1x1x512xf32> to vector<1x512xf32>
    %420 = arith.addf %417, %419 : vector<1x512xf32>
    %421 = vector.extract_strided_slice %420 {offsets = [0, 0], sizes = [1, 128], strides = [1, 1]} : vector<1x512xf32> to vector<1x128xf32>
    %422 = arith.negf %421 : vector<1x128xf32>
    %423 = math.exp %422 : vector<1x128xf32>
    %cst_254 = arith.constant 1.000000e+00 : f32
    %424 = vector.broadcast %cst_254 : f32 to vector<1x128xf32>
    %425 = arith.addf %424, %423 : vector<1x128xf32>
    %426 = arith.divf %424, %425 : vector<1x128xf32>
    %427 = vector.extract_strided_slice %420 {offsets = [0, 128], sizes = [1, 128], strides = [1, 1]} : vector<1x512xf32> to vector<1x128xf32>
    %428 = arith.negf %427 : vector<1x128xf32>
    %429 = math.exp %428 : vector<1x128xf32>
    %cst_255 = arith.constant 1.000000e+00 : f32
    %430 = vector.broadcast %cst_255 : f32 to vector<1x128xf32>
    %431 = arith.addf %430, %429 : vector<1x128xf32>
    %432 = arith.divf %430, %431 : vector<1x128xf32>
    %433 = vector.extract_strided_slice %420 {offsets = [0, 256], sizes = [1, 128], strides = [1, 1]} : vector<1x512xf32> to vector<1x128xf32>
    %434 = math.tanh %433 : vector<1x128xf32>
    %435 = vector.extract_strided_slice %420 {offsets = [0, 384], sizes = [1, 128], strides = [1, 1]} : vector<1x512xf32> to vector<1x128xf32>
    %436 = arith.negf %435 : vector<1x128xf32>
    %437 = math.exp %436 : vector<1x128xf32>
    %cst_256 = arith.constant 1.000000e+00 : f32
    %438 = vector.broadcast %cst_256 : f32 to vector<1x128xf32>
    %439 = arith.addf %438, %437 : vector<1x128xf32>
    %440 = arith.divf %438, %439 : vector<1x128xf32>
    %441 = arith.mulf %432, %410 : vector<1x128xf32>
    %442 = arith.mulf %426, %434 : vector<1x128xf32>
    %443 = arith.addf %441, %442 : vector<1x128xf32>
    %444 = math.tanh %443 : vector<1x128xf32>
    %445 = arith.mulf %440, %444 : vector<1x128xf32>
    %c1_257 = arith.constant 1 : index
    %c0_258 = arith.constant 0 : index
    %c0_259 = arith.constant 0 : index
    %446 = vector.load %arg10[%c1_257, %c0_258, %c0_259] : memref<2x1x128xf32, #tpu.memory_space<vmem>>, vector<1x1x128xf32>
    %447 = vector.shape_cast %446 : vector<1x1x128xf32> to vector<1x128xf32>
    %448 = vector.shape_cast %445 : vector<1x128xf32> to vector<1x1x128xf32>
    tpu.vector_store %arg10[%c1_257, %c0_258, %c0_259], %448 {strides = array<i32>} : memref<2x1x128xf32, #tpu.memory_space<vmem>>, vector<1x1x128xf32>,
    %c1_260 = arith.constant 1 : index
    %c0_261 = arith.constant 0 : index
    %c0_262 = arith.constant 0 : index
    %449 = vector.load %arg11[%c1_260, %c0_261, %c0_262] : memref<2x1x128xf32, #tpu.memory_space<vmem>>, vector<1x1x128xf32>
    %450 = vector.shape_cast %449 : vector<1x1x128xf32> to vector<1x128xf32>
    %451 = vector.shape_cast %443 : vector<1x128xf32> to vector<1x1x128xf32>
    tpu.vector_store %arg11[%c1_260, %c0_261, %c0_262], %451 {strides = array<i32>} : memref<2x1x128xf32, #tpu.memory_space<vmem>>, vector<1x1x128xf32>,
    %452 = arith.index_cast %c3_i32_214 : i32 to index
    %c0_263 = arith.constant 0 : index
    %453 = vector.load %arg14[%452, %c0_263] : memref<8x128xf32, #tpu.memory_space<vmem>>, vector<1x128xf32>
    tpu.vector_store %arg14[%452, %c0_263], %445 {strides = array<i32>} : memref<8x128xf32, #tpu.memory_space<vmem>>, vector<1x128xf32>,
    %c4_i32_264 = arith.constant 4 : i32
    %c0_265 = arith.constant 0 : index
    %c0_266 = arith.constant 0 : index
    %c0_267 = arith.constant 0 : index
    %454 = vector.load %arg10[%c0_265, %c0_266, %c0_267] : memref<2x1x128xf32, #tpu.memory_space<vmem>>, vector<1x1x128xf32>
    %455 = vector.shape_cast %454 : vector<1x1x128xf32> to vector<1x128xf32>
    %c0_268 = arith.constant 0 : index
    %c0_269 = arith.constant 0 : index
    %c0_270 = arith.constant 0 : index
    %456 = vector.load %arg11[%c0_268, %c0_269, %c0_270] : memref<2x1x128xf32, #tpu.memory_space<vmem>>, vector<1x1x128xf32>
    %457 = vector.shape_cast %456 : vector<1x1x128xf32> to vector<1x128xf32>
    %458 = arith.index_cast %c4_i32_264 : i32 to index
    %c0_271 = arith.constant 0 : index
    %459 = vector.load %arg13[%458, %c0_271] : memref<8x512xf32, #tpu.memory_space<vmem>>, vector<1x512xf32>
    %460 = arith.truncf %455 : vector<1x128xf32> to vector<1x128xbf16>
    %c0_272 = arith.constant 0 : index
    %c128_273 = arith.constant 128 : index
    %c0_274 = arith.constant 0 : index
    %461 = vector.load %arg3[%c0_272, %c128_273, %c0_274] : memref<2x256x512xbf16, #tpu.memory_space<vmem>>, vector<1x128x512xbf16>
    %462 = vector.shape_cast %461 : vector<1x128x512xbf16> to vector<128x512xbf16>
    %cst_275 = arith.constant dense<0.000000e+00> : vector<1x512xf32>
    %463 = tpu.matmul %460, %462, %cst_275 {dimension_numbers = #tpu.dot_dimension_numbers<[1], [0], [0], [1], [0, 0, 1, 1], [], []>} : vector<1x128xbf16>, vector<128x512xbf16>, vector<1x512xf32> -> vector<1x512xf32>
    %464 = arith.addf %459, %463 : vector<1x512xf32>
    %465 = vector.extract_strided_slice %464 {offsets = [0, 0], sizes = [1, 128], strides = [1, 1]} : vector<1x512xf32> to vector<1x128xf32>
    %466 = arith.negf %465 : vector<1x128xf32>
    %467 = math.exp %466 : vector<1x128xf32>
    %cst_276 = arith.constant 1.000000e+00 : f32
    %468 = vector.broadcast %cst_276 : f32 to vector<1x128xf32>
    %469 = arith.addf %468, %467 : vector<1x128xf32>
    %470 = arith.divf %468, %469 : vector<1x128xf32>
    %471 = vector.extract_strided_slice %464 {offsets = [0, 128], sizes = [1, 128], strides = [1, 1]} : vector<1x512xf32> to vector<1x128xf32>
    %472 = arith.negf %471 : vector<1x128xf32>
    %473 = math.exp %472 : vector<1x128xf32>
    %cst_277 = arith.constant 1.000000e+00 : f32
    %474 = vector.broadcast %cst_277 : f32 to vector<1x128xf32>
    %475 = arith.addf %474, %473 : vector<1x128xf32>
    %476 = arith.divf %474, %475 : vector<1x128xf32>
    %477 = vector.extract_strided_slice %464 {offsets = [0, 256], sizes = [1, 128], strides = [1, 1]} : vector<1x512xf32> to vector<1x128xf32>
    %478 = math.tanh %477 : vector<1x128xf32>
    %479 = vector.extract_strided_slice %464 {offsets = [0, 384], sizes = [1, 128], strides = [1, 1]} : vector<1x512xf32> to vector<1x128xf32>
    %480 = arith.negf %479 : vector<1x128xf32>
    %481 = math.exp %480 : vector<1x128xf32>
    %cst_278 = arith.constant 1.000000e+00 : f32
    %482 = vector.broadcast %cst_278 : f32 to vector<1x128xf32>
    %483 = arith.addf %482, %481 : vector<1x128xf32>
    %484 = arith.divf %482, %483 : vector<1x128xf32>
    %485 = arith.mulf %476, %457 : vector<1x128xf32>
    %486 = arith.mulf %470, %478 : vector<1x128xf32>
    %487 = arith.addf %485, %486 : vector<1x128xf32>
    %488 = math.tanh %487 : vector<1x128xf32>
    %489 = arith.mulf %484, %488 : vector<1x128xf32>
    %c0_279 = arith.constant 0 : index
    %c0_280 = arith.constant 0 : index
    %c0_281 = arith.constant 0 : index
    %490 = vector.load %arg10[%c0_279, %c0_280, %c0_281] : memref<2x1x128xf32, #tpu.memory_space<vmem>>, vector<1x1x128xf32>
    %491 = vector.shape_cast %490 : vector<1x1x128xf32> to vector<1x128xf32>
    %492 = vector.shape_cast %489 : vector<1x128xf32> to vector<1x1x128xf32>
    tpu.vector_store %arg10[%c0_279, %c0_280, %c0_281], %492 {strides = array<i32>} : memref<2x1x128xf32, #tpu.memory_space<vmem>>, vector<1x1x128xf32>,
    %c0_282 = arith.constant 0 : index
    %c0_283 = arith.constant 0 : index
    %c0_284 = arith.constant 0 : index
    %493 = vector.load %arg11[%c0_282, %c0_283, %c0_284] : memref<2x1x128xf32, #tpu.memory_space<vmem>>, vector<1x1x128xf32>
    %494 = vector.shape_cast %493 : vector<1x1x128xf32> to vector<1x128xf32>
    %495 = vector.shape_cast %487 : vector<1x128xf32> to vector<1x1x128xf32>
    tpu.vector_store %arg11[%c0_282, %c0_283, %c0_284], %495 {strides = array<i32>} : memref<2x1x128xf32, #tpu.memory_space<vmem>>, vector<1x1x128xf32>,
    %c1_285 = arith.constant 1 : index
    %c0_286 = arith.constant 0 : index
    %c0_287 = arith.constant 0 : index
    %496 = vector.load %arg10[%c1_285, %c0_286, %c0_287] : memref<2x1x128xf32, #tpu.memory_space<vmem>>, vector<1x1x128xf32>
    %497 = vector.shape_cast %496 : vector<1x1x128xf32> to vector<1x128xf32>
    %c1_288 = arith.constant 1 : index
    %c0_289 = arith.constant 0 : index
    %c0_290 = arith.constant 0 : index
    %498 = vector.load %arg11[%c1_288, %c0_289, %c0_290] : memref<2x1x128xf32, #tpu.memory_space<vmem>>, vector<1x1x128xf32>
    %499 = vector.shape_cast %498 : vector<1x1x128xf32> to vector<1x128xf32>
    %c0_291 = arith.constant 0 : index
    %c0_292 = arith.constant 0 : index
    %500 = vector.load %arg15[%c0_291, %c0_292] : memref<1x256xf32, #tpu.memory_space<vmem>>, vector<1x128xf32>
    tpu.vector_store %arg15[%c0_291, %c0_292], %489 {strides = array<i32>} : memref<1x256xf32, #tpu.memory_space<vmem>>, vector<1x128xf32>,
    %c0_293 = arith.constant 0 : index
    %c128_294 = arith.constant 128 : index
    %501 = vector.load %arg15[%c0_293, %c128_294] : memref<1x256xf32, #tpu.memory_space<vmem>>, vector<1x128xf32>
    tpu.vector_store %arg15[%c0_293, %c128_294], %497 {strides = array<i32>} : memref<1x256xf32, #tpu.memory_space<vmem>>, vector<1x128xf32>,
    %c0_295 = arith.constant 0 : index
    %c0_296 = arith.constant 0 : index
    %502 = vector.load %arg15[%c0_295, %c0_296] : memref<1x256xf32, #tpu.memory_space<vmem>>, vector<1x256xf32>
    %503 = arith.truncf %502 : vector<1x256xf32> to vector<1x256xbf16>
    %c1_297 = arith.constant 1 : index
    %c0_298 = arith.constant 0 : index
    %c0_299 = arith.constant 0 : index
    %504 = vector.load %arg3[%c1_297, %c0_298, %c0_299] : memref<2x256x512xbf16, #tpu.memory_space<vmem>>, vector<1x256x512xbf16>
    %505 = vector.shape_cast %504 : vector<1x256x512xbf16> to vector<256x512xbf16>
    %cst_300 = arith.constant dense<0.000000e+00> : vector<1x512xf32>
    %506 = tpu.matmul %503, %505, %cst_300 {dimension_numbers = #tpu.dot_dimension_numbers<[1], [0], [0], [1], [0, 0, 1, 1], [], []>} : vector<1x256xbf16>, vector<256x512xbf16>, vector<1x512xf32> -> vector<1x512xf32>
    %c1_301 = arith.constant 1 : index
    %c0_302 = arith.constant 0 : index
    %c0_303 = arith.constant 0 : index
    %507 = vector.load %arg4[%c1_301, %c0_302, %c0_303] : memref<2x1x512xf32, #tpu.memory_space<vmem>>, vector<1x1x512xf32>
    %508 = vector.shape_cast %507 : vector<1x1x512xf32> to vector<1x512xf32>
    %509 = arith.addf %506, %508 : vector<1x512xf32>
    %510 = vector.extract_strided_slice %509 {offsets = [0, 0], sizes = [1, 128], strides = [1, 1]} : vector<1x512xf32> to vector<1x128xf32>
    %511 = arith.negf %510 : vector<1x128xf32>
    %512 = math.exp %511 : vector<1x128xf32>
    %cst_304 = arith.constant 1.000000e+00 : f32
    %513 = vector.broadcast %cst_304 : f32 to vector<1x128xf32>
    %514 = arith.addf %513, %512 : vector<1x128xf32>
    %515 = arith.divf %513, %514 : vector<1x128xf32>
    %516 = vector.extract_strided_slice %509 {offsets = [0, 128], sizes = [1, 128], strides = [1, 1]} : vector<1x512xf32> to vector<1x128xf32>
    %517 = arith.negf %516 : vector<1x128xf32>
    %518 = math.exp %517 : vector<1x128xf32>
    %cst_305 = arith.constant 1.000000e+00 : f32
    %519 = vector.broadcast %cst_305 : f32 to vector<1x128xf32>
    %520 = arith.addf %519, %518 : vector<1x128xf32>
    %521 = arith.divf %519, %520 : vector<1x128xf32>
    %522 = vector.extract_strided_slice %509 {offsets = [0, 256], sizes = [1, 128], strides = [1, 1]} : vector<1x512xf32> to vector<1x128xf32>
    %523 = math.tanh %522 : vector<1x128xf32>
    %524 = vector.extract_strided_slice %509 {offsets = [0, 384], sizes = [1, 128], strides = [1, 1]} : vector<1x512xf32> to vector<1x128xf32>
    %525 = arith.negf %524 : vector<1x128xf32>
    %526 = math.exp %525 : vector<1x128xf32>
    %cst_306 = arith.constant 1.000000e+00 : f32
    %527 = vector.broadcast %cst_306 : f32 to vector<1x128xf32>
    %528 = arith.addf %527, %526 : vector<1x128xf32>
    %529 = arith.divf %527, %528 : vector<1x128xf32>
    %530 = arith.mulf %521, %499 : vector<1x128xf32>
    %531 = arith.mulf %515, %523 : vector<1x128xf32>
    %532 = arith.addf %530, %531 : vector<1x128xf32>
    %533 = math.tanh %532 : vector<1x128xf32>
    %534 = arith.mulf %529, %533 : vector<1x128xf32>
    %c1_307 = arith.constant 1 : index
    %c0_308 = arith.constant 0 : index
    %c0_309 = arith.constant 0 : index
    %535 = vector.load %arg10[%c1_307, %c0_308, %c0_309] : memref<2x1x128xf32, #tpu.memory_space<vmem>>, vector<1x1x128xf32>
    %536 = vector.shape_cast %535 : vector<1x1x128xf32> to vector<1x128xf32>
    %537 = vector.shape_cast %534 : vector<1x128xf32> to vector<1x1x128xf32>
    tpu.vector_store %arg10[%c1_307, %c0_308, %c0_309], %537 {strides = array<i32>} : memref<2x1x128xf32, #tpu.memory_space<vmem>>, vector<1x1x128xf32>,
    %c1_310 = arith.constant 1 : index
    %c0_311 = arith.constant 0 : index
    %c0_312 = arith.constant 0 : index
    %538 = vector.load %arg11[%c1_310, %c0_311, %c0_312] : memref<2x1x128xf32, #tpu.memory_space<vmem>>, vector<1x1x128xf32>
    %539 = vector.shape_cast %538 : vector<1x1x128xf32> to vector<1x128xf32>
    %540 = vector.shape_cast %532 : vector<1x128xf32> to vector<1x1x128xf32>
    tpu.vector_store %arg11[%c1_310, %c0_311, %c0_312], %540 {strides = array<i32>} : memref<2x1x128xf32, #tpu.memory_space<vmem>>, vector<1x1x128xf32>,
    %541 = arith.index_cast %c4_i32_264 : i32 to index
    %c0_313 = arith.constant 0 : index
    %542 = vector.load %arg14[%541, %c0_313] : memref<8x128xf32, #tpu.memory_space<vmem>>, vector<1x128xf32>
    tpu.vector_store %arg14[%541, %c0_313], %534 {strides = array<i32>} : memref<8x128xf32, #tpu.memory_space<vmem>>, vector<1x128xf32>,
    %c5_i32_314 = arith.constant 5 : i32
    %c0_315 = arith.constant 0 : index
    %c0_316 = arith.constant 0 : index
    %c0_317 = arith.constant 0 : index
    %543 = vector.load %arg10[%c0_315, %c0_316, %c0_317] : memref<2x1x128xf32, #tpu.memory_space<vmem>>, vector<1x1x128xf32>
    %544 = vector.shape_cast %543 : vector<1x1x128xf32> to vector<1x128xf32>
    %c0_318 = arith.constant 0 : index
    %c0_319 = arith.constant 0 : index
    %c0_320 = arith.constant 0 : index
    %545 = vector.load %arg11[%c0_318, %c0_319, %c0_320] : memref<2x1x128xf32, #tpu.memory_space<vmem>>, vector<1x1x128xf32>
    %546 = vector.shape_cast %545 : vector<1x1x128xf32> to vector<1x128xf32>
    %547 = arith.index_cast %c5_i32_314 : i32 to index
    %c0_321 = arith.constant 0 : index
    %548 = vector.load %arg13[%547, %c0_321] : memref<8x512xf32, #tpu.memory_space<vmem>>, vector<1x512xf32>
    %549 = arith.truncf %544 : vector<1x128xf32> to vector<1x128xbf16>
    %c0_322 = arith.constant 0 : index
    %c128_323 = arith.constant 128 : index
    %c0_324 = arith.constant 0 : index
    %550 = vector.load %arg3[%c0_322, %c128_323, %c0_324] : memref<2x256x512xbf16, #tpu.memory_space<vmem>>, vector<1x128x512xbf16>
    %551 = vector.shape_cast %550 : vector<1x128x512xbf16> to vector<128x512xbf16>
    %cst_325 = arith.constant dense<0.000000e+00> : vector<1x512xf32>
    %552 = tpu.matmul %549, %551, %cst_325 {dimension_numbers = #tpu.dot_dimension_numbers<[1], [0], [0], [1], [0, 0, 1, 1], [], []>} : vector<1x128xbf16>, vector<128x512xbf16>, vector<1x512xf32> -> vector<1x512xf32>
    %553 = arith.addf %548, %552 : vector<1x512xf32>
    %554 = vector.extract_strided_slice %553 {offsets = [0, 0], sizes = [1, 128], strides = [1, 1]} : vector<1x512xf32> to vector<1x128xf32>
    %555 = arith.negf %554 : vector<1x128xf32>
    %556 = math.exp %555 : vector<1x128xf32>
    %cst_326 = arith.constant 1.000000e+00 : f32
    %557 = vector.broadcast %cst_326 : f32 to vector<1x128xf32>
    %558 = arith.addf %557, %556 : vector<1x128xf32>
    %559 = arith.divf %557, %558 : vector<1x128xf32>
    %560 = vector.extract_strided_slice %553 {offsets = [0, 128], sizes = [1, 128], strides = [1, 1]} : vector<1x512xf32> to vector<1x128xf32>
    %561 = arith.negf %560 : vector<1x128xf32>
    %562 = math.exp %561 : vector<1x128xf32>
    %cst_327 = arith.constant 1.000000e+00 : f32
    %563 = vector.broadcast %cst_327 : f32 to vector<1x128xf32>
    %564 = arith.addf %563, %562 : vector<1x128xf32>
    %565 = arith.divf %563, %564 : vector<1x128xf32>
    %566 = vector.extract_strided_slice %553 {offsets = [0, 256], sizes = [1, 128], strides = [1, 1]} : vector<1x512xf32> to vector<1x128xf32>
    %567 = math.tanh %566 : vector<1x128xf32>
    %568 = vector.extract_strided_slice %553 {offsets = [0, 384], sizes = [1, 128], strides = [1, 1]} : vector<1x512xf32> to vector<1x128xf32>
    %569 = arith.negf %568 : vector<1x128xf32>
    %570 = math.exp %569 : vector<1x128xf32>
    %cst_328 = arith.constant 1.000000e+00 : f32
    %571 = vector.broadcast %cst_328 : f32 to vector<1x128xf32>
    %572 = arith.addf %571, %570 : vector<1x128xf32>
    %573 = arith.divf %571, %572 : vector<1x128xf32>
    %574 = arith.mulf %565, %546 : vector<1x128xf32>
    %575 = arith.mulf %559, %567 : vector<1x128xf32>
    %576 = arith.addf %574, %575 : vector<1x128xf32>
    %577 = math.tanh %576 : vector<1x128xf32>
    %578 = arith.mulf %573, %577 : vector<1x128xf32>
    %c0_329 = arith.constant 0 : index
    %c0_330 = arith.constant 0 : index
    %c0_331 = arith.constant 0 : index
    %579 = vector.load %arg10[%c0_329, %c0_330, %c0_331] : memref<2x1x128xf32, #tpu.memory_space<vmem>>, vector<1x1x128xf32>
    %580 = vector.shape_cast %579 : vector<1x1x128xf32> to vector<1x128xf32>
    %581 = vector.shape_cast %578 : vector<1x128xf32> to vector<1x1x128xf32>
    tpu.vector_store %arg10[%c0_329, %c0_330, %c0_331], %581 {strides = array<i32>} : memref<2x1x128xf32, #tpu.memory_space<vmem>>, vector<1x1x128xf32>,
    %c0_332 = arith.constant 0 : index
    %c0_333 = arith.constant 0 : index
    %c0_334 = arith.constant 0 : index
    %582 = vector.load %arg11[%c0_332, %c0_333, %c0_334] : memref<2x1x128xf32, #tpu.memory_space<vmem>>, vector<1x1x128xf32>
    %583 = vector.shape_cast %582 : vector<1x1x128xf32> to vector<1x128xf32>
    %584 = vector.shape_cast %576 : vector<1x128xf32> to vector<1x1x128xf32>
    tpu.vector_store %arg11[%c0_332, %c0_333, %c0_334], %584 {strides = array<i32>} : memref<2x1x128xf32, #tpu.memory_space<vmem>>, vector<1x1x128xf32>,
    %c1_335 = arith.constant 1 : index
    %c0_336 = arith.constant 0 : index
    %c0_337 = arith.constant 0 : index
    %585 = vector.load %arg10[%c1_335, %c0_336, %c0_337] : memref<2x1x128xf32, #tpu.memory_space<vmem>>, vector<1x1x128xf32>
    %586 = vector.shape_cast %585 : vector<1x1x128xf32> to vector<1x128xf32>
    %c1_338 = arith.constant 1 : index
    %c0_339 = arith.constant 0 : index
    %c0_340 = arith.constant 0 : index
    %587 = vector.load %arg11[%c1_338, %c0_339, %c0_340] : memref<2x1x128xf32, #tpu.memory_space<vmem>>, vector<1x1x128xf32>
    %588 = vector.shape_cast %587 : vector<1x1x128xf32> to vector<1x128xf32>
    %c0_341 = arith.constant 0 : index
    %c0_342 = arith.constant 0 : index
    %589 = vector.load %arg15[%c0_341, %c0_342] : memref<1x256xf32, #tpu.memory_space<vmem>>, vector<1x128xf32>
    tpu.vector_store %arg15[%c0_341, %c0_342], %578 {strides = array<i32>} : memref<1x256xf32, #tpu.memory_space<vmem>>, vector<1x128xf32>,
    %c0_343 = arith.constant 0 : index
    %c128_344 = arith.constant 128 : index
    %590 = vector.load %arg15[%c0_343, %c128_344] : memref<1x256xf32, #tpu.memory_space<vmem>>, vector<1x128xf32>
    tpu.vector_store %arg15[%c0_343, %c128_344], %586 {strides = array<i32>} : memref<1x256xf32, #tpu.memory_space<vmem>>, vector<1x128xf32>,
    %c0_345 = arith.constant 0 : index
    %c0_346 = arith.constant 0 : index
    %591 = vector.load %arg15[%c0_345, %c0_346] : memref<1x256xf32, #tpu.memory_space<vmem>>, vector<1x256xf32>
    %592 = arith.truncf %591 : vector<1x256xf32> to vector<1x256xbf16>
    %c1_347 = arith.constant 1 : index
    %c0_348 = arith.constant 0 : index
    %c0_349 = arith.constant 0 : index
    %593 = vector.load %arg3[%c1_347, %c0_348, %c0_349] : memref<2x256x512xbf16, #tpu.memory_space<vmem>>, vector<1x256x512xbf16>
    %594 = vector.shape_cast %593 : vector<1x256x512xbf16> to vector<256x512xbf16>
    %cst_350 = arith.constant dense<0.000000e+00> : vector<1x512xf32>
    %595 = tpu.matmul %592, %594, %cst_350 {dimension_numbers = #tpu.dot_dimension_numbers<[1], [0], [0], [1], [0, 0, 1, 1], [], []>} : vector<1x256xbf16>, vector<256x512xbf16>, vector<1x512xf32> -> vector<1x512xf32>
    %c1_351 = arith.constant 1 : index
    %c0_352 = arith.constant 0 : index
    %c0_353 = arith.constant 0 : index
    %596 = vector.load %arg4[%c1_351, %c0_352, %c0_353] : memref<2x1x512xf32, #tpu.memory_space<vmem>>, vector<1x1x512xf32>
    %597 = vector.shape_cast %596 : vector<1x1x512xf32> to vector<1x512xf32>
    %598 = arith.addf %595, %597 : vector<1x512xf32>
    %599 = vector.extract_strided_slice %598 {offsets = [0, 0], sizes = [1, 128], strides = [1, 1]} : vector<1x512xf32> to vector<1x128xf32>
    %600 = arith.negf %599 : vector<1x128xf32>
    %601 = math.exp %600 : vector<1x128xf32>
    %cst_354 = arith.constant 1.000000e+00 : f32
    %602 = vector.broadcast %cst_354 : f32 to vector<1x128xf32>
    %603 = arith.addf %602, %601 : vector<1x128xf32>
    %604 = arith.divf %602, %603 : vector<1x128xf32>
    %605 = vector.extract_strided_slice %598 {offsets = [0, 128], sizes = [1, 128], strides = [1, 1]} : vector<1x512xf32> to vector<1x128xf32>
    %606 = arith.negf %605 : vector<1x128xf32>
    %607 = math.exp %606 : vector<1x128xf32>
    %cst_355 = arith.constant 1.000000e+00 : f32
    %608 = vector.broadcast %cst_355 : f32 to vector<1x128xf32>
    %609 = arith.addf %608, %607 : vector<1x128xf32>
    %610 = arith.divf %608, %609 : vector<1x128xf32>
    %611 = vector.extract_strided_slice %598 {offsets = [0, 256], sizes = [1, 128], strides = [1, 1]} : vector<1x512xf32> to vector<1x128xf32>
    %612 = math.tanh %611 : vector<1x128xf32>
    %613 = vector.extract_strided_slice %598 {offsets = [0, 384], sizes = [1, 128], strides = [1, 1]} : vector<1x512xf32> to vector<1x128xf32>
    %614 = arith.negf %613 : vector<1x128xf32>
    %615 = math.exp %614 : vector<1x128xf32>
    %cst_356 = arith.constant 1.000000e+00 : f32
    %616 = vector.broadcast %cst_356 : f32 to vector<1x128xf32>
    %617 = arith.addf %616, %615 : vector<1x128xf32>
    %618 = arith.divf %616, %617 : vector<1x128xf32>
    %619 = arith.mulf %610, %588 : vector<1x128xf32>
    %620 = arith.mulf %604, %612 : vector<1x128xf32>
    %621 = arith.addf %619, %620 : vector<1x128xf32>
    %622 = math.tanh %621 : vector<1x128xf32>
    %623 = arith.mulf %618, %622 : vector<1x128xf32>
    %c1_357 = arith.constant 1 : index
    %c0_358 = arith.constant 0 : index
    %c0_359 = arith.constant 0 : index
    %624 = vector.load %arg10[%c1_357, %c0_358, %c0_359] : memref<2x1x128xf32, #tpu.memory_space<vmem>>, vector<1x1x128xf32>
    %625 = vector.shape_cast %624 : vector<1x1x128xf32> to vector<1x128xf32>
    %626 = vector.shape_cast %623 : vector<1x128xf32> to vector<1x1x128xf32>
    tpu.vector_store %arg10[%c1_357, %c0_358, %c0_359], %626 {strides = array<i32>} : memref<2x1x128xf32, #tpu.memory_space<vmem>>, vector<1x1x128xf32>,
    %c1_360 = arith.constant 1 : index
    %c0_361 = arith.constant 0 : index
    %c0_362 = arith.constant 0 : index
    %627 = vector.load %arg11[%c1_360, %c0_361, %c0_362] : memref<2x1x128xf32, #tpu.memory_space<vmem>>, vector<1x1x128xf32>
    %628 = vector.shape_cast %627 : vector<1x1x128xf32> to vector<1x128xf32>
    %629 = vector.shape_cast %621 : vector<1x128xf32> to vector<1x1x128xf32>
    tpu.vector_store %arg11[%c1_360, %c0_361, %c0_362], %629 {strides = array<i32>} : memref<2x1x128xf32, #tpu.memory_space<vmem>>, vector<1x1x128xf32>,
    %630 = arith.index_cast %c5_i32_314 : i32 to index
    %c0_363 = arith.constant 0 : index
    %631 = vector.load %arg14[%630, %c0_363] : memref<8x128xf32, #tpu.memory_space<vmem>>, vector<1x128xf32>
    tpu.vector_store %arg14[%630, %c0_363], %623 {strides = array<i32>} : memref<8x128xf32, #tpu.memory_space<vmem>>, vector<1x128xf32>,
    %c6_i32_364 = arith.constant 6 : i32
    %c0_365 = arith.constant 0 : index
    %c0_366 = arith.constant 0 : index
    %c0_367 = arith.constant 0 : index
    %632 = vector.load %arg10[%c0_365, %c0_366, %c0_367] : memref<2x1x128xf32, #tpu.memory_space<vmem>>, vector<1x1x128xf32>
    %633 = vector.shape_cast %632 : vector<1x1x128xf32> to vector<1x128xf32>
    %c0_368 = arith.constant 0 : index
    %c0_369 = arith.constant 0 : index
    %c0_370 = arith.constant 0 : index
    %634 = vector.load %arg11[%c0_368, %c0_369, %c0_370] : memref<2x1x128xf32, #tpu.memory_space<vmem>>, vector<1x1x128xf32>
    %635 = vector.shape_cast %634 : vector<1x1x128xf32> to vector<1x128xf32>
    %636 = arith.index_cast %c6_i32_364 : i32 to index
    %c0_371 = arith.constant 0 : index
    %637 = vector.load %arg13[%636, %c0_371] : memref<8x512xf32, #tpu.memory_space<vmem>>, vector<1x512xf32>
    %638 = arith.truncf %633 : vector<1x128xf32> to vector<1x128xbf16>
    %c0_372 = arith.constant 0 : index
    %c128_373 = arith.constant 128 : index
    %c0_374 = arith.constant 0 : index
    %639 = vector.load %arg3[%c0_372, %c128_373, %c0_374] : memref<2x256x512xbf16, #tpu.memory_space<vmem>>, vector<1x128x512xbf16>
    %640 = vector.shape_cast %639 : vector<1x128x512xbf16> to vector<128x512xbf16>
    %cst_375 = arith.constant dense<0.000000e+00> : vector<1x512xf32>
    %641 = tpu.matmul %638, %640, %cst_375 {dimension_numbers = #tpu.dot_dimension_numbers<[1], [0], [0], [1], [0, 0, 1, 1], [], []>} : vector<1x128xbf16>, vector<128x512xbf16>, vector<1x512xf32> -> vector<1x512xf32>
    %642 = arith.addf %637, %641 : vector<1x512xf32>
    %643 = vector.extract_strided_slice %642 {offsets = [0, 0], sizes = [1, 128], strides = [1, 1]} : vector<1x512xf32> to vector<1x128xf32>
    %644 = arith.negf %643 : vector<1x128xf32>
    %645 = math.exp %644 : vector<1x128xf32>
    %cst_376 = arith.constant 1.000000e+00 : f32
    %646 = vector.broadcast %cst_376 : f32 to vector<1x128xf32>
    %647 = arith.addf %646, %645 : vector<1x128xf32>
    %648 = arith.divf %646, %647 : vector<1x128xf32>
    %649 = vector.extract_strided_slice %642 {offsets = [0, 128], sizes = [1, 128], strides = [1, 1]} : vector<1x512xf32> to vector<1x128xf32>
    %650 = arith.negf %649 : vector<1x128xf32>
    %651 = math.exp %650 : vector<1x128xf32>
    %cst_377 = arith.constant 1.000000e+00 : f32
    %652 = vector.broadcast %cst_377 : f32 to vector<1x128xf32>
    %653 = arith.addf %652, %651 : vector<1x128xf32>
    %654 = arith.divf %652, %653 : vector<1x128xf32>
    %655 = vector.extract_strided_slice %642 {offsets = [0, 256], sizes = [1, 128], strides = [1, 1]} : vector<1x512xf32> to vector<1x128xf32>
    %656 = math.tanh %655 : vector<1x128xf32>
    %657 = vector.extract_strided_slice %642 {offsets = [0, 384], sizes = [1, 128], strides = [1, 1]} : vector<1x512xf32> to vector<1x128xf32>
    %658 = arith.negf %657 : vector<1x128xf32>
    %659 = math.exp %658 : vector<1x128xf32>
    %cst_378 = arith.constant 1.000000e+00 : f32
    %660 = vector.broadcast %cst_378 : f32 to vector<1x128xf32>
    %661 = arith.addf %660, %659 : vector<1x128xf32>
    %662 = arith.divf %660, %661 : vector<1x128xf32>
    %663 = arith.mulf %654, %635 : vector<1x128xf32>
    %664 = arith.mulf %648, %656 : vector<1x128xf32>
    %665 = arith.addf %663, %664 : vector<1x128xf32>
    %666 = math.tanh %665 : vector<1x128xf32>
    %667 = arith.mulf %662, %666 : vector<1x128xf32>
    %c0_379 = arith.constant 0 : index
    %c0_380 = arith.constant 0 : index
    %c0_381 = arith.constant 0 : index
    %668 = vector.load %arg10[%c0_379, %c0_380, %c0_381] : memref<2x1x128xf32, #tpu.memory_space<vmem>>, vector<1x1x128xf32>
    %669 = vector.shape_cast %668 : vector<1x1x128xf32> to vector<1x128xf32>
    %670 = vector.shape_cast %667 : vector<1x128xf32> to vector<1x1x128xf32>
    tpu.vector_store %arg10[%c0_379, %c0_380, %c0_381], %670 {strides = array<i32>} : memref<2x1x128xf32, #tpu.memory_space<vmem>>, vector<1x1x128xf32>,
    %c0_382 = arith.constant 0 : index
    %c0_383 = arith.constant 0 : index
    %c0_384 = arith.constant 0 : index
    %671 = vector.load %arg11[%c0_382, %c0_383, %c0_384] : memref<2x1x128xf32, #tpu.memory_space<vmem>>, vector<1x1x128xf32>
    %672 = vector.shape_cast %671 : vector<1x1x128xf32> to vector<1x128xf32>
    %673 = vector.shape_cast %665 : vector<1x128xf32> to vector<1x1x128xf32>
    tpu.vector_store %arg11[%c0_382, %c0_383, %c0_384], %673 {strides = array<i32>} : memref<2x1x128xf32, #tpu.memory_space<vmem>>, vector<1x1x128xf32>,
    %c1_385 = arith.constant 1 : index
    %c0_386 = arith.constant 0 : index
    %c0_387 = arith.constant 0 : index
    %674 = vector.load %arg10[%c1_385, %c0_386, %c0_387] : memref<2x1x128xf32, #tpu.memory_space<vmem>>, vector<1x1x128xf32>
    %675 = vector.shape_cast %674 : vector<1x1x128xf32> to vector<1x128xf32>
    %c1_388 = arith.constant 1 : index
    %c0_389 = arith.constant 0 : index
    %c0_390 = arith.constant 0 : index
    %676 = vector.load %arg11[%c1_388, %c0_389, %c0_390] : memref<2x1x128xf32, #tpu.memory_space<vmem>>, vector<1x1x128xf32>
    %677 = vector.shape_cast %676 : vector<1x1x128xf32> to vector<1x128xf32>
    %c0_391 = arith.constant 0 : index
    %c0_392 = arith.constant 0 : index
    %678 = vector.load %arg15[%c0_391, %c0_392] : memref<1x256xf32, #tpu.memory_space<vmem>>, vector<1x128xf32>
    tpu.vector_store %arg15[%c0_391, %c0_392], %667 {strides = array<i32>} : memref<1x256xf32, #tpu.memory_space<vmem>>, vector<1x128xf32>,
    %c0_393 = arith.constant 0 : index
    %c128_394 = arith.constant 128 : index
    %679 = vector.load %arg15[%c0_393, %c128_394] : memref<1x256xf32, #tpu.memory_space<vmem>>, vector<1x128xf32>
    tpu.vector_store %arg15[%c0_393, %c128_394], %675 {strides = array<i32>} : memref<1x256xf32, #tpu.memory_space<vmem>>, vector<1x128xf32>,
    %c0_395 = arith.constant 0 : index
    %c0_396 = arith.constant 0 : index
    %680 = vector.load %arg15[%c0_395, %c0_396] : memref<1x256xf32, #tpu.memory_space<vmem>>, vector<1x256xf32>
    %681 = arith.truncf %680 : vector<1x256xf32> to vector<1x256xbf16>
    %c1_397 = arith.constant 1 : index
    %c0_398 = arith.constant 0 : index
    %c0_399 = arith.constant 0 : index
    %682 = vector.load %arg3[%c1_397, %c0_398, %c0_399] : memref<2x256x512xbf16, #tpu.memory_space<vmem>>, vector<1x256x512xbf16>
    %683 = vector.shape_cast %682 : vector<1x256x512xbf16> to vector<256x512xbf16>
    %cst_400 = arith.constant dense<0.000000e+00> : vector<1x512xf32>
    %684 = tpu.matmul %681, %683, %cst_400 {dimension_numbers = #tpu.dot_dimension_numbers<[1], [0], [0], [1], [0, 0, 1, 1], [], []>} : vector<1x256xbf16>, vector<256x512xbf16>, vector<1x512xf32> -> vector<1x512xf32>
    %c1_401 = arith.constant 1 : index
    %c0_402 = arith.constant 0 : index
    %c0_403 = arith.constant 0 : index
    %685 = vector.load %arg4[%c1_401, %c0_402, %c0_403] : memref<2x1x512xf32, #tpu.memory_space<vmem>>, vector<1x1x512xf32>
    %686 = vector.shape_cast %685 : vector<1x1x512xf32> to vector<1x512xf32>
    %687 = arith.addf %684, %686 : vector<1x512xf32>
    %688 = vector.extract_strided_slice %687 {offsets = [0, 0], sizes = [1, 128], strides = [1, 1]} : vector<1x512xf32> to vector<1x128xf32>
    %689 = arith.negf %688 : vector<1x128xf32>
    %690 = math.exp %689 : vector<1x128xf32>
    %cst_404 = arith.constant 1.000000e+00 : f32
    %691 = vector.broadcast %cst_404 : f32 to vector<1x128xf32>
    %692 = arith.addf %691, %690 : vector<1x128xf32>
    %693 = arith.divf %691, %692 : vector<1x128xf32>
    %694 = vector.extract_strided_slice %687 {offsets = [0, 128], sizes = [1, 128], strides = [1, 1]} : vector<1x512xf32> to vector<1x128xf32>
    %695 = arith.negf %694 : vector<1x128xf32>
    %696 = math.exp %695 : vector<1x128xf32>
    %cst_405 = arith.constant 1.000000e+00 : f32
    %697 = vector.broadcast %cst_405 : f32 to vector<1x128xf32>
    %698 = arith.addf %697, %696 : vector<1x128xf32>
    %699 = arith.divf %697, %698 : vector<1x128xf32>
    %700 = vector.extract_strided_slice %687 {offsets = [0, 256], sizes = [1, 128], strides = [1, 1]} : vector<1x512xf32> to vector<1x128xf32>
    %701 = math.tanh %700 : vector<1x128xf32>
    %702 = vector.extract_strided_slice %687 {offsets = [0, 384], sizes = [1, 128], strides = [1, 1]} : vector<1x512xf32> to vector<1x128xf32>
    %703 = arith.negf %702 : vector<1x128xf32>
    %704 = math.exp %703 : vector<1x128xf32>
    %cst_406 = arith.constant 1.000000e+00 : f32
    %705 = vector.broadcast %cst_406 : f32 to vector<1x128xf32>
    %706 = arith.addf %705, %704 : vector<1x128xf32>
    %707 = arith.divf %705, %706 : vector<1x128xf32>
    %708 = arith.mulf %699, %677 : vector<1x128xf32>
    %709 = arith.mulf %693, %701 : vector<1x128xf32>
    %710 = arith.addf %708, %709 : vector<1x128xf32>
    %711 = math.tanh %710 : vector<1x128xf32>
    %712 = arith.mulf %707, %711 : vector<1x128xf32>
    %c1_407 = arith.constant 1 : index
    %c0_408 = arith.constant 0 : index
    %c0_409 = arith.constant 0 : index
    %713 = vector.load %arg10[%c1_407, %c0_408, %c0_409] : memref<2x1x128xf32, #tpu.memory_space<vmem>>, vector<1x1x128xf32>
    %714 = vector.shape_cast %713 : vector<1x1x128xf32> to vector<1x128xf32>
    %715 = vector.shape_cast %712 : vector<1x128xf32> to vector<1x1x128xf32>
    tpu.vector_store %arg10[%c1_407, %c0_408, %c0_409], %715 {strides = array<i32>} : memref<2x1x128xf32, #tpu.memory_space<vmem>>, vector<1x1x128xf32>,
    %c1_410 = arith.constant 1 : index
    %c0_411 = arith.constant 0 : index
    %c0_412 = arith.constant 0 : index
    %716 = vector.load %arg11[%c1_410, %c0_411, %c0_412] : memref<2x1x128xf32, #tpu.memory_space<vmem>>, vector<1x1x128xf32>
    %717 = vector.shape_cast %716 : vector<1x1x128xf32> to vector<1x128xf32>
    %718 = vector.shape_cast %710 : vector<1x128xf32> to vector<1x1x128xf32>
    tpu.vector_store %arg11[%c1_410, %c0_411, %c0_412], %718 {strides = array<i32>} : memref<2x1x128xf32, #tpu.memory_space<vmem>>, vector<1x1x128xf32>,
    %719 = arith.index_cast %c6_i32_364 : i32 to index
    %c0_413 = arith.constant 0 : index
    %720 = vector.load %arg14[%719, %c0_413] : memref<8x128xf32, #tpu.memory_space<vmem>>, vector<1x128xf32>
    tpu.vector_store %arg14[%719, %c0_413], %712 {strides = array<i32>} : memref<8x128xf32, #tpu.memory_space<vmem>>, vector<1x128xf32>,
    %c7_i32_414 = arith.constant 7 : i32
    %c0_415 = arith.constant 0 : index
    %c0_416 = arith.constant 0 : index
    %c0_417 = arith.constant 0 : index
    %721 = vector.load %arg10[%c0_415, %c0_416, %c0_417] : memref<2x1x128xf32, #tpu.memory_space<vmem>>, vector<1x1x128xf32>
    %722 = vector.shape_cast %721 : vector<1x1x128xf32> to vector<1x128xf32>
    %c0_418 = arith.constant 0 : index
    %c0_419 = arith.constant 0 : index
    %c0_420 = arith.constant 0 : index
    %723 = vector.load %arg11[%c0_418, %c0_419, %c0_420] : memref<2x1x128xf32, #tpu.memory_space<vmem>>, vector<1x1x128xf32>
    %724 = vector.shape_cast %723 : vector<1x1x128xf32> to vector<1x128xf32>
    %725 = arith.index_cast %c7_i32_414 : i32 to index
    %c0_421 = arith.constant 0 : index
    %726 = vector.load %arg13[%725, %c0_421] : memref<8x512xf32, #tpu.memory_space<vmem>>, vector<1x512xf32>
    %727 = arith.truncf %722 : vector<1x128xf32> to vector<1x128xbf16>
    %c0_422 = arith.constant 0 : index
    %c128_423 = arith.constant 128 : index
    %c0_424 = arith.constant 0 : index
    %728 = vector.load %arg3[%c0_422, %c128_423, %c0_424] : memref<2x256x512xbf16, #tpu.memory_space<vmem>>, vector<1x128x512xbf16>
    %729 = vector.shape_cast %728 : vector<1x128x512xbf16> to vector<128x512xbf16>
    %cst_425 = arith.constant dense<0.000000e+00> : vector<1x512xf32>
    %730 = tpu.matmul %727, %729, %cst_425 {dimension_numbers = #tpu.dot_dimension_numbers<[1], [0], [0], [1], [0, 0, 1, 1], [], []>} : vector<1x128xbf16>, vector<128x512xbf16>, vector<1x512xf32> -> vector<1x512xf32>
    %731 = arith.addf %726, %730 : vector<1x512xf32>
    %732 = vector.extract_strided_slice %731 {offsets = [0, 0], sizes = [1, 128], strides = [1, 1]} : vector<1x512xf32> to vector<1x128xf32>
    %733 = arith.negf %732 : vector<1x128xf32>
    %734 = math.exp %733 : vector<1x128xf32>
    %cst_426 = arith.constant 1.000000e+00 : f32
    %735 = vector.broadcast %cst_426 : f32 to vector<1x128xf32>
    %736 = arith.addf %735, %734 : vector<1x128xf32>
    %737 = arith.divf %735, %736 : vector<1x128xf32>
    %738 = vector.extract_strided_slice %731 {offsets = [0, 128], sizes = [1, 128], strides = [1, 1]} : vector<1x512xf32> to vector<1x128xf32>
    %739 = arith.negf %738 : vector<1x128xf32>
    %740 = math.exp %739 : vector<1x128xf32>
    %cst_427 = arith.constant 1.000000e+00 : f32
    %741 = vector.broadcast %cst_427 : f32 to vector<1x128xf32>
    %742 = arith.addf %741, %740 : vector<1x128xf32>
    %743 = arith.divf %741, %742 : vector<1x128xf32>
    %744 = vector.extract_strided_slice %731 {offsets = [0, 256], sizes = [1, 128], strides = [1, 1]} : vector<1x512xf32> to vector<1x128xf32>
    %745 = math.tanh %744 : vector<1x128xf32>
    %746 = vector.extract_strided_slice %731 {offsets = [0, 384], sizes = [1, 128], strides = [1, 1]} : vector<1x512xf32> to vector<1x128xf32>
    %747 = arith.negf %746 : vector<1x128xf32>
    %748 = math.exp %747 : vector<1x128xf32>
    %cst_428 = arith.constant 1.000000e+00 : f32
    %749 = vector.broadcast %cst_428 : f32 to vector<1x128xf32>
    %750 = arith.addf %749, %748 : vector<1x128xf32>
    %751 = arith.divf %749, %750 : vector<1x128xf32>
    %752 = arith.mulf %743, %724 : vector<1x128xf32>
    %753 = arith.mulf %737, %745 : vector<1x128xf32>
    %754 = arith.addf %752, %753 : vector<1x128xf32>
    %755 = math.tanh %754 : vector<1x128xf32>
    %756 = arith.mulf %751, %755 : vector<1x128xf32>
    %c0_429 = arith.constant 0 : index
    %c0_430 = arith.constant 0 : index
    %c0_431 = arith.constant 0 : index
    %757 = vector.load %arg10[%c0_429, %c0_430, %c0_431] : memref<2x1x128xf32, #tpu.memory_space<vmem>>, vector<1x1x128xf32>
    %758 = vector.shape_cast %757 : vector<1x1x128xf32> to vector<1x128xf32>
    %759 = vector.shape_cast %756 : vector<1x128xf32> to vector<1x1x128xf32>
    tpu.vector_store %arg10[%c0_429, %c0_430, %c0_431], %759 {strides = array<i32>} : memref<2x1x128xf32, #tpu.memory_space<vmem>>, vector<1x1x128xf32>,
    %c0_432 = arith.constant 0 : index
    %c0_433 = arith.constant 0 : index
    %c0_434 = arith.constant 0 : index
    %760 = vector.load %arg11[%c0_432, %c0_433, %c0_434] : memref<2x1x128xf32, #tpu.memory_space<vmem>>, vector<1x1x128xf32>
    %761 = vector.shape_cast %760 : vector<1x1x128xf32> to vector<1x128xf32>
    %762 = vector.shape_cast %754 : vector<1x128xf32> to vector<1x1x128xf32>
    tpu.vector_store %arg11[%c0_432, %c0_433, %c0_434], %762 {strides = array<i32>} : memref<2x1x128xf32, #tpu.memory_space<vmem>>, vector<1x1x128xf32>,
    %c1_435 = arith.constant 1 : index
    %c0_436 = arith.constant 0 : index
    %c0_437 = arith.constant 0 : index
    %763 = vector.load %arg10[%c1_435, %c0_436, %c0_437] : memref<2x1x128xf32, #tpu.memory_space<vmem>>, vector<1x1x128xf32>
    %764 = vector.shape_cast %763 : vector<1x1x128xf32> to vector<1x128xf32>
    %c1_438 = arith.constant 1 : index
    %c0_439 = arith.constant 0 : index
    %c0_440 = arith.constant 0 : index
    %765 = vector.load %arg11[%c1_438, %c0_439, %c0_440] : memref<2x1x128xf32, #tpu.memory_space<vmem>>, vector<1x1x128xf32>
    %766 = vector.shape_cast %765 : vector<1x1x128xf32> to vector<1x128xf32>
    %c0_441 = arith.constant 0 : index
    %c0_442 = arith.constant 0 : index
    %767 = vector.load %arg15[%c0_441, %c0_442] : memref<1x256xf32, #tpu.memory_space<vmem>>, vector<1x128xf32>
    tpu.vector_store %arg15[%c0_441, %c0_442], %756 {strides = array<i32>} : memref<1x256xf32, #tpu.memory_space<vmem>>, vector<1x128xf32>,
    %c0_443 = arith.constant 0 : index
    %c128_444 = arith.constant 128 : index
    %768 = vector.load %arg15[%c0_443, %c128_444] : memref<1x256xf32, #tpu.memory_space<vmem>>, vector<1x128xf32>
    tpu.vector_store %arg15[%c0_443, %c128_444], %764 {strides = array<i32>} : memref<1x256xf32, #tpu.memory_space<vmem>>, vector<1x128xf32>,
    %c0_445 = arith.constant 0 : index
    %c0_446 = arith.constant 0 : index
    %769 = vector.load %arg15[%c0_445, %c0_446] : memref<1x256xf32, #tpu.memory_space<vmem>>, vector<1x256xf32>
    %770 = arith.truncf %769 : vector<1x256xf32> to vector<1x256xbf16>
    %c1_447 = arith.constant 1 : index
    %c0_448 = arith.constant 0 : index
    %c0_449 = arith.constant 0 : index
    %771 = vector.load %arg3[%c1_447, %c0_448, %c0_449] : memref<2x256x512xbf16, #tpu.memory_space<vmem>>, vector<1x256x512xbf16>
    %772 = vector.shape_cast %771 : vector<1x256x512xbf16> to vector<256x512xbf16>
    %cst_450 = arith.constant dense<0.000000e+00> : vector<1x512xf32>
    %773 = tpu.matmul %770, %772, %cst_450 {dimension_numbers = #tpu.dot_dimension_numbers<[1], [0], [0], [1], [0, 0, 1, 1], [], []>} : vector<1x256xbf16>, vector<256x512xbf16>, vector<1x512xf32> -> vector<1x512xf32>
    %c1_451 = arith.constant 1 : index
    %c0_452 = arith.constant 0 : index
    %c0_453 = arith.constant 0 : index
    %774 = vector.load %arg4[%c1_451, %c0_452, %c0_453] : memref<2x1x512xf32, #tpu.memory_space<vmem>>, vector<1x1x512xf32>
    %775 = vector.shape_cast %774 : vector<1x1x512xf32> to vector<1x512xf32>
    %776 = arith.addf %773, %775 : vector<1x512xf32>
    %777 = vector.extract_strided_slice %776 {offsets = [0, 0], sizes = [1, 128], strides = [1, 1]} : vector<1x512xf32> to vector<1x128xf32>
    %778 = arith.negf %777 : vector<1x128xf32>
    %779 = math.exp %778 : vector<1x128xf32>
    %cst_454 = arith.constant 1.000000e+00 : f32
    %780 = vector.broadcast %cst_454 : f32 to vector<1x128xf32>
    %781 = arith.addf %780, %779 : vector<1x128xf32>
    %782 = arith.divf %780, %781 : vector<1x128xf32>
    %783 = vector.extract_strided_slice %776 {offsets = [0, 128], sizes = [1, 128], strides = [1, 1]} : vector<1x512xf32> to vector<1x128xf32>
    %784 = arith.negf %783 : vector<1x128xf32>
    %785 = math.exp %784 : vector<1x128xf32>
    %cst_455 = arith.constant 1.000000e+00 : f32
    %786 = vector.broadcast %cst_455 : f32 to vector<1x128xf32>
    %787 = arith.addf %786, %785 : vector<1x128xf32>
    %788 = arith.divf %786, %787 : vector<1x128xf32>
    %789 = vector.extract_strided_slice %776 {offsets = [0, 256], sizes = [1, 128], strides = [1, 1]} : vector<1x512xf32> to vector<1x128xf32>
    %790 = math.tanh %789 : vector<1x128xf32>
    %791 = vector.extract_strided_slice %776 {offsets = [0, 384], sizes = [1, 128], strides = [1, 1]} : vector<1x512xf32> to vector<1x128xf32>
    %792 = arith.negf %791 : vector<1x128xf32>
    %793 = math.exp %792 : vector<1x128xf32>
    %cst_456 = arith.constant 1.000000e+00 : f32
    %794 = vector.broadcast %cst_456 : f32 to vector<1x128xf32>
    %795 = arith.addf %794, %793 : vector<1x128xf32>
    %796 = arith.divf %794, %795 : vector<1x128xf32>
    %797 = arith.mulf %788, %766 : vector<1x128xf32>
    %798 = arith.mulf %782, %790 : vector<1x128xf32>
    %799 = arith.addf %797, %798 : vector<1x128xf32>
    %800 = math.tanh %799 : vector<1x128xf32>
    %801 = arith.mulf %796, %800 : vector<1x128xf32>
    %c1_457 = arith.constant 1 : index
    %c0_458 = arith.constant 0 : index
    %c0_459 = arith.constant 0 : index
    %802 = vector.load %arg10[%c1_457, %c0_458, %c0_459] : memref<2x1x128xf32, #tpu.memory_space<vmem>>, vector<1x1x128xf32>
    %803 = vector.shape_cast %802 : vector<1x1x128xf32> to vector<1x128xf32>
    %804 = vector.shape_cast %801 : vector<1x128xf32> to vector<1x1x128xf32>
    tpu.vector_store %arg10[%c1_457, %c0_458, %c0_459], %804 {strides = array<i32>} : memref<2x1x128xf32, #tpu.memory_space<vmem>>, vector<1x1x128xf32>,
    %c1_460 = arith.constant 1 : index
    %c0_461 = arith.constant 0 : index
    %c0_462 = arith.constant 0 : index
    %805 = vector.load %arg11[%c1_460, %c0_461, %c0_462] : memref<2x1x128xf32, #tpu.memory_space<vmem>>, vector<1x1x128xf32>
    %806 = vector.shape_cast %805 : vector<1x1x128xf32> to vector<1x128xf32>
    %807 = vector.shape_cast %799 : vector<1x128xf32> to vector<1x1x128xf32>
    tpu.vector_store %arg11[%c1_460, %c0_461, %c0_462], %807 {strides = array<i32>} : memref<2x1x128xf32, #tpu.memory_space<vmem>>, vector<1x1x128xf32>,
    %808 = arith.index_cast %c7_i32_414 : i32 to index
    %c0_463 = arith.constant 0 : index
    %809 = vector.load %arg14[%808, %c0_463] : memref<8x128xf32, #tpu.memory_space<vmem>>, vector<1x128xf32>
    tpu.vector_store %arg14[%808, %c0_463], %801 {strides = array<i32>} : memref<8x128xf32, #tpu.memory_space<vmem>>, vector<1x128xf32>,
    %c8_i32_464 = arith.constant 8 : i32
    %c0_465 = arith.constant 0 : index
    %c0_466 = arith.constant 0 : index
    %810 = vector.load %arg14[%c0_465, %c0_466] : memref<8x128xf32, #tpu.memory_space<vmem>>, vector<8x128xf32>
    %811 = arith.truncf %810 : vector<8x128xf32> to vector<8x128xbf16>
    %c0_467 = arith.constant 0 : index
    %c0_468 = arith.constant 0 : index
    %812 = vector.load %arg7[%c0_467, %c0_468] : memref<128x256xbf16, #tpu.memory_space<vmem>>, vector<128x256xbf16>
    %cst_469 = arith.constant dense<0.000000e+00> : vector<8x256xf32>
    %813 = tpu.matmul %811, %812, %cst_469 {dimension_numbers = #tpu.dot_dimension_numbers<[1], [0], [0], [1], [0, 0, 1, 1], [], []>} : vector<8x128xbf16>, vector<128x256xbf16>, vector<8x256xf32> -> vector<8x256xf32>
    %c0_470 = arith.constant 0 : index
    %c0_471 = arith.constant 0 : index
    %814 = vector.load %arg8[%c0_470, %c0_471] : memref<1x256xf32, #tpu.memory_space<vmem>>, vector<1x256xf32>
    %815 = vector.broadcast %814 : vector<1x256xf32> to vector<8x256xf32>
    %816 = arith.addf %813, %815 : vector<8x256xf32>
    %c0_472 = arith.constant 0 : index
    %c0_473 = arith.constant 0 : index
    %817 = vector.load %arg9[%c0_472, %c0_473] : memref<8x256xf32, #tpu.memory_space<vmem>>, vector<8x256xf32>
    tpu.vector_store %arg9[%c0_472, %c0_473], %816 {strides = array<i32>} : memref<8x256xf32, #tpu.memory_space<vmem>>, vector<8x256xf32>,
    return
  }
  func.func @transform_0(%arg0: i32, %arg1: memref<8xi32, #tpu.memory_space<smem>>) -> (i32, i32) {
    %c0_i32 = arith.constant 0 : i32
    %c0_i32_0 = arith.constant 0 : i32
    %c0_i32_1 = arith.constant 0 : i32
    return %c0_i32, %c0_i32_0 : i32, i32
  }
  func.func @transform_1(%arg0: i32, %arg1: memref<8xi32, #tpu.memory_space<smem>>) -> (i32, i32, i32) {
    %c0_i32 = arith.constant 0 : i32
    %c0_i32_0 = arith.constant 0 : i32
    %c0_i32_1 = arith.constant 0 : i32
    %c0_i32_2 = arith.constant 0 : i32
    return %c0_i32, %c0_i32_0, %c0_i32_1 : i32, i32, i32
  }
  func.func @transform_2(%arg0: i32, %arg1: memref<8xi32, #tpu.memory_space<smem>>) -> (i32, i32, i32) {
    %c0_i32 = arith.constant 0 : i32
    %c0_i32_0 = arith.constant 0 : i32
    %c0_i32_1 = arith.constant 0 : i32
    %c0_i32_2 = arith.constant 0 : i32
    return %c0_i32, %c0_i32_0, %c0_i32_1 : i32, i32, i32
  }
  func.func @transform_3(%arg0: i32, %arg1: memref<8xi32, #tpu.memory_space<smem>>) -> (i32, i32, i32) {
    %c0_i32 = arith.constant 0 : i32
    %c0_i32_0 = arith.constant 0 : i32
    %c0_i32_1 = arith.constant 0 : i32
    %c0_i32_2 = arith.constant 0 : i32
    return %c0_i32, %c0_i32_0, %c0_i32_1 : i32, i32, i32
  }
  func.func @transform_4(%arg0: i32, %arg1: memref<8xi32, #tpu.memory_space<smem>>) -> (i32, i32, i32) {
    %c0_i32 = arith.constant 0 : i32
    %c0_i32_0 = arith.constant 0 : i32
    %c0_i32_1 = arith.constant 0 : i32
    %c0_i32_2 = arith.constant 0 : i32
    return %c0_i32, %c0_i32_0, %c0_i32_1 : i32, i32, i32
  }
  func.func @transform_5(%arg0: i32, %arg1: memref<8xi32, #tpu.memory_space<smem>>) -> (i32, i32) {
    %c0_i32 = arith.constant 0 : i32
    %c0_i32_0 = arith.constant 0 : i32
    %c0_i32_1 = arith.constant 0 : i32
    return %c0_i32, %c0_i32_0 : i32, i32
  }
  func.func @transform_6(%arg0: i32, %arg1: memref<8xi32, #tpu.memory_space<smem>>) -> (i32, i32) {
    %c0_i32 = arith.constant 0 : i32
    %c0_i32_0 = arith.constant 0 : i32
    %c0_i32_1 = arith.constant 0 : i32
    return %c0_i32, %c0_i32_0 : i32, i32
  }
  func.func @transform_7(%arg0: i32, %arg1: memref<8xi32, #tpu.memory_space<smem>>) -> (i32, i32) {
    %c0_i32 = arith.constant 0 : i32
    %c0_i32_0 = arith.constant 0 : i32
    %c0_i32_1 = arith.constant 0 : i32
    return %c0_i32, %c0_i32_0 : i32, i32
  }
  func.func @transform_8(%arg0: i32, %arg1: memref<8xi32, #tpu.memory_space<smem>>) -> (i32, i32, i32) {
    %c0_i32 = arith.constant 0 : i32
    %c0_i32_0 = arith.constant 0 : i32
    %c0_i32_1 = arith.constant 0 : i32
    %c0_i32_2 = arith.constant 0 : i32
    return %c0_i32, %c0_i32_0, %c0_i32_1 : i32, i32, i32
  }
  func.func @transform_9(%arg0: i32, %arg1: memref<8xi32, #tpu.memory_space<smem>>) -> (i32, i32, i32) {
    %c0_i32 = arith.constant 0 : i32
    %c0_i32_0 = arith.constant 0 : i32
    %c0_i32_1 = arith.constant 0 : i32
    %c0_i32_2 = arith.constant 0 : i32
    return %c0_i32, %c0_i32_0, %c0_i32_1 : i32, i32, i32
  }
}

</mosaic_0001>

<bundles_post_ra>
// kernel: tpu_custom_call.1
= control target key start
LH: loop header
LB: loop body
LE: loop exit
PB: predicated region body
PF: predicated region fallthrough
CT: control target
= control target key end

     0   :  { %s11514_s0 = inlined_call_operand.hbm [shape: s32[8], index: 0, kind: input, shape index: {}]   ;;  %s11515_s1 = inlined_call_operand.hbm [shape: f32[129,128], index: 1, kind: input, shape index: {}]   ;;  %s11516_s2 = inlined_call_operand.hbm [shape: bf16[2,256,512], index: 2, kind: input, shape index: {}]   ;;  %s11517_s3 = inlined_call_operand.vmem [shape: f32[2,1,512], index: 3, kind: input, shape index: {}]   ;;  %s11518_s4 = inlined_call_operand.vmem [shape: f32[2,1,128], index: 4, kind: input, shape index: {}]   ;;  %s11519_s5 = inlined_call_operand.vmem [shape: f32[2,1,128], index: 5, kind: input, shape index: {}]   ;;  %s11520_s6 = inlined_call_operand.hbm [shape: bf16[128,256], index: 6, kind: input, shape index: {}]   ;;  %s11521_s7 = inlined_call_operand.vmem [shape: f32[1,256], index: 7, kind: input, shape index: {}]   ;;  %s11522_s8 = inlined_call_operand.hbm [shape: f32[8,256], index: 8, kind: output, shape index: {0}]   ;;  %s11523_s9 = inlined_call_operand.hbm [shape: f32[2,1,128], index: 9, kind: output, shape index: {1}]   ;;  %s11524_s10 = inlined_call_operand.hbm [shape: f32[2,1,128], index: 10, kind: output, shape index: {2}]  }
   0x1   :  { %s9563_s15 = scalar_lea.hbm %s11514_s0, 16 }
   0x2   :  { %p9564_p0 = scmp.ne.s32.totalorder %s11514_s0, %s9563_s15  ;;  %p9567_p1 = scmp.lt.u32.totalorder %s9563_s15, %s11514_s0 }
   0x4   :  { %p9569_p2 = pnand %p9567_p1, %p9564_p0 }
   0x6   :  { %9572 = shalt.err (!%p9569_p2)  }
   0x7   :  { %s9715_s20 = smov [#allocation7]  }
   0x8   :  { %17 = dma.hbm_to_smem %s11514_s0, 16, %s9715_s20, [#allocation6] }
   0x9   :  { %9705 = dma.done.wait [#allocation6], 16 }
   0xa   :  { %9706 = vsyncadd [#allocation6], 4294967280 }
   0xb   :  { %19 = sfence }
   0xc   :  { %20 = vsyncpa [#allocation9], 0 }
   0xd   :  { %21 = vsyncpa [#allocation12], 0 }
   0xe   :  { %22 = vsyncpa [#allocation10], 0 }
   0xf   :  { %23 = vsyncpa [#allocation16], 0  ;;  %s9716_s23 = smov [#allocation11]   ;;  %s9573_s27 = scalar_lea.hbm %s11516_s2, 16384 }
  0x10   :  { %s41_s24 = sshll.u32 %s9716_s23, 4  ;;  %p9574_p3 = scmp.ne.s32.totalorder %s11516_s2, %s9573_s27  ;;  %s42_s24 = int_to_ptr.vmem [resolvable:$true] %s41_s24 }
  0x11   :  { %p9577_p4 = scmp.lt.u32.totalorder %s9573_s27, %s11516_s2 }
  0x13   :  { %p9579_p5 = pnand %p9577_p4, %p9574_p3 }
  0x15   :  { %9582 = shalt.err (!%p9579_p5)
}
  0x16   :  { %s9583_s11 = scalar_lea.vmem %s42_s24, 16384  ;;  %p9588_p7 = scmp.lt.s32.totalorder %s42_s24, %s42_s24 }
  0x17   :  { %p9584_p6 = scmp.ne.s32.totalorder %s42_s24, %s9583_s11  ;;  %p9589_p8 = scmp.lt.s32.totalorder %s9583_s11, %s9583_s11 }
  0x19   :  { %p9590_p9 = por %p9589_p8, %p9588_p7 }
  0x1b   :  { %p9591_p10 = pnand %p9590_p9, %p9584_p6 }
  0x1d   :  { %9594 = shalt.err (!%p9591_p10)
}
  0x1e   :  { %s9717_s12 = smov 256   ;;  %s9718_s13 = smov 16  }
  0x1f   :  { %47 = dma.hbm_to_vmem [thread:$0]  %s11516_s2, 16384, %s42_s24, [#allocation12], %s9717_s12, %s9717_s12, %s9718_s13  }
  0x20   :  { %s9719_s16 = smov [#allocation8]   ;;  %s9595_s20 = scalar_lea.hbm %s11515_s1, 2176 }
  0x21   :  { %s29_s17 = sshll.u32 %s9719_s16, 4  ;;  %p9596_p11 = scmp.ne.s32.totalorder %s11515_s1, %s9595_s20  ;;  %s30_s17 = int_to_ptr.vmem [resolvable:$true] %s29_s17 }
  0x22   :  { %p9599_p12 = scmp.lt.u32.totalorder %s9595_s20, %s11515_s1 }
  0x24   :  { %p9601_p13 = pnand %p9599_p12, %p9596_p11 }
  0x26   :  { %9604 = shalt.err (!%p9601_p13)
}
  0x27   :  { %s9605_s26 = scalar_lea.vmem %s30_s17, 2176  ;;  %p9610_p1 = scmp.lt.s32.totalorder %s30_s17, %s30_s17 }
  0x28   :  { %p9606_p0 = scmp.ne.s32.totalorder %s30_s17, %s9605_s26  ;;  %p9611_p2 = scmp.lt.s32.totalorder %s9605_s26, %s9605_s26 }
  0x2a   :  { %p9612_p3 = por %p9611_p2, %p9610_p1 }
  0x2c   :  { %p9613_p4 = pnand %p9612_p3, %p9606_p0 }
  0x2e   :  { %9616 = shalt.err (!%p9613_p4)
}
  0x2f   :  { %s9720_s2 = smov 128   ;;  %s9721_s24 = smov 8  }
  0x30   :  { %35 = dma.hbm_to_vmem [thread:$0]  %s11515_s1, 2176, %s30_s17, [#allocation9], %s9720_s2, %s9720_s2, %s9721_s24  }
  0x31   :  { %s9722_s29 = smov [#allocation13]   ;;  %s9617_s12 = scalar_lea.hbm %s11520_s6, 2048 }
  0x32   :  { %s59_s30 = sshll.u32 %s9722_s29, 4  ;;  %p9618_p5 = scmp.ne.s32.totalorder %s11520_s6, %s9617_s12  ;;  %s60_s30 = int_to_ptr.vmem [resolvable:$true] %s59_s30 }
  0x33   :  { %p9621_p6 = scmp.lt.u32.totalorder %s9617_s12, %s11520_s6 }
  0x35   :  { %p9623_p7 = pnand %p9621_p6, %p9618_p5 }
  0x37   :  { %9626 = shalt.err (!%p9623_p7)
}
  0x38   :  { %s9627_s19 = scalar_lea.vmem %s60_s30, 2048  ;;  %p9632_p9 = scmp.lt.s32.totalorder %s60_s30, %s60_s30 }
  0x39   :  { %p9628_p8 = scmp.ne.s32.totalorder %s60_s30, %s9627_s19  ;;  %p9633_p10 = scmp.lt.s32.totalorder %s9627_s19, %s9627_s19 }
  0x3b   :  { %p9634_p11 = por %p9633_p10, %p9632_p9 }
  0x3d   :  { %p9635_p12 = pnand %p9634_p11, %p9628_p8 }
  0x3f   :  { %9638 = shalt.err (!%p9635_p12)
}
  0x40   :  { %65 = dma.hbm_to_vmem [thread:$0]  %s11520_s6, 2048, %s60_s30, [#allocation12], %s9720_s2, %s9720_s2, %s9721_s24  }
  0x41   :  { %9707 = dma.done.wait [#allocation9], 2176  }
  0x42   :  { %9708 = vsyncadd [#allocation9], 4294965120 }
  0x43   :  { %9709 = dma.done.wait [#allocation12], 18432  }
  0x44   :  { %9710 = vsyncadd [#allocation12], 4294948864  ;;  %v11525_v0 = vmov 0   ;;  %v9724_v1 = vmov 0.0   ;;  %s88_s20 = sld [smem:[#allocation7]]  ;;  %s7682_s21 = sld [smem:[#allocation7 + $0x1]] }
  0x45   :  { %408 = vmatprep.mubr.bf16.mxu0 %v11525_v0  ;;  %449 = vmatprep.mubr.bf16.mxu1 %v11525_v0  ;;  %86 = vst [vmem:[#allocation2] sm:$0xff] %v9724_v1  ;;  %87 = vst [vmem:[#allocation4] sm:$0xff] %v9724_v1  ;;  %s9836_s22 = sld [smem:[#allocation7 + $0x2]]  ;;  %s9838_s23 = sld [smem:[#allocation7 + $0x3]]  ;;  %v8627_v2 = vld [vmem:[#allocation11 + $0x4] ss:$16 sps:$4 sm:$0xff]  }
  0x46   :  { %s9840_s25 = sld [smem:[#allocation7 + $0x4]]  ;;  %s9842_s6 = sld [smem:[#allocation7 + $0x5]]  ;;  %v8629_v3 = vld [vmem:[#allocation11 + $0xc] ss:$16 sps:$4 sm:$0xff]   ;;  %376 = vmatprep.subr.bf16.mxu0 %v8627_v2  ;;  %v8631_v4 = vld [vmem:[#allocation11] ss:$16 sps:$4 sm:$0xff]  }
  0x47   :  { %s9844_s26 = sld [smem:[#allocation7 + $0x6]]  ;;  %v8632_v5 = vld [vmem:[#allocation11 + $0x8] ss:$16 sps:$4 sm:$0xff]   ;;  %417 = vmatprep.subr.bf16.mxu1 %v8629_v3  ;;  %v8633_v6 = vld [vmem:[#allocation11 + $0x24] ss:$16 sps:$4 sm:$0xff]   ;;  %377 = vmatpush1.bf16.msra.mxu0 %v8631_v4  ;;  %s9856_s27 = sld [smem:[#allocation7 + $0x7]] }
  0x48   :  { %418 = vmatpush1.bf16.msra.mxu1 %v8632_v5  ;;  %v8635_v7 = vld [vmem:[#allocation11 + $0x2c] ss:$16 sps:$4 sm:$0xff]   ;;  %v8637_v8 = vld [vmem:[#allocation11 + $0x20] ss:$16 sps:$4 sm:$0xff]   ;;  %378 = vmatprep.subr.bf16.mxu0 %v8633_v6  ;;  %v8638_v9 = vld [vmem:[#allocation11 + $0x28] ss:$16 sps:$4 sm:$0xff]  }
  0x49   :  { %419 = vmatprep.subr.bf16.mxu1 %v8635_v7  ;;  %v8639_v10 = vld [vmem:[#allocation11 + $0x44] ss:$16 sps:$4 sm:$0xff]   ;;  %v8641_v11 = vld [vmem:[#allocation11 + $0x4c] ss:$16 sps:$4 sm:$0xff]   ;;  %v8643_v12 = vld [vmem:[#allocation11 + $0x40] ss:$16 sps:$4 sm:$0xff]  }
  0x4a   :  { %p89_p13 = scmp.gt.s32.totalorder %s88_s20, 0  ;;  %p7677_p0 = scmp.lt.s32.totalorder %s88_s20, 128  ;;  %v8644_v13 = vld [vmem:[#allocation11 + $0x48] ss:$16 sps:$4 sm:$0xff]   ;;  %v8645_v14 = vld [vmem:[#allocation11 + $0x64] ss:$16 sps:$4 sm:$0xff]  }
  0x4b   :  { %p98_p1 = scmp.gt.s32.totalorder %s7682_s21, 0  ;;  %p7683_p2 = scmp.lt.s32.totalorder %s7682_s21, 128  ;;  %379 = vmatpush1.bf16.msra.mxu0 %v8637_v8  ;;  %v8647_v15 = vld [vmem:[#allocation11 + $0x6c] ss:$16 sps:$4 sm:$0xff]   ;;  %v8649_v16 = vld [vmem:[#allocation11 + $0x60] ss:$16 sps:$4 sm:$0xff]  }
  0x4c   :  { %s90_s2 = scalar_select %p89_p13, %s88_s20, 0  ;;  %420 = vmatpush1.bf16.msra.mxu1 %v8638_v9  ;;  %380 = vmatprep.subr.bf16.mxu0 %v8639_v10  ;;  %v8650_v17 = vld [vmem:[#allocation11 + $0x68] ss:$16 sps:$4 sm:$0xff]   ;;  %v8651_v18 = vld [vmem:[#allocation11 + $0x84] ss:$16 sps:$4 sm:$0xff]  }
  0x4d   :  { %s99_s24 = scalar_select %p98_p1, %s7682_s21, 0  ;;  %421 = vmatprep.subr.bf16.mxu1 %v8641_v11  ;;  %v8653_v19 = vld [vmem:[#allocation11 + $0x8c] ss:$16 sps:$4 sm:$0xff]   ;;  %v8655_v20 = vld [vmem:[#allocation11 + $0x80] ss:$16 sps:$4 sm:$0xff]  }
  0x4e   :  { %s12136_s2 = smov (!%p7677_p0, %s90_s2), 128  ;;  %p107_p3 = scmp.gt.s32.totalorder %s9836_s22, 0  ;;  %v8656_v21 = vld [vmem:[#allocation11 + $0x88] ss:$16 sps:$4 sm:$0xff]   ;;  %v8657_v22 = vld [vmem:[#allocation11 + $0xa4] ss:$16 sps:$4 sm:$0xff]  }
  0x4f   :  { %s12138_s24 = smov (!%p7683_p2, %s99_s24), 128  ;;  %p7689_p4 = scmp.lt.s32.totalorder %s9836_s22, 128  ;;  %381 = vmatpush1.bf16.msra.mxu0 %v8643_v12  ;;  %v8659_v23 = vld [vmem:[#allocation11 + $0xac] ss:$16 sps:$4 sm:$0xff]   ;;  %v8661_v24 = vld [vmem:[#allocation11 + $0xa0] ss:$16 sps:$4 sm:$0xff]  }
  0x50   :  { %s12140_s22 = smov (!%p107_p3, %s9836_s22), 0  ;;  %p116_p5 = scmp.gt.s32.totalorder %s9838_s23, 0  ;;  %422 = vmatpush1.bf16.msra.mxu1 %v8644_v13  ;;  %382 = vmatprep.subr.bf16.mxu0 %v8645_v14  ;;  %v8662_v25 = vld [vmem:[#allocation11 + $0xa8] ss:$16 sps:$4 sm:$0xff]   ;;  %v8663_v26 = vld [vmem:[#allocation11 + $0xc4] ss:$16 sps:$4 sm:$0xff]  }
  0x51   :  { %s12142_s22 = smov (!%p7689_p4, %s12140_s22), 128  ;;  %423 = vmatprep.subr.bf16.mxu1 %v8647_v15  ;;  %p7695_p6 = scmp.lt.s32.totalorder %s9838_s23, 128  ;;  %v8665_v27 = vld [vmem:[#allocation11 + $0xcc] ss:$16 sps:$4 sm:$0xff]   ;;  %v8667_v30 = vld [vmem:[#allocation11 + $0xc0] ss:$16 sps:$4 sm:$0xff]  }
  0x52   :  { %s117_s28 = scalar_select %p116_p5, %s9838_s23, 0  ;;  %v8668_v31 = vld [vmem:[#allocation11 + $0xc8] ss:$16 sps:$4 sm:$0xff]   ;;  %v8669_v38 = vld [vmem:[#allocation11 + $0xe4] ss:$16 sps:$4 sm:$0xff]  }
  0x53   :  { %p125_p7 = scmp.gt.s32.totalorder %s9840_s25, 0  ;;  %p7701_p8 = scmp.lt.s32.totalorder %s9840_s25, 128  ;;  %383 = vmatpush1.bf16.msra.mxu0 %v8649_v16  ;;  %v8671_v40 = vld [vmem:[#allocation11 + $0xec] ss:$16 sps:$4 sm:$0xff]   ;;  %v8673_v42 = vld [vmem:[#allocation11 + $0xe0] ss:$16 sps:$4 sm:$0xff]  }
  0x54   :  { %424 = vmatpush1.bf16.msra.mxu1 %v8650_v17  ;;  %s12144_s28 = smov (!%p7695_p6, %s117_s28), 128  ;;  %384 = vmatprep.subr.bf16.mxu0 %v8651_v18  ;;  %p134_p9 = scmp.gt.s32.totalorder %s9842_s6, 0  ;;  %v8674_v43 = vld [vmem:[#allocation11 + $0xe8] ss:$16 sps:$4 sm:$0xff]   ;;  %v8677_v44 = vld [vmem:[#allocation11 + $0x104] ss:$16 sps:$4 sm:$0xff]  }
  0x55   :  { %425 = vmatprep.subr.bf16.mxu1 %v8653_v19  ;;  %s12146_s25 = smov (!%p125_p7, %s9840_s25), 0  ;;  %s93_s29 = scalar_lea.vmem [#allocation8], %s12136_s2  ;;  %v8680_v46 = vld [vmem:[#allocation11 + $0x10c] ss:$16 sps:$4 sm:$0xff]   ;;  %v8675_v52 = vld [vmem:[#allocation11 + $0x100] ss:$16 sps:$4 sm:$0xff]  }
  0x56   :  { %s12148_s25 = smov (!%p7701_p8, %s12146_s25), 128  ;;  %v94_v28 = vld [vmem:[%s93_s29] sm:$0x1]  ;;  %s102_s30 = scalar_lea.vmem [#allocation8], %s12138_s24  ;;  %v8678_v53 = vld [vmem:[#allocation11 + $0x108] ss:$16 sps:$4 sm:$0xff]  }
  0x57   :  { %385 = vmatpush1.bf16.msra.mxu0 %v8655_v20  ;;  %v103_v29 = vld [vmem:[%s102_s30] sm:$0x1]  ;;  %v95_v32 = vmax.f32 %v94_v28, 0.0  ;;  %s111_s0 = scalar_lea.vmem [#allocation8], %s12142_s22  ;;  %s120_s11 = scalar_lea.vmem [#allocation8], %s12144_s28 }
  0x58   :  { %426 = vmatpush1.bf16.msra.mxu1 %v8656_v21  ;;  %386 = vmatprep.subr.bf16.mxu0 %v8657_v22  ;;  %v104_v33 = vmax.f32 %v103_v29, 0.0  ;;  %v112_v34 = vld [vmem:[%s111_s0] sm:$0x1]  ;;  %p7707_p10 = scmp.lt.s32.totalorder %s9842_s6, 128  ;;  %s129_s12 = scalar_lea.vmem [#allocation8], %s12148_s25 }
  0x59   :  { %427 = vmatprep.subr.bf16.mxu1 %v8659_v23  ;;  %v121_v35 = vld [vmem:[%s120_s11] sm:$0x1]  ;;  %v113_v36 = vmax.f32 %v112_v34, 0.0  ;;  %96 = vst [vmem:[#allocation2] sm:$0x1] %v95_v32  ;;  %s135_s14 = scalar_select %p134_p9, %s9842_s6, 0 }
  0x5a   :  { %v122_v37 = vmax.f32 %v121_v35, 0.0  ;;  %105 = vst [vmem:[#allocation2 + $0x1] sm:$0x1] %v104_v33  ;;  %v130_v39 = vld [vmem:[%s129_s12] sm:$0x1]  ;;  %p143_p11 = scmp.gt.s32.totalorder %s9844_s26, 0 }
  0x5b   :  { %387 = vmatpush1.bf16.msra.mxu0 %v8661_v24  ;;  %114 = vst [vmem:[#allocation2 + $0x2] sm:$0x1] %v113_v36  ;;  %v131_v41 = vmax.f32 %v130_v39, 0.0  ;;  %p7713_p12 = scmp.lt.s32.totalorder %s9844_s26, 128  ;;  %s12150_s14 = smov (!%p7707_p10, %s135_s14), 128 }
  0x5c   :  { %428 = vmatpush1.bf16.msra.mxu1 %v8662_v25  ;;  %388 = vmatprep.subr.bf16.mxu0 %v8663_v26  ;;  %123 = vst [vmem:[#allocation2 + $0x3] sm:$0x1] %v122_v37  ;;  %s144_s15 = scalar_select %p143_p11, %s9844_s26, 0  ;;  %v8683_v55 = vld [vmem:[#allocation11 + $0x124] ss:$16 sps:$4 sm:$0xff]  }
  0x5d   :  { %429 = vmatprep.subr.bf16.mxu1 %v8665_v27  ;;  %132 = vst [vmem:[#allocation2 + $0x4] sm:$0x1] %v131_v41  ;;  %p152_p13 = scmp.gt.s32.totalorder %s9856_s27, 0  ;;  %s138_s16 = scalar_lea.vmem [#allocation8], %s12150_s14  ;;  %v78_v56 = vld [vmem:[%s11518_s4] sm:$0x3]  }
  0x5e   :  { %v139_v45 = vld [vmem:[%s138_s16] sm:$0x1]  ;;  %s12152_s15 = smov (!%p7713_p12, %s144_s15), 128  ;;  %p7719_p0 = scmp.lt.s32.totalorder %s9856_s27, 128  ;;  %v8686_v58 = vld [vmem:[#allocation11 + $0x12c] ss:$16 sps:$4 sm:$0xff]  }
  0x5f   :  { %389 = vmatpush1.bf16.msra.mxu0 %v8667_v30  ;;  %v140_v47 = vmax.f32 %v139_v45, 0.0  ;;  %s153_s18 = scalar_select %p152_p13, %s9856_s27, 0  ;;  %80 = vst [vmem:[#allocation15] sm:$0x3] %v78_v56   ;;  %v8681_v59 = vld [vmem:[#allocation11 + $0x120] ss:$16 sps:$4 sm:$0xff]  }
  0x60   :  { %430 = vmatpush1.bf16.msra.mxu1 %v8668_v31  ;;  %390 = vmatprep.subr.bf16.mxu0 %v8669_v38  ;;  %s147_s19 = scalar_lea.vmem [#allocation8], %s12152_s15  ;;  %v8684_v60 = vld [vmem:[#allocation11 + $0x128] ss:$16 sps:$4 sm:$0xff]   ;;  %v8689_v61 = vld [vmem:[#allocation11 + $0x144] ss:$16 sps:$4 sm:$0xff]  }
  0x61   :  { %431 = vmatprep.subr.bf16.mxu1 %v8671_v40  ;;  %141 = vst [vmem:[#allocation2 + $0x5] sm:$0x1] %v140_v47  ;;  %v148_v48 = vld [vmem:[%s147_s19] sm:$0x1]  ;;  %s12154_s18 = smov (!%p7719_p0, %s153_s18), 128 }
  0x62   :  { %v149_v49 = vmax.f32 %v148_v48, 0.0  ;;  %s156_s1 = scalar_lea.vmem [#allocation8], %s12154_s18  ;;  %v8692_v62 = vld [vmem:[#allocation11 + $0x14c] ss:$16 sps:$4 sm:$0xff]   ;;  %v8687_v63 = vld [vmem:[#allocation11 + $0x140] ss:$16 sps:$4 sm:$0xff]  }
  0x63   :  { %391 = vmatpush1.bf16.msra.mxu0 %v8673_v42  ;;  %v157_v50 = vld [vmem:[%s156_s1] sm:$0x1]  ;;  %v8690_v1 = vld [vmem:[#allocation11 + $0x148] ss:$16 sps:$4 sm:$0xff]   ;;  %v8698_v3 = vld [vmem:[#allocation11 + $0x16c] ss:$16 sps:$4 sm:$0xff]  }
  0x64   :  { %432 = vmatpush1.bf16.msra.mxu1 %v8674_v43  ;;  %658 = vmatprep.subr.bf16.mxu0 %v8677_v44  ;;  %150 = vst [vmem:[#allocation2 + $0x6] sm:$0x1] %v149_v49  ;;  %v158_v51 = vmax.f32 %v157_v50, 0.0  ;;  %v8695_v2 = vld [vmem:[#allocation11 + $0x164] ss:$16 sps:$4 sm:$0xff]  }
  0x65   :  { %699 = vmatprep.subr.bf16.mxu1 %v8680_v46  ;;  %v8693_v4 = vld [vmem:[#allocation11 + $0x160] ss:$16 sps:$4 sm:$0xff]   ;;  %v8696_v5 = vld [vmem:[#allocation11 + $0x168] ss:$16 sps:$4 sm:$0xff]   ;;  %v8701_v6 = vld [vmem:[#allocation11 + $0x184] ss:$16 sps:$4 sm:$0xff]  }
  0x66   :  { %159 = vst [vmem:[#allocation2 + $0x7] sm:$0x1] %v158_v51  ;;  %v8704_v7 = vld [vmem:[#allocation11 + $0x18c] ss:$16 sps:$4 sm:$0xff]   ;;  %v8699_v8 = vld [vmem:[#allocation11 + $0x180] ss:$16 sps:$4 sm:$0xff]  }
  0x67   :  { %v8702_v9 = vld [vmem:[#allocation11 + $0x188] ss:$16 sps:$4 sm:$0xff]   ;;  %v8707_v10 = vld [vmem:[#allocation11 + $0x1a4] ss:$16 sps:$4 sm:$0xff]   ;;  %v8710_v11 = vld [vmem:[#allocation11 + $0x1ac] ss:$16 sps:$4 sm:$0xff]  }
  0x68   :  { %v8705_v12 = vld [vmem:[#allocation11 + $0x1a0] ss:$16 sps:$4 sm:$0xff]   ;;  %v8708_v13 = vld [vmem:[#allocation11 + $0x1a8] ss:$16 sps:$4 sm:$0xff]   ;;  %v8713_v14 = vld [vmem:[#allocation11 + $0x1c4] ss:$16 sps:$4 sm:$0xff]  }
  0x69   :  { %v8716_v15 = vld [vmem:[#allocation11 + $0x1cc] ss:$16 sps:$4 sm:$0xff]   ;;  %v8711_v16 = vld [vmem:[#allocation11 + $0x1c0] ss:$16 sps:$4 sm:$0xff]   ;;  %v8714_v17 = vld [vmem:[#allocation11 + $0x1c8] ss:$16 sps:$4 sm:$0xff]  }
  0x6a   :  { %v8719_v18 = vld [vmem:[#allocation11 + $0x1e4] ss:$16 sps:$4 sm:$0xff]   ;;  %v8722_v19 = vld [vmem:[#allocation11 + $0x1ec] ss:$16 sps:$4 sm:$0xff]   ;;  %v8717_v20 = vld [vmem:[#allocation11 + $0x1e0] ss:$16 sps:$4 sm:$0xff]  }
  0x6b   :  { %v8720_v21 = vld [vmem:[#allocation11 + $0x1e8] ss:$16 sps:$4 sm:$0xff]   ;;  %v462_v22 = vld [vmem:[#allocation15] sm:$0x1]  ;;  %v82_v24 = vld [vmem:[%s11519_s5] sm:$0x1] }
  0x6c   :  { %v465_v23 = vpack.c.bf16 %v462_v22, %v462_v22  ;;  %v9894_v25 = vld [vmem:[#allocation11 + $0x204] ss:$16 sps:$4 sm:$0xff]   ;;  %v9896_v26 = vld [vmem:[#allocation11 + $0x20c] ss:$16 sps:$4 sm:$0xff]   ;;  %84 = vst [vmem:[#allocation17] sm:$0x1] %v82_v24 }
  0x6d   :  { %v160_v54 = vld [vmem:[#allocation2] sm:$0xff]  ;;  %v9898_v27 = vld [vmem:[#allocation11 + $0x200] ss:$16 sps:$4 sm:$0xff]  }
  0x6e   :  { %v161_v57 = vpack.c.bf16 %v160_v54, %v160_v54  ;;  %v9900_v28 = vld [vmem:[#allocation11 + $0x208] ss:$16 sps:$4 sm:$0xff]   ;;  %v9906_v29 = vld [vmem:[#allocation11 + $0x224] ss:$16 sps:$4 sm:$0xff]   ;;  %v9908_v30 = vld [vmem:[#allocation11 + $0x22c] ss:$16 sps:$4 sm:$0xff]  }
  0x6f   :  { %v9910_v31 = vld [vmem:[#allocation11 + $0x220] ss:$16 sps:$4 sm:$0xff]   ;;  %v9912_v32 = vld [vmem:[#allocation11 + $0x228] ss:$16 sps:$4 sm:$0xff]   ;;  %v9918_v33 = vld [vmem:[#allocation11 + $0x244] ss:$16 sps:$4 sm:$0xff]  }
  0x70   :  { %409 = vmatmul.mubr.bf16.vlgmr.msra.gmra.mrb[0].mxu0 %v161_v57  ;;  %450 = vmatmul.mubr.bf16.vlgmr.msra.gmra.mrb[0].mxu1 %v161_v57  ;;  %v9920_v34 = vld [vmem:[#allocation11 + $0x24c] ss:$16 sps:$4 sm:$0xff]   ;;  %v9922_v35 = vld [vmem:[#allocation11 + $0x240] ss:$16 sps:$4 sm:$0xff]   ;;  %v9924_v36 = vld [vmem:[#allocation11 + $0x248] ss:$16 sps:$4 sm:$0xff]  }
  0x71   :  { %659 = vmatpush1.bf16.msra.mxu0 %v8675_v52  ;;  %700 = vmatpush1.bf16.msra.mxu1 %v8678_v53  ;;  %v9930_v37 = vld [vmem:[#allocation11 + $0x264] ss:$16 sps:$4 sm:$0xff]   ;;  %v9932_v38 = vld [vmem:[#allocation11 + $0x26c] ss:$16 sps:$4 sm:$0xff]   ;;  %v9934_v39 = vld [vmem:[#allocation11 + $0x260] ss:$16 sps:$4 sm:$0xff]  }
  0x72   :  { %660 = vmatprep.subr.bf16.mxu0 %v8683_v55  ;;  %701 = vmatprep.subr.bf16.mxu1 %v8686_v58  ;;  %v9936_v40 = vld [vmem:[#allocation11 + $0x268] ss:$16 sps:$4 sm:$0xff]   ;;  %v9942_v41 = vld [vmem:[#allocation11 + $0x284] ss:$16 sps:$4 sm:$0xff]   ;;  %v9944_v42 = vld [vmem:[#allocation11 + $0x28c] ss:$16 sps:$4 sm:$0xff]  }
  0x73   :  { %690 = vmatprep.mubr.bf16.mxu0 %v11525_v0  ;;  %731 = vmatprep.mubr.bf16.mxu1 %v11525_v0  ;;  %v9946_v43 = vld [vmem:[#allocation11 + $0x280] ss:$16 sps:$4 sm:$0xff]   ;;  %v9948_v44 = vld [vmem:[#allocation11 + $0x288] ss:$16 sps:$4 sm:$0xff]   ;;  %v9954_v45 = vld [vmem:[#allocation11 + $0x2a4] ss:$16 sps:$4 sm:$0xff]  }
  0x74   :  { %v9956_v46 = vld [vmem:[#allocation11 + $0x2ac] ss:$16 sps:$4 sm:$0xff]   ;;  %v9958_v47 = vld [vmem:[#allocation11 + $0x2a0] ss:$16 sps:$4 sm:$0xff]   ;;  %v9960_v48 = vld [vmem:[#allocation11 + $0x2a8] ss:$16 sps:$4 sm:$0xff]  }
  0x75   :  { %661 = vmatpush1.bf16.msra.mxu0 %v8681_v59  ;;  %702 = vmatpush1.bf16.msra.mxu1 %v8684_v60  ;;  %v9966_v49 = vld [vmem:[#allocation11 + $0x2c4] ss:$16 sps:$4 sm:$0xff]   ;;  %v9968_v50 = vld [vmem:[#allocation11 + $0x2cc] ss:$16 sps:$4 sm:$0xff]   ;;  %v9970_v51 = vld [vmem:[#allocation11 + $0x2c0] ss:$16 sps:$4 sm:$0xff]  }
  0x76   :  { %662 = vmatprep.subr.bf16.mxu0 %v8689_v61  ;;  %703 = vmatprep.subr.bf16.mxu1 %v8692_v62  ;;  %v9972_v52 = vld [vmem:[#allocation11 + $0x2c8] ss:$16 sps:$4 sm:$0xff]   ;;  %v9978_v53 = vld [vmem:[#allocation11 + $0x2e4] ss:$16 sps:$4 sm:$0xff]   ;;  %v9980_v54 = vld [vmem:[#allocation11 + $0x2ec] ss:$16 sps:$4 sm:$0xff]  }
  0x77   :  { %v9982_v55 = vld [vmem:[#allocation11 + $0x2e0] ss:$16 sps:$4 sm:$0xff]   ;;  %v9984_v56 = vld [vmem:[#allocation11 + $0x2e8] ss:$16 sps:$4 sm:$0xff]   ;;  %v9990_v57 = vld [vmem:[#allocation11 + $0x304] ss:$16 sps:$4 sm:$0xff]  }
  0x78   :  { %v9992_v58 = vld [vmem:[#allocation11 + $0x30c] ss:$16 sps:$4 sm:$0xff]   ;;  %v9994_v59 = vld [vmem:[#allocation11 + $0x300] ss:$16 sps:$4 sm:$0xff]   ;;  %v9996_v60 = vld [vmem:[#allocation11 + $0x308] ss:$16 sps:$4 sm:$0xff]  }
  0x79   :  { %663 = vmatpush1.bf16.msra.mxu0 %v8687_v63  ;;  %704 = vmatpush1.bf16.msra.mxu1 %v8690_v1  ;;  %v10002_v61 = vld [vmem:[#allocation11 + $0x324] ss:$16 sps:$4 sm:$0xff]   ;;  %v10004_v62 = vld [vmem:[#allocation11 + $0x32c] ss:$16 sps:$4 sm:$0xff]   ;;  %v10006_v63 = vld [vmem:[#allocation11 + $0x320] ss:$16 sps:$4 sm:$0xff]  }
  0x7a   :  { %664 = vmatprep.subr.bf16.mxu0 %v8695_v2  ;;  %705 = vmatprep.subr.bf16.mxu1 %v8698_v3  ;;  %v10008_v1 = vld [vmem:[#allocation11 + $0x328] ss:$16 sps:$4 sm:$0xff]   ;;  %v10014_v2 = vld [vmem:[#allocation11 + $0x344] ss:$16 sps:$4 sm:$0xff]   ;;  %v10016_v3 = vld [vmem:[#allocation11 + $0x34c] ss:$16 sps:$4 sm:$0xff]  }
  0x7b   :  { %11730 = vst [vmem:[#allocation23_spill] sm:$0xff] %v10008_v1  ;;  %11731 = vst [vmem:[#allocation24_spill] sm:$0xff] %v10014_v2  ;;  %v10070_v22 = vld [vmem:[#allocation11 + $0x3cc] ss:$16 sps:$4 sm:$0xff]   ;;  %v10074_v24 = vld [vmem:[#allocation11 + $0x3c8] ss:$16 sps:$4 sm:$0xff]  }
  0x7c   :  { %11732 = vst [vmem:[#allocation25_spill] sm:$0xff] %v10016_v3  ;;  %11750 = vst [vmem:[#allocation41_spill] sm:$0xff] %v10070_v22  ;;  %v10082_v0 = vld [vmem:[#allocation11 + $0x3e4] ss:$16 sps:$4 sm:$0xff]  }
  0x7d   :  { %665 = vmatpush1.bf16.msra.mxu0 %v8693_v4  ;;  %706 = vmatpush1.bf16.msra.mxu1 %v8696_v5  ;;  %v10018_v4 = vld [vmem:[#allocation11 + $0x340] ss:$16 sps:$4 sm:$0xff]   ;;  %v10020_v5 = vld [vmem:[#allocation11 + $0x348] ss:$16 sps:$4 sm:$0xff]   ;;  %11752 = vst [vmem:[#allocation43_spill] sm:$0xff] %v10074_v24  ;;  %11754 = vst [vmem:[#allocation45_spill] sm:$0xff] %v10082_v0 }
  0x7e   :  { %666 = vmatprep.subr.bf16.mxu0 %v8701_v6  ;;  %707 = vmatprep.subr.bf16.mxu1 %v8704_v7  ;;  %11733 = vst [vmem:[#allocation26_spill] sm:$0xff] %v10018_v4  ;;  %11734 = vst [vmem:[#allocation27_spill] sm:$0xff] %v10020_v5  ;;  %v10026_v6 = vld [vmem:[#allocation11 + $0x364] ss:$16 sps:$4 sm:$0xff]   ;;  %v10028_v7 = vld [vmem:[#allocation11 + $0x36c] ss:$16 sps:$4 sm:$0xff]  }
  0x7f   :  { %11735 = vst [vmem:[#allocation28_spill] sm:$0xff] %v10026_v6  ;;  %11736 = vst [vmem:[#allocation29_spill] sm:$0xff] %v10028_v7 }
  0x81   :  { %667 = vmatpush1.bf16.msra.mxu0 %v8699_v8  ;;  %708 = vmatpush1.bf16.msra.mxu1 %v8702_v9  ;;  %v10030_v8 = vld [vmem:[#allocation11 + $0x360] ss:$16 sps:$4 sm:$0xff]   ;;  %v10032_v9 = vld [vmem:[#allocation11 + $0x368] ss:$16 sps:$4 sm:$0xff]  }
  0x82   :  { %668 = vmatprep.subr.bf16.mxu0 %v8707_v10  ;;  %709 = vmatprep.subr.bf16.mxu1 %v8710_v11  ;;  %11737 = vst [vmem:[#allocation30_spill] sm:$0xff] %v10030_v8  ;;  %11738 = vst [vmem:[#allocation31_spill] sm:$0xff] %v10032_v9  ;;  %v10038_v10 = vld [vmem:[#allocation11 + $0x384] ss:$16 sps:$4 sm:$0xff]   ;;  %v10040_v11 = vld [vmem:[#allocation11 + $0x38c] ss:$16 sps:$4 sm:$0xff]  }
  0x83   :  { %11739 = vst [vmem:[#allocation32_spill] sm:$0xff] %v10038_v10  ;;  %11740 = vst [vmem:[#allocation33_spill] sm:$0xff] %v10040_v11 }
  0x85   :  { %669 = vmatpush1.bf16.msra.mxu0 %v8705_v12  ;;  %710 = vmatpush1.bf16.msra.mxu1 %v8708_v13  ;;  %v10042_v12 = vld [vmem:[#allocation11 + $0x380] ss:$16 sps:$4 sm:$0xff]   ;;  %v10044_v13 = vld [vmem:[#allocation11 + $0x388] ss:$16 sps:$4 sm:$0xff]  }
  0x86   :  { %670 = vmatprep.subr.bf16.mxu0 %v8713_v14  ;;  %711 = vmatprep.subr.bf16.mxu1 %v8716_v15  ;;  %11741 = vst [vmem:[#allocation34_spill] sm:$0xff] %v10042_v12  ;;  %11742 = vst [vmem:[#allocation35_spill] sm:$0xff] %v10044_v13  ;;  %v196_v14 = vlaneseq  ;;  %v10050_v15 = vld [vmem:[#allocation11 + $0x3a4] ss:$16 sps:$4 sm:$0xff]  }
  0x87   :  { %11743 = vst [vmem:[#allocation36_spill] sm:$0xff] %v10050_v15 }
  0x88   :  { %vm10054_vm0 = vcmp.lt.s32.totalorder %v196_v14, 128 }
  0x89   :  { %671 = vmatpush1.bf16.msra.mxu0 %v8711_v16  ;;  %712 = vmatpush1.bf16.msra.mxu1 %v8714_v17  ;;  %v10052_v16 = vld [vmem:[#allocation11 + $0x3ac] ss:$16 sps:$4 sm:$0xff]   ;;  %v804_v17 = vld [vmem:[#allocation15 + $0x1] sm:$0x1] }
  0x8a   :  { %672 = vmatprep.subr.bf16.mxu0 %v8719_v18  ;;  %713 = vmatprep.subr.bf16.mxu1 %v8722_v19  ;;  %11744 = vst [vmem:[#allocation37_spill] sm:$0xff] %v10052_v16  ;;  %v10058_v19 = vld [vmem:[#allocation11 + $0x3a0] ss:$16 sps:$4 sm:$0xff]   ;;  %812 = vst.msk [vmem:[#allocation5 + $0x1] sm:$0x1] %vm10054_vm0, %v804_v17 }
  0x8b   :  { %11747 = vst [vmem:[#allocation38_spill] sm:$0xff] %v10058_v19  ;;  %v10080_v17 = vld [vmem:[#allocation11 + $0x3e0] ss:$16 sps:$4 sm:$0xff]  }
  0x8c   :  { %11753 = vst [vmem:[#allocation44_spill] sm:$0xff] %v10080_v17  ;;  %v9254_v18 = vld [vmem:[#allocation13 + $0x10] ss:$8 sps:$4 sm:$0xff]  }
  0x8d   :  { %673 = vmatpush1.bf16.msra.mxu0 %v8717_v20  ;;  %714 = vmatpush1.bf16.msra.mxu1 %v8720_v21  ;;  %v10063_v20 = vld [vmem:[#allocation11 + $0x3a8] ss:$16 sps:$4 sm:$0xff]   ;;  %v10068_v21 = vld [vmem:[#allocation11 + $0x3c4] ss:$16 sps:$4 sm:$0xff]  }
  0x8e   :  { %1235 = vmatprep.subr.bf16.mxu0 %v9894_v25  ;;  %1276 = vmatprep.subr.bf16.mxu1 %v9896_v26  ;;  %11748 = vst [vmem:[#allocation39_spill] sm:$0xff] %v10063_v20  ;;  %11749 = vst [vmem:[#allocation40_spill] sm:$0xff] %v10068_v21 }
  0x90   :  { %691 = vmatmul.mubr.bf16.vlgmr.msra.gmra.mrb[4].mxu0 %v465_v23  ;;  %732 = vmatmul.mubr.bf16.vlgmr.msra.gmra.mrb[4].mxu1 %v465_v23  ;;  %v10072_v23 = vld [vmem:[#allocation11 + $0x3c0] ss:$16 sps:$4 sm:$0xff]  }
  0x91   :  { %1236 = vmatpush1.bf16.msra.mxu0 %v9898_v27  ;;  %1277 = vmatpush1.bf16.msra.mxu1 %v9900_v28  ;;  %11751 = vst [vmem:[#allocation42_spill] sm:$0xff] %v10072_v23 }
  0x92   :  { %1237 = vmatprep.subr.bf16.mxu0 %v9906_v29  ;;  %1278 = vmatprep.subr.bf16.mxu1 %v9908_v30 }
  0x95   :  { %1238 = vmatpush1.bf16.msra.mxu0 %v9910_v31  ;;  %1279 = vmatpush1.bf16.msra.mxu1 %v9912_v32 }
  0x96   :  { %1239 = vmatprep.subr.bf16.mxu0 %v9918_v33  ;;  %1280 = vmatprep.subr.bf16.mxu1 %v9920_v34 }
  0x99   :  { %1240 = vmatpush1.bf16.msra.mxu0 %v9922_v35  ;;  %1281 = vmatpush1.bf16.msra.mxu1 %v9924_v36 }
  0x9a   :  { %1241 = vmatprep.subr.bf16.mxu0 %v9930_v37  ;;  %1282 = vmatprep.subr.bf16.mxu1 %v9932_v38 }
  0x9d   :  { %1242 = vmatpush1.bf16.msra.mxu0 %v9934_v39  ;;  %1283 = vmatpush1.bf16.msra.mxu1 %v9936_v40 }
  0x9e   :  { %1243 = vmatprep.subr.bf16.mxu0 %v9942_v41  ;;  %1284 = vmatprep.subr.bf16.mxu1 %v9944_v42 }
  0xa1   :  { %1244 = vmatpush1.bf16.msra.mxu0 %v9946_v43  ;;  %1285 = vmatpush1.bf16.msra.mxu1 %v9948_v44 }
  0xa2   :  { %1245 = vmatprep.subr.bf16.mxu0 %v9954_v45  ;;  %1286 = vmatprep.subr.bf16.mxu1 %v9956_v46 }
  0xa5   :  { %1246 = vmatpush1.bf16.msra.mxu0 %v9958_v47  ;;  %1287 = vmatpush1.bf16.msra.mxu1 %v9960_v48 }
  0xa6   :  { %1247 = vmatprep.subr.bf16.mxu0 %v9966_v49  ;;  %1288 = vmatprep.subr.bf16.mxu1 %v9968_v50 }
  0xa9   :  { %1248 = vmatpush1.bf16.msra.mxu0 %v9970_v51  ;;  %1289 = vmatpush1.bf16.msra.mxu1 %v9972_v52 }
  0xaa   :  { %1249 = vmatprep.subr.bf16.mxu0 %v9978_v53  ;;  %1290 = vmatprep.subr.bf16.mxu1 %v9980_v54 }
  0xad   :  { %1250 = vmatpush1.bf16.msra.mxu0 %v9982_v55  ;;  %1291 = vmatpush1.bf16.msra.mxu1 %v9984_v56 }
  0xae   :  { %1251 = vmatprep.subr.bf16.mxu0 %v9990_v57  ;;  %1292 = vmatprep.subr.bf16.mxu1 %v9992_v58 }
  0xb1   :  { %1252 = vmatpush1.bf16.msra.mxu0 %v9994_v59  ;;  %1293 = vmatpush1.bf16.msra.mxu1 %v9996_v60 }
  0xb2   :  { %1253 = vmatprep.subr.bf16.mxu0 %v10002_v61  ;;  %1294 = vmatprep.subr.bf16.mxu1 %v10004_v62 }
  0xb5   :  { %1254 = vmatpush1.bf16.msra.mxu0 %v10006_v63  ;;  %1295 = vmatpush1.bf16.msra.mxu1 %v10008_v1 }
  0xb6   :  { %1255 = vmatprep.subr.bf16.mxu0 %v10014_v2  ;;  %1296 = vmatprep.subr.bf16.mxu1 %v10016_v3 }
  0xb9   :  { %1256 = vmatpush1.bf16.msra.mxu0 %v10018_v4  ;;  %1297 = vmatpush1.bf16.msra.mxu1 %v10020_v5 }
  0xba   :  { %1257 = vmatprep.subr.bf16.mxu0 %v10026_v6  ;;  %1298 = vmatprep.subr.bf16.mxu1 %v10028_v7 }
  0xbd   :  { %1258 = vmatpush1.bf16.msra.mxu0 %v10030_v8  ;;  %1299 = vmatpush1.bf16.msra.mxu1 %v10032_v9 }
  0xbe   :  { %1259 = vmatprep.subr.bf16.mxu0 %v10038_v10  ;;  %1300 = vmatprep.subr.bf16.mxu1 %v10040_v11 }
  0xc1   :  { %1260 = vmatpush1.bf16.msra.mxu0 %v10042_v12  ;;  %1301 = vmatpush1.bf16.msra.mxu1 %v10044_v13 }
  0xc2   :  { %1261 = vmatprep.subr.bf16.mxu0 %v10050_v15  ;;  %1302 = vmatprep.subr.bf16.mxu1 %v10052_v16  ;;  %v194_v15 = vld [vmem:[%s11517_s3] sm:$0xf] }
  0xc5   :  { %1262 = vmatpush1.bf16.msra.mxu0 %v10058_v19  ;;  %1303 = vmatpush1.bf16.msra.mxu1 %v10063_v20  ;;  %v10084_v20 = vld [vmem:[#allocation11 + $0x3e8] ss:$16 sps:$4 sm:$0xff]   ;;  %v10086_v19 = vld [vmem:[#allocation11 + $0x3ec] ss:$16 sps:$4 sm:$0xff]  }
  0xc6   :  { %1263 = vmatprep.subr.bf16.mxu0 %v10068_v21  ;;  %1304 = vmatprep.subr.bf16.mxu1 %v10070_v22  ;;  %11755 = vst [vmem:[#allocation46_spill] sm:$0xff] %v10084_v20  ;;  %11756 = vst [vmem:[#allocation47_spill] sm:$0xff] %v10086_v19  ;;  %v9531_v22 = vld [vmem:[#allocation11 + $0x104] ss:$16 sps:$4 sm:$0xff]  }
  0xc9   :  { %1264 = vmatpush1.bf16.msra.mxu0 %v10072_v23  ;;  %1305 = vmatpush1.bf16.msra.mxu1 %v10074_v24  ;;  %v9532_v23 = vld [vmem:[#allocation11 + $0x10c] ss:$16 sps:$4 sm:$0xff]   ;;  %v197_v24 = vshrl.u32 %v196_v14, 7 }
  0xca   :  { %1265 = vmatprep.subr.bf16.mxu0 %v10082_v0  ;;  %1306 = vmatprep.subr.bf16.mxu1 %v10086_v19 }
  0xcb   :  { %v10092_v21 = vsub.s32 0, %v197_v24  ;;  %v10094_v16 = vsub.s32 2, %v197_v24  ;;  %v10099_v0 = vsub.s32 1, %v197_v24  ;;  %v10101_v19 = vsub.s32 3, %v197_v24 }
  0xcd   :  { %1266 = vmatpush1.bf16.msra.mxu0 %v10080_v17  ;;  %1307 = vmatpush1.bf16.msra.mxu1 %v10084_v20  ;;  %11757 = vst [vmem:[#allocation48_spill] sm:$0xff] %v10094_v16  ;;  %11758 = vst [vmem:[#allocation49_spill] sm:$0xff] %v10101_v19  ;;  %v199_v17 = vrot.slane %v194_v15, %v10092_v21  ;;  %v207_v20 = vrot.slane %v194_v15, %v10094_v16  ;;  %v9725_v16 = vmov 1966171168  }
  0xce   :  { %1541 = vmatprep.subr.bf16.mxu0 %v9531_v22  ;;  %1582 = vmatprep.subr.bf16.mxu1 %v9532_v23  ;;  %v203_v22 = vrot.slane %v194_v15, %v10099_v0  ;;  %v211_v14 = vrot.slane %v194_v15, %v10101_v19  ;;  %v747_v2 = vunpack.c.l.s4 %v9725_v16 }
  0xd0   :  { %v748_v1 = vunpack.c.0.s8 %v747_v2 }
  0xd2   :  { %v10107_v15 = vsub.s32 %v748_v1, %v197_v24 }
 0x143   :  { %v410_v23 = vpop.f32.mrb[0].mxu0  ;;  %v451_v13 = vpop.f32.mrb[0].mxu1 }
 0x144   :  { %v411_v12 = vadd.f32 %v410_v23, %v199_v17  ;;  %v452_v11 = vadd.f32 %v451_v13, %v207_v20  ;;  %v412_v10 = vpop.f32.mrb[1].mxu0  ;;  %v453_v9 = vpop.f32.mrb[1].mxu1 }
 0x145   :  { %v413_v8 = vadd.f32 %v412_v10, %v203_v22  ;;  %v454_v7 = vadd.f32 %v453_v9, %v211_v14  ;;  %v414_v6 = vpop.f32.mrb[2].mxu0  ;;  %v455_v5 = vpop.f32.mrb[2].mxu1 }
 0x146   :  { %458 = vst [vmem:[#allocation3] sm:$0xff] %v411_v12  ;;  %460 = vst [vmem:[#allocation3 + $0x10] sm:$0xff] %v452_v11  ;;  %v415_v4 = vpop.f32.mrb[3].mxu0  ;;  %v456_v3 = vpop.f32.mrb[3].mxu1 }
 0x147   :  { %459 = vst [vmem:[#allocation3 + $0x8] sm:$0xff] %v413_v8  ;;  %461 = vst [vmem:[#allocation3 + $0x18] sm:$0xff] %v454_v7 }
 0x14e   :  { %v464_v2 = vld [vmem:[#allocation3] ss:$8 sm:$0xf] }
 0x163   :  { %v692_v19 = vpop.f32.mrb[4].mxu0  ;;  %v733_v17 = vpop.f32.mrb[4].mxu1 }
 0x164   :  { %v694_v13 = vpop.f32.mrb[5].mxu0  ;;  %v735_v20 = vpop.f32.mrb[5].mxu1 }
 0x165   :  { %v744_v23 = vcombine.low %v692_v19, %v694_v13  ;;  %v745_v10 = vcombine.low %v733_v17, %v735_v20  ;;  %v696_v9 = vpop.f32.mrb[6].mxu0  ;;  %v737_v6 = vpop.f32.mrb[6].mxu1 }
 0x166   :  { %v697_v5 = vpop.f32.mrb[7].mxu0  ;;  %v738_v12 = vpop.f32.mrb[7].mxu1  ;;  %v463_v6 = vld [vmem:[#allocation17] sm:$0x1] }
 0x167   :  { %v752_v4 = vrot.slane %v744_v23, %v10107_v15  ;;  %v759_v3 = vrot.slane %v745_v10, %v10107_v15 }
 0x169   :  { %v760_v7 = vcombine.low %v752_v4, %v759_v3 }
 0x16b   :  { %v767_v8 = vrot.slane %v760_v7, %v10107_v15 }
 0x16d   :  { %v769_v1 = vadd.f32 %v767_v8, %v464_v2 }
 0x16f   :  { %v7788_v11 = vmul.f32 -1.442695, %v769_v1  ;;  %v777_v16 = vrot.slane %v769_v1, 1  ;;  %v788_v19 = vrot.slane %v769_v1, 3  ;;  %v785_v17 = vrot.slane %v769_v1, 2 }
 0x171   :  { %9275 = vpow2.f32 %v7788_v11  ;;  %v7789_v24 = vmul.f32 -1.442695, %v777_v16  ;;  %v7790_v22 = vmul.f32 -1.442695, %v788_v19 }
 0x173   :  { %9277 = vpow2.f32 %v7789_v24 }
 0x174   :  { %9279 = vpow2.f32 %v7790_v22 }
 0x17b   :  { %v9276_v14 = vpop.eup %9275 }
 0x17c   :  { %v773_v13 = vadd.f32 1.0, %v9276_v14 }
 0x17d   :  { %v9278_v20 = vpop.eup %9277 }
 0x17e   :  { %9281 = vrcp.f32 %v773_v13  ;;  %v782_v23 = vadd.f32 1.0, %v9278_v20  ;;  %v9280_v10 = vpop.eup %9279  ;;  %v9534_v13 = vld [vmem:[#allocation11 + $0x108] ss:$16 sps:$4 sm:$0xff]   ;;  %v9535_v20 = vld [vmem:[#allocation11 + $0x124] ss:$16 sps:$4 sm:$0xff]  }
 0x17f   :  { %9283 = vtanh.f32 %v785_v17  ;;  %v793_v4 = vadd.f32 1.0, %v9280_v10  ;;  %v9533_v17 = vld [vmem:[#allocation11 + $0x100] ss:$16 sps:$4 sm:$0xff]   ;;  %v11759_v10 = vmov 0  }
 0x180   :  { %9285 = vrcp.f32 %v782_v23  ;;  %v9536_v23 = vld [vmem:[#allocation11 + $0x12c] ss:$16 sps:$4 sm:$0xff]  }
 0x181   :  { %9287 = vrcp.f32 %v793_v4  ;;  %v9541_v4 = vld [vmem:[#allocation11 + $0x140] ss:$16 sps:$4 sm:$0xff]  }
 0x188   :  { %v9282_v9 = vpop.eup %9281 }
 0x189   :  { %v9284_v5 = vpop.eup %9283 }
 0x18a   :  { %v9286_v12 = vpop.eup %9285  ;;  %v797_v7 = vmul.f32 %v9284_v5, %v9282_v9  ;;  %v9537_v9 = vld [vmem:[#allocation11 + $0x120] ss:$16 sps:$4 sm:$0xff]   ;;  %v9539_v5 = vld [vmem:[#allocation11 + $0x144] ss:$16 sps:$4 sm:$0xff]  }
 0x18b   :  { %v796_v3 = vmul.f32 %v9286_v12, %v463_v6  ;;  %v9288_v2 = vpop.eup %9287  ;;  %v9538_v6 = vld [vmem:[#allocation11 + $0x128] ss:$16 sps:$4 sm:$0xff]   ;;  %v9540_v12 = vld [vmem:[#allocation11 + $0x14c] ss:$16 sps:$4 sm:$0xff]  }
 0x18d   :  { %v798_v8 = vadd.f32 %v797_v7, %v796_v3  ;;  %v9542_v3 = vld [vmem:[#allocation11 + $0x148] ss:$16 sps:$4 sm:$0xff]   ;;  %v9543_v7 = vld [vmem:[#allocation11 + $0x164] ss:$16 sps:$4 sm:$0xff]  }
 0x18f   :  { %9289 = vtanh.f32 %v798_v8  ;;  %802 = vst [vmem:[#allocation17] sm:$0x1] %v798_v8  ;;  %v9544_v8 = vld [vmem:[#allocation11 + $0x16c] ss:$16 sps:$4 sm:$0xff]  }
 0x199   :  { %v9290_v1 = vpop.eup %9289 }
 0x19a   :  { %v800_v11 = vmul.f32 %v9290_v1, %v9288_v2  ;;  %v9545_v2 = vld [vmem:[#allocation11 + $0x160] ss:$16 sps:$4 sm:$0xff]   ;;  %v9546_v1 = vld [vmem:[#allocation11 + $0x168] ss:$16 sps:$4 sm:$0xff]  }
 0x19c   :  { %801 = vst [vmem:[#allocation15] sm:$0x1] %v800_v11  ;;  %811 = vst.msk [vmem:[#allocation5] sm:$0x1] %vm10054_vm0, %v800_v11  ;;  %v9547_v11 = vld [vmem:[#allocation11 + $0x184] ss:$16 sps:$4 sm:$0xff]  }
 0x1a3   :  { %v813_v16 = vld [vmem:[#allocation5] sm:$0x3] }
 0x1a4   :  { %v822_v24 = vrot.slane %v813_v16, %v10099_v0  ;;  %v818_v19 = vrot.slane %v813_v16, %v10092_v21  ;;  %v9548_v16 = vld [vmem:[#allocation11 + $0x18c] ss:$16 sps:$4 sm:$0xff]  }
 0x1a6   :  { %v826_v22 = vpack.c.bf16 %v822_v24, %v822_v24  ;;  %v825_v14 = vpack.c.bf16 %v818_v19, %v818_v19  ;;  %v9549_v24 = vld [vmem:[#allocation11 + $0x180] ss:$16 sps:$4 sm:$0xff]   ;;  %v9550_v19 = vld [vmem:[#allocation11 + $0x188] ss:$16 sps:$4 sm:$0xff]  }
 0x1a8   :  { %1267 = vmatprep.mubr.bf16.mxu0 %v826_v22  ;;  %1308 = vmatprep.mubr.bf16.mxu1 %v826_v22  ;;  %v9551_v22 = vld [vmem:[#allocation11 + $0x1a4] ss:$16 sps:$4 sm:$0xff]  }
 0x1a9   :  { %1268 = vmatmul.mubr.bf16.vlgmr.msra.gmra.mrb[8].mxu0 %v825_v14  ;;  %1309 = vmatmul.mubr.bf16.vlgmr.msra.gmra.mrb[8].mxu1 %v825_v14  ;;  %v9552_v14 = vld [vmem:[#allocation11 + $0x1ac] ss:$16 sps:$4 sm:$0xff]  }
 0x1aa   :  { %1542 = vmatpush1.bf16.msra.mxu0 %v9533_v17  ;;  %1583 = vmatpush1.bf16.msra.mxu1 %v9534_v13  ;;  %v9553_v17 = vld [vmem:[#allocation11 + $0x1a0] ss:$16 sps:$4 sm:$0xff]   ;;  %v9554_v13 = vld [vmem:[#allocation11 + $0x1a8] ss:$16 sps:$4 sm:$0xff]  }
 0x1ab   :  { %1543 = vmatprep.subr.bf16.mxu0 %v9535_v20  ;;  %1584 = vmatprep.subr.bf16.mxu1 %v9536_v23  ;;  %v9555_v20 = vld [vmem:[#allocation11 + $0x1c4] ss:$16 sps:$4 sm:$0xff]   ;;  %v9556_v23 = vld [vmem:[#allocation11 + $0x1cc] ss:$16 sps:$4 sm:$0xff]  }
 0x1ac   :  { %1573 = vmatprep.mubr.bf16.mxu0 %v11759_v10  ;;  %1614 = vmatprep.mubr.bf16.mxu1 %v11759_v10 }
 0x1ae   :  { %1544 = vmatpush1.bf16.msra.mxu0 %v9537_v9  ;;  %1585 = vmatpush1.bf16.msra.mxu1 %v9538_v6  ;;  %v9557_v9 = vld [vmem:[#allocation11 + $0x1c0] ss:$16 sps:$4 sm:$0xff]   ;;  %v9558_v6 = vld [vmem:[#allocation11 + $0x1c8] ss:$16 sps:$4 sm:$0xff]  }
 0x1af   :  { %1545 = vmatprep.subr.bf16.mxu0 %v9539_v5  ;;  %1586 = vmatprep.subr.bf16.mxu1 %v9540_v12  ;;  %v9559_v5 = vld [vmem:[#allocation11 + $0x1e4] ss:$16 sps:$4 sm:$0xff]   ;;  %v9560_v12 = vld [vmem:[#allocation11 + $0x1ec] ss:$16 sps:$4 sm:$0xff]  }
 0x1b2   :  { %1546 = vmatpush1.bf16.msra.mxu0 %v9541_v4  ;;  %1587 = vmatpush1.bf16.msra.mxu1 %v9542_v3  ;;  %v1344_v4 = vld [vmem:[#allocation15] sm:$0x1] }
 0x1b3   :  { %1547 = vmatprep.subr.bf16.mxu0 %v9543_v7  ;;  %1588 = vmatprep.subr.bf16.mxu1 %v9544_v8  ;;  %v9561_v3 = vld [vmem:[#allocation11 + $0x1e0] ss:$16 sps:$4 sm:$0xff]   ;;  %v9562_v7 = vld [vmem:[#allocation11 + $0x1e8] ss:$16 sps:$4 sm:$0xff]   ;;  %v1348_v8 = vpack.c.bf16 %v1344_v4, %v1344_v4 }
 0x1b6   :  { %1548 = vmatpush1.bf16.msra.mxu0 %v9545_v2  ;;  %1589 = vmatpush1.bf16.msra.mxu1 %v9546_v1 }
 0x1b7   :  { %1549 = vmatprep.subr.bf16.mxu0 %v9547_v11  ;;  %1590 = vmatprep.subr.bf16.mxu1 %v9548_v16 }
 0x1ba   :  { %1550 = vmatpush1.bf16.msra.mxu0 %v9549_v24  ;;  %1591 = vmatpush1.bf16.msra.mxu1 %v9550_v19  ;;  %v11785_v24 = vld [vmem:[#allocation49_spill] sm:$0xff] }
 0x1bb   :  { %1551 = vmatprep.subr.bf16.mxu0 %v9551_v22  ;;  %1592 = vmatprep.subr.bf16.mxu1 %v9552_v14  ;;  %v11786_v14 = vld [vmem:[#allocation48_spill] sm:$0xff] }
 0x1be   :  { %1552 = vmatpush1.bf16.msra.mxu0 %v9553_v17  ;;  %1593 = vmatpush1.bf16.msra.mxu1 %v9554_v13 }
 0x1bf   :  { %1553 = vmatprep.subr.bf16.mxu0 %v9555_v20  ;;  %1594 = vmatprep.subr.bf16.mxu1 %v9556_v23 }
 0x1c2   :  { %1554 = vmatpush1.bf16.msra.mxu0 %v9557_v9  ;;  %1595 = vmatpush1.bf16.msra.mxu1 %v9558_v6 }
 0x1c3   :  { %1555 = vmatprep.subr.bf16.mxu0 %v9559_v5  ;;  %1596 = vmatprep.subr.bf16.mxu1 %v9560_v12 }
 0x1c6   :  { %1556 = vmatpush1.bf16.msra.mxu0 %v9561_v3  ;;  %1597 = vmatpush1.bf16.msra.mxu1 %v9562_v7 }
 0x1c7   :  { %2110 = vmatprep.subr.bf16.mxu0 %v9894_v25  ;;  %2151 = vmatprep.subr.bf16.mxu1 %v9896_v26  ;;  %v11760_v25 = vld [vmem:[#allocation23_spill] sm:$0xff]  ;;  %v11761_v26 = vld [vmem:[#allocation24_spill] sm:$0xff] }
 0x1c9   :  { %1574 = vmatmul.mubr.bf16.vlgmr.msra.gmra.mrb[12].mxu0 %v1348_v8  ;;  %1615 = vmatmul.mubr.bf16.vlgmr.msra.gmra.mrb[12].mxu1 %v1348_v8 }
 0x1ca   :  { %2111 = vmatpush1.bf16.msra.mxu0 %v9898_v27  ;;  %2152 = vmatpush1.bf16.msra.mxu1 %v9900_v28  ;;  %v11762_v27 = vld [vmem:[#allocation25_spill] sm:$0xff]  ;;  %v11763_v28 = vld [vmem:[#allocation26_spill] sm:$0xff] }
 0x1cb   :  { %2112 = vmatprep.subr.bf16.mxu0 %v9906_v29  ;;  %2153 = vmatprep.subr.bf16.mxu1 %v9908_v30  ;;  %v11764_v29 = vld [vmem:[#allocation27_spill] sm:$0xff]  ;;  %v11765_v30 = vld [vmem:[#allocation28_spill] sm:$0xff] }
 0x1ce   :  { %2113 = vmatpush1.bf16.msra.mxu0 %v9910_v31  ;;  %2154 = vmatpush1.bf16.msra.mxu1 %v9912_v32  ;;  %v11766_v31 = vld [vmem:[#allocation29_spill] sm:$0xff]  ;;  %v11767_v32 = vld [vmem:[#allocation30_spill] sm:$0xff] }
 0x1cf   :  { %2114 = vmatprep.subr.bf16.mxu0 %v9918_v33  ;;  %2155 = vmatprep.subr.bf16.mxu1 %v9920_v34  ;;  %v11768_v33 = vld [vmem:[#allocation31_spill] sm:$0xff]  ;;  %v11769_v34 = vld [vmem:[#allocation32_spill] sm:$0xff] }
 0x1d2   :  { %2115 = vmatpush1.bf16.msra.mxu0 %v9922_v35  ;;  %2156 = vmatpush1.bf16.msra.mxu1 %v9924_v36  ;;  %v11770_v35 = vld [vmem:[#allocation33_spill] sm:$0xff]  ;;  %v11771_v36 = vld [vmem:[#allocation34_spill] sm:$0xff] }
 0x1d3   :  { %2116 = vmatprep.subr.bf16.mxu0 %v9930_v37  ;;  %2157 = vmatprep.subr.bf16.mxu1 %v9932_v38  ;;  %v11772_v37 = vld [vmem:[#allocation35_spill] sm:$0xff]  ;;  %v11773_v38 = vld [vmem:[#allocation36_spill] sm:$0xff] }
 0x1d6   :  { %2117 = vmatpush1.bf16.msra.mxu0 %v9934_v39  ;;  %2158 = vmatpush1.bf16.msra.mxu1 %v9936_v40  ;;  %v11774_v39 = vld [vmem:[#allocation37_spill] sm:$0xff]  ;;  %v11775_v40 = vld [vmem:[#allocation38_spill] sm:$0xff] }
 0x1d7   :  { %2118 = vmatprep.subr.bf16.mxu0 %v9942_v41  ;;  %2159 = vmatprep.subr.bf16.mxu1 %v9944_v42  ;;  %v11776_v41 = vld [vmem:[#allocation39_spill] sm:$0xff]  ;;  %v11777_v42 = vld [vmem:[#allocation40_spill] sm:$0xff] }
 0x1da   :  { %2119 = vmatpush1.bf16.msra.mxu0 %v9946_v43  ;;  %2160 = vmatpush1.bf16.msra.mxu1 %v9948_v44  ;;  %v11778_v43 = vld [vmem:[#allocation41_spill] sm:$0xff]  ;;  %v11779_v44 = vld [vmem:[#allocation42_spill] sm:$0xff] }
 0x1db   :  { %2120 = vmatprep.subr.bf16.mxu0 %v9954_v45  ;;  %2161 = vmatprep.subr.bf16.mxu1 %v9956_v46  ;;  %v11780_v45 = vld [vmem:[#allocation43_spill] sm:$0xff]  ;;  %v11781_v46 = vld [vmem:[#allocation45_spill] sm:$0xff] }
 0x1de   :  { %2121 = vmatpush1.bf16.msra.mxu0 %v9958_v47  ;;  %2162 = vmatpush1.bf16.msra.mxu1 %v9960_v48  ;;  %v11782_v47 = vld [vmem:[#allocation47_spill] sm:$0xff]  ;;  %v11783_v48 = vld [vmem:[#allocation44_spill] sm:$0xff] }
 0x1df   :  { %2122 = vmatprep.subr.bf16.mxu0 %v9966_v49  ;;  %2163 = vmatprep.subr.bf16.mxu1 %v9968_v50  ;;  %v11784_v49 = vld [vmem:[#allocation46_spill] sm:$0xff]  ;;  %v83_v50 = vld [vmem:[%s11519_s5 + $0x1] sm:$0x1] }
 0x1e0   :  { %85 = vst [vmem:[#allocation17 + $0x1] sm:$0x1] %v83_v50 }
 0x1e2   :  { %2123 = vmatpush1.bf16.msra.mxu0 %v9970_v51  ;;  %2164 = vmatpush1.bf16.msra.mxu1 %v9972_v52  ;;  %v10185_v51 = vld [vmem:[#allocation11 + $0x104] ss:$16 sps:$4 sm:$0xff]   ;;  %v10187_v52 = vld [vmem:[#allocation11 + $0x10c] ss:$16 sps:$4 sm:$0xff]  }
 0x1e3   :  { %2124 = vmatprep.subr.bf16.mxu0 %v9978_v53  ;;  %2165 = vmatprep.subr.bf16.mxu1 %v9980_v54  ;;  %v7791_v53 = vld [vmem:[%s11517_s3 + $0x4] sm:$0xf] }
 0x1e4   :  { %v1218_v54 = vrot.slane %v7791_v53, %v10092_v21  ;;  %v1230_v19 = vrot.slane %v7791_v53, %v11785_v24  ;;  %v1226_v17 = vrot.slane %v7791_v53, %v11786_v14 }
 0x1e6   :  { %2125 = vmatpush1.bf16.msra.mxu0 %v9982_v55  ;;  %2166 = vmatpush1.bf16.msra.mxu1 %v9984_v56  ;;  %v1222_v55 = vrot.slane %v7791_v53, %v10099_v0 }
 0x1e7   :  { %2126 = vmatprep.subr.bf16.mxu0 %v9990_v57  ;;  %2167 = vmatprep.subr.bf16.mxu1 %v9992_v58  ;;  %v806_v3 = vld [vmem:[#allocation17 + $0x1] sm:$0x1] }
 0x1ea   :  { %2127 = vmatpush1.bf16.msra.mxu0 %v9994_v59  ;;  %2168 = vmatpush1.bf16.msra.mxu1 %v9996_v60 }
 0x1eb   :  { %2128 = vmatprep.subr.bf16.mxu0 %v10002_v61  ;;  %2169 = vmatprep.subr.bf16.mxu1 %v10004_v62 }
 0x1ee   :  { %2129 = vmatpush1.bf16.msra.mxu0 %v10006_v63  ;;  %2170 = vmatpush1.bf16.msra.mxu1 %v11760_v25 }
 0x1ef   :  { %2130 = vmatprep.subr.bf16.mxu0 %v11761_v26  ;;  %2171 = vmatprep.subr.bf16.mxu1 %v11762_v27 }
 0x1f2   :  { %2131 = vmatpush1.bf16.msra.mxu0 %v11763_v28  ;;  %2172 = vmatpush1.bf16.msra.mxu1 %v11764_v29 }
 0x1f3   :  { %2132 = vmatprep.subr.bf16.mxu0 %v11765_v30  ;;  %2173 = vmatprep.subr.bf16.mxu1 %v11766_v31 }
 0x1f6   :  { %2133 = vmatpush1.bf16.msra.mxu0 %v11767_v32  ;;  %2174 = vmatpush1.bf16.msra.mxu1 %v11768_v33 }
 0x1f7   :  { %2134 = vmatprep.subr.bf16.mxu0 %v11769_v34  ;;  %2175 = vmatprep.subr.bf16.mxu1 %v11770_v35 }
 0x1fa   :  { %2135 = vmatpush1.bf16.msra.mxu0 %v11771_v36  ;;  %2176 = vmatpush1.bf16.msra.mxu1 %v11772_v37 }
 0x1fb   :  { %2136 = vmatprep.subr.bf16.mxu0 %v11773_v38  ;;  %2177 = vmatprep.subr.bf16.mxu1 %v11774_v39 }
 0x1fe   :  { %2137 = vmatpush1.bf16.msra.mxu0 %v11775_v40  ;;  %2178 = vmatpush1.bf16.msra.mxu1 %v11776_v41 }
 0x1ff   :  { %2138 = vmatprep.subr.bf16.mxu0 %v11777_v42  ;;  %2179 = vmatprep.subr.bf16.mxu1 %v11778_v43  ;;  %v1347_v43 = vld [vmem:[#allocation3 + $0x1] ss:$8 sm:$0xf] }
 0x202   :  { %2139 = vmatpush1.bf16.msra.mxu0 %v11779_v44  ;;  %2180 = vmatpush1.bf16.msra.mxu1 %v11780_v45 }
 0x203   :  { %2140 = vmatprep.subr.bf16.mxu0 %v11781_v46  ;;  %2181 = vmatprep.subr.bf16.mxu1 %v11782_v47 }
 0x206   :  { %2141 = vmatpush1.bf16.msra.mxu0 %v11783_v48  ;;  %2182 = vmatpush1.bf16.msra.mxu1 %v11784_v49 }
 0x207   :  { %2416 = vmatprep.subr.bf16.mxu0 %v10185_v51  ;;  %2457 = vmatprep.subr.bf16.mxu1 %v10187_v52 }
 0x27c   :  { %v1269_v56 = vpop.f32.mrb[8].mxu0  ;;  %v1310_v57 = vpop.f32.mrb[8].mxu1 }
 0x27d   :  { %v1270_v58 = vadd.f32 %v1269_v56, %v1218_v54  ;;  %v1271_v59 = vpop.f32.mrb[9].mxu0  ;;  %v1312_v60 = vpop.f32.mrb[9].mxu1  ;;  %v1311_v20 = vadd.f32 %v1310_v57, %v1226_v17 }
 0x27e   :  { %v1272_v61 = vadd.f32 %v1271_v59, %v1222_v55  ;;  %v1273_v62 = vpop.f32.mrb[10].mxu0  ;;  %v1314_v63 = vpop.f32.mrb[10].mxu1  ;;  %v1313_v22 = vadd.f32 %v1312_v60, %v1230_v19 }
 0x27f   :  { %v7856_v2 = vmul.f32 -1.442695, %v1270_v58  ;;  %v1274_v1 = vpop.f32.mrb[11].mxu0  ;;  %v1315_v11 = vpop.f32.mrb[11].mxu1 }
 0x280   :  { %v7857_v16 = vmul.f32 -1.442695, %v1272_v61  ;;  %v7858_v13 = vmul.f32 -1.442695, %v1313_v22  ;;  %v1345_v1 = vld [vmem:[#allocation17] sm:$0x1] }
 0x281   :  { %9291 = vpow2.f32 %v7856_v2 }
 0x282   :  { %9293 = vpow2.f32 %v7857_v16 }
 0x283   :  { %9295 = vpow2.f32 %v7858_v13 }
 0x284   :  { %9297 = vtanh.f32 %v1311_v20 }
 0x28b   :  { %v9292_v23 = vpop.eup %9291 }
 0x28c   :  { %v9294_v9 = vpop.eup %9293  ;;  %v1320_v6 = vadd.f32 1.0, %v9292_v23 }
 0x28d   :  { %v1326_v5 = vadd.f32 1.0, %v9294_v9  ;;  %v9296_v12 = vpop.eup %9295 }
 0x28e   :  { %9299 = vrcp.f32 %v1320_v6  ;;  %v9298_v4 = vpop.eup %9297  ;;  %v1333_v26 = vadd.f32 1.0, %v9296_v12  ;;  %v10207_v12 = vld [vmem:[#allocation11 + $0x100] ss:$16 sps:$4 sm:$0xff]  }
 0x28f   :  { %9301 = vrcp.f32 %v1326_v5 }
 0x290   :  { %9303 = vrcp.f32 %v1333_v26  ;;  %v10219_v26 = vld [vmem:[#allocation11 + $0x128] ss:$16 sps:$4 sm:$0xff]  }
 0x298   :  { %v9300_v7 = vpop.eup %9299 }
 0x299   :  { %v9302_v8 = vpop.eup %9301  ;;  %v1337_v25 = vmul.f32 %v9300_v7, %v9298_v4  ;;  %v10209_v4 = vld [vmem:[#allocation11 + $0x108] ss:$16 sps:$4 sm:$0xff]   ;;  %v10211_v7 = vld [vmem:[#allocation11 + $0x124] ss:$16 sps:$4 sm:$0xff]  }
 0x29a   :  { %v1336_v27 = vmul.f32 %v9302_v8, %v806_v3  ;;  %v9304_v45 = vpop.eup %9303  ;;  %v10213_v8 = vld [vmem:[#allocation11 + $0x12c] ss:$16 sps:$4 sm:$0xff]  }
 0x29c   :  { %v1338_v28 = vadd.f32 %v1337_v25, %v1336_v27  ;;  %v1575_v29 = vpop.f32.mrb[12].mxu0  ;;  %v1616_v30 = vpop.f32.mrb[12].mxu1  ;;  %v10217_v25 = vld [vmem:[#allocation11 + $0x120] ss:$16 sps:$4 sm:$0xff]   ;;  %v10223_v27 = vld [vmem:[#allocation11 + $0x144] ss:$16 sps:$4 sm:$0xff]  }
 0x29d   :  { %v1577_v31 = vpop.f32.mrb[13].mxu0  ;;  %v1618_v32 = vpop.f32.mrb[13].mxu1 }
 0x29e   :  { %9305 = vtanh.f32 %v1338_v28  ;;  %1342 = vst [vmem:[#allocation17 + $0x1] sm:$0x1] %v1338_v28  ;;  %v1627_v33 = vcombine.low %v1575_v29, %v1577_v31  ;;  %v1628_v34 = vcombine.low %v1616_v30, %v1618_v32  ;;  %v1579_v35 = vpop.f32.mrb[14].mxu0  ;;  %v1620_v36 = vpop.f32.mrb[14].mxu1  ;;  %v10225_v28 = vld [vmem:[#allocation11 + $0x14c] ss:$16 sps:$4 sm:$0xff]  }
 0x29f   :  { %v1580_v37 = vpop.f32.mrb[15].mxu0  ;;  %v1621_v38 = vpop.f32.mrb[15].mxu1  ;;  %v10231_v29 = vld [vmem:[#allocation11 + $0x140] ss:$16 sps:$4 sm:$0xff]   ;;  %v10233_v30 = vld [vmem:[#allocation11 + $0x148] ss:$16 sps:$4 sm:$0xff]  }
 0x2a0   :  { %v1635_v39 = vrot.slane %v1627_v33, %v10107_v15  ;;  %v1642_v40 = vrot.slane %v1628_v34, %v10107_v15  ;;  %v10237_v31 = vld [vmem:[#allocation11 + $0x164] ss:$16 sps:$4 sm:$0xff]   ;;  %v10239_v32 = vld [vmem:[#allocation11 + $0x16c] ss:$16 sps:$4 sm:$0xff]   ;;  %v10243_v33 = vld [vmem:[#allocation11 + $0x160] ss:$16 sps:$4 sm:$0xff]  }
 0x2a1   :  { %v10245_v34 = vld [vmem:[#allocation11 + $0x168] ss:$16 sps:$4 sm:$0xff]   ;;  %v10249_v35 = vld [vmem:[#allocation11 + $0x184] ss:$16 sps:$4 sm:$0xff]   ;;  %v10251_v36 = vld [vmem:[#allocation11 + $0x18c] ss:$16 sps:$4 sm:$0xff]  }
 0x2a2   :  { %v1643_v41 = vcombine.low %v1635_v39, %v1642_v40  ;;  %v10255_v37 = vld [vmem:[#allocation11 + $0x180] ss:$16 sps:$4 sm:$0xff]   ;;  %v10257_v38 = vld [vmem:[#allocation11 + $0x188] ss:$16 sps:$4 sm:$0xff]   ;;  %v10261_v39 = vld [vmem:[#allocation11 + $0x1a4] ss:$16 sps:$4 sm:$0xff]  }
 0x2a3   :  { %v10263_v40 = vld [vmem:[#allocation11 + $0x1ac] ss:$16 sps:$4 sm:$0xff]  }
 0x2a4   :  { %v1650_v42 = vrot.slane %v1643_v41, %v10107_v15  ;;  %v10267_v41 = vld [vmem:[#allocation11 + $0x1a0] ss:$16 sps:$4 sm:$0xff]  }
 0x2a6   :  { %v1652_v44 = vadd.f32 %v1650_v42, %v1347_v43  ;;  %v10269_v42 = vld [vmem:[#allocation11 + $0x1a8] ss:$16 sps:$4 sm:$0xff]   ;;  %v10273_v43 = vld [vmem:[#allocation11 + $0x1c4] ss:$16 sps:$4 sm:$0xff]  }
 0x2a8   :  { %v9306_v46 = vpop.eup %9305  ;;  %v7891_v47 = vmul.f32 -1.442695, %v1652_v44  ;;  %v1660_v48 = vrot.slane %v1652_v44, 1  ;;  %v1671_v53 = vrot.slane %v1652_v44, 3  ;;  %v1668_v57 = vrot.slane %v1652_v44, 2 }
 0x2a9   :  { %v1340_v49 = vmul.f32 %v9306_v46, %v9304_v45  ;;  %v10275_v44 = vld [vmem:[#allocation11 + $0x1cc] ss:$16 sps:$4 sm:$0xff]   ;;  %v10279_v45 = vld [vmem:[#allocation11 + $0x1c0] ss:$16 sps:$4 sm:$0xff]   ;;  %v10281_v46 = vld [vmem:[#allocation11 + $0x1c8] ss:$16 sps:$4 sm:$0xff]  }
 0x2aa   :  { %9307 = vpow2.f32 %v7891_v47  ;;  %v7892_v50 = vmul.f32 -1.442695, %v1660_v48  ;;  %v7893_v55 = vmul.f32 -1.442695, %v1671_v53  ;;  %v10285_v47 = vld [vmem:[#allocation11 + $0x1e4] ss:$16 sps:$4 sm:$0xff]  }
 0x2ab   :  { %1341 = vst [vmem:[#allocation15 + $0x1] sm:$0x1] %v1340_v49  ;;  %1343 = vst [vmem:[#allocation4] sm:$0x1] %v1340_v49  ;;  %v10287_v48 = vld [vmem:[#allocation11 + $0x1ec] ss:$16 sps:$4 sm:$0xff]  }
 0x2ac   :  { %9309 = vpow2.f32 %v7892_v50  ;;  %v10291_v49 = vld [vmem:[#allocation11 + $0x1e0] ss:$16 sps:$4 sm:$0xff]   ;;  %v10293_v50 = vld [vmem:[#allocation11 + $0x1e8] ss:$16 sps:$4 sm:$0xff]  }
 0x2ad   :  { %9311 = vpow2.f32 %v7893_v55  ;;  %v10299_v55 = vld [vmem:[#allocation11 + $0x204] ss:$16 sps:$4 sm:$0xff]  }
 0x2b2   :  { %v1686_v54 = vld [vmem:[#allocation15 + $0x1] sm:$0x1] }
 0x2b3   :  { %1689 = vst.msk [vmem:[#allocation5 + $0x1] sm:$0x1] %vm10054_vm0, %v1686_v54 }
 0x2b4   :  { %v9308_v56 = vpop.eup %9307 }
 0x2b5   :  { %v1656_v58 = vadd.f32 1.0, %v9308_v56  ;;  %v10301_v56 = vld [vmem:[#allocation11 + $0x20c] ss:$16 sps:$4 sm:$0xff]  }
 0x2b6   :  { %v9310_v59 = vpop.eup %9309 }
 0x2b7   :  { %9313 = vrcp.f32 %v1656_v58  ;;  %v1665_v60 = vadd.f32 1.0, %v9310_v59  ;;  %v9312_v61 = vpop.eup %9311  ;;  %v10305_v58 = vld [vmem:[#allocation11 + $0x208] ss:$16 sps:$4 sm:$0xff]   ;;  %v10311_v59 = vld [vmem:[#allocation11 + $0x224] ss:$16 sps:$4 sm:$0xff]  }
 0x2b8   :  { %9315 = vtanh.f32 %v1668_v57  ;;  %v1676_v11 = vadd.f32 1.0, %v9312_v61  ;;  %v10303_v57 = vld [vmem:[#allocation11 + $0x200] ss:$16 sps:$4 sm:$0xff]  }
 0x2b9   :  { %9317 = vrcp.f32 %v1665_v60  ;;  %v10313_v60 = vld [vmem:[#allocation11 + $0x22c] ss:$16 sps:$4 sm:$0xff]   ;;  %v10315_v61 = vld [vmem:[#allocation11 + $0x220] ss:$16 sps:$4 sm:$0xff]  }
 0x2ba   :  { %9319 = vrcp.f32 %v1676_v11  ;;  %11787 = vst [vmem:[#allocation23_spill] sm:$0xff] %v10315_v61  ;;  %v10329_v11 = vld [vmem:[#allocation11 + $0x248] ss:$16 sps:$4 sm:$0xff]  }
 0x2bb   :  { %11792 = vst [vmem:[#allocation28_spill] sm:$0xff] %v10329_v11 }
 0x2c1   :  { %v9314_v62 = vpop.eup %9313 }
 0x2c2   :  { %v9316_v63 = vpop.eup %9315 }
 0x2c3   :  { %v9318_v2 = vpop.eup %9317  ;;  %v1680_v19 = vmul.f32 %v9316_v63, %v9314_v62  ;;  %v10317_v62 = vld [vmem:[#allocation11 + $0x228] ss:$16 sps:$4 sm:$0xff]   ;;  %v10323_v63 = vld [vmem:[#allocation11 + $0x244] ss:$16 sps:$4 sm:$0xff]  }
 0x2c4   :  { %v1679_v16 = vmul.f32 %v9318_v2, %v1345_v1  ;;  %v9320_v17 = vpop.eup %9319  ;;  %11788 = vst [vmem:[#allocation24_spill] sm:$0xff] %v10317_v62  ;;  %11789 = vst [vmem:[#allocation25_spill] sm:$0xff] %v10323_v63  ;;  %v10325_v2 = vld [vmem:[#allocation11 + $0x24c] ss:$16 sps:$4 sm:$0xff]   ;;  %v10327_v1 = vld [vmem:[#allocation11 + $0x240] ss:$16 sps:$4 sm:$0xff]  }
 0x2c5   :  { %11790 = vst [vmem:[#allocation26_spill] sm:$0xff] %v10325_v2  ;;  %11791 = vst [vmem:[#allocation27_spill] sm:$0xff] %v10327_v1 }
 0x2c6   :  { %v1681_v22 = vadd.f32 %v1680_v19, %v1679_v16  ;;  %v10335_v16 = vld [vmem:[#allocation11 + $0x264] ss:$16 sps:$4 sm:$0xff]   ;;  %v10337_v19 = vld [vmem:[#allocation11 + $0x26c] ss:$16 sps:$4 sm:$0xff]  }
 0x2c7   :  { %11793 = vst [vmem:[#allocation29_spill] sm:$0xff] %v10335_v16  ;;  %11794 = vst [vmem:[#allocation30_spill] sm:$0xff] %v10337_v19 }
 0x2c8   :  { %9321 = vtanh.f32 %v1681_v22  ;;  %1685 = vst [vmem:[#allocation17] sm:$0x1] %v1681_v22  ;;  %v10339_v22 = vld [vmem:[#allocation11 + $0x260] ss:$16 sps:$4 sm:$0xff]  }
 0x2c9   :  { %11795 = vst [vmem:[#allocation31_spill] sm:$0xff] %v10339_v22 }
 0x2d2   :  { %v9322_v13 = vpop.eup %9321 }
 0x2d3   :  { %v1683_v20 = vmul.f32 %v9322_v13, %v9320_v17  ;;  %v10341_v17 = vld [vmem:[#allocation11 + $0x268] ss:$16 sps:$4 sm:$0xff]   ;;  %v10347_v13 = vld [vmem:[#allocation11 + $0x284] ss:$16 sps:$4 sm:$0xff]  }
 0x2d4   :  { %11796 = vst [vmem:[#allocation32_spill] sm:$0xff] %v10341_v17  ;;  %11797 = vst [vmem:[#allocation33_spill] sm:$0xff] %v10347_v13 }
 0x2d5   :  { %1684 = vst [vmem:[#allocation15] sm:$0x1] %v1683_v20  ;;  %1688 = vst.msk [vmem:[#allocation5] sm:$0x1] %vm10054_vm0, %v1683_v20  ;;  %v10349_v20 = vld [vmem:[#allocation11 + $0x28c] ss:$16 sps:$4 sm:$0xff]  }
 0x2d6   :  { %11798 = vst [vmem:[#allocation34_spill] sm:$0xff] %v10349_v20 }
 0x2dc   :  { %v1690_v23 = vld [vmem:[#allocation5] sm:$0x3]  ;;  %v2219_v53 = vld [vmem:[#allocation15] sm:$0x1] }
 0x2dd   :  { %v1699_v9 = vrot.slane %v1690_v23, %v10099_v0  ;;  %v1695_v6 = vrot.slane %v1690_v23, %v10092_v21  ;;  %v2223_v54 = vpack.c.bf16 %v2219_v53, %v2219_v53  ;;  %v10351_v23 = vld [vmem:[#allocation11 + $0x280] ss:$16 sps:$4 sm:$0xff]   ;;  %v10365_v53 = vld [vmem:[#allocation11 + $0x2a8] ss:$16 sps:$4 sm:$0xff]  }
 0x2de   :  { %11799 = vst [vmem:[#allocation35_spill] sm:$0xff] %v10351_v23  ;;  %11804 = vst [vmem:[#allocation40_spill] sm:$0xff] %v10365_v53 }
 0x2df   :  { %v1703_v5 = vpack.c.bf16 %v1699_v9, %v1699_v9  ;;  %v1702_v3 = vpack.c.bf16 %v1695_v6, %v1695_v6  ;;  %v10353_v9 = vld [vmem:[#allocation11 + $0x288] ss:$16 sps:$4 sm:$0xff]   ;;  %v10359_v6 = vld [vmem:[#allocation11 + $0x2a4] ss:$16 sps:$4 sm:$0xff]  }
 0x2e0   :  { %11800 = vst [vmem:[#allocation36_spill] sm:$0xff] %v10353_v9  ;;  %11801 = vst [vmem:[#allocation37_spill] sm:$0xff] %v10359_v6 }
 0x2e1   :  { %2142 = vmatprep.mubr.bf16.mxu0 %v1703_v5  ;;  %2183 = vmatprep.mubr.bf16.mxu1 %v1703_v5  ;;  %v10361_v5 = vld [vmem:[#allocation11 + $0x2ac] ss:$16 sps:$4 sm:$0xff]  }
 0x2e2   :  { %2143 = vmatmul.mubr.bf16.vlgmr.msra.gmra.mrb[16].mxu0 %v1702_v3  ;;  %2184 = vmatmul.mubr.bf16.vlgmr.msra.gmra.mrb[16].mxu1 %v1702_v3  ;;  %11802 = vst [vmem:[#allocation38_spill] sm:$0xff] %v10361_v5  ;;  %v10363_v3 = vld [vmem:[#allocation11 + $0x2a0] ss:$16 sps:$4 sm:$0xff]  }
 0x2e3   :  { %2417 = vmatpush1.bf16.msra.mxu0 %v10207_v12  ;;  %2458 = vmatpush1.bf16.msra.mxu1 %v10209_v4  ;;  %11803 = vst [vmem:[#allocation39_spill] sm:$0xff] %v10363_v3 }
 0x2e4   :  { %2418 = vmatprep.subr.bf16.mxu0 %v10211_v7  ;;  %2459 = vmatprep.subr.bf16.mxu1 %v10213_v8 }
 0x2e5   :  { %2448 = vmatprep.mubr.bf16.mxu0 %v11759_v10  ;;  %2489 = vmatprep.mubr.bf16.mxu1 %v11759_v10 }
 0x2e7   :  { %2419 = vmatpush1.bf16.msra.mxu0 %v10217_v25  ;;  %2460 = vmatpush1.bf16.msra.mxu1 %v10219_v26 }
 0x2e8   :  { %2420 = vmatprep.subr.bf16.mxu0 %v10223_v27  ;;  %2461 = vmatprep.subr.bf16.mxu1 %v10225_v28 }
 0x2eb   :  { %2421 = vmatpush1.bf16.msra.mxu0 %v10231_v29  ;;  %2462 = vmatpush1.bf16.msra.mxu1 %v10233_v30 }
 0x2ec   :  { %2422 = vmatprep.subr.bf16.mxu0 %v10237_v31  ;;  %2463 = vmatprep.subr.bf16.mxu1 %v10239_v32 }
 0x2ef   :  { %2423 = vmatpush1.bf16.msra.mxu0 %v10243_v33  ;;  %2464 = vmatpush1.bf16.msra.mxu1 %v10245_v34 }
 0x2f0   :  { %2424 = vmatprep.subr.bf16.mxu0 %v10249_v35  ;;  %2465 = vmatprep.subr.bf16.mxu1 %v10251_v36 }
 0x2f3   :  { %2425 = vmatpush1.bf16.msra.mxu0 %v10255_v37  ;;  %2466 = vmatpush1.bf16.msra.mxu1 %v10257_v38 }
 0x2f4   :  { %2426 = vmatprep.subr.bf16.mxu0 %v10261_v39  ;;  %2467 = vmatprep.subr.bf16.mxu1 %v10263_v40 }
 0x2f7   :  { %2427 = vmatpush1.bf16.msra.mxu0 %v10267_v41  ;;  %2468 = vmatpush1.bf16.msra.mxu1 %v10269_v42 }
 0x2f8   :  { %2428 = vmatprep.subr.bf16.mxu0 %v10273_v43  ;;  %2469 = vmatprep.subr.bf16.mxu1 %v10275_v44 }
 0x2fb   :  { %2429 = vmatpush1.bf16.msra.mxu0 %v10279_v45  ;;  %2470 = vmatpush1.bf16.msra.mxu1 %v10281_v46 }
 0x2fc   :  { %2430 = vmatprep.subr.bf16.mxu0 %v10285_v47  ;;  %2471 = vmatprep.subr.bf16.mxu1 %v10287_v48 }
 0x2ff   :  { %2431 = vmatpush1.bf16.msra.mxu0 %v10291_v49  ;;  %2472 = vmatpush1.bf16.msra.mxu1 %v10293_v50 }
 0x300   :  { %2985 = vmatprep.subr.bf16.mxu0 %v10299_v55  ;;  %3026 = vmatprep.subr.bf16.mxu1 %v10301_v56 }
 0x302   :  { %2449 = vmatmul.mubr.bf16.vlgmr.msra.gmra.mrb[20].mxu0 %v2223_v54  ;;  %2490 = vmatmul.mubr.bf16.vlgmr.msra.gmra.mrb[20].mxu1 %v2223_v54  ;;  %v10371_v54 = vld [vmem:[#allocation11 + $0x2c4] ss:$16 sps:$4 sm:$0xff]  }
 0x303   :  { %2986 = vmatpush1.bf16.msra.mxu0 %v10303_v57  ;;  %3027 = vmatpush1.bf16.msra.mxu1 %v10305_v58  ;;  %11805 = vst [vmem:[#allocation41_spill] sm:$0xff] %v10371_v54 }
 0x304   :  { %2987 = vmatprep.subr.bf16.mxu0 %v10311_v59  ;;  %3028 = vmatprep.subr.bf16.mxu1 %v10313_v60 }
 0x307   :  { %2988 = vmatpush1.bf16.msra.mxu0 %v10315_v61  ;;  %3029 = vmatpush1.bf16.msra.mxu1 %v10317_v62 }
 0x308   :  { %2989 = vmatprep.subr.bf16.mxu0 %v10323_v63  ;;  %3030 = vmatprep.subr.bf16.mxu1 %v10325_v2 }
 0x30b   :  { %2990 = vmatpush1.bf16.msra.mxu0 %v10327_v1  ;;  %3031 = vmatpush1.bf16.msra.mxu1 %v10329_v11 }
 0x30c   :  { %2991 = vmatprep.subr.bf16.mxu0 %v10335_v16  ;;  %3032 = vmatprep.subr.bf16.mxu1 %v10337_v19 }
 0x30f   :  { %2992 = vmatpush1.bf16.msra.mxu0 %v10339_v22  ;;  %3033 = vmatpush1.bf16.msra.mxu1 %v10341_v17 }
 0x310   :  { %2993 = vmatprep.subr.bf16.mxu0 %v10347_v13  ;;  %3034 = vmatprep.subr.bf16.mxu1 %v10349_v20  ;;  %v10377_v20 = vld [vmem:[#allocation11 + $0x2c8] ss:$16 sps:$4 sm:$0xff]   ;;  %v10465_v13 = vld [vmem:[#allocation11 + $0x3c4] ss:$16 sps:$4 sm:$0xff]  }
 0x311   :  { %11808 = vst [vmem:[#allocation45_spill] sm:$0xff] %v10377_v20  ;;  %11837 = vst [vmem:[#allocation73_spill] sm:$0xff] %v10465_v13 }
 0x313   :  { %2994 = vmatpush1.bf16.msra.mxu0 %v10351_v23  ;;  %3035 = vmatpush1.bf16.msra.mxu1 %v10353_v9  ;;  %v10373_v23 = vld [vmem:[#allocation11 + $0x2cc] ss:$16 sps:$4 sm:$0xff]   ;;  %v10375_v9 = vld [vmem:[#allocation11 + $0x2c0] ss:$16 sps:$4 sm:$0xff]  }
 0x314   :  { %2995 = vmatprep.subr.bf16.mxu0 %v10359_v6  ;;  %3036 = vmatprep.subr.bf16.mxu1 %v10361_v5  ;;  %11806 = vst [vmem:[#allocation42_spill] sm:$0xff] %v10373_v23  ;;  %11807 = vst [vmem:[#allocation43_spill] sm:$0xff] %v10375_v9  ;;  %v10383_v5 = vld [vmem:[#allocation11 + $0x2e4] ss:$16 sps:$4 sm:$0xff]   ;;  %v10389_v6 = vld [vmem:[#allocation11 + $0x2e8] ss:$16 sps:$4 sm:$0xff]  }
 0x315   :  { %11809 = vst [vmem:[#allocation47_spill] sm:$0xff] %v10383_v5  ;;  %11812 = vst [vmem:[#allocation49_spill] sm:$0xff] %v10389_v6 }
 0x317   :  { %2996 = vmatpush1.bf16.msra.mxu0 %v10363_v3  ;;  %3037 = vmatpush1.bf16.msra.mxu1 %v10365_v53  ;;  %v10385_v3 = vld [vmem:[#allocation11 + $0x2ec] ss:$16 sps:$4 sm:$0xff]   ;;  %v10387_v53 = vld [vmem:[#allocation11 + $0x2e0] ss:$16 sps:$4 sm:$0xff]  }
 0x318   :  { %2997 = vmatprep.subr.bf16.mxu0 %v10371_v54  ;;  %3038 = vmatprep.subr.bf16.mxu1 %v10373_v23  ;;  %11810 = vst [vmem:[#allocation44_spill] sm:$0xff] %v10385_v3  ;;  %11811 = vst [vmem:[#allocation46_spill] sm:$0xff] %v10387_v53  ;;  %v10395_v23 = vld [vmem:[#allocation11 + $0x304] ss:$16 sps:$4 sm:$0xff]   ;;  %v10401_v54 = vld [vmem:[#allocation11 + $0x308] ss:$16 sps:$4 sm:$0xff]  }
 0x319   :  { %11813 = vst [vmem:[#allocation48_spill] sm:$0xff] %v10395_v23  ;;  %11816 = vst [vmem:[#allocation52_spill] sm:$0xff] %v10401_v54 }
 0x31b   :  { %2998 = vmatpush1.bf16.msra.mxu0 %v10375_v9  ;;  %3039 = vmatpush1.bf16.msra.mxu1 %v10377_v20  ;;  %v10397_v9 = vld [vmem:[#allocation11 + $0x30c] ss:$16 sps:$4 sm:$0xff]   ;;  %v10399_v20 = vld [vmem:[#allocation11 + $0x300] ss:$16 sps:$4 sm:$0xff]  }
 0x31c   :  { %2999 = vmatprep.subr.bf16.mxu0 %v10383_v5  ;;  %3040 = vmatprep.subr.bf16.mxu1 %v10385_v3  ;;  %11814 = vst [vmem:[#allocation50_spill] sm:$0xff] %v10397_v9  ;;  %11815 = vst [vmem:[#allocation51_spill] sm:$0xff] %v10399_v20  ;;  %v10407_v3 = vld [vmem:[#allocation11 + $0x324] ss:$16 sps:$4 sm:$0xff]   ;;  %v10413_v5 = vld [vmem:[#allocation11 + $0x328] ss:$16 sps:$4 sm:$0xff]  }
 0x31d   :  { %11817 = vst [vmem:[#allocation53_spill] sm:$0xff] %v10407_v3  ;;  %11820 = vst [vmem:[#allocation56_spill] sm:$0xff] %v10413_v5 }
 0x31f   :  { %3000 = vmatpush1.bf16.msra.mxu0 %v10387_v53  ;;  %3041 = vmatpush1.bf16.msra.mxu1 %v10389_v6  ;;  %v10409_v53 = vld [vmem:[#allocation11 + $0x32c] ss:$16 sps:$4 sm:$0xff]   ;;  %v10411_v6 = vld [vmem:[#allocation11 + $0x320] ss:$16 sps:$4 sm:$0xff]  }
 0x320   :  { %3001 = vmatprep.subr.bf16.mxu0 %v10395_v23  ;;  %3042 = vmatprep.subr.bf16.mxu1 %v10397_v9  ;;  %11818 = vst [vmem:[#allocation54_spill] sm:$0xff] %v10409_v53  ;;  %11819 = vst [vmem:[#allocation55_spill] sm:$0xff] %v10411_v6  ;;  %v10419_v9 = vld [vmem:[#allocation11 + $0x344] ss:$16 sps:$4 sm:$0xff]   ;;  %v10425_v23 = vld [vmem:[#allocation11 + $0x348] ss:$16 sps:$4 sm:$0xff]  }
 0x321   :  { %11821 = vst [vmem:[#allocation57_spill] sm:$0xff] %v10419_v9  ;;  %11824 = vst [vmem:[#allocation60_spill] sm:$0xff] %v10425_v23 }
 0x323   :  { %3002 = vmatpush1.bf16.msra.mxu0 %v10399_v20  ;;  %3043 = vmatpush1.bf16.msra.mxu1 %v10401_v54  ;;  %v10421_v20 = vld [vmem:[#allocation11 + $0x34c] ss:$16 sps:$4 sm:$0xff]   ;;  %v10423_v54 = vld [vmem:[#allocation11 + $0x340] ss:$16 sps:$4 sm:$0xff]  }
 0x324   :  { %3003 = vmatprep.subr.bf16.mxu0 %v10407_v3  ;;  %3044 = vmatprep.subr.bf16.mxu1 %v10409_v53  ;;  %11822 = vst [vmem:[#allocation58_spill] sm:$0xff] %v10421_v20  ;;  %11823 = vst [vmem:[#allocation59_spill] sm:$0xff] %v10423_v54  ;;  %v10431_v53 = vld [vmem:[#allocation11 + $0x364] ss:$16 sps:$4 sm:$0xff]   ;;  %v10437_v3 = vld [vmem:[#allocation11 + $0x368] ss:$16 sps:$4 sm:$0xff]  }
 0x325   :  { %11825 = vst [vmem:[#allocation61_spill] sm:$0xff] %v10431_v53  ;;  %11828 = vst [vmem:[#allocation64_spill] sm:$0xff] %v10437_v3 }
 0x327   :  { %3004 = vmatpush1.bf16.msra.mxu0 %v10411_v6  ;;  %3045 = vmatpush1.bf16.msra.mxu1 %v10413_v5  ;;  %v10433_v6 = vld [vmem:[#allocation11 + $0x36c] ss:$16 sps:$4 sm:$0xff]   ;;  %v10435_v5 = vld [vmem:[#allocation11 + $0x360] ss:$16 sps:$4 sm:$0xff]  }
 0x328   :  { %3005 = vmatprep.subr.bf16.mxu0 %v10419_v9  ;;  %3046 = vmatprep.subr.bf16.mxu1 %v10421_v20  ;;  %11826 = vst [vmem:[#allocation62_spill] sm:$0xff] %v10433_v6  ;;  %11827 = vst [vmem:[#allocation63_spill] sm:$0xff] %v10435_v5  ;;  %v10443_v20 = vld [vmem:[#allocation11 + $0x384] ss:$16 sps:$4 sm:$0xff]   ;;  %v10449_v9 = vld [vmem:[#allocation11 + $0x388] ss:$16 sps:$4 sm:$0xff]  }
 0x329   :  { %11829 = vst [vmem:[#allocation65_spill] sm:$0xff] %v10443_v20  ;;  %11832 = vst [vmem:[#allocation68_spill] sm:$0xff] %v10449_v9 }
 0x32b   :  { %3006 = vmatpush1.bf16.msra.mxu0 %v10423_v54  ;;  %3047 = vmatpush1.bf16.msra.mxu1 %v10425_v23  ;;  %v10445_v54 = vld [vmem:[#allocation11 + $0x38c] ss:$16 sps:$4 sm:$0xff]   ;;  %v10447_v23 = vld [vmem:[#allocation11 + $0x380] ss:$16 sps:$4 sm:$0xff]  }
 0x32c   :  { %3007 = vmatprep.subr.bf16.mxu0 %v10431_v53  ;;  %3048 = vmatprep.subr.bf16.mxu1 %v10433_v6  ;;  %11830 = vst [vmem:[#allocation66_spill] sm:$0xff] %v10445_v54  ;;  %11831 = vst [vmem:[#allocation67_spill] sm:$0xff] %v10447_v23  ;;  %v10455_v6 = vld [vmem:[#allocation11 + $0x3a4] ss:$16 sps:$4 sm:$0xff]   ;;  %v10461_v53 = vld [vmem:[#allocation11 + $0x3a8] ss:$16 sps:$4 sm:$0xff]  }
 0x32d   :  { %11833 = vst [vmem:[#allocation69_spill] sm:$0xff] %v10455_v6  ;;  %11836 = vst [vmem:[#allocation72_spill] sm:$0xff] %v10461_v53 }
 0x32f   :  { %3008 = vmatpush1.bf16.msra.mxu0 %v10435_v5  ;;  %3049 = vmatpush1.bf16.msra.mxu1 %v10437_v3  ;;  %v10457_v5 = vld [vmem:[#allocation11 + $0x3ac] ss:$16 sps:$4 sm:$0xff]   ;;  %v10459_v3 = vld [vmem:[#allocation11 + $0x3a0] ss:$16 sps:$4 sm:$0xff]  }
 0x330   :  { %3009 = vmatprep.subr.bf16.mxu0 %v10443_v20  ;;  %3050 = vmatprep.subr.bf16.mxu1 %v10445_v54  ;;  %11834 = vst [vmem:[#allocation70_spill] sm:$0xff] %v10457_v5  ;;  %11835 = vst [vmem:[#allocation71_spill] sm:$0xff] %v10459_v3  ;;  %v10467_v20 = vld [vmem:[#allocation11 + $0x3cc] ss:$16 sps:$4 sm:$0xff]   ;;  %v10477_v54 = vld [vmem:[#allocation11 + $0x3e4] ss:$16 sps:$4 sm:$0xff]  }
 0x331   :  { %11838 = vst [vmem:[#allocation74_spill] sm:$0xff] %v10467_v20  ;;  %11841 = vst [vmem:[#allocation77_spill] sm:$0xff] %v10477_v54 }
 0x333   :  { %3010 = vmatpush1.bf16.msra.mxu0 %v10447_v23  ;;  %3051 = vmatpush1.bf16.msra.mxu1 %v10449_v9  ;;  %v10471_v9 = vld [vmem:[#allocation11 + $0x3c0] ss:$16 sps:$4 sm:$0xff]   ;;  %v10473_v23 = vld [vmem:[#allocation11 + $0x3c8] ss:$16 sps:$4 sm:$0xff]  }
 0x334   :  { %3011 = vmatprep.subr.bf16.mxu0 %v10455_v6  ;;  %3052 = vmatprep.subr.bf16.mxu1 %v10457_v5  ;;  %11839 = vst [vmem:[#allocation75_spill] sm:$0xff] %v10471_v9  ;;  %11840 = vst [vmem:[#allocation76_spill] sm:$0xff] %v10473_v23  ;;  %v10479_v6 = vld [vmem:[#allocation11 + $0x3ec] ss:$16 sps:$4 sm:$0xff]   ;;  %v10483_v5 = vld [vmem:[#allocation11 + $0x3e0] ss:$16 sps:$4 sm:$0xff]  }
 0x335   :  { %11842 = vst [vmem:[#allocation78_spill] sm:$0xff] %v10479_v6  ;;  %11843 = vst [vmem:[#allocation79_spill] sm:$0xff] %v10483_v5 }
 0x337   :  { %3012 = vmatpush1.bf16.msra.mxu0 %v10459_v3  ;;  %3053 = vmatpush1.bf16.msra.mxu1 %v10461_v53  ;;  %v10485_v3 = vld [vmem:[#allocation11 + $0x3e8] ss:$16 sps:$4 sm:$0xff]  }
 0x338   :  { %3013 = vmatprep.subr.bf16.mxu0 %v10465_v13  ;;  %3054 = vmatprep.subr.bf16.mxu1 %v10467_v20  ;;  %11844 = vst [vmem:[#allocation80_spill] sm:$0xff] %v10485_v3 }
 0x33b   :  { %3014 = vmatpush1.bf16.msra.mxu0 %v10471_v9  ;;  %3055 = vmatpush1.bf16.msra.mxu1 %v10473_v23  ;;  %v7894_v23 = vld [vmem:[%s11517_s3 + $0x4] sm:$0xf] }
 0x33c   :  { %3015 = vmatprep.subr.bf16.mxu0 %v10477_v54  ;;  %3056 = vmatprep.subr.bf16.mxu1 %v10479_v6  ;;  %v2093_v9 = vrot.slane %v7894_v23, %v10092_v21  ;;  %v2097_v20 = vrot.slane %v7894_v23, %v10099_v0  ;;  %v2105_v11 = vrot.slane %v7894_v23, %v11785_v24 }
 0x33d   :  { %v2101_v2 = vrot.slane %v7894_v23, %v11786_v14 }
 0x33f   :  { %3016 = vmatpush1.bf16.msra.mxu0 %v10483_v5  ;;  %3057 = vmatpush1.bf16.msra.mxu1 %v10485_v3 }
 0x340   :  { %3291 = vmatprep.subr.bf16.mxu0 %v10185_v51  ;;  %3332 = vmatprep.subr.bf16.mxu1 %v10187_v52 }
 0x3b5   :  { %v2144_v13 = vpop.f32.mrb[16].mxu0  ;;  %v2185_v54 = vpop.f32.mrb[16].mxu1 }
 0x3b6   :  { %v2145_v53 = vadd.f32 %v2144_v13, %v2093_v9  ;;  %v2146_v6 = vpop.f32.mrb[17].mxu0  ;;  %v2187_v17 = vpop.f32.mrb[17].mxu1  ;;  %v2186_v62 = vadd.f32 %v2185_v54, %v2101_v2 }
 0x3b7   :  { %v2147_v5 = vadd.f32 %v2146_v6, %v2097_v20  ;;  %v2148_v22 = vpop.f32.mrb[18].mxu0  ;;  %v2189_v3 = vpop.f32.mrb[18].mxu1  ;;  %v2188_v1 = vadd.f32 %v2187_v17, %v2105_v11 }
 0x3b8   :  { %v7959_v19 = vmul.f32 -1.442695, %v2145_v53  ;;  %v2149_v51 = vpop.f32.mrb[19].mxu0  ;;  %v2190_v16 = vpop.f32.mrb[19].mxu1 }
 0x3b9   :  { %v7960_v52 = vmul.f32 -1.442695, %v2147_v5  ;;  %v7961_v63 = vmul.f32 -1.442695, %v2188_v1 }
 0x3ba   :  { %9323 = vpow2.f32 %v7959_v19  ;;  %v1687_v19 = vld [vmem:[#allocation17 + $0x1] sm:$0x1] }
 0x3bb   :  { %9325 = vpow2.f32 %v7960_v52 }
 0x3bc   :  { %9327 = vpow2.f32 %v7961_v63 }
 0x3bd   :  { %9329 = vtanh.f32 %v2186_v62 }
 0x3c4   :  { %v9324_v61 = vpop.eup %9323 }
 0x3c5   :  { %v9326_v13 = vpop.eup %9325  ;;  %v2195_v9 = vadd.f32 1.0, %v9324_v61 }
 0x3c6   :  { %v2201_v22 = vadd.f32 1.0, %v9326_v13  ;;  %v9328_v20 = vpop.eup %9327 }
 0x3c7   :  { %9331 = vrcp.f32 %v2195_v9  ;;  %v9330_v16 = vpop.eup %9329  ;;  %v2208_v53 = vadd.f32 1.0, %v9328_v20 }
 0x3c8   :  { %9333 = vrcp.f32 %v2201_v22 }
 0x3c9   :  { %9335 = vrcp.f32 %v2208_v53 }
 0x3d1   :  { %v9332_v6 = vpop.eup %9331 }
 0x3d2   :  { %v9334_v5 = vpop.eup %9333  ;;  %v2212_v3 = vmul.f32 %v9332_v6, %v9330_v16  ;;  %v2222_v6 = vld [vmem:[#allocation3 + $0x2] ss:$8 sm:$0xf] }
 0x3d3   :  { %v2211_v11 = vmul.f32 %v9334_v5, %v1687_v19 }
 0x3d5   :  { %v2213_v17 = vadd.f32 %v2212_v3, %v2211_v11  ;;  %v2450_v23 = vpop.f32.mrb[20].mxu0  ;;  %v2491_v1 = vpop.f32.mrb[20].mxu1 }
 0x3d6   :  { %v2452_v2 = vpop.f32.mrb[21].mxu0  ;;  %v2493_v54 = vpop.f32.mrb[21].mxu1 }
 0x3d7   :  { %9337 = vtanh.f32 %v2213_v17  ;;  %2217 = vst [vmem:[#allocation17 + $0x1] sm:$0x1] %v2213_v17  ;;  %v2502_v61 = vcombine.low %v2450_v23, %v2452_v2  ;;  %v2503_v62 = vcombine.low %v2491_v1, %v2493_v54  ;;  %v2454_v63 = vpop.f32.mrb[22].mxu0  ;;  %v2495_v51 = vpop.f32.mrb[22].mxu1 }
 0x3d8   :  { %v2455_v52 = vpop.f32.mrb[23].mxu0  ;;  %v2496_v13 = vpop.f32.mrb[23].mxu1 }
 0x3d9   :  { %v2510_v9 = vrot.slane %v2502_v61, %v10107_v15  ;;  %v2517_v22 = vrot.slane %v2503_v62, %v10107_v15  ;;  %v9336_v3 = vpop.eup %9335 }
 0x3db   :  { %v2518_v20 = vcombine.low %v2510_v9, %v2517_v22 }
 0x3dd   :  { %v2525_v16 = vrot.slane %v2518_v20, %v10107_v15 }
 0x3df   :  { %v2527_v5 = vadd.f32 %v2525_v16, %v2222_v6  ;;  %v2220_v16 = vld [vmem:[#allocation17] sm:$0x1] }
 0x3e1   :  { %v9338_v19 = vpop.eup %9337  ;;  %v7994_v53 = vmul.f32 -1.442695, %v2527_v5  ;;  %v2535_v11 = vrot.slane %v2527_v5, 1  ;;  %v2546_v1 = vrot.slane %v2527_v5, 3  ;;  %v2543_v62 = vrot.slane %v2527_v5, 2 }
 0x3e2   :  { %v2215_v17 = vmul.f32 %v9338_v19, %v9336_v3 }
 0x3e3   :  { %9339 = vpow2.f32 %v7994_v53  ;;  %v7995_v23 = vmul.f32 -1.442695, %v2535_v11  ;;  %v7996_v54 = vmul.f32 -1.442695, %v2546_v1 }
 0x3e4   :  { %2216 = vst [vmem:[#allocation15 + $0x1] sm:$0x1] %v2215_v17  ;;  %2218 = vst [vmem:[#allocation4 + $0x1] sm:$0x1] %v2215_v17 }
 0x3e5   :  { %9341 = vpow2.f32 %v7995_v23 }
 0x3e6   :  { %9343 = vpow2.f32 %v7996_v54 }
 0x3eb   :  { %v2561_v2 = vld [vmem:[#allocation15 + $0x1] sm:$0x1] }
 0x3ec   :  { %2564 = vst.msk [vmem:[#allocation5 + $0x1] sm:$0x1] %vm10054_vm0, %v2561_v2 }
 0x3ed   :  { %v9340_v61 = vpop.eup %9339 }
 0x3ee   :  { %v2531_v63 = vadd.f32 1.0, %v9340_v61 }
 0x3ef   :  { %v9342_v51 = vpop.eup %9341 }
 0x3f0   :  { %9345 = vrcp.f32 %v2531_v63  ;;  %v2540_v52 = vadd.f32 1.0, %v9342_v51  ;;  %v9344_v13 = vpop.eup %9343  ;;  %v11880_v63 = vld [vmem:[#allocation58_spill] sm:$0xff]  ;;  %v11881_v51 = vld [vmem:[#allocation59_spill] sm:$0xff] }
 0x3f1   :  { %9347 = vtanh.f32 %v2543_v62  ;;  %v2551_v6 = vadd.f32 1.0, %v9344_v13  ;;  %v11879_v62 = vld [vmem:[#allocation57_spill] sm:$0xff] }
 0x3f2   :  { %9349 = vrcp.f32 %v2540_v52  ;;  %v11882_v52 = vld [vmem:[#allocation60_spill] sm:$0xff]  ;;  %v11883_v13 = vld [vmem:[#allocation61_spill] sm:$0xff] }
 0x3f3   :  { %9351 = vrcp.f32 %v2551_v6  ;;  %v11888_v6 = vld [vmem:[#allocation66_spill] sm:$0xff] }
 0x3fa   :  { %v9346_v9 = vpop.eup %9345 }
 0x3fb   :  { %v9348_v22 = vpop.eup %9347 }
 0x3fc   :  { %v9350_v20 = vpop.eup %9349  ;;  %v2555_v19 = vmul.f32 %v9348_v22, %v9346_v9  ;;  %v11884_v9 = vld [vmem:[#allocation62_spill] sm:$0xff]  ;;  %v11885_v22 = vld [vmem:[#allocation63_spill] sm:$0xff] }
 0x3fd   :  { %v2554_v3 = vmul.f32 %v9350_v20, %v2220_v16  ;;  %v9352_v5 = vpop.eup %9351  ;;  %v11886_v20 = vld [vmem:[#allocation64_spill] sm:$0xff]  ;;  %v11887_v16 = vld [vmem:[#allocation65_spill] sm:$0xff] }
 0x3ff   :  { %v2556_v53 = vadd.f32 %v2555_v19, %v2554_v3  ;;  %v11889_v3 = vld [vmem:[#allocation67_spill] sm:$0xff]  ;;  %v11890_v19 = vld [vmem:[#allocation68_spill] sm:$0xff] }
 0x401   :  { %9353 = vtanh.f32 %v2556_v53  ;;  %2560 = vst [vmem:[#allocation17] sm:$0x1] %v2556_v53  ;;  %v11891_v53 = vld [vmem:[#allocation69_spill] sm:$0xff] }
 0x40b   :  { %v9354_v11 = vpop.eup %9353 }
 0x40c   :  { %v2558_v17 = vmul.f32 %v9354_v11, %v9352_v5  ;;  %v11892_v5 = vld [vmem:[#allocation70_spill] sm:$0xff]  ;;  %v11893_v11 = vld [vmem:[#allocation71_spill] sm:$0xff] }
 0x40e   :  { %2563 = vst.msk [vmem:[#allocation5] sm:$0x1] %vm10054_vm0, %v2558_v17  ;;  %2559 = vst [vmem:[#allocation15] sm:$0x1] %v2558_v17  ;;  %v11894_v17 = vld [vmem:[#allocation72_spill] sm:$0xff] }
 0x415   :  { %v2565_v23 = vld [vmem:[#allocation5] sm:$0x3] }
 0x416   :  { %v2574_v1 = vrot.slane %v2565_v23, %v10099_v0  ;;  %v2570_v2 = vrot.slane %v2565_v23, %v10092_v21  ;;  %v11895_v23 = vld [vmem:[#allocation73_spill] sm:$0xff] }
 0x418   :  { %v2578_v54 = vpack.c.bf16 %v2574_v1, %v2574_v1  ;;  %v2577_v61 = vpack.c.bf16 %v2570_v2, %v2570_v2  ;;  %v11896_v1 = vld [vmem:[#allocation74_spill] sm:$0xff]  ;;  %v11897_v2 = vld [vmem:[#allocation75_spill] sm:$0xff] }
 0x41a   :  { %3017 = vmatprep.mubr.bf16.mxu0 %v2578_v54  ;;  %3058 = vmatprep.mubr.bf16.mxu1 %v2578_v54  ;;  %v11898_v54 = vld [vmem:[#allocation76_spill] sm:$0xff] }
 0x41b   :  { %3018 = vmatmul.mubr.bf16.vlgmr.msra.gmra.mrb[24].mxu0 %v2577_v61  ;;  %3059 = vmatmul.mubr.bf16.vlgmr.msra.gmra.mrb[24].mxu1 %v2577_v61  ;;  %v11899_v61 = vld [vmem:[#allocation77_spill] sm:$0xff] }
 0x41c   :  { %3292 = vmatpush1.bf16.msra.mxu0 %v10207_v12  ;;  %3333 = vmatpush1.bf16.msra.mxu1 %v10209_v4  ;;  %v3094_v12 = vld [vmem:[#allocation15] sm:$0x1] }
 0x41d   :  { %3293 = vmatprep.subr.bf16.mxu0 %v10211_v7  ;;  %3334 = vmatprep.subr.bf16.mxu1 %v10213_v8  ;;  %v3098_v4 = vpack.c.bf16 %v3094_v12, %v3094_v12  ;;  %v11845_v7 = vld [vmem:[#allocation23_spill] sm:$0xff]  ;;  %v11846_v8 = vld [vmem:[#allocation24_spill] sm:$0xff]  ;;  %v11900_v12 = vld [vmem:[#allocation78_spill] sm:$0xff] }
 0x41e   :  { %3323 = vmatprep.mubr.bf16.mxu0 %v11759_v10  ;;  %3364 = vmatprep.mubr.bf16.mxu1 %v11759_v10 }
 0x420   :  { %3294 = vmatpush1.bf16.msra.mxu0 %v10217_v25  ;;  %3335 = vmatpush1.bf16.msra.mxu1 %v10219_v26  ;;  %v11847_v25 = vld [vmem:[#allocation25_spill] sm:$0xff]  ;;  %v11848_v26 = vld [vmem:[#allocation26_spill] sm:$0xff] }
 0x421   :  { %3295 = vmatprep.subr.bf16.mxu0 %v10223_v27  ;;  %3336 = vmatprep.subr.bf16.mxu1 %v10225_v28  ;;  %v11849_v27 = vld [vmem:[#allocation27_spill] sm:$0xff]  ;;  %v11850_v28 = vld [vmem:[#allocation28_spill] sm:$0xff] }
 0x424   :  { %3296 = vmatpush1.bf16.msra.mxu0 %v10231_v29  ;;  %3337 = vmatpush1.bf16.msra.mxu1 %v10233_v30  ;;  %v11851_v29 = vld [vmem:[#allocation29_spill] sm:$0xff]  ;;  %v11852_v30 = vld [vmem:[#allocation30_spill] sm:$0xff] }
 0x425   :  { %3297 = vmatprep.subr.bf16.mxu0 %v10237_v31  ;;  %3338 = vmatprep.subr.bf16.mxu1 %v10239_v32  ;;  %v11853_v31 = vld [vmem:[#allocation31_spill] sm:$0xff]  ;;  %v11854_v32 = vld [vmem:[#allocation32_spill] sm:$0xff] }
 0x428   :  { %3298 = vmatpush1.bf16.msra.mxu0 %v10243_v33  ;;  %3339 = vmatpush1.bf16.msra.mxu1 %v10245_v34  ;;  %v11855_v33 = vld [vmem:[#allocation33_spill] sm:$0xff]  ;;  %v11856_v34 = vld [vmem:[#allocation34_spill] sm:$0xff] }
 0x429   :  { %3299 = vmatprep.subr.bf16.mxu0 %v10249_v35  ;;  %3340 = vmatprep.subr.bf16.mxu1 %v10251_v36  ;;  %v11857_v35 = vld [vmem:[#allocation35_spill] sm:$0xff]  ;;  %v11858_v36 = vld [vmem:[#allocation36_spill] sm:$0xff] }
 0x42c   :  { %3300 = vmatpush1.bf16.msra.mxu0 %v10255_v37  ;;  %3341 = vmatpush1.bf16.msra.mxu1 %v10257_v38  ;;  %v11859_v37 = vld [vmem:[#allocation37_spill] sm:$0xff]  ;;  %v11860_v38 = vld [vmem:[#allocation38_spill] sm:$0xff] }
 0x42d   :  { %3301 = vmatprep.subr.bf16.mxu0 %v10261_v39  ;;  %3342 = vmatprep.subr.bf16.mxu1 %v10263_v40  ;;  %v11861_v39 = vld [vmem:[#allocation39_spill] sm:$0xff]  ;;  %v11862_v40 = vld [vmem:[#allocation40_spill] sm:$0xff] }
 0x430   :  { %3302 = vmatpush1.bf16.msra.mxu0 %v10267_v41  ;;  %3343 = vmatpush1.bf16.msra.mxu1 %v10269_v42  ;;  %v11863_v41 = vld [vmem:[#allocation41_spill] sm:$0xff]  ;;  %v11864_v42 = vld [vmem:[#allocation42_spill] sm:$0xff] }
 0x431   :  { %3303 = vmatprep.subr.bf16.mxu0 %v10273_v43  ;;  %3344 = vmatprep.subr.bf16.mxu1 %v10275_v44  ;;  %v11865_v43 = vld [vmem:[#allocation43_spill] sm:$0xff]  ;;  %v11866_v44 = vld [vmem:[#allocation45_spill] sm:$0xff] }
 0x434   :  { %3304 = vmatpush1.bf16.msra.mxu0 %v10279_v45  ;;  %3345 = vmatpush1.bf16.msra.mxu1 %v10281_v46  ;;  %v11867_v45 = vld [vmem:[#allocation47_spill] sm:$0xff]  ;;  %v11868_v46 = vld [vmem:[#allocation44_spill] sm:$0xff] }
 0x435   :  { %3305 = vmatprep.subr.bf16.mxu0 %v10285_v47  ;;  %3346 = vmatprep.subr.bf16.mxu1 %v10287_v48  ;;  %v11869_v47 = vld [vmem:[#allocation46_spill] sm:$0xff]  ;;  %v11870_v48 = vld [vmem:[#allocation49_spill] sm:$0xff] }
 0x438   :  { %3306 = vmatpush1.bf16.msra.mxu0 %v10291_v49  ;;  %3347 = vmatpush1.bf16.msra.mxu1 %v10293_v50  ;;  %v11871_v49 = vld [vmem:[#allocation48_spill] sm:$0xff]  ;;  %v11872_v50 = vld [vmem:[#allocation50_spill] sm:$0xff] }
 0x439   :  { %3860 = vmatprep.subr.bf16.mxu0 %v10299_v55  ;;  %3901 = vmatprep.subr.bf16.mxu1 %v10301_v56  ;;  %v11873_v55 = vld [vmem:[#allocation51_spill] sm:$0xff]  ;;  %v11874_v56 = vld [vmem:[#allocation52_spill] sm:$0xff] }
 0x43b   :  { %3324 = vmatmul.mubr.bf16.vlgmr.msra.gmra.mrb[28].mxu0 %v3098_v4  ;;  %3365 = vmatmul.mubr.bf16.vlgmr.msra.gmra.mrb[28].mxu1 %v3098_v4  ;;  %v11901_v4 = vld [vmem:[#allocation79_spill] sm:$0xff] }
 0x43c   :  { %3861 = vmatpush1.bf16.msra.mxu0 %v10303_v57  ;;  %3902 = vmatpush1.bf16.msra.mxu1 %v10305_v58  ;;  %v11875_v57 = vld [vmem:[#allocation53_spill] sm:$0xff]  ;;  %v11876_v58 = vld [vmem:[#allocation54_spill] sm:$0xff] }
 0x43d   :  { %3862 = vmatprep.subr.bf16.mxu0 %v10311_v59  ;;  %3903 = vmatprep.subr.bf16.mxu1 %v10313_v60  ;;  %v11877_v59 = vld [vmem:[#allocation55_spill] sm:$0xff]  ;;  %v11878_v60 = vld [vmem:[#allocation56_spill] sm:$0xff] }
 0x440   :  { %3863 = vmatpush1.bf16.msra.mxu0 %v11845_v7  ;;  %3904 = vmatpush1.bf16.msra.mxu1 %v11846_v8  ;;  %v11902_v7 = vld [vmem:[#allocation80_spill] sm:$0xff]  ;;  %v10605_v8 = vld [vmem:[#allocation11 + $0x104] ss:$16 sps:$4 sm:$0xff]  }
 0x441   :  { %3864 = vmatprep.subr.bf16.mxu0 %v11847_v25  ;;  %3905 = vmatprep.subr.bf16.mxu1 %v11848_v26  ;;  %v10607_v25 = vld [vmem:[#allocation11 + $0x10c] ss:$16 sps:$4 sm:$0xff]  }
 0x442   :  { %v7997_v26 = vld [vmem:[%s11517_s3 + $0x4] sm:$0xf] }
 0x444   :  { %3865 = vmatpush1.bf16.msra.mxu0 %v11849_v27  ;;  %3906 = vmatpush1.bf16.msra.mxu1 %v11850_v28  ;;  %v2968_v27 = vrot.slane %v7997_v26, %v10092_v21  ;;  %v2972_v28 = vrot.slane %v7997_v26, %v10099_v0 }
 0x445   :  { %3866 = vmatprep.subr.bf16.mxu0 %v11851_v29  ;;  %3907 = vmatprep.subr.bf16.mxu1 %v11852_v30 }
 0x448   :  { %3867 = vmatpush1.bf16.msra.mxu0 %v11853_v31  ;;  %3908 = vmatpush1.bf16.msra.mxu1 %v11854_v32 }
 0x449   :  { %3868 = vmatprep.subr.bf16.mxu0 %v11855_v33  ;;  %3909 = vmatprep.subr.bf16.mxu1 %v11856_v34 }
 0x44c   :  { %3869 = vmatpush1.bf16.msra.mxu0 %v11857_v35  ;;  %3910 = vmatpush1.bf16.msra.mxu1 %v11858_v36 }
 0x44d   :  { %3870 = vmatprep.subr.bf16.mxu0 %v11859_v37  ;;  %3911 = vmatprep.subr.bf16.mxu1 %v11860_v38 }
 0x450   :  { %3871 = vmatpush1.bf16.msra.mxu0 %v11861_v39  ;;  %3912 = vmatpush1.bf16.msra.mxu1 %v11862_v40 }
 0x451   :  { %3872 = vmatprep.subr.bf16.mxu0 %v11863_v41  ;;  %3913 = vmatprep.subr.bf16.mxu1 %v11864_v42  ;;  %v2980_v41 = vrot.slane %v7997_v26, %v11785_v24 }
 0x454   :  { %3873 = vmatpush1.bf16.msra.mxu0 %v11865_v43  ;;  %3914 = vmatpush1.bf16.msra.mxu1 %v11866_v44  ;;  %v2976_v43 = vrot.slane %v7997_v26, %v11786_v14 }
 0x455   :  { %3874 = vmatprep.subr.bf16.mxu0 %v11867_v45  ;;  %3915 = vmatprep.subr.bf16.mxu1 %v11868_v46 }
 0x458   :  { %3875 = vmatpush1.bf16.msra.mxu0 %v11869_v47  ;;  %3916 = vmatpush1.bf16.msra.mxu1 %v11870_v48 }
 0x459   :  { %3876 = vmatprep.subr.bf16.mxu0 %v11871_v49  ;;  %3917 = vmatprep.subr.bf16.mxu1 %v11872_v50 }
 0x45c   :  { %3877 = vmatpush1.bf16.msra.mxu0 %v11873_v55  ;;  %3918 = vmatpush1.bf16.msra.mxu1 %v11874_v56 }
 0x45d   :  { %3878 = vmatprep.subr.bf16.mxu0 %v11875_v57  ;;  %3919 = vmatprep.subr.bf16.mxu1 %v11876_v58 }
 0x460   :  { %3879 = vmatpush1.bf16.msra.mxu0 %v11877_v59  ;;  %3920 = vmatpush1.bf16.msra.mxu1 %v11878_v60  ;;  %v2562_v59 = vld [vmem:[#allocation17 + $0x1] sm:$0x1] }
 0x461   :  { %3880 = vmatprep.subr.bf16.mxu0 %v11879_v62  ;;  %3921 = vmatprep.subr.bf16.mxu1 %v11880_v63 }
 0x464   :  { %3881 = vmatpush1.bf16.msra.mxu0 %v11881_v51  ;;  %3922 = vmatpush1.bf16.msra.mxu1 %v11882_v52 }
 0x465   :  { %3882 = vmatprep.subr.bf16.mxu0 %v11883_v13  ;;  %3923 = vmatprep.subr.bf16.mxu1 %v11884_v9 }
 0x468   :  { %3883 = vmatpush1.bf16.msra.mxu0 %v11885_v22  ;;  %3924 = vmatpush1.bf16.msra.mxu1 %v11886_v20 }
 0x469   :  { %3884 = vmatprep.subr.bf16.mxu0 %v11887_v16  ;;  %3925 = vmatprep.subr.bf16.mxu1 %v11888_v6 }
 0x46c   :  { %3885 = vmatpush1.bf16.msra.mxu0 %v11889_v3  ;;  %3926 = vmatpush1.bf16.msra.mxu1 %v11890_v19 }
 0x46d   :  { %3886 = vmatprep.subr.bf16.mxu0 %v11891_v53  ;;  %3927 = vmatprep.subr.bf16.mxu1 %v11892_v5 }
 0x470   :  { %3887 = vmatpush1.bf16.msra.mxu0 %v11893_v11  ;;  %3928 = vmatpush1.bf16.msra.mxu1 %v11894_v17 }
 0x471   :  { %3888 = vmatprep.subr.bf16.mxu0 %v11895_v23  ;;  %3929 = vmatprep.subr.bf16.mxu1 %v11896_v1  ;;  %v3097_v23 = vld [vmem:[#allocation3 + $0x3] ss:$8 sm:$0xf] }
 0x474   :  { %3889 = vmatpush1.bf16.msra.mxu0 %v11897_v2  ;;  %3930 = vmatpush1.bf16.msra.mxu1 %v11898_v54 }
 0x475   :  { %3890 = vmatprep.subr.bf16.mxu0 %v11899_v61  ;;  %3931 = vmatprep.subr.bf16.mxu1 %v11900_v12 }
 0x478   :  { %3891 = vmatpush1.bf16.msra.mxu0 %v11901_v4  ;;  %3932 = vmatpush1.bf16.msra.mxu1 %v11902_v7 }
 0x479   :  { %4166 = vmatprep.subr.bf16.mxu0 %v10605_v8  ;;  %4207 = vmatprep.subr.bf16.mxu1 %v10607_v25 }
 0x4ee   :  { %v3019_v29 = vpop.f32.mrb[24].mxu0  ;;  %v3060_v30 = vpop.f32.mrb[24].mxu1 }
 0x4ef   :  { %v3020_v31 = vadd.f32 %v3019_v29, %v2968_v27  ;;  %v3021_v32 = vpop.f32.mrb[25].mxu0  ;;  %v3062_v33 = vpop.f32.mrb[25].mxu1  ;;  %v3061_v45 = vadd.f32 %v3060_v30, %v2976_v43 }
 0x4f0   :  { %v3022_v34 = vadd.f32 %v3021_v32, %v2972_v28  ;;  %v3023_v35 = vpop.f32.mrb[26].mxu0  ;;  %v3064_v36 = vpop.f32.mrb[26].mxu1  ;;  %v3063_v42 = vadd.f32 %v3062_v33, %v2980_v41 }
 0x4f1   :  { %v8062_v37 = vmul.f32 -1.442695, %v3020_v31  ;;  %v3024_v38 = vpop.f32.mrb[27].mxu0  ;;  %v3065_v39 = vpop.f32.mrb[27].mxu1 }
 0x4f2   :  { %v8063_v40 = vmul.f32 -1.442695, %v3022_v34  ;;  %v8064_v44 = vmul.f32 -1.442695, %v3063_v42  ;;  %v3095_v38 = vld [vmem:[#allocation17] sm:$0x1] }
 0x4f3   :  { %9355 = vpow2.f32 %v8062_v37 }
 0x4f4   :  { %9357 = vpow2.f32 %v8063_v40 }
 0x4f5   :  { %9359 = vpow2.f32 %v8064_v44 }
 0x4f6   :  { %9361 = vtanh.f32 %v3061_v45 }
 0x4fd   :  { %v9356_v46 = vpop.eup %9355 }
 0x4fe   :  { %v9358_v47 = vpop.eup %9357  ;;  %v3070_v48 = vadd.f32 1.0, %v9356_v46 }
 0x4ff   :  { %v3076_v49 = vadd.f32 1.0, %v9358_v47  ;;  %v9360_v50 = vpop.eup %9359 }
 0x500   :  { %9363 = vrcp.f32 %v3070_v48  ;;  %v9362_v55 = vpop.eup %9361  ;;  %v3083_v60 = vadd.f32 1.0, %v9360_v50  ;;  %v10627_v50 = vld [vmem:[#allocation11 + $0x100] ss:$16 sps:$4 sm:$0xff]  }
 0x501   :  { %9365 = vrcp.f32 %v3076_v49 }
 0x502   :  { %9367 = vrcp.f32 %v3083_v60  ;;  %v10639_v60 = vld [vmem:[#allocation11 + $0x128] ss:$16 sps:$4 sm:$0xff]  }
 0x50a   :  { %v9364_v56 = vpop.eup %9363 }
 0x50b   :  { %v9366_v57 = vpop.eup %9365  ;;  %v3087_v58 = vmul.f32 %v9364_v56, %v9362_v55  ;;  %v10629_v55 = vld [vmem:[#allocation11 + $0x108] ss:$16 sps:$4 sm:$0xff]  }
 0x50c   :  { %v3086_v62 = vmul.f32 %v9366_v57, %v2562_v59  ;;  %v9368_v2 = vpop.eup %9367  ;;  %v10631_v57 = vld [vmem:[#allocation11 + $0x124] ss:$16 sps:$4 sm:$0xff]   ;;  %v10637_v59 = vld [vmem:[#allocation11 + $0x120] ss:$16 sps:$4 sm:$0xff]  }
 0x50e   :  { %v3088_v63 = vadd.f32 %v3087_v58, %v3086_v62  ;;  %v3325_v51 = vpop.f32.mrb[28].mxu0  ;;  %v3366_v52 = vpop.f32.mrb[28].mxu1  ;;  %v10633_v58 = vld [vmem:[#allocation11 + $0x12c] ss:$16 sps:$4 sm:$0xff]   ;;  %v10643_v62 = vld [vmem:[#allocation11 + $0x144] ss:$16 sps:$4 sm:$0xff]  }
 0x50f   :  { %v3327_v13 = vpop.f32.mrb[29].mxu0  ;;  %v3368_v9 = vpop.f32.mrb[29].mxu1 }
 0x510   :  { %9369 = vtanh.f32 %v3088_v63  ;;  %3092 = vst [vmem:[#allocation17 + $0x1] sm:$0x1] %v3088_v63  ;;  %v3377_v22 = vcombine.low %v3325_v51, %v3327_v13  ;;  %v3378_v20 = vcombine.low %v3366_v52, %v3368_v9  ;;  %v3329_v16 = vpop.f32.mrb[30].mxu0  ;;  %v3370_v6 = vpop.f32.mrb[30].mxu1  ;;  %v10645_v63 = vld [vmem:[#allocation11 + $0x14c] ss:$16 sps:$4 sm:$0xff]  }
 0x511   :  { %v3330_v3 = vpop.f32.mrb[31].mxu0  ;;  %v3371_v19 = vpop.f32.mrb[31].mxu1  ;;  %v10651_v51 = vld [vmem:[#allocation11 + $0x140] ss:$16 sps:$4 sm:$0xff]   ;;  %v10653_v52 = vld [vmem:[#allocation11 + $0x148] ss:$16 sps:$4 sm:$0xff]  }
 0x512   :  { %v3385_v53 = vrot.slane %v3377_v22, %v10107_v15  ;;  %v3392_v5 = vrot.slane %v3378_v20, %v10107_v15  ;;  %v10657_v13 = vld [vmem:[#allocation11 + $0x164] ss:$16 sps:$4 sm:$0xff]   ;;  %v10659_v9 = vld [vmem:[#allocation11 + $0x16c] ss:$16 sps:$4 sm:$0xff]   ;;  %v10663_v22 = vld [vmem:[#allocation11 + $0x160] ss:$16 sps:$4 sm:$0xff]  }
 0x513   :  { %v10665_v20 = vld [vmem:[#allocation11 + $0x168] ss:$16 sps:$4 sm:$0xff]   ;;  %v10669_v16 = vld [vmem:[#allocation11 + $0x184] ss:$16 sps:$4 sm:$0xff]   ;;  %v10671_v6 = vld [vmem:[#allocation11 + $0x18c] ss:$16 sps:$4 sm:$0xff]  }
 0x514   :  { %v3393_v11 = vcombine.low %v3385_v53, %v3392_v5  ;;  %v10675_v3 = vld [vmem:[#allocation11 + $0x180] ss:$16 sps:$4 sm:$0xff]   ;;  %v10677_v19 = vld [vmem:[#allocation11 + $0x188] ss:$16 sps:$4 sm:$0xff]   ;;  %v10681_v53 = vld [vmem:[#allocation11 + $0x1a4] ss:$16 sps:$4 sm:$0xff]  }
 0x515   :  { %v10683_v5 = vld [vmem:[#allocation11 + $0x1ac] ss:$16 sps:$4 sm:$0xff]  }
 0x516   :  { %v3400_v17 = vrot.slane %v3393_v11, %v10107_v15  ;;  %v10687_v11 = vld [vmem:[#allocation11 + $0x1a0] ss:$16 sps:$4 sm:$0xff]  }
 0x518   :  { %v3402_v1 = vadd.f32 %v3400_v17, %v3097_v23  ;;  %v10689_v17 = vld [vmem:[#allocation11 + $0x1a8] ss:$16 sps:$4 sm:$0xff]   ;;  %v10693_v23 = vld [vmem:[#allocation11 + $0x1c4] ss:$16 sps:$4 sm:$0xff]  }
 0x51a   :  { %v9370_v54 = vpop.eup %9369  ;;  %v8097_v61 = vmul.f32 -1.442695, %v3402_v1  ;;  %v3410_v12 = vrot.slane %v3402_v1, 1  ;;  %v3421_v26 = vrot.slane %v3402_v1, 3  ;;  %v3418_v30 = vrot.slane %v3402_v1, 2 }
 0x51b   :  { %v3090_v4 = vmul.f32 %v9370_v54, %v9368_v2  ;;  %v10695_v1 = vld [vmem:[#allocation11 + $0x1cc] ss:$16 sps:$4 sm:$0xff]   ;;  %v10699_v2 = vld [vmem:[#allocation11 + $0x1c0] ss:$16 sps:$4 sm:$0xff]   ;;  %v10701_v54 = vld [vmem:[#allocation11 + $0x1c8] ss:$16 sps:$4 sm:$0xff]  }
 0x51c   :  { %9371 = vpow2.f32 %v8097_v61  ;;  %v8098_v7 = vmul.f32 -1.442695, %v3410_v12  ;;  %v8099_v28 = vmul.f32 -1.442695, %v3421_v26  ;;  %v10705_v61 = vld [vmem:[#allocation11 + $0x1e4] ss:$16 sps:$4 sm:$0xff]  }
 0x51d   :  { %3091 = vst [vmem:[#allocation15 + $0x1] sm:$0x1] %v3090_v4  ;;  %3093 = vst [vmem:[#allocation4 + $0x2] sm:$0x1] %v3090_v4  ;;  %v10707_v12 = vld [vmem:[#allocation11 + $0x1ec] ss:$16 sps:$4 sm:$0xff]  }
 0x51e   :  { %9373 = vpow2.f32 %v8098_v7  ;;  %v10711_v4 = vld [vmem:[#allocation11 + $0x1e0] ss:$16 sps:$4 sm:$0xff]   ;;  %v10713_v7 = vld [vmem:[#allocation11 + $0x1e8] ss:$16 sps:$4 sm:$0xff]  }
 0x51f   :  { %9375 = vpow2.f32 %v8099_v28  ;;  %v10719_v28 = vld [vmem:[#allocation11 + $0x204] ss:$16 sps:$4 sm:$0xff]  }
 0x524   :  { %v3436_v27 = vld [vmem:[#allocation15 + $0x1] sm:$0x1] }
 0x525   :  { %3439 = vst.msk [vmem:[#allocation5 + $0x1] sm:$0x1] %vm10054_vm0, %v3436_v27 }
 0x526   :  { %v9372_v29 = vpop.eup %9371 }
 0x527   :  { %v3406_v31 = vadd.f32 1.0, %v9372_v29  ;;  %v10721_v29 = vld [vmem:[#allocation11 + $0x20c] ss:$16 sps:$4 sm:$0xff]  }
 0x528   :  { %v9374_v32 = vpop.eup %9373 }
 0x529   :  { %9377 = vrcp.f32 %v3406_v31  ;;  %v3415_v33 = vadd.f32 1.0, %v9374_v32  ;;  %v9376_v34 = vpop.eup %9375  ;;  %v10725_v31 = vld [vmem:[#allocation11 + $0x208] ss:$16 sps:$4 sm:$0xff]   ;;  %v10731_v32 = vld [vmem:[#allocation11 + $0x224] ss:$16 sps:$4 sm:$0xff]  }
 0x52a   :  { %9379 = vtanh.f32 %v3418_v30  ;;  %v3426_v39 = vadd.f32 1.0, %v9376_v34  ;;  %v10723_v30 = vld [vmem:[#allocation11 + $0x200] ss:$16 sps:$4 sm:$0xff]  }
 0x52b   :  { %9381 = vrcp.f32 %v3415_v33  ;;  %v10733_v33 = vld [vmem:[#allocation11 + $0x22c] ss:$16 sps:$4 sm:$0xff]   ;;  %v10735_v34 = vld [vmem:[#allocation11 + $0x220] ss:$16 sps:$4 sm:$0xff]  }
 0x52c   :  { %9383 = vrcp.f32 %v3426_v39  ;;  %11903 = vst [vmem:[#allocation23_spill] sm:$0xff] %v10735_v34  ;;  %v10749_v39 = vld [vmem:[#allocation11 + $0x248] ss:$16 sps:$4 sm:$0xff]  }
 0x52d   :  { %11908 = vst [vmem:[#allocation28_spill] sm:$0xff] %v10749_v39 }
 0x533   :  { %v9378_v35 = vpop.eup %9377 }
 0x534   :  { %v9380_v36 = vpop.eup %9379 }
 0x535   :  { %v9382_v37 = vpop.eup %9381  ;;  %v3430_v41 = vmul.f32 %v9380_v36, %v9378_v35  ;;  %v10737_v35 = vld [vmem:[#allocation11 + $0x228] ss:$16 sps:$4 sm:$0xff]   ;;  %v10743_v36 = vld [vmem:[#allocation11 + $0x244] ss:$16 sps:$4 sm:$0xff]  }
 0x536   :  { %v3429_v40 = vmul.f32 %v9382_v37, %v3095_v38  ;;  %v9384_v43 = vpop.eup %9383  ;;  %11904 = vst [vmem:[#allocation24_spill] sm:$0xff] %v10737_v35  ;;  %11905 = vst [vmem:[#allocation25_spill] sm:$0xff] %v10743_v36  ;;  %v10745_v37 = vld [vmem:[#allocation11 + $0x24c] ss:$16 sps:$4 sm:$0xff]   ;;  %v10747_v38 = vld [vmem:[#allocation11 + $0x240] ss:$16 sps:$4 sm:$0xff]  }
 0x537   :  { %11906 = vst [vmem:[#allocation26_spill] sm:$0xff] %v10745_v37  ;;  %11907 = vst [vmem:[#allocation27_spill] sm:$0xff] %v10747_v38 }
 0x538   :  { %v3431_v42 = vadd.f32 %v3430_v41, %v3429_v40  ;;  %v10755_v40 = vld [vmem:[#allocation11 + $0x264] ss:$16 sps:$4 sm:$0xff]   ;;  %v10757_v41 = vld [vmem:[#allocation11 + $0x26c] ss:$16 sps:$4 sm:$0xff]  }
 0x539   :  { %11909 = vst [vmem:[#allocation29_spill] sm:$0xff] %v10755_v40  ;;  %11910 = vst [vmem:[#allocation30_spill] sm:$0xff] %v10757_v41 }
 0x53a   :  { %9385 = vtanh.f32 %v3431_v42  ;;  %3435 = vst [vmem:[#allocation17] sm:$0x1] %v3431_v42  ;;  %v10759_v42 = vld [vmem:[#allocation11 + $0x260] ss:$16 sps:$4 sm:$0xff]  }
 0x53b   :  { %11911 = vst [vmem:[#allocation31_spill] sm:$0xff] %v10759_v42 }
 0x544   :  { %v9386_v44 = vpop.eup %9385 }
 0x545   :  { %v3433_v45 = vmul.f32 %v9386_v44, %v9384_v43  ;;  %v10761_v43 = vld [vmem:[#allocation11 + $0x268] ss:$16 sps:$4 sm:$0xff]   ;;  %v10767_v44 = vld [vmem:[#allocation11 + $0x284] ss:$16 sps:$4 sm:$0xff]  }
 0x546   :  { %11912 = vst [vmem:[#allocation32_spill] sm:$0xff] %v10761_v43  ;;  %11913 = vst [vmem:[#allocation33_spill] sm:$0xff] %v10767_v44 }
 0x547   :  { %3438 = vst.msk [vmem:[#allocation5] sm:$0x1] %vm10054_vm0, %v3433_v45  ;;  %3434 = vst [vmem:[#allocation15] sm:$0x1] %v3433_v45  ;;  %v10769_v45 = vld [vmem:[#allocation11 + $0x28c] ss:$16 sps:$4 sm:$0xff]  }
 0x548   :  { %11914 = vst [vmem:[#allocation34_spill] sm:$0xff] %v10769_v45 }
 0x54e   :  { %v3440_v46 = vld [vmem:[#allocation5] sm:$0x3]  ;;  %v3969_v26 = vld [vmem:[#allocation15] sm:$0x1] }
 0x54f   :  { %v3449_v47 = vrot.slane %v3440_v46, %v10099_v0  ;;  %v3445_v48 = vrot.slane %v3440_v46, %v10092_v21  ;;  %v3973_v27 = vpack.c.bf16 %v3969_v26, %v3969_v26  ;;  %v10771_v46 = vld [vmem:[#allocation11 + $0x280] ss:$16 sps:$4 sm:$0xff]   ;;  %v10785_v26 = vld [vmem:[#allocation11 + $0x2a8] ss:$16 sps:$4 sm:$0xff]  }
 0x550   :  { %11915 = vst [vmem:[#allocation35_spill] sm:$0xff] %v10771_v46  ;;  %11920 = vst [vmem:[#allocation40_spill] sm:$0xff] %v10785_v26 }
 0x551   :  { %v3453_v49 = vpack.c.bf16 %v3449_v47, %v3449_v47  ;;  %v3452_v56 = vpack.c.bf16 %v3445_v48, %v3445_v48  ;;  %v10773_v47 = vld [vmem:[#allocation11 + $0x288] ss:$16 sps:$4 sm:$0xff]   ;;  %v10779_v48 = vld [vmem:[#allocation11 + $0x2a4] ss:$16 sps:$4 sm:$0xff]  }
 0x552   :  { %11916 = vst [vmem:[#allocation36_spill] sm:$0xff] %v10773_v47  ;;  %11917 = vst [vmem:[#allocation37_spill] sm:$0xff] %v10779_v48 }
 0x553   :  { %3892 = vmatprep.mubr.bf16.mxu0 %v3453_v49  ;;  %3933 = vmatprep.mubr.bf16.mxu1 %v3453_v49  ;;  %v10781_v49 = vld [vmem:[#allocation11 + $0x2ac] ss:$16 sps:$4 sm:$0xff]  }
 0x554   :  { %3893 = vmatmul.mubr.bf16.vlgmr.msra.gmra.mrb[32].mxu0 %v3452_v56  ;;  %3934 = vmatmul.mubr.bf16.vlgmr.msra.gmra.mrb[32].mxu1 %v3452_v56  ;;  %11918 = vst [vmem:[#allocation38_spill] sm:$0xff] %v10781_v49  ;;  %v10783_v56 = vld [vmem:[#allocation11 + $0x2a0] ss:$16 sps:$4 sm:$0xff]  }
 0x555   :  { %4167 = vmatpush1.bf16.msra.mxu0 %v10627_v50  ;;  %4208 = vmatpush1.bf16.msra.mxu1 %v10629_v55  ;;  %11919 = vst [vmem:[#allocation39_spill] sm:$0xff] %v10783_v56 }
 0x556   :  { %4168 = vmatprep.subr.bf16.mxu0 %v10631_v57  ;;  %4209 = vmatprep.subr.bf16.mxu1 %v10633_v58 }
 0x557   :  { %4198 = vmatprep.mubr.bf16.mxu0 %v11759_v10  ;;  %4239 = vmatprep.mubr.bf16.mxu1 %v11759_v10 }
 0x559   :  { %4169 = vmatpush1.bf16.msra.mxu0 %v10637_v59  ;;  %4210 = vmatpush1.bf16.msra.mxu1 %v10639_v60 }
 0x55a   :  { %4170 = vmatprep.subr.bf16.mxu0 %v10643_v62  ;;  %4211 = vmatprep.subr.bf16.mxu1 %v10645_v63 }
 0x55d   :  { %4171 = vmatpush1.bf16.msra.mxu0 %v10651_v51  ;;  %4212 = vmatpush1.bf16.msra.mxu1 %v10653_v52 }
 0x55e   :  { %4172 = vmatprep.subr.bf16.mxu0 %v10657_v13  ;;  %4213 = vmatprep.subr.bf16.mxu1 %v10659_v9 }
 0x561   :  { %4173 = vmatpush1.bf16.msra.mxu0 %v10663_v22  ;;  %4214 = vmatpush1.bf16.msra.mxu1 %v10665_v20 }
 0x562   :  { %4174 = vmatprep.subr.bf16.mxu0 %v10669_v16  ;;  %4215 = vmatprep.subr.bf16.mxu1 %v10671_v6 }
 0x565   :  { %4175 = vmatpush1.bf16.msra.mxu0 %v10675_v3  ;;  %4216 = vmatpush1.bf16.msra.mxu1 %v10677_v19 }
 0x566   :  { %4176 = vmatprep.subr.bf16.mxu0 %v10681_v53  ;;  %4217 = vmatprep.subr.bf16.mxu1 %v10683_v5 }
 0x569   :  { %4177 = vmatpush1.bf16.msra.mxu0 %v10687_v11  ;;  %4218 = vmatpush1.bf16.msra.mxu1 %v10689_v17 }
 0x56a   :  { %4178 = vmatprep.subr.bf16.mxu0 %v10693_v23  ;;  %4219 = vmatprep.subr.bf16.mxu1 %v10695_v1 }
 0x56d   :  { %4179 = vmatpush1.bf16.msra.mxu0 %v10699_v2  ;;  %4220 = vmatpush1.bf16.msra.mxu1 %v10701_v54 }
 0x56e   :  { %4180 = vmatprep.subr.bf16.mxu0 %v10705_v61  ;;  %4221 = vmatprep.subr.bf16.mxu1 %v10707_v12 }
 0x571   :  { %4181 = vmatpush1.bf16.msra.mxu0 %v10711_v4  ;;  %4222 = vmatpush1.bf16.msra.mxu1 %v10713_v7 }
 0x572   :  { %4735 = vmatprep.subr.bf16.mxu0 %v10719_v28  ;;  %4776 = vmatprep.subr.bf16.mxu1 %v10721_v29 }
 0x574   :  { %4199 = vmatmul.mubr.bf16.vlgmr.msra.gmra.mrb[36].mxu0 %v3973_v27  ;;  %4240 = vmatmul.mubr.bf16.vlgmr.msra.gmra.mrb[36].mxu1 %v3973_v27  ;;  %v10791_v27 = vld [vmem:[#allocation11 + $0x2c4] ss:$16 sps:$4 sm:$0xff]  }
 0x575   :  { %4736 = vmatpush1.bf16.msra.mxu0 %v10723_v30  ;;  %4777 = vmatpush1.bf16.msra.mxu1 %v10725_v31  ;;  %11921 = vst [vmem:[#allocation41_spill] sm:$0xff] %v10791_v27 }
 0x576   :  { %4737 = vmatprep.subr.bf16.mxu0 %v10731_v32  ;;  %4778 = vmatprep.subr.bf16.mxu1 %v10733_v33 }
 0x579   :  { %4738 = vmatpush1.bf16.msra.mxu0 %v10735_v34  ;;  %4779 = vmatpush1.bf16.msra.mxu1 %v10737_v35 }
 0x57a   :  { %4739 = vmatprep.subr.bf16.mxu0 %v10743_v36  ;;  %4780 = vmatprep.subr.bf16.mxu1 %v10745_v37 }
 0x57d   :  { %4740 = vmatpush1.bf16.msra.mxu0 %v10747_v38  ;;  %4781 = vmatpush1.bf16.msra.mxu1 %v10749_v39 }
 0x57e   :  { %4741 = vmatprep.subr.bf16.mxu0 %v10755_v40  ;;  %4782 = vmatprep.subr.bf16.mxu1 %v10757_v41 }
 0x581   :  { %4742 = vmatpush1.bf16.msra.mxu0 %v10759_v42  ;;  %4783 = vmatpush1.bf16.msra.mxu1 %v10761_v43 }
 0x582   :  { %4743 = vmatprep.subr.bf16.mxu0 %v10767_v44  ;;  %4784 = vmatprep.subr.bf16.mxu1 %v10769_v45  ;;  %v10797_v45 = vld [vmem:[#allocation11 + $0x2c8] ss:$16 sps:$4 sm:$0xff]   ;;  %v10885_v44 = vld [vmem:[#allocation11 + $0x3c4] ss:$16 sps:$4 sm:$0xff]  }
 0x583   :  { %11924 = vst [vmem:[#allocation45_spill] sm:$0xff] %v10797_v45  ;;  %11953 = vst [vmem:[#allocation73_spill] sm:$0xff] %v10885_v44 }
 0x585   :  { %4744 = vmatpush1.bf16.msra.mxu0 %v10771_v46  ;;  %4785 = vmatpush1.bf16.msra.mxu1 %v10773_v47  ;;  %v10793_v46 = vld [vmem:[#allocation11 + $0x2cc] ss:$16 sps:$4 sm:$0xff]   ;;  %v10795_v47 = vld [vmem:[#allocation11 + $0x2c0] ss:$16 sps:$4 sm:$0xff]  }
 0x586   :  { %4745 = vmatprep.subr.bf16.mxu0 %v10779_v48  ;;  %4786 = vmatprep.subr.bf16.mxu1 %v10781_v49  ;;  %11922 = vst [vmem:[#allocation42_spill] sm:$0xff] %v10793_v46  ;;  %11923 = vst [vmem:[#allocation43_spill] sm:$0xff] %v10795_v47  ;;  %v10803_v49 = vld [vmem:[#allocation11 + $0x2e4] ss:$16 sps:$4 sm:$0xff]   ;;  %v10809_v48 = vld [vmem:[#allocation11 + $0x2e8] ss:$16 sps:$4 sm:$0xff]  }
 0x587   :  { %11925 = vst [vmem:[#allocation47_spill] sm:$0xff] %v10803_v49  ;;  %11928 = vst [vmem:[#allocation49_spill] sm:$0xff] %v10809_v48 }
 0x589   :  { %4746 = vmatpush1.bf16.msra.mxu0 %v10783_v56  ;;  %4787 = vmatpush1.bf16.msra.mxu1 %v10785_v26  ;;  %v10805_v56 = vld [vmem:[#allocation11 + $0x2ec] ss:$16 sps:$4 sm:$0xff]   ;;  %v10807_v26 = vld [vmem:[#allocation11 + $0x2e0] ss:$16 sps:$4 sm:$0xff]  }
 0x58a   :  { %4747 = vmatprep.subr.bf16.mxu0 %v10791_v27  ;;  %4788 = vmatprep.subr.bf16.mxu1 %v10793_v46  ;;  %11926 = vst [vmem:[#allocation44_spill] sm:$0xff] %v10805_v56  ;;  %11927 = vst [vmem:[#allocation46_spill] sm:$0xff] %v10807_v26  ;;  %v10815_v46 = vld [vmem:[#allocation11 + $0x304] ss:$16 sps:$4 sm:$0xff]   ;;  %v10821_v27 = vld [vmem:[#allocation11 + $0x308] ss:$16 sps:$4 sm:$0xff]  }
 0x58b   :  { %11929 = vst [vmem:[#allocation48_spill] sm:$0xff] %v10815_v46  ;;  %11932 = vst [vmem:[#allocation52_spill] sm:$0xff] %v10821_v27 }
 0x58d   :  { %4748 = vmatpush1.bf16.msra.mxu0 %v10795_v47  ;;  %4789 = vmatpush1.bf16.msra.mxu1 %v10797_v45  ;;  %v10817_v47 = vld [vmem:[#allocation11 + $0x30c] ss:$16 sps:$4 sm:$0xff]   ;;  %v10819_v45 = vld [vmem:[#allocation11 + $0x300] ss:$16 sps:$4 sm:$0xff]  }
 0x58e   :  { %4749 = vmatprep.subr.bf16.mxu0 %v10803_v49  ;;  %4790 = vmatprep.subr.bf16.mxu1 %v10805_v56  ;;  %11930 = vst [vmem:[#allocation50_spill] sm:$0xff] %v10817_v47  ;;  %11931 = vst [vmem:[#allocation51_spill] sm:$0xff] %v10819_v45  ;;  %v10827_v56 = vld [vmem:[#allocation11 + $0x324] ss:$16 sps:$4 sm:$0xff]   ;;  %v10833_v49 = vld [vmem:[#allocation11 + $0x328] ss:$16 sps:$4 sm:$0xff]  }
 0x58f   :  { %11933 = vst [vmem:[#allocation53_spill] sm:$0xff] %v10827_v56  ;;  %11936 = vst [vmem:[#allocation56_spill] sm:$0xff] %v10833_v49 }
 0x591   :  { %4750 = vmatpush1.bf16.msra.mxu0 %v10807_v26  ;;  %4791 = vmatpush1.bf16.msra.mxu1 %v10809_v48  ;;  %v10829_v26 = vld [vmem:[#allocation11 + $0x32c] ss:$16 sps:$4 sm:$0xff]   ;;  %v10831_v48 = vld [vmem:[#allocation11 + $0x320] ss:$16 sps:$4 sm:$0xff]  }
 0x592   :  { %4751 = vmatprep.subr.bf16.mxu0 %v10815_v46  ;;  %4792 = vmatprep.subr.bf16.mxu1 %v10817_v47  ;;  %11934 = vst [vmem:[#allocation54_spill] sm:$0xff] %v10829_v26  ;;  %11935 = vst [vmem:[#allocation55_spill] sm:$0xff] %v10831_v48  ;;  %v10839_v47 = vld [vmem:[#allocation11 + $0x344] ss:$16 sps:$4 sm:$0xff]   ;;  %v10845_v46 = vld [vmem:[#allocation11 + $0x348] ss:$16 sps:$4 sm:$0xff]  }
 0x593   :  { %11937 = vst [vmem:[#allocation57_spill] sm:$0xff] %v10839_v47  ;;  %11940 = vst [vmem:[#allocation60_spill] sm:$0xff] %v10845_v46 }
 0x595   :  { %4752 = vmatpush1.bf16.msra.mxu0 %v10819_v45  ;;  %4793 = vmatpush1.bf16.msra.mxu1 %v10821_v27  ;;  %v10841_v45 = vld [vmem:[#allocation11 + $0x34c] ss:$16 sps:$4 sm:$0xff]   ;;  %v10843_v27 = vld [vmem:[#allocation11 + $0x340] ss:$16 sps:$4 sm:$0xff]  }
 0x596   :  { %4753 = vmatprep.subr.bf16.mxu0 %v10827_v56  ;;  %4794 = vmatprep.subr.bf16.mxu1 %v10829_v26  ;;  %11938 = vst [vmem:[#allocation58_spill] sm:$0xff] %v10841_v45  ;;  %11939 = vst [vmem:[#allocation59_spill] sm:$0xff] %v10843_v27  ;;  %v10851_v26 = vld [vmem:[#allocation11 + $0x364] ss:$16 sps:$4 sm:$0xff]   ;;  %v10857_v56 = vld [vmem:[#allocation11 + $0x368] ss:$16 sps:$4 sm:$0xff]  }
 0x597   :  { %11941 = vst [vmem:[#allocation61_spill] sm:$0xff] %v10851_v26  ;;  %11944 = vst [vmem:[#allocation64_spill] sm:$0xff] %v10857_v56 }
 0x599   :  { %4754 = vmatpush1.bf16.msra.mxu0 %v10831_v48  ;;  %4795 = vmatpush1.bf16.msra.mxu1 %v10833_v49  ;;  %v10853_v48 = vld [vmem:[#allocation11 + $0x36c] ss:$16 sps:$4 sm:$0xff]   ;;  %v10855_v49 = vld [vmem:[#allocation11 + $0x360] ss:$16 sps:$4 sm:$0xff]  }
 0x59a   :  { %4755 = vmatprep.subr.bf16.mxu0 %v10839_v47  ;;  %4796 = vmatprep.subr.bf16.mxu1 %v10841_v45  ;;  %11942 = vst [vmem:[#allocation62_spill] sm:$0xff] %v10853_v48  ;;  %11943 = vst [vmem:[#allocation63_spill] sm:$0xff] %v10855_v49  ;;  %v10863_v45 = vld [vmem:[#allocation11 + $0x384] ss:$16 sps:$4 sm:$0xff]   ;;  %v10869_v47 = vld [vmem:[#allocation11 + $0x388] ss:$16 sps:$4 sm:$0xff]  }
 0x59b   :  { %11945 = vst [vmem:[#allocation65_spill] sm:$0xff] %v10863_v45  ;;  %11948 = vst [vmem:[#allocation68_spill] sm:$0xff] %v10869_v47 }
 0x59d   :  { %4756 = vmatpush1.bf16.msra.mxu0 %v10843_v27  ;;  %4797 = vmatpush1.bf16.msra.mxu1 %v10845_v46  ;;  %v10865_v27 = vld [vmem:[#allocation11 + $0x38c] ss:$16 sps:$4 sm:$0xff]   ;;  %v10867_v46 = vld [vmem:[#allocation11 + $0x380] ss:$16 sps:$4 sm:$0xff]  }
 0x59e   :  { %4757 = vmatprep.subr.bf16.mxu0 %v10851_v26  ;;  %4798 = vmatprep.subr.bf16.mxu1 %v10853_v48  ;;  %11946 = vst [vmem:[#allocation66_spill] sm:$0xff] %v10865_v27  ;;  %11947 = vst [vmem:[#allocation67_spill] sm:$0xff] %v10867_v46  ;;  %v10875_v48 = vld [vmem:[#allocation11 + $0x3a4] ss:$16 sps:$4 sm:$0xff]   ;;  %v10881_v26 = vld [vmem:[#allocation11 + $0x3a8] ss:$16 sps:$4 sm:$0xff]  }
 0x59f   :  { %11949 = vst [vmem:[#allocation69_spill] sm:$0xff] %v10875_v48  ;;  %11952 = vst [vmem:[#allocation72_spill] sm:$0xff] %v10881_v26 }
 0x5a1   :  { %4758 = vmatpush1.bf16.msra.mxu0 %v10855_v49  ;;  %4799 = vmatpush1.bf16.msra.mxu1 %v10857_v56  ;;  %v10877_v49 = vld [vmem:[#allocation11 + $0x3ac] ss:$16 sps:$4 sm:$0xff]   ;;  %v10879_v56 = vld [vmem:[#allocation11 + $0x3a0] ss:$16 sps:$4 sm:$0xff]  }
 0x5a2   :  { %4759 = vmatprep.subr.bf16.mxu0 %v10863_v45  ;;  %4800 = vmatprep.subr.bf16.mxu1 %v10865_v27  ;;  %11950 = vst [vmem:[#allocation70_spill] sm:$0xff] %v10877_v49  ;;  %11951 = vst [vmem:[#allocation71_spill] sm:$0xff] %v10879_v56  ;;  %v10887_v45 = vld [vmem:[#allocation11 + $0x3cc] ss:$16 sps:$4 sm:$0xff]   ;;  %v10897_v27 = vld [vmem:[#allocation11 + $0x3e4] ss:$16 sps:$4 sm:$0xff]  }
 0x5a3   :  { %11954 = vst [vmem:[#allocation74_spill] sm:$0xff] %v10887_v45  ;;  %11957 = vst [vmem:[#allocation77_spill] sm:$0xff] %v10897_v27 }
 0x5a5   :  { %4760 = vmatpush1.bf16.msra.mxu0 %v10867_v46  ;;  %4801 = vmatpush1.bf16.msra.mxu1 %v10869_v47  ;;  %v10891_v47 = vld [vmem:[#allocation11 + $0x3c0] ss:$16 sps:$4 sm:$0xff]   ;;  %v10893_v46 = vld [vmem:[#allocation11 + $0x3c8] ss:$16 sps:$4 sm:$0xff]  }
 0x5a6   :  { %4761 = vmatprep.subr.bf16.mxu0 %v10875_v48  ;;  %4802 = vmatprep.subr.bf16.mxu1 %v10877_v49  ;;  %11955 = vst [vmem:[#allocation75_spill] sm:$0xff] %v10891_v47  ;;  %11956 = vst [vmem:[#allocation76_spill] sm:$0xff] %v10893_v46  ;;  %v10899_v48 = vld [vmem:[#allocation11 + $0x3ec] ss:$16 sps:$4 sm:$0xff]   ;;  %v10903_v49 = vld [vmem:[#allocation11 + $0x3e0] ss:$16 sps:$4 sm:$0xff]  }
 0x5a7   :  { %11958 = vst [vmem:[#allocation78_spill] sm:$0xff] %v10899_v48  ;;  %11959 = vst [vmem:[#allocation79_spill] sm:$0xff] %v10903_v49 }
 0x5a9   :  { %4762 = vmatpush1.bf16.msra.mxu0 %v10879_v56  ;;  %4803 = vmatpush1.bf16.msra.mxu1 %v10881_v26  ;;  %v10905_v56 = vld [vmem:[#allocation11 + $0x3e8] ss:$16 sps:$4 sm:$0xff]  }
 0x5aa   :  { %4763 = vmatprep.subr.bf16.mxu0 %v10885_v44  ;;  %4804 = vmatprep.subr.bf16.mxu1 %v10887_v45  ;;  %11960 = vst [vmem:[#allocation80_spill] sm:$0xff] %v10905_v56 }
 0x5ad   :  { %4764 = vmatpush1.bf16.msra.mxu0 %v10891_v47  ;;  %4805 = vmatpush1.bf16.msra.mxu1 %v10893_v46  ;;  %v8100_v46 = vld [vmem:[%s11517_s3 + $0x4] sm:$0xf] }
 0x5ae   :  { %4765 = vmatprep.subr.bf16.mxu0 %v10897_v27  ;;  %4806 = vmatprep.subr.bf16.mxu1 %v10899_v48  ;;  %v3843_v47 = vrot.slane %v8100_v46, %v10092_v21  ;;  %v3847_v45 = vrot.slane %v8100_v46, %v10099_v0  ;;  %v3855_v39 = vrot.slane %v8100_v46, %v11785_v24 }
 0x5af   :  { %v3851_v37 = vrot.slane %v8100_v46, %v11786_v14 }
 0x5b1   :  { %4766 = vmatpush1.bf16.msra.mxu0 %v10903_v49  ;;  %4807 = vmatpush1.bf16.msra.mxu1 %v10905_v56 }
 0x5b2   :  { %5041 = vmatprep.subr.bf16.mxu0 %v10605_v8  ;;  %5082 = vmatprep.subr.bf16.mxu1 %v10607_v25 }
 0x627   :  { %v3894_v44 = vpop.f32.mrb[32].mxu0  ;;  %v3935_v27 = vpop.f32.mrb[32].mxu1 }
 0x628   :  { %v3895_v26 = vadd.f32 %v3894_v44, %v3843_v47  ;;  %v3896_v48 = vpop.f32.mrb[33].mxu0  ;;  %v3937_v43 = vpop.f32.mrb[33].mxu1  ;;  %v3936_v35 = vadd.f32 %v3935_v27, %v3851_v37 }
 0x629   :  { %v3897_v49 = vadd.f32 %v3896_v48, %v3847_v45  ;;  %v3898_v42 = vpop.f32.mrb[34].mxu0  ;;  %v3939_v56 = vpop.f32.mrb[34].mxu1  ;;  %v3938_v38 = vadd.f32 %v3937_v43, %v3855_v39 }
 0x62a   :  { %v8165_v41 = vmul.f32 -1.442695, %v3895_v26  ;;  %v3899_v8 = vpop.f32.mrb[35].mxu0  ;;  %v3940_v40 = vpop.f32.mrb[35].mxu1 }
 0x62b   :  { %v8166_v25 = vmul.f32 -1.442695, %v3897_v49  ;;  %v8167_v36 = vmul.f32 -1.442695, %v3938_v38 }
 0x62c   :  { %9387 = vpow2.f32 %v8165_v41  ;;  %v3437_v41 = vld [vmem:[#allocation17 + $0x1] sm:$0x1] }
 0x62d   :  { %9389 = vpow2.f32 %v8166_v25 }
 0x62e   :  { %9391 = vpow2.f32 %v8167_v36 }
 0x62f   :  { %9393 = vtanh.f32 %v3936_v35 }
 0x636   :  { %v9388_v34 = vpop.eup %9387 }
 0x637   :  { %v9390_v44 = vpop.eup %9389  ;;  %v3945_v47 = vadd.f32 1.0, %v9388_v34 }
 0x638   :  { %v3951_v42 = vadd.f32 1.0, %v9390_v44  ;;  %v9392_v45 = vpop.eup %9391 }
 0x639   :  { %9395 = vrcp.f32 %v3945_v47  ;;  %v9394_v40 = vpop.eup %9393  ;;  %v3958_v26 = vadd.f32 1.0, %v9392_v45 }
 0x63a   :  { %9397 = vrcp.f32 %v3951_v42 }
 0x63b   :  { %9399 = vrcp.f32 %v3958_v26 }
 0x643   :  { %v9396_v48 = vpop.eup %9395 }
 0x644   :  { %v9398_v49 = vpop.eup %9397  ;;  %v3962_v56 = vmul.f32 %v9396_v48, %v9394_v40  ;;  %v3972_v48 = vld [vmem:[#allocation3 + $0x4] ss:$8 sm:$0xf] }
 0x645   :  { %v3961_v39 = vmul.f32 %v9398_v49, %v3437_v41 }
 0x647   :  { %v3963_v43 = vadd.f32 %v3962_v56, %v3961_v39  ;;  %v4200_v46 = vpop.f32.mrb[36].mxu0  ;;  %v4241_v38 = vpop.f32.mrb[36].mxu1 }
 0x648   :  { %v4202_v37 = vpop.f32.mrb[37].mxu0  ;;  %v4243_v27 = vpop.f32.mrb[37].mxu1 }
 0x649   :  { %9401 = vtanh.f32 %v3963_v43  ;;  %3967 = vst [vmem:[#allocation17 + $0x1] sm:$0x1] %v3963_v43  ;;  %v4252_v34 = vcombine.low %v4200_v46, %v4202_v37  ;;  %v4253_v35 = vcombine.low %v4241_v38, %v4243_v27  ;;  %v4204_v36 = vpop.f32.mrb[38].mxu0  ;;  %v4245_v8 = vpop.f32.mrb[38].mxu1 }
 0x64a   :  { %v4205_v25 = vpop.f32.mrb[39].mxu0  ;;  %v4246_v44 = vpop.f32.mrb[39].mxu1 }
 0x64b   :  { %v4260_v47 = vrot.slane %v4252_v34, %v10107_v15  ;;  %v4267_v42 = vrot.slane %v4253_v35, %v10107_v15  ;;  %v9400_v56 = vpop.eup %9399 }
 0x64d   :  { %v4268_v45 = vcombine.low %v4260_v47, %v4267_v42 }
 0x64f   :  { %v4275_v40 = vrot.slane %v4268_v45, %v10107_v15 }
 0x651   :  { %v4277_v49 = vadd.f32 %v4275_v40, %v3972_v48  ;;  %v3970_v40 = vld [vmem:[#allocation17] sm:$0x1] }
 0x653   :  { %v9402_v41 = vpop.eup %9401  ;;  %v8200_v26 = vmul.f32 -1.442695, %v4277_v49  ;;  %v4285_v39 = vrot.slane %v4277_v49, 1  ;;  %v4296_v38 = vrot.slane %v4277_v49, 3  ;;  %v4293_v35 = vrot.slane %v4277_v49, 2 }
 0x654   :  { %v3965_v43 = vmul.f32 %v9402_v41, %v9400_v56 }
 0x655   :  { %9403 = vpow2.f32 %v8200_v26  ;;  %v8201_v46 = vmul.f32 -1.442695, %v4285_v39  ;;  %v8202_v37 = vmul.f32 -1.442695, %v4296_v38 }
 0x656   :  { %3966 = vst [vmem:[#allocation15 + $0x1] sm:$0x1] %v3965_v43  ;;  %3968 = vst [vmem:[#allocation4 + $0x3] sm:$0x1] %v3965_v43 }
 0x657   :  { %9405 = vpow2.f32 %v8201_v46 }
 0x658   :  { %9407 = vpow2.f32 %v8202_v37 }
 0x65d   :  { %v4311_v27 = vld [vmem:[#allocation15 + $0x1] sm:$0x1] }
 0x65e   :  { %4314 = vst.msk [vmem:[#allocation5 + $0x1] sm:$0x1] %vm10054_vm0, %v4311_v27 }
 0x65f   :  { %v9404_v34 = vpop.eup %9403 }
 0x660   :  { %v4281_v36 = vadd.f32 1.0, %v9404_v34 }
 0x661   :  { %v9406_v8 = vpop.eup %9405 }
 0x662   :  { %9409 = vrcp.f32 %v4281_v36  ;;  %v4290_v25 = vadd.f32 1.0, %v9406_v8  ;;  %v9408_v44 = vpop.eup %9407  ;;  %v11996_v36 = vld [vmem:[#allocation58_spill] sm:$0xff]  ;;  %v11997_v8 = vld [vmem:[#allocation59_spill] sm:$0xff] }
 0x663   :  { %9411 = vtanh.f32 %v4293_v35  ;;  %v4301_v48 = vadd.f32 1.0, %v9408_v44  ;;  %v11995_v35 = vld [vmem:[#allocation57_spill] sm:$0xff] }
 0x664   :  { %9413 = vrcp.f32 %v4290_v25  ;;  %v11998_v25 = vld [vmem:[#allocation60_spill] sm:$0xff]  ;;  %v11999_v44 = vld [vmem:[#allocation61_spill] sm:$0xff] }
 0x665   :  { %9415 = vrcp.f32 %v4301_v48  ;;  %v12004_v48 = vld [vmem:[#allocation66_spill] sm:$0xff] }
 0x66c   :  { %v9410_v47 = vpop.eup %9409 }
 0x66d   :  { %v9412_v42 = vpop.eup %9411 }
 0x66e   :  { %v9414_v45 = vpop.eup %9413  ;;  %v4305_v41 = vmul.f32 %v9412_v42, %v9410_v47  ;;  %v12000_v47 = vld [vmem:[#allocation62_spill] sm:$0xff]  ;;  %v12001_v42 = vld [vmem:[#allocation63_spill] sm:$0xff] }
 0x66f   :  { %v4304_v56 = vmul.f32 %v9414_v45, %v3970_v40  ;;  %v9416_v49 = vpop.eup %9415  ;;  %v12002_v45 = vld [vmem:[#allocation64_spill] sm:$0xff]  ;;  %v12003_v40 = vld [vmem:[#allocation65_spill] sm:$0xff] }
 0x671   :  { %v4306_v26 = vadd.f32 %v4305_v41, %v4304_v56  ;;  %v12005_v56 = vld [vmem:[#allocation67_spill] sm:$0xff]  ;;  %v12006_v41 = vld [vmem:[#allocation68_spill] sm:$0xff] }
 0x673   :  { %9417 = vtanh.f32 %v4306_v26  ;;  %4310 = vst [vmem:[#allocation17] sm:$0x1] %v4306_v26  ;;  %v12007_v26 = vld [vmem:[#allocation69_spill] sm:$0xff] }
 0x67d   :  { %v9418_v39 = vpop.eup %9417 }
 0x67e   :  { %v4308_v43 = vmul.f32 %v9418_v39, %v9416_v49  ;;  %v12008_v49 = vld [vmem:[#allocation70_spill] sm:$0xff]  ;;  %v12009_v39 = vld [vmem:[#allocation71_spill] sm:$0xff] }
 0x680   :  { %4309 = vst [vmem:[#allocation15] sm:$0x1] %v4308_v43  ;;  %4313 = vst.msk [vmem:[#allocation5] sm:$0x1] %vm10054_vm0, %v4308_v43  ;;  %v12010_v43 = vld [vmem:[#allocation72_spill] sm:$0xff] }
 0x687   :  { %v4315_v46 = vld [vmem:[#allocation5] sm:$0x3] }
 0x688   :  { %v4324_v38 = vrot.slane %v4315_v46, %v10099_v0  ;;  %v4320_v37 = vrot.slane %v4315_v46, %v10092_v21  ;;  %v12011_v46 = vld [vmem:[#allocation73_spill] sm:$0xff] }
 0x68a   :  { %v4328_v27 = vpack.c.bf16 %v4324_v38, %v4324_v38  ;;  %v4327_v34 = vpack.c.bf16 %v4320_v37, %v4320_v37  ;;  %v12012_v38 = vld [vmem:[#allocation74_spill] sm:$0xff]  ;;  %v12013_v37 = vld [vmem:[#allocation75_spill] sm:$0xff] }
 0x68c   :  { %4767 = vmatprep.mubr.bf16.mxu0 %v4328_v27  ;;  %4808 = vmatprep.mubr.bf16.mxu1 %v4328_v27  ;;  %v12014_v27 = vld [vmem:[#allocation76_spill] sm:$0xff] }
 0x68d   :  { %4768 = vmatmul.mubr.bf16.vlgmr.msra.gmra.mrb[40].mxu0 %v4327_v34  ;;  %4809 = vmatmul.mubr.bf16.vlgmr.msra.gmra.mrb[40].mxu1 %v4327_v34  ;;  %v12015_v34 = vld [vmem:[#allocation77_spill] sm:$0xff] }
 0x68e   :  { %5042 = vmatpush1.bf16.msra.mxu0 %v10627_v50  ;;  %5083 = vmatpush1.bf16.msra.mxu1 %v10629_v55  ;;  %v4844_v50 = vld [vmem:[#allocation15] sm:$0x1] }
 0x68f   :  { %5043 = vmatprep.subr.bf16.mxu0 %v10631_v57  ;;  %5084 = vmatprep.subr.bf16.mxu1 %v10633_v58  ;;  %v4848_v55 = vpack.c.bf16 %v4844_v50, %v4844_v50  ;;  %v11961_v57 = vld [vmem:[#allocation23_spill] sm:$0xff]  ;;  %v11962_v58 = vld [vmem:[#allocation24_spill] sm:$0xff]  ;;  %v12016_v50 = vld [vmem:[#allocation78_spill] sm:$0xff] }
 0x690   :  { %5073 = vmatprep.mubr.bf16.mxu0 %v11759_v10  ;;  %5114 = vmatprep.mubr.bf16.mxu1 %v11759_v10 }
 0x692   :  { %5044 = vmatpush1.bf16.msra.mxu0 %v10637_v59  ;;  %5085 = vmatpush1.bf16.msra.mxu1 %v10639_v60  ;;  %v11963_v59 = vld [vmem:[#allocation25_spill] sm:$0xff]  ;;  %v11964_v60 = vld [vmem:[#allocation26_spill] sm:$0xff] }
 0x693   :  { %5045 = vmatprep.subr.bf16.mxu0 %v10643_v62  ;;  %5086 = vmatprep.subr.bf16.mxu1 %v10645_v63  ;;  %v11965_v62 = vld [vmem:[#allocation27_spill] sm:$0xff]  ;;  %v11966_v63 = vld [vmem:[#allocation28_spill] sm:$0xff] }
 0x696   :  { %5046 = vmatpush1.bf16.msra.mxu0 %v10651_v51  ;;  %5087 = vmatpush1.bf16.msra.mxu1 %v10653_v52  ;;  %v11967_v51 = vld [vmem:[#allocation29_spill] sm:$0xff]  ;;  %v11968_v52 = vld [vmem:[#allocation30_spill] sm:$0xff] }
 0x697   :  { %5047 = vmatprep.subr.bf16.mxu0 %v10657_v13  ;;  %5088 = vmatprep.subr.bf16.mxu1 %v10659_v9  ;;  %v11969_v13 = vld [vmem:[#allocation31_spill] sm:$0xff]  ;;  %v11970_v9 = vld [vmem:[#allocation32_spill] sm:$0xff] }
 0x69a   :  { %5048 = vmatpush1.bf16.msra.mxu0 %v10663_v22  ;;  %5089 = vmatpush1.bf16.msra.mxu1 %v10665_v20  ;;  %v11971_v22 = vld [vmem:[#allocation33_spill] sm:$0xff]  ;;  %v11972_v20 = vld [vmem:[#allocation34_spill] sm:$0xff] }
 0x69b   :  { %5049 = vmatprep.subr.bf16.mxu0 %v10669_v16  ;;  %5090 = vmatprep.subr.bf16.mxu1 %v10671_v6  ;;  %v11973_v16 = vld [vmem:[#allocation35_spill] sm:$0xff]  ;;  %v11974_v6 = vld [vmem:[#allocation36_spill] sm:$0xff] }
 0x69e   :  { %5050 = vmatpush1.bf16.msra.mxu0 %v10675_v3  ;;  %5091 = vmatpush1.bf16.msra.mxu1 %v10677_v19  ;;  %v11975_v3 = vld [vmem:[#allocation37_spill] sm:$0xff]  ;;  %v11976_v19 = vld [vmem:[#allocation38_spill] sm:$0xff] }
 0x69f   :  { %5051 = vmatprep.subr.bf16.mxu0 %v10681_v53  ;;  %5092 = vmatprep.subr.bf16.mxu1 %v10683_v5  ;;  %v11977_v53 = vld [vmem:[#allocation39_spill] sm:$0xff]  ;;  %v11978_v5 = vld [vmem:[#allocation40_spill] sm:$0xff] }
 0x6a2   :  { %5052 = vmatpush1.bf16.msra.mxu0 %v10687_v11  ;;  %5093 = vmatpush1.bf16.msra.mxu1 %v10689_v17  ;;  %v11979_v11 = vld [vmem:[#allocation41_spill] sm:$0xff]  ;;  %v11980_v17 = vld [vmem:[#allocation42_spill] sm:$0xff] }
 0x6a3   :  { %5053 = vmatprep.subr.bf16.mxu0 %v10693_v23  ;;  %5094 = vmatprep.subr.bf16.mxu1 %v10695_v1  ;;  %v11981_v23 = vld [vmem:[#allocation43_spill] sm:$0xff]  ;;  %v11982_v1 = vld [vmem:[#allocation45_spill] sm:$0xff] }
 0x6a6   :  { %5054 = vmatpush1.bf16.msra.mxu0 %v10699_v2  ;;  %5095 = vmatpush1.bf16.msra.mxu1 %v10701_v54  ;;  %v11983_v2 = vld [vmem:[#allocation47_spill] sm:$0xff]  ;;  %v11984_v54 = vld [vmem:[#allocation44_spill] sm:$0xff] }
 0x6a7   :  { %5055 = vmatprep.subr.bf16.mxu0 %v10705_v61  ;;  %5096 = vmatprep.subr.bf16.mxu1 %v10707_v12  ;;  %v11985_v61 = vld [vmem:[#allocation46_spill] sm:$0xff]  ;;  %v11986_v12 = vld [vmem:[#allocation49_spill] sm:$0xff] }
 0x6aa   :  { %5056 = vmatpush1.bf16.msra.mxu0 %v10711_v4  ;;  %5097 = vmatpush1.bf16.msra.mxu1 %v10713_v7  ;;  %v11987_v4 = vld [vmem:[#allocation48_spill] sm:$0xff]  ;;  %v11988_v7 = vld [vmem:[#allocation50_spill] sm:$0xff] }
 0x6ab   :  { %5610 = vmatprep.subr.bf16.mxu0 %v10719_v28  ;;  %5651 = vmatprep.subr.bf16.mxu1 %v10721_v29  ;;  %v11989_v28 = vld [vmem:[#allocation51_spill] sm:$0xff]  ;;  %v11990_v29 = vld [vmem:[#allocation52_spill] sm:$0xff] }
 0x6ad   :  { %5074 = vmatmul.mubr.bf16.vlgmr.msra.gmra.mrb[44].mxu0 %v4848_v55  ;;  %5115 = vmatmul.mubr.bf16.vlgmr.msra.gmra.mrb[44].mxu1 %v4848_v55  ;;  %v12017_v55 = vld [vmem:[#allocation79_spill] sm:$0xff] }
 0x6ae   :  { %5611 = vmatpush1.bf16.msra.mxu0 %v10723_v30  ;;  %5652 = vmatpush1.bf16.msra.mxu1 %v10725_v31  ;;  %v11991_v30 = vld [vmem:[#allocation53_spill] sm:$0xff]  ;;  %v11992_v31 = vld [vmem:[#allocation54_spill] sm:$0xff] }
 0x6af   :  { %5612 = vmatprep.subr.bf16.mxu0 %v10731_v32  ;;  %5653 = vmatprep.subr.bf16.mxu1 %v10733_v33  ;;  %v11993_v32 = vld [vmem:[#allocation55_spill] sm:$0xff]  ;;  %v11994_v33 = vld [vmem:[#allocation56_spill] sm:$0xff] }
 0x6b2   :  { %5613 = vmatpush1.bf16.msra.mxu0 %v11961_v57  ;;  %5654 = vmatpush1.bf16.msra.mxu1 %v11962_v58  ;;  %v12018_v57 = vld [vmem:[#allocation80_spill] sm:$0xff]  ;;  %v11025_v58 = vld [vmem:[#allocation11 + $0x104] ss:$16 sps:$4 sm:$0xff]  }
 0x6b3   :  { %5614 = vmatprep.subr.bf16.mxu0 %v11963_v59  ;;  %5655 = vmatprep.subr.bf16.mxu1 %v11964_v60  ;;  %v11027_v59 = vld [vmem:[#allocation11 + $0x10c] ss:$16 sps:$4 sm:$0xff]  }
 0x6b4   :  { %v8203_v60 = vld [vmem:[%s11517_s3 + $0x4] sm:$0xf] }
 0x6b6   :  { %5615 = vmatpush1.bf16.msra.mxu0 %v11965_v62  ;;  %5656 = vmatpush1.bf16.msra.mxu1 %v11966_v63  ;;  %v4718_v62 = vrot.slane %v8203_v60, %v10092_v21  ;;  %v4722_v63 = vrot.slane %v8203_v60, %v10099_v0 }
 0x6b7   :  { %5616 = vmatprep.subr.bf16.mxu0 %v11967_v51  ;;  %5657 = vmatprep.subr.bf16.mxu1 %v11968_v52 }
 0x6ba   :  { %5617 = vmatpush1.bf16.msra.mxu0 %v11969_v13  ;;  %5658 = vmatpush1.bf16.msra.mxu1 %v11970_v9 }
 0x6bb   :  { %5618 = vmatprep.subr.bf16.mxu0 %v11971_v22  ;;  %5659 = vmatprep.subr.bf16.mxu1 %v11972_v20 }
 0x6be   :  { %5619 = vmatpush1.bf16.msra.mxu0 %v11973_v16  ;;  %5660 = vmatpush1.bf16.msra.mxu1 %v11974_v6 }
 0x6bf   :  { %5620 = vmatprep.subr.bf16.mxu0 %v11975_v3  ;;  %5661 = vmatprep.subr.bf16.mxu1 %v11976_v19 }
 0x6c2   :  { %5621 = vmatpush1.bf16.msra.mxu0 %v11977_v53  ;;  %5662 = vmatpush1.bf16.msra.mxu1 %v11978_v5 }
 0x6c3   :  { %5622 = vmatprep.subr.bf16.mxu0 %v11979_v11  ;;  %5663 = vmatprep.subr.bf16.mxu1 %v11980_v17  ;;  %v4730_v11 = vrot.slane %v8203_v60, %v11785_v24 }
 0x6c6   :  { %5623 = vmatpush1.bf16.msra.mxu0 %v11981_v23  ;;  %5664 = vmatpush1.bf16.msra.mxu1 %v11982_v1  ;;  %v4726_v23 = vrot.slane %v8203_v60, %v11786_v14 }
 0x6c7   :  { %5624 = vmatprep.subr.bf16.mxu0 %v11983_v2  ;;  %5665 = vmatprep.subr.bf16.mxu1 %v11984_v54 }
 0x6ca   :  { %5625 = vmatpush1.bf16.msra.mxu0 %v11985_v61  ;;  %5666 = vmatpush1.bf16.msra.mxu1 %v11986_v12 }
 0x6cb   :  { %5626 = vmatprep.subr.bf16.mxu0 %v11987_v4  ;;  %5667 = vmatprep.subr.bf16.mxu1 %v11988_v7 }
 0x6ce   :  { %5627 = vmatpush1.bf16.msra.mxu0 %v11989_v28  ;;  %5668 = vmatpush1.bf16.msra.mxu1 %v11990_v29 }
 0x6cf   :  { %5628 = vmatprep.subr.bf16.mxu0 %v11991_v30  ;;  %5669 = vmatprep.subr.bf16.mxu1 %v11992_v31 }
 0x6d2   :  { %5629 = vmatpush1.bf16.msra.mxu0 %v11993_v32  ;;  %5670 = vmatpush1.bf16.msra.mxu1 %v11994_v33  ;;  %v4312_v32 = vld [vmem:[#allocation17 + $0x1] sm:$0x1] }
 0x6d3   :  { %5630 = vmatprep.subr.bf16.mxu0 %v11995_v35  ;;  %5671 = vmatprep.subr.bf16.mxu1 %v11996_v36 }
 0x6d6   :  { %5631 = vmatpush1.bf16.msra.mxu0 %v11997_v8  ;;  %5672 = vmatpush1.bf16.msra.mxu1 %v11998_v25 }
 0x6d7   :  { %5632 = vmatprep.subr.bf16.mxu0 %v11999_v44  ;;  %5673 = vmatprep.subr.bf16.mxu1 %v12000_v47 }
 0x6da   :  { %5633 = vmatpush1.bf16.msra.mxu0 %v12001_v42  ;;  %5674 = vmatpush1.bf16.msra.mxu1 %v12002_v45 }
 0x6db   :  { %5634 = vmatprep.subr.bf16.mxu0 %v12003_v40  ;;  %5675 = vmatprep.subr.bf16.mxu1 %v12004_v48 }
 0x6de   :  { %5635 = vmatpush1.bf16.msra.mxu0 %v12005_v56  ;;  %5676 = vmatpush1.bf16.msra.mxu1 %v12006_v41 }
 0x6df   :  { %5636 = vmatprep.subr.bf16.mxu0 %v12007_v26  ;;  %5677 = vmatprep.subr.bf16.mxu1 %v12008_v49 }
 0x6e2   :  { %5637 = vmatpush1.bf16.msra.mxu0 %v12009_v39  ;;  %5678 = vmatpush1.bf16.msra.mxu1 %v12010_v43 }
 0x6e3   :  { %5638 = vmatprep.subr.bf16.mxu0 %v12011_v46  ;;  %5679 = vmatprep.subr.bf16.mxu1 %v12012_v38  ;;  %v4847_v46 = vld [vmem:[#allocation3 + $0x5] ss:$8 sm:$0xf] }
 0x6e6   :  { %5639 = vmatpush1.bf16.msra.mxu0 %v12013_v37  ;;  %5680 = vmatpush1.bf16.msra.mxu1 %v12014_v27 }
 0x6e7   :  { %5640 = vmatprep.subr.bf16.mxu0 %v12015_v34  ;;  %5681 = vmatprep.subr.bf16.mxu1 %v12016_v50 }
 0x6ea   :  { %5641 = vmatpush1.bf16.msra.mxu0 %v12017_v55  ;;  %5682 = vmatpush1.bf16.msra.mxu1 %v12018_v57 }
 0x6eb   :  { %5916 = vmatprep.subr.bf16.mxu0 %v11025_v58  ;;  %5957 = vmatprep.subr.bf16.mxu1 %v11027_v59 }
 0x760   :  { %v4769_v51 = vpop.f32.mrb[40].mxu0  ;;  %v4810_v52 = vpop.f32.mrb[40].mxu1 }
 0x761   :  { %v4770_v13 = vadd.f32 %v4769_v51, %v4718_v62  ;;  %v4771_v9 = vpop.f32.mrb[41].mxu0  ;;  %v4812_v22 = vpop.f32.mrb[41].mxu1  ;;  %v4811_v2 = vadd.f32 %v4810_v52, %v4726_v23 }
 0x762   :  { %v4772_v20 = vadd.f32 %v4771_v9, %v4722_v63  ;;  %v4773_v16 = vpop.f32.mrb[42].mxu0  ;;  %v4814_v6 = vpop.f32.mrb[42].mxu1  ;;  %v4813_v17 = vadd.f32 %v4812_v22, %v4730_v11 }
 0x763   :  { %v8268_v3 = vmul.f32 -1.442695, %v4770_v13  ;;  %v4774_v19 = vpop.f32.mrb[43].mxu0  ;;  %v4815_v53 = vpop.f32.mrb[43].mxu1 }
 0x764   :  { %v8269_v5 = vmul.f32 -1.442695, %v4772_v20  ;;  %v8270_v1 = vmul.f32 -1.442695, %v4813_v17  ;;  %v4845_v19 = vld [vmem:[#allocation17] sm:$0x1] }
 0x765   :  { %9419 = vpow2.f32 %v8268_v3 }
 0x766   :  { %9421 = vpow2.f32 %v8269_v5 }
 0x767   :  { %9423 = vpow2.f32 %v8270_v1 }
 0x768   :  { %9425 = vtanh.f32 %v4811_v2 }
 0x76f   :  { %v9420_v54 = vpop.eup %9419 }
 0x770   :  { %v9422_v61 = vpop.eup %9421  ;;  %v4820_v12 = vadd.f32 1.0, %v9420_v54 }
 0x771   :  { %v4826_v4 = vadd.f32 1.0, %v9422_v61  ;;  %v9424_v7 = vpop.eup %9423 }
 0x772   :  { %9427 = vrcp.f32 %v4820_v12  ;;  %v9426_v28 = vpop.eup %9425  ;;  %v4833_v33 = vadd.f32 1.0, %v9424_v7  ;;  %v11047_v7 = vld [vmem:[#allocation11 + $0x100] ss:$16 sps:$4 sm:$0xff]  }
 0x773   :  { %9429 = vrcp.f32 %v4826_v4 }
 0x774   :  { %9431 = vrcp.f32 %v4833_v33  ;;  %v11059_v33 = vld [vmem:[#allocation11 + $0x128] ss:$16 sps:$4 sm:$0xff]  }
 0x77c   :  { %v9428_v29 = vpop.eup %9427 }
 0x77d   :  { %v9430_v30 = vpop.eup %9429  ;;  %v4837_v31 = vmul.f32 %v9428_v29, %v9426_v28  ;;  %v11049_v28 = vld [vmem:[#allocation11 + $0x108] ss:$16 sps:$4 sm:$0xff]  }
 0x77e   :  { %v4836_v35 = vmul.f32 %v9430_v30, %v4312_v32  ;;  %v9432_v37 = vpop.eup %9431  ;;  %v11051_v30 = vld [vmem:[#allocation11 + $0x124] ss:$16 sps:$4 sm:$0xff]   ;;  %v11057_v32 = vld [vmem:[#allocation11 + $0x120] ss:$16 sps:$4 sm:$0xff]  }
 0x780   :  { %v4838_v36 = vadd.f32 %v4837_v31, %v4836_v35  ;;  %v5075_v8 = vpop.f32.mrb[44].mxu0  ;;  %v5116_v25 = vpop.f32.mrb[44].mxu1  ;;  %v11053_v31 = vld [vmem:[#allocation11 + $0x12c] ss:$16 sps:$4 sm:$0xff]   ;;  %v11063_v35 = vld [vmem:[#allocation11 + $0x144] ss:$16 sps:$4 sm:$0xff]  }
 0x781   :  { %v5077_v44 = vpop.f32.mrb[45].mxu0  ;;  %v5118_v47 = vpop.f32.mrb[45].mxu1 }
 0x782   :  { %9433 = vtanh.f32 %v4838_v36  ;;  %4842 = vst [vmem:[#allocation17 + $0x1] sm:$0x1] %v4838_v36  ;;  %v5127_v42 = vcombine.low %v5075_v8, %v5077_v44  ;;  %v5128_v45 = vcombine.low %v5116_v25, %v5118_v47  ;;  %v5079_v40 = vpop.f32.mrb[46].mxu0  ;;  %v5120_v48 = vpop.f32.mrb[46].mxu1  ;;  %v11065_v36 = vld [vmem:[#allocation11 + $0x14c] ss:$16 sps:$4 sm:$0xff]  }
 0x783   :  { %v5080_v56 = vpop.f32.mrb[47].mxu0  ;;  %v5121_v41 = vpop.f32.mrb[47].mxu1  ;;  %v11071_v8 = vld [vmem:[#allocation11 + $0x140] ss:$16 sps:$4 sm:$0xff]   ;;  %v11073_v25 = vld [vmem:[#allocation11 + $0x148] ss:$16 sps:$4 sm:$0xff]  }
 0x784   :  { %v5135_v26 = vrot.slane %v5127_v42, %v10107_v15  ;;  %v5142_v49 = vrot.slane %v5128_v45, %v10107_v15  ;;  %v11077_v44 = vld [vmem:[#allocation11 + $0x164] ss:$16 sps:$4 sm:$0xff]   ;;  %v11079_v47 = vld [vmem:[#allocation11 + $0x16c] ss:$16 sps:$4 sm:$0xff]   ;;  %v11083_v42 = vld [vmem:[#allocation11 + $0x160] ss:$16 sps:$4 sm:$0xff]  }
 0x785   :  { %v11085_v45 = vld [vmem:[#allocation11 + $0x168] ss:$16 sps:$4 sm:$0xff]   ;;  %v11089_v40 = vld [vmem:[#allocation11 + $0x184] ss:$16 sps:$4 sm:$0xff]   ;;  %v11091_v48 = vld [vmem:[#allocation11 + $0x18c] ss:$16 sps:$4 sm:$0xff]  }
 0x786   :  { %v5143_v39 = vcombine.low %v5135_v26, %v5142_v49  ;;  %v11095_v56 = vld [vmem:[#allocation11 + $0x180] ss:$16 sps:$4 sm:$0xff]   ;;  %v11097_v41 = vld [vmem:[#allocation11 + $0x188] ss:$16 sps:$4 sm:$0xff]   ;;  %v11101_v26 = vld [vmem:[#allocation11 + $0x1a4] ss:$16 sps:$4 sm:$0xff]  }
 0x787   :  { %v11103_v49 = vld [vmem:[#allocation11 + $0x1ac] ss:$16 sps:$4 sm:$0xff]  }
 0x788   :  { %v5150_v43 = vrot.slane %v5143_v39, %v10107_v15  ;;  %v11107_v39 = vld [vmem:[#allocation11 + $0x1a0] ss:$16 sps:$4 sm:$0xff]  }
 0x78a   :  { %v5152_v38 = vadd.f32 %v5150_v43, %v4847_v46  ;;  %v11109_v43 = vld [vmem:[#allocation11 + $0x1a8] ss:$16 sps:$4 sm:$0xff]   ;;  %v11113_v46 = vld [vmem:[#allocation11 + $0x1c4] ss:$16 sps:$4 sm:$0xff]  }
 0x78c   :  { %v9434_v27 = vpop.eup %9433  ;;  %v8303_v34 = vmul.f32 -1.442695, %v5152_v38  ;;  %v5160_v50 = vrot.slane %v5152_v38, 1  ;;  %v5171_v60 = vrot.slane %v5152_v38, 3  ;;  %v5168_v52 = vrot.slane %v5152_v38, 2 }
 0x78d   :  { %v4840_v55 = vmul.f32 %v9434_v27, %v9432_v37  ;;  %v11115_v38 = vld [vmem:[#allocation11 + $0x1cc] ss:$16 sps:$4 sm:$0xff]   ;;  %v11119_v37 = vld [vmem:[#allocation11 + $0x1c0] ss:$16 sps:$4 sm:$0xff]   ;;  %v11121_v27 = vld [vmem:[#allocation11 + $0x1c8] ss:$16 sps:$4 sm:$0xff]  }
 0x78e   :  { %9435 = vpow2.f32 %v8303_v34  ;;  %v8304_v57 = vmul.f32 -1.442695, %v5160_v50  ;;  %v8305_v62 = vmul.f32 -1.442695, %v5171_v60  ;;  %v11125_v34 = vld [vmem:[#allocation11 + $0x1e4] ss:$16 sps:$4 sm:$0xff]  }
 0x78f   :  { %4841 = vst [vmem:[#allocation15 + $0x1] sm:$0x1] %v4840_v55  ;;  %4843 = vst [vmem:[#allocation4 + $0x4] sm:$0x1] %v4840_v55  ;;  %v11127_v50 = vld [vmem:[#allocation11 + $0x1ec] ss:$16 sps:$4 sm:$0xff]  }
 0x790   :  { %9437 = vpow2.f32 %v8304_v57  ;;  %v11131_v55 = vld [vmem:[#allocation11 + $0x1e0] ss:$16 sps:$4 sm:$0xff]   ;;  %v11133_v57 = vld [vmem:[#allocation11 + $0x1e8] ss:$16 sps:$4 sm:$0xff]  }
 0x791   :  { %9439 = vpow2.f32 %v8305_v62 }
 0x796   :  { %v5186_v63 = vld [vmem:[#allocation15 + $0x1] sm:$0x1] }
 0x797   :  { %5189 = vst.msk [vmem:[#allocation5 + $0x1] sm:$0x1] %vm10054_vm0, %v5186_v63  ;;  %v11139_v63 = vld [vmem:[#allocation11 + $0x204] ss:$16 sps:$4 sm:$0xff]  }
 0x798   :  { %v9436_v51 = vpop.eup %9435 }
 0x799   :  { %v5156_v13 = vadd.f32 1.0, %v9436_v51  ;;  %v11141_v51 = vld [vmem:[#allocation11 + $0x20c] ss:$16 sps:$4 sm:$0xff]  }
 0x79a   :  { %v9438_v9 = vpop.eup %9437 }
 0x79b   :  { %9441 = vrcp.f32 %v5156_v13  ;;  %v5165_v22 = vadd.f32 1.0, %v9438_v9  ;;  %v9440_v20 = vpop.eup %9439  ;;  %v11145_v13 = vld [vmem:[#allocation11 + $0x208] ss:$16 sps:$4 sm:$0xff]   ;;  %v11151_v9 = vld [vmem:[#allocation11 + $0x224] ss:$16 sps:$4 sm:$0xff]  }
 0x79c   :  { %9443 = vtanh.f32 %v5168_v52  ;;  %v5176_v53 = vadd.f32 1.0, %v9440_v20  ;;  %v11143_v52 = vld [vmem:[#allocation11 + $0x200] ss:$16 sps:$4 sm:$0xff]  }
 0x79d   :  { %9445 = vrcp.f32 %v5165_v22  ;;  %v11153_v22 = vld [vmem:[#allocation11 + $0x22c] ss:$16 sps:$4 sm:$0xff]   ;;  %v11155_v20 = vld [vmem:[#allocation11 + $0x220] ss:$16 sps:$4 sm:$0xff]  }
 0x79e   :  { %9447 = vrcp.f32 %v5176_v53  ;;  %12019 = vst [vmem:[#allocation23_spill] sm:$0xff] %v11155_v20  ;;  %v11169_v53 = vld [vmem:[#allocation11 + $0x248] ss:$16 sps:$4 sm:$0xff]  }
 0x79f   :  { %12024 = vst [vmem:[#allocation28_spill] sm:$0xff] %v11169_v53 }
 0x7a5   :  { %v9442_v16 = vpop.eup %9441 }
 0x7a6   :  { %v9444_v6 = vpop.eup %9443 }
 0x7a7   :  { %v9446_v3 = vpop.eup %9445  ;;  %v5180_v11 = vmul.f32 %v9444_v6, %v9442_v16  ;;  %v11157_v16 = vld [vmem:[#allocation11 + $0x228] ss:$16 sps:$4 sm:$0xff]   ;;  %v11163_v6 = vld [vmem:[#allocation11 + $0x244] ss:$16 sps:$4 sm:$0xff]  }
 0x7a8   :  { %v5179_v5 = vmul.f32 %v9446_v3, %v4845_v19  ;;  %v9448_v23 = vpop.eup %9447  ;;  %12020 = vst [vmem:[#allocation24_spill] sm:$0xff] %v11157_v16  ;;  %12021 = vst [vmem:[#allocation25_spill] sm:$0xff] %v11163_v6  ;;  %v11165_v3 = vld [vmem:[#allocation11 + $0x24c] ss:$16 sps:$4 sm:$0xff]   ;;  %v11167_v19 = vld [vmem:[#allocation11 + $0x240] ss:$16 sps:$4 sm:$0xff]  }
 0x7a9   :  { %12022 = vst [vmem:[#allocation26_spill] sm:$0xff] %v11165_v3  ;;  %12023 = vst [vmem:[#allocation27_spill] sm:$0xff] %v11167_v19 }
 0x7aa   :  { %v5181_v17 = vadd.f32 %v5180_v11, %v5179_v5  ;;  %v11175_v5 = vld [vmem:[#allocation11 + $0x264] ss:$16 sps:$4 sm:$0xff]   ;;  %v11177_v11 = vld [vmem:[#allocation11 + $0x26c] ss:$16 sps:$4 sm:$0xff]  }
 0x7ab   :  { %12025 = vst [vmem:[#allocation29_spill] sm:$0xff] %v11175_v5  ;;  %12026 = vst [vmem:[#allocation30_spill] sm:$0xff] %v11177_v11 }
 0x7ac   :  { %9449 = vtanh.f32 %v5181_v17  ;;  %5185 = vst [vmem:[#allocation17] sm:$0x1] %v5181_v17  ;;  %v11179_v17 = vld [vmem:[#allocation11 + $0x260] ss:$16 sps:$4 sm:$0xff]  }
 0x7ad   :  { %12027 = vst [vmem:[#allocation31_spill] sm:$0xff] %v11179_v17 }
 0x7b6   :  { %v9450_v1 = vpop.eup %9449 }
 0x7b7   :  { %v5183_v2 = vmul.f32 %v9450_v1, %v9448_v23  ;;  %v11181_v23 = vld [vmem:[#allocation11 + $0x268] ss:$16 sps:$4 sm:$0xff]   ;;  %v11187_v1 = vld [vmem:[#allocation11 + $0x284] ss:$16 sps:$4 sm:$0xff]  }
 0x7b8   :  { %12028 = vst [vmem:[#allocation32_spill] sm:$0xff] %v11181_v23  ;;  %12029 = vst [vmem:[#allocation33_spill] sm:$0xff] %v11187_v1 }
 0x7b9   :  { %5184 = vst [vmem:[#allocation15] sm:$0x1] %v5183_v2  ;;  %5188 = vst.msk [vmem:[#allocation5] sm:$0x1] %vm10054_vm0, %v5183_v2  ;;  %v11189_v2 = vld [vmem:[#allocation11 + $0x28c] ss:$16 sps:$4 sm:$0xff]  }
 0x7ba   :  { %12030 = vst [vmem:[#allocation34_spill] sm:$0xff] %v11189_v2 }
 0x7c0   :  { %v5190_v54 = vld [vmem:[#allocation5] sm:$0x3]  ;;  %v5719_v60 = vld [vmem:[#allocation15] sm:$0x1] }
 0x7c1   :  { %v5199_v61 = vrot.slane %v5190_v54, %v10099_v0  ;;  %v5195_v12 = vrot.slane %v5190_v54, %v10092_v21  ;;  %v5723_v62 = vpack.c.bf16 %v5719_v60, %v5719_v60  ;;  %v11191_v54 = vld [vmem:[#allocation11 + $0x280] ss:$16 sps:$4 sm:$0xff]   ;;  %v11205_v60 = vld [vmem:[#allocation11 + $0x2a8] ss:$16 sps:$4 sm:$0xff]  }
 0x7c2   :  { %12031 = vst [vmem:[#allocation35_spill] sm:$0xff] %v11191_v54  ;;  %12036 = vst [vmem:[#allocation40_spill] sm:$0xff] %v11205_v60 }
 0x7c3   :  { %v5203_v4 = vpack.c.bf16 %v5199_v61, %v5199_v61  ;;  %v5202_v29 = vpack.c.bf16 %v5195_v12, %v5195_v12  ;;  %v11193_v61 = vld [vmem:[#allocation11 + $0x288] ss:$16 sps:$4 sm:$0xff]   ;;  %v11199_v12 = vld [vmem:[#allocation11 + $0x2a4] ss:$16 sps:$4 sm:$0xff]  }
 0x7c4   :  { %12032 = vst [vmem:[#allocation36_spill] sm:$0xff] %v11193_v61  ;;  %12033 = vst [vmem:[#allocation37_spill] sm:$0xff] %v11199_v12 }
 0x7c5   :  { %5642 = vmatprep.mubr.bf16.mxu0 %v5203_v4  ;;  %5683 = vmatprep.mubr.bf16.mxu1 %v5203_v4  ;;  %v11201_v4 = vld [vmem:[#allocation11 + $0x2ac] ss:$16 sps:$4 sm:$0xff]  }
 0x7c6   :  { %5643 = vmatmul.mubr.bf16.vlgmr.msra.gmra.mrb[48].mxu0 %v5202_v29  ;;  %5684 = vmatmul.mubr.bf16.vlgmr.msra.gmra.mrb[48].mxu1 %v5202_v29  ;;  %12034 = vst [vmem:[#allocation38_spill] sm:$0xff] %v11201_v4  ;;  %v11203_v29 = vld [vmem:[#allocation11 + $0x2a0] ss:$16 sps:$4 sm:$0xff]  }
 0x7c7   :  { %5917 = vmatpush1.bf16.msra.mxu0 %v11047_v7  ;;  %5958 = vmatpush1.bf16.msra.mxu1 %v11049_v28  ;;  %12035 = vst [vmem:[#allocation39_spill] sm:$0xff] %v11203_v29 }
 0x7c8   :  { %5918 = vmatprep.subr.bf16.mxu0 %v11051_v30  ;;  %5959 = vmatprep.subr.bf16.mxu1 %v11053_v31 }
 0x7c9   :  { %5948 = vmatprep.mubr.bf16.mxu0 %v11759_v10  ;;  %5989 = vmatprep.mubr.bf16.mxu1 %v11759_v10 }
 0x7cb   :  { %5919 = vmatpush1.bf16.msra.mxu0 %v11057_v32  ;;  %5960 = vmatpush1.bf16.msra.mxu1 %v11059_v33 }
 0x7cc   :  { %5920 = vmatprep.subr.bf16.mxu0 %v11063_v35  ;;  %5961 = vmatprep.subr.bf16.mxu1 %v11065_v36 }
 0x7cf   :  { %5921 = vmatpush1.bf16.msra.mxu0 %v11071_v8  ;;  %5962 = vmatpush1.bf16.msra.mxu1 %v11073_v25 }
 0x7d0   :  { %5922 = vmatprep.subr.bf16.mxu0 %v11077_v44  ;;  %5963 = vmatprep.subr.bf16.mxu1 %v11079_v47 }
 0x7d3   :  { %5923 = vmatpush1.bf16.msra.mxu0 %v11083_v42  ;;  %5964 = vmatpush1.bf16.msra.mxu1 %v11085_v45 }
 0x7d4   :  { %5924 = vmatprep.subr.bf16.mxu0 %v11089_v40  ;;  %5965 = vmatprep.subr.bf16.mxu1 %v11091_v48 }
 0x7d7   :  { %5925 = vmatpush1.bf16.msra.mxu0 %v11095_v56  ;;  %5966 = vmatpush1.bf16.msra.mxu1 %v11097_v41 }
 0x7d8   :  { %5926 = vmatprep.subr.bf16.mxu0 %v11101_v26  ;;  %5967 = vmatprep.subr.bf16.mxu1 %v11103_v49 }
 0x7db   :  { %5927 = vmatpush1.bf16.msra.mxu0 %v11107_v39  ;;  %5968 = vmatpush1.bf16.msra.mxu1 %v11109_v43 }
 0x7dc   :  { %5928 = vmatprep.subr.bf16.mxu0 %v11113_v46  ;;  %5969 = vmatprep.subr.bf16.mxu1 %v11115_v38 }
 0x7df   :  { %5929 = vmatpush1.bf16.msra.mxu0 %v11119_v37  ;;  %5970 = vmatpush1.bf16.msra.mxu1 %v11121_v27 }
 0x7e0   :  { %5930 = vmatprep.subr.bf16.mxu0 %v11125_v34  ;;  %5971 = vmatprep.subr.bf16.mxu1 %v11127_v50 }
 0x7e3   :  { %5931 = vmatpush1.bf16.msra.mxu0 %v11131_v55  ;;  %5972 = vmatpush1.bf16.msra.mxu1 %v11133_v57 }
 0x7e4   :  { %6485 = vmatprep.subr.bf16.mxu0 %v11139_v63  ;;  %6526 = vmatprep.subr.bf16.mxu1 %v11141_v51 }
 0x7e6   :  { %5949 = vmatmul.mubr.bf16.vlgmr.msra.gmra.mrb[52].mxu0 %v5723_v62  ;;  %5990 = vmatmul.mubr.bf16.vlgmr.msra.gmra.mrb[52].mxu1 %v5723_v62  ;;  %v11211_v62 = vld [vmem:[#allocation11 + $0x2c4] ss:$16 sps:$4 sm:$0xff]  }
 0x7e7   :  { %6486 = vmatpush1.bf16.msra.mxu0 %v11143_v52  ;;  %6527 = vmatpush1.bf16.msra.mxu1 %v11145_v13  ;;  %12037 = vst [vmem:[#allocation41_spill] sm:$0xff] %v11211_v62 }
 0x7e8   :  { %6487 = vmatprep.subr.bf16.mxu0 %v11151_v9  ;;  %6528 = vmatprep.subr.bf16.mxu1 %v11153_v22 }
 0x7eb   :  { %6488 = vmatpush1.bf16.msra.mxu0 %v11155_v20  ;;  %6529 = vmatpush1.bf16.msra.mxu1 %v11157_v16 }
 0x7ec   :  { %6489 = vmatprep.subr.bf16.mxu0 %v11163_v6  ;;  %6530 = vmatprep.subr.bf16.mxu1 %v11165_v3 }
 0x7ef   :  { %6490 = vmatpush1.bf16.msra.mxu0 %v11167_v19  ;;  %6531 = vmatpush1.bf16.msra.mxu1 %v11169_v53 }
 0x7f0   :  { %6491 = vmatprep.subr.bf16.mxu0 %v11175_v5  ;;  %6532 = vmatprep.subr.bf16.mxu1 %v11177_v11 }
 0x7f3   :  { %6492 = vmatpush1.bf16.msra.mxu0 %v11179_v17  ;;  %6533 = vmatpush1.bf16.msra.mxu1 %v11181_v23 }
 0x7f4   :  { %6493 = vmatprep.subr.bf16.mxu0 %v11187_v1  ;;  %6534 = vmatprep.subr.bf16.mxu1 %v11189_v2  ;;  %v11217_v2 = vld [vmem:[#allocation11 + $0x2c8] ss:$16 sps:$4 sm:$0xff]   ;;  %v11305_v1 = vld [vmem:[#allocation11 + $0x3c4] ss:$16 sps:$4 sm:$0xff]  }
 0x7f5   :  { %12040 = vst [vmem:[#allocation45_spill] sm:$0xff] %v11217_v2  ;;  %12069 = vst [vmem:[#allocation73_spill] sm:$0xff] %v11305_v1 }
 0x7f7   :  { %6494 = vmatpush1.bf16.msra.mxu0 %v11191_v54  ;;  %6535 = vmatpush1.bf16.msra.mxu1 %v11193_v61  ;;  %v11213_v54 = vld [vmem:[#allocation11 + $0x2cc] ss:$16 sps:$4 sm:$0xff]   ;;  %v11215_v61 = vld [vmem:[#allocation11 + $0x2c0] ss:$16 sps:$4 sm:$0xff]  }
 0x7f8   :  { %6495 = vmatprep.subr.bf16.mxu0 %v11199_v12  ;;  %6536 = vmatprep.subr.bf16.mxu1 %v11201_v4  ;;  %12038 = vst [vmem:[#allocation42_spill] sm:$0xff] %v11213_v54  ;;  %12039 = vst [vmem:[#allocation43_spill] sm:$0xff] %v11215_v61  ;;  %v11223_v4 = vld [vmem:[#allocation11 + $0x2e4] ss:$16 sps:$4 sm:$0xff]   ;;  %v11229_v12 = vld [vmem:[#allocation11 + $0x2e8] ss:$16 sps:$4 sm:$0xff]  }
 0x7f9   :  { %12041 = vst [vmem:[#allocation47_spill] sm:$0xff] %v11223_v4  ;;  %12044 = vst [vmem:[#allocation49_spill] sm:$0xff] %v11229_v12 }
 0x7fb   :  { %6496 = vmatpush1.bf16.msra.mxu0 %v11203_v29  ;;  %6537 = vmatpush1.bf16.msra.mxu1 %v11205_v60  ;;  %v11225_v29 = vld [vmem:[#allocation11 + $0x2ec] ss:$16 sps:$4 sm:$0xff]   ;;  %v11227_v60 = vld [vmem:[#allocation11 + $0x2e0] ss:$16 sps:$4 sm:$0xff]  }
 0x7fc   :  { %6497 = vmatprep.subr.bf16.mxu0 %v11211_v62  ;;  %6538 = vmatprep.subr.bf16.mxu1 %v11213_v54  ;;  %12042 = vst [vmem:[#allocation44_spill] sm:$0xff] %v11225_v29  ;;  %12043 = vst [vmem:[#allocation46_spill] sm:$0xff] %v11227_v60  ;;  %v11235_v54 = vld [vmem:[#allocation11 + $0x304] ss:$16 sps:$4 sm:$0xff]   ;;  %v11241_v62 = vld [vmem:[#allocation11 + $0x308] ss:$16 sps:$4 sm:$0xff]  }
 0x7fd   :  { %12045 = vst [vmem:[#allocation48_spill] sm:$0xff] %v11235_v54  ;;  %12048 = vst [vmem:[#allocation52_spill] sm:$0xff] %v11241_v62 }
 0x7ff   :  { %6498 = vmatpush1.bf16.msra.mxu0 %v11215_v61  ;;  %6539 = vmatpush1.bf16.msra.mxu1 %v11217_v2  ;;  %v11237_v61 = vld [vmem:[#allocation11 + $0x30c] ss:$16 sps:$4 sm:$0xff]   ;;  %v11239_v2 = vld [vmem:[#allocation11 + $0x300] ss:$16 sps:$4 sm:$0xff]  }
 0x800   :  { %6499 = vmatprep.subr.bf16.mxu0 %v11223_v4  ;;  %6540 = vmatprep.subr.bf16.mxu1 %v11225_v29  ;;  %12046 = vst [vmem:[#allocation50_spill] sm:$0xff] %v11237_v61  ;;  %12047 = vst [vmem:[#allocation51_spill] sm:$0xff] %v11239_v2  ;;  %v11247_v29 = vld [vmem:[#allocation11 + $0x324] ss:$16 sps:$4 sm:$0xff]   ;;  %v11253_v4 = vld [vmem:[#allocation11 + $0x328] ss:$16 sps:$4 sm:$0xff]  }
 0x801   :  { %12049 = vst [vmem:[#allocation53_spill] sm:$0xff] %v11247_v29  ;;  %12052 = vst [vmem:[#allocation56_spill] sm:$0xff] %v11253_v4 }
 0x803   :  { %6500 = vmatpush1.bf16.msra.mxu0 %v11227_v60  ;;  %6541 = vmatpush1.bf16.msra.mxu1 %v11229_v12  ;;  %v11249_v60 = vld [vmem:[#allocation11 + $0x32c] ss:$16 sps:$4 sm:$0xff]   ;;  %v11251_v12 = vld [vmem:[#allocation11 + $0x320] ss:$16 sps:$4 sm:$0xff]  }
 0x804   :  { %6501 = vmatprep.subr.bf16.mxu0 %v11235_v54  ;;  %6542 = vmatprep.subr.bf16.mxu1 %v11237_v61  ;;  %12050 = vst [vmem:[#allocation54_spill] sm:$0xff] %v11249_v60  ;;  %12051 = vst [vmem:[#allocation55_spill] sm:$0xff] %v11251_v12  ;;  %v11259_v61 = vld [vmem:[#allocation11 + $0x344] ss:$16 sps:$4 sm:$0xff]   ;;  %v11265_v54 = vld [vmem:[#allocation11 + $0x348] ss:$16 sps:$4 sm:$0xff]  }
 0x805   :  { %12053 = vst [vmem:[#allocation57_spill] sm:$0xff] %v11259_v61  ;;  %12056 = vst [vmem:[#allocation60_spill] sm:$0xff] %v11265_v54 }
 0x807   :  { %6502 = vmatpush1.bf16.msra.mxu0 %v11239_v2  ;;  %6543 = vmatpush1.bf16.msra.mxu1 %v11241_v62  ;;  %v11261_v2 = vld [vmem:[#allocation11 + $0x34c] ss:$16 sps:$4 sm:$0xff]   ;;  %v11263_v62 = vld [vmem:[#allocation11 + $0x340] ss:$16 sps:$4 sm:$0xff]  }
 0x808   :  { %6503 = vmatprep.subr.bf16.mxu0 %v11247_v29  ;;  %6544 = vmatprep.subr.bf16.mxu1 %v11249_v60  ;;  %12054 = vst [vmem:[#allocation58_spill] sm:$0xff] %v11261_v2  ;;  %12055 = vst [vmem:[#allocation59_spill] sm:$0xff] %v11263_v62  ;;  %v11271_v60 = vld [vmem:[#allocation11 + $0x364] ss:$16 sps:$4 sm:$0xff]   ;;  %v11277_v29 = vld [vmem:[#allocation11 + $0x368] ss:$16 sps:$4 sm:$0xff]  }
 0x809   :  { %12057 = vst [vmem:[#allocation61_spill] sm:$0xff] %v11271_v60  ;;  %12060 = vst [vmem:[#allocation64_spill] sm:$0xff] %v11277_v29 }
 0x80b   :  { %6504 = vmatpush1.bf16.msra.mxu0 %v11251_v12  ;;  %6545 = vmatpush1.bf16.msra.mxu1 %v11253_v4  ;;  %v11273_v12 = vld [vmem:[#allocation11 + $0x36c] ss:$16 sps:$4 sm:$0xff]   ;;  %v11275_v4 = vld [vmem:[#allocation11 + $0x360] ss:$16 sps:$4 sm:$0xff]  }
 0x80c   :  { %6505 = vmatprep.subr.bf16.mxu0 %v11259_v61  ;;  %6546 = vmatprep.subr.bf16.mxu1 %v11261_v2  ;;  %12058 = vst [vmem:[#allocation62_spill] sm:$0xff] %v11273_v12  ;;  %12059 = vst [vmem:[#allocation63_spill] sm:$0xff] %v11275_v4  ;;  %v11283_v2 = vld [vmem:[#allocation11 + $0x384] ss:$16 sps:$4 sm:$0xff]   ;;  %v11289_v61 = vld [vmem:[#allocation11 + $0x388] ss:$16 sps:$4 sm:$0xff]  }
 0x80d   :  { %12061 = vst [vmem:[#allocation65_spill] sm:$0xff] %v11283_v2  ;;  %12064 = vst [vmem:[#allocation68_spill] sm:$0xff] %v11289_v61 }
 0x80f   :  { %6506 = vmatpush1.bf16.msra.mxu0 %v11263_v62  ;;  %6547 = vmatpush1.bf16.msra.mxu1 %v11265_v54  ;;  %v11285_v62 = vld [vmem:[#allocation11 + $0x38c] ss:$16 sps:$4 sm:$0xff]   ;;  %v11287_v54 = vld [vmem:[#allocation11 + $0x380] ss:$16 sps:$4 sm:$0xff]  }
 0x810   :  { %6507 = vmatprep.subr.bf16.mxu0 %v11271_v60  ;;  %6548 = vmatprep.subr.bf16.mxu1 %v11273_v12  ;;  %12062 = vst [vmem:[#allocation66_spill] sm:$0xff] %v11285_v62  ;;  %12063 = vst [vmem:[#allocation67_spill] sm:$0xff] %v11287_v54  ;;  %v11295_v12 = vld [vmem:[#allocation11 + $0x3a4] ss:$16 sps:$4 sm:$0xff]   ;;  %v11301_v60 = vld [vmem:[#allocation11 + $0x3a8] ss:$16 sps:$4 sm:$0xff]  }
 0x811   :  { %12065 = vst [vmem:[#allocation69_spill] sm:$0xff] %v11295_v12  ;;  %12068 = vst [vmem:[#allocation72_spill] sm:$0xff] %v11301_v60 }
 0x813   :  { %6508 = vmatpush1.bf16.msra.mxu0 %v11275_v4  ;;  %6549 = vmatpush1.bf16.msra.mxu1 %v11277_v29  ;;  %v11297_v4 = vld [vmem:[#allocation11 + $0x3ac] ss:$16 sps:$4 sm:$0xff]   ;;  %v11299_v29 = vld [vmem:[#allocation11 + $0x3a0] ss:$16 sps:$4 sm:$0xff]  }
 0x814   :  { %6509 = vmatprep.subr.bf16.mxu0 %v11283_v2  ;;  %6550 = vmatprep.subr.bf16.mxu1 %v11285_v62  ;;  %12066 = vst [vmem:[#allocation70_spill] sm:$0xff] %v11297_v4  ;;  %12067 = vst [vmem:[#allocation71_spill] sm:$0xff] %v11299_v29  ;;  %v11307_v2 = vld [vmem:[#allocation11 + $0x3cc] ss:$16 sps:$4 sm:$0xff]   ;;  %v11317_v62 = vld [vmem:[#allocation11 + $0x3e4] ss:$16 sps:$4 sm:$0xff]  }
 0x815   :  { %12070 = vst [vmem:[#allocation74_spill] sm:$0xff] %v11307_v2  ;;  %12073 = vst [vmem:[#allocation77_spill] sm:$0xff] %v11317_v62 }
 0x817   :  { %6510 = vmatpush1.bf16.msra.mxu0 %v11287_v54  ;;  %6551 = vmatpush1.bf16.msra.mxu1 %v11289_v61  ;;  %v11311_v61 = vld [vmem:[#allocation11 + $0x3c0] ss:$16 sps:$4 sm:$0xff]   ;;  %v11313_v54 = vld [vmem:[#allocation11 + $0x3c8] ss:$16 sps:$4 sm:$0xff]  }
 0x818   :  { %6511 = vmatprep.subr.bf16.mxu0 %v11295_v12  ;;  %6552 = vmatprep.subr.bf16.mxu1 %v11297_v4  ;;  %12071 = vst [vmem:[#allocation75_spill] sm:$0xff] %v11311_v61  ;;  %12072 = vst [vmem:[#allocation76_spill] sm:$0xff] %v11313_v54  ;;  %v11319_v12 = vld [vmem:[#allocation11 + $0x3ec] ss:$16 sps:$4 sm:$0xff]   ;;  %v11323_v4 = vld [vmem:[#allocation11 + $0x3e0] ss:$16 sps:$4 sm:$0xff]  }
 0x819   :  { %12074 = vst [vmem:[#allocation78_spill] sm:$0xff] %v11319_v12  ;;  %12075 = vst [vmem:[#allocation79_spill] sm:$0xff] %v11323_v4 }
 0x81b   :  { %6512 = vmatpush1.bf16.msra.mxu0 %v11299_v29  ;;  %6553 = vmatpush1.bf16.msra.mxu1 %v11301_v60  ;;  %v11325_v29 = vld [vmem:[#allocation11 + $0x3e8] ss:$16 sps:$4 sm:$0xff]  }
 0x81c   :  { %6513 = vmatprep.subr.bf16.mxu0 %v11305_v1  ;;  %6554 = vmatprep.subr.bf16.mxu1 %v11307_v2  ;;  %12076 = vst [vmem:[#allocation80_spill] sm:$0xff] %v11325_v29 }
 0x81f   :  { %6514 = vmatpush1.bf16.msra.mxu0 %v11311_v61  ;;  %6555 = vmatpush1.bf16.msra.mxu1 %v11313_v54  ;;  %v8306_v54 = vld [vmem:[%s11517_s3 + $0x4] sm:$0xf] }
 0x820   :  { %6515 = vmatprep.subr.bf16.mxu0 %v11317_v62  ;;  %6556 = vmatprep.subr.bf16.mxu1 %v11319_v12  ;;  %v5593_v61 = vrot.slane %v8306_v54, %v10092_v21  ;;  %v5597_v2 = vrot.slane %v8306_v54, %v10099_v0  ;;  %v5605_v53 = vrot.slane %v8306_v54, %v11785_v24 }
 0x821   :  { %v5601_v3 = vrot.slane %v8306_v54, %v11786_v14 }
 0x823   :  { %6516 = vmatpush1.bf16.msra.mxu0 %v11323_v4  ;;  %6557 = vmatpush1.bf16.msra.mxu1 %v11325_v29 }
 0x824   :  { %6791 = vmatprep.subr.bf16.mxu0 %v11025_v58  ;;  %6832 = vmatprep.subr.bf16.mxu1 %v11027_v59 }
 0x899   :  { %v5644_v1 = vpop.f32.mrb[48].mxu0  ;;  %v5685_v62 = vpop.f32.mrb[48].mxu1 }
 0x89a   :  { %v5645_v60 = vadd.f32 %v5644_v1, %v5593_v61  ;;  %v5646_v12 = vpop.f32.mrb[49].mxu0  ;;  %v5687_v23 = vpop.f32.mrb[49].mxu1  ;;  %v5686_v16 = vadd.f32 %v5685_v62, %v5601_v3 }
 0x89b   :  { %v5647_v4 = vadd.f32 %v5646_v12, %v5597_v2  ;;  %v5648_v17 = vpop.f32.mrb[50].mxu0  ;;  %v5689_v29 = vpop.f32.mrb[50].mxu1  ;;  %v5688_v19 = vadd.f32 %v5687_v23, %v5605_v53 }
 0x89c   :  { %v8371_v11 = vmul.f32 -1.442695, %v5645_v60  ;;  %v5649_v58 = vpop.f32.mrb[51].mxu0  ;;  %v5690_v5 = vpop.f32.mrb[51].mxu1 }
 0x89d   :  { %v8372_v59 = vmul.f32 -1.442695, %v5647_v4  ;;  %v8373_v6 = vmul.f32 -1.442695, %v5688_v19 }
 0x89e   :  { %9451 = vpow2.f32 %v8371_v11  ;;  %v5187_v11 = vld [vmem:[#allocation17 + $0x1] sm:$0x1] }
 0x89f   :  { %9453 = vpow2.f32 %v8372_v59 }
 0x8a0   :  { %9455 = vpow2.f32 %v8373_v6 }
 0x8a1   :  { %9457 = vtanh.f32 %v5686_v16 }
 0x8a8   :  { %v9452_v20 = vpop.eup %9451 }
 0x8a9   :  { %v9454_v1 = vpop.eup %9453  ;;  %v5695_v61 = vadd.f32 1.0, %v9452_v20 }
 0x8aa   :  { %v5701_v17 = vadd.f32 1.0, %v9454_v1  ;;  %v9456_v2 = vpop.eup %9455 }
 0x8ab   :  { %9459 = vrcp.f32 %v5695_v61  ;;  %v9458_v5 = vpop.eup %9457  ;;  %v5708_v60 = vadd.f32 1.0, %v9456_v2 }
 0x8ac   :  { %9461 = vrcp.f32 %v5701_v17 }
 0x8ad   :  { %9463 = vrcp.f32 %v5708_v60 }
 0x8b5   :  { %v9460_v12 = vpop.eup %9459 }
 0x8b6   :  { %v9462_v4 = vpop.eup %9461  ;;  %v5712_v29 = vmul.f32 %v9460_v12, %v9458_v5  ;;  %v5722_v12 = vld [vmem:[#allocation3 + $0x6] ss:$8 sm:$0xf] }
 0x8b7   :  { %v5711_v53 = vmul.f32 %v9462_v4, %v5187_v11 }
 0x8b9   :  { %v5713_v23 = vadd.f32 %v5712_v29, %v5711_v53  ;;  %v5950_v54 = vpop.f32.mrb[52].mxu0  ;;  %v5991_v19 = vpop.f32.mrb[52].mxu1 }
 0x8ba   :  { %v5952_v3 = vpop.f32.mrb[53].mxu0  ;;  %v5993_v62 = vpop.f32.mrb[53].mxu1 }
 0x8bb   :  { %9465 = vtanh.f32 %v5713_v23  ;;  %5717 = vst [vmem:[#allocation17 + $0x1] sm:$0x1] %v5713_v23  ;;  %v6002_v20 = vcombine.low %v5950_v54, %v5952_v3  ;;  %v6003_v16 = vcombine.low %v5991_v19, %v5993_v62  ;;  %v5954_v6 = vpop.f32.mrb[54].mxu0  ;;  %v5995_v58 = vpop.f32.mrb[54].mxu1 }
 0x8bc   :  { %v5955_v59 = vpop.f32.mrb[55].mxu0  ;;  %v5996_v1 = vpop.f32.mrb[55].mxu1 }
 0x8bd   :  { %v6010_v61 = vrot.slane %v6002_v20, %v10107_v15  ;;  %v6017_v17 = vrot.slane %v6003_v16, %v10107_v15  ;;  %v9464_v29 = vpop.eup %9463 }
 0x8bf   :  { %v6018_v2 = vcombine.low %v6010_v61, %v6017_v17 }
 0x8c1   :  { %v6025_v5 = vrot.slane %v6018_v2, %v10107_v15 }
 0x8c3   :  { %v6027_v4 = vadd.f32 %v6025_v5, %v5722_v12  ;;  %v5720_v5 = vld [vmem:[#allocation17] sm:$0x1] }
 0x8c5   :  { %v9466_v11 = vpop.eup %9465  ;;  %v8406_v60 = vmul.f32 -1.442695, %v6027_v4  ;;  %v6035_v53 = vrot.slane %v6027_v4, 1  ;;  %v6046_v19 = vrot.slane %v6027_v4, 3  ;;  %v6043_v16 = vrot.slane %v6027_v4, 2 }
 0x8c6   :  { %v5715_v23 = vmul.f32 %v9466_v11, %v9464_v29 }
 0x8c7   :  { %9467 = vpow2.f32 %v8406_v60  ;;  %v8407_v54 = vmul.f32 -1.442695, %v6035_v53  ;;  %v8408_v3 = vmul.f32 -1.442695, %v6046_v19 }
 0x8c8   :  { %5716 = vst [vmem:[#allocation15 + $0x1] sm:$0x1] %v5715_v23  ;;  %5718 = vst [vmem:[#allocation4 + $0x5] sm:$0x1] %v5715_v23 }
 0x8c9   :  { %9469 = vpow2.f32 %v8407_v54 }
 0x8ca   :  { %9471 = vpow2.f32 %v8408_v3 }
 0x8cf   :  { %v6061_v62 = vld [vmem:[#allocation15 + $0x1] sm:$0x1] }
 0x8d0   :  { %6064 = vst.msk [vmem:[#allocation5 + $0x1] sm:$0x1] %vm10054_vm0, %v6061_v62 }
 0x8d1   :  { %v9468_v20 = vpop.eup %9467 }
 0x8d2   :  { %v6031_v6 = vadd.f32 1.0, %v9468_v20 }
 0x8d3   :  { %v9470_v58 = vpop.eup %9469 }
 0x8d4   :  { %9473 = vrcp.f32 %v6031_v6  ;;  %v6040_v59 = vadd.f32 1.0, %v9470_v58  ;;  %v9472_v1 = vpop.eup %9471  ;;  %v12112_v6 = vld [vmem:[#allocation58_spill] sm:$0xff]  ;;  %v12113_v58 = vld [vmem:[#allocation59_spill] sm:$0xff] }
 0x8d5   :  { %9475 = vtanh.f32 %v6043_v16  ;;  %v6051_v12 = vadd.f32 1.0, %v9472_v1  ;;  %v12111_v16 = vld [vmem:[#allocation57_spill] sm:$0xff] }
 0x8d6   :  { %9477 = vrcp.f32 %v6040_v59  ;;  %v12114_v59 = vld [vmem:[#allocation60_spill] sm:$0xff]  ;;  %v12115_v1 = vld [vmem:[#allocation61_spill] sm:$0xff] }
 0x8d7   :  { %9479 = vrcp.f32 %v6051_v12  ;;  %v12120_v12 = vld [vmem:[#allocation66_spill] sm:$0xff] }
 0x8de   :  { %v9474_v61 = vpop.eup %9473 }
 0x8df   :  { %v9476_v17 = vpop.eup %9475 }
 0x8e0   :  { %v9478_v2 = vpop.eup %9477  ;;  %v6055_v11 = vmul.f32 %v9476_v17, %v9474_v61  ;;  %v12116_v61 = vld [vmem:[#allocation62_spill] sm:$0xff]  ;;  %v12117_v17 = vld [vmem:[#allocation63_spill] sm:$0xff] }
 0x8e1   :  { %v6054_v29 = vmul.f32 %v9478_v2, %v5720_v5  ;;  %v9480_v4 = vpop.eup %9479  ;;  %v12118_v2 = vld [vmem:[#allocation64_spill] sm:$0xff]  ;;  %v12119_v5 = vld [vmem:[#allocation65_spill] sm:$0xff] }
 0x8e3   :  { %v6056_v60 = vadd.f32 %v6055_v11, %v6054_v29  ;;  %v12121_v29 = vld [vmem:[#allocation67_spill] sm:$0xff]  ;;  %v12122_v11 = vld [vmem:[#allocation68_spill] sm:$0xff] }
 0x8e5   :  { %9481 = vtanh.f32 %v6056_v60  ;;  %6060 = vst [vmem:[#allocation17] sm:$0x1] %v6056_v60  ;;  %v12123_v60 = vld [vmem:[#allocation69_spill] sm:$0xff] }
 0x8ef   :  { %v9482_v53 = vpop.eup %9481 }
 0x8f0   :  { %v6058_v23 = vmul.f32 %v9482_v53, %v9480_v4  ;;  %v12124_v4 = vld [vmem:[#allocation70_spill] sm:$0xff]  ;;  %v12125_v53 = vld [vmem:[#allocation71_spill] sm:$0xff] }
 0x8f2   :  { %6059 = vst [vmem:[#allocation15] sm:$0x1] %v6058_v23  ;;  %6063 = vst.msk [vmem:[#allocation5] sm:$0x1] %vm10054_vm0, %v6058_v23  ;;  %v12126_v23 = vld [vmem:[#allocation72_spill] sm:$0xff] }
 0x8f9   :  { %v6065_v54 = vld [vmem:[#allocation5] sm:$0x3] }
 0x8fa   :  { %v6074_v19 = vrot.slane %v6065_v54, %v10099_v0  ;;  %v6070_v3 = vrot.slane %v6065_v54, %v10092_v21  ;;  %v12127_v54 = vld [vmem:[#allocation73_spill] sm:$0xff] }
 0x8fc   :  { %v6078_v62 = vpack.c.bf16 %v6074_v19, %v6074_v19  ;;  %v6077_v20 = vpack.c.bf16 %v6070_v3, %v6070_v3  ;;  %v12128_v19 = vld [vmem:[#allocation74_spill] sm:$0xff]  ;;  %v12129_v3 = vld [vmem:[#allocation75_spill] sm:$0xff] }
 0x8fe   :  { %6517 = vmatprep.mubr.bf16.mxu0 %v6078_v62  ;;  %6558 = vmatprep.mubr.bf16.mxu1 %v6078_v62  ;;  %v12130_v62 = vld [vmem:[#allocation76_spill] sm:$0xff] }
 0x8ff   :  { %6518 = vmatmul.mubr.bf16.vlgmr.msra.gmra.mrb[56].mxu0 %v6077_v20  ;;  %6559 = vmatmul.mubr.bf16.vlgmr.msra.gmra.mrb[56].mxu1 %v6077_v20  ;;  %v12131_v20 = vld [vmem:[#allocation77_spill] sm:$0xff] }
 0x900   :  { %6792 = vmatpush1.bf16.msra.mxu0 %v11047_v7  ;;  %6833 = vmatpush1.bf16.msra.mxu1 %v11049_v28  ;;  %v6594_v7 = vld [vmem:[#allocation15] sm:$0x1] }
 0x901   :  { %6793 = vmatprep.subr.bf16.mxu0 %v11051_v30  ;;  %6834 = vmatprep.subr.bf16.mxu1 %v11053_v31  ;;  %v6598_v28 = vpack.c.bf16 %v6594_v7, %v6594_v7  ;;  %v12077_v30 = vld [vmem:[#allocation23_spill] sm:$0xff]  ;;  %v12078_v31 = vld [vmem:[#allocation24_spill] sm:$0xff]  ;;  %v12132_v7 = vld [vmem:[#allocation78_spill] sm:$0xff] }
 0x902   :  { %6823 = vmatprep.mubr.bf16.mxu0 %v11759_v10  ;;  %6864 = vmatprep.mubr.bf16.mxu1 %v11759_v10 }
 0x904   :  { %6794 = vmatpush1.bf16.msra.mxu0 %v11057_v32  ;;  %6835 = vmatpush1.bf16.msra.mxu1 %v11059_v33  ;;  %v12079_v32 = vld [vmem:[#allocation25_spill] sm:$0xff]  ;;  %v12080_v33 = vld [vmem:[#allocation26_spill] sm:$0xff] }
 0x905   :  { %6795 = vmatprep.subr.bf16.mxu0 %v11063_v35  ;;  %6836 = vmatprep.subr.bf16.mxu1 %v11065_v36  ;;  %v12081_v35 = vld [vmem:[#allocation27_spill] sm:$0xff]  ;;  %v12082_v36 = vld [vmem:[#allocation28_spill] sm:$0xff] }
 0x908   :  { %6796 = vmatpush1.bf16.msra.mxu0 %v11071_v8  ;;  %6837 = vmatpush1.bf16.msra.mxu1 %v11073_v25  ;;  %v12083_v8 = vld [vmem:[#allocation29_spill] sm:$0xff]  ;;  %v12084_v25 = vld [vmem:[#allocation30_spill] sm:$0xff] }
 0x909   :  { %6797 = vmatprep.subr.bf16.mxu0 %v11077_v44  ;;  %6838 = vmatprep.subr.bf16.mxu1 %v11079_v47  ;;  %v12085_v44 = vld [vmem:[#allocation31_spill] sm:$0xff]  ;;  %v12086_v47 = vld [vmem:[#allocation32_spill] sm:$0xff] }
 0x90c   :  { %6798 = vmatpush1.bf16.msra.mxu0 %v11083_v42  ;;  %6839 = vmatpush1.bf16.msra.mxu1 %v11085_v45  ;;  %v12087_v42 = vld [vmem:[#allocation33_spill] sm:$0xff]  ;;  %v12088_v45 = vld [vmem:[#allocation34_spill] sm:$0xff] }
 0x90d   :  { %6799 = vmatprep.subr.bf16.mxu0 %v11089_v40  ;;  %6840 = vmatprep.subr.bf16.mxu1 %v11091_v48  ;;  %v12089_v40 = vld [vmem:[#allocation35_spill] sm:$0xff]  ;;  %v12090_v48 = vld [vmem:[#allocation36_spill] sm:$0xff] }
 0x910   :  { %6800 = vmatpush1.bf16.msra.mxu0 %v11095_v56  ;;  %6841 = vmatpush1.bf16.msra.mxu1 %v11097_v41  ;;  %v12091_v56 = vld [vmem:[#allocation37_spill] sm:$0xff]  ;;  %v12092_v41 = vld [vmem:[#allocation38_spill] sm:$0xff] }
 0x911   :  { %6801 = vmatprep.subr.bf16.mxu0 %v11101_v26  ;;  %6842 = vmatprep.subr.bf16.mxu1 %v11103_v49  ;;  %v12093_v26 = vld [vmem:[#allocation39_spill] sm:$0xff]  ;;  %v12094_v49 = vld [vmem:[#allocation40_spill] sm:$0xff] }
 0x914   :  { %6802 = vmatpush1.bf16.msra.mxu0 %v11107_v39  ;;  %6843 = vmatpush1.bf16.msra.mxu1 %v11109_v43  ;;  %v12095_v39 = vld [vmem:[#allocation41_spill] sm:$0xff]  ;;  %v12096_v43 = vld [vmem:[#allocation42_spill] sm:$0xff] }
 0x915   :  { %6803 = vmatprep.subr.bf16.mxu0 %v11113_v46  ;;  %6844 = vmatprep.subr.bf16.mxu1 %v11115_v38  ;;  %v12097_v46 = vld [vmem:[#allocation43_spill] sm:$0xff]  ;;  %v12098_v38 = vld [vmem:[#allocation45_spill] sm:$0xff] }
 0x918   :  { %6804 = vmatpush1.bf16.msra.mxu0 %v11119_v37  ;;  %6845 = vmatpush1.bf16.msra.mxu1 %v11121_v27  ;;  %v12099_v37 = vld [vmem:[#allocation47_spill] sm:$0xff]  ;;  %v12100_v27 = vld [vmem:[#allocation44_spill] sm:$0xff] }
 0x919   :  { %6805 = vmatprep.subr.bf16.mxu0 %v11125_v34  ;;  %6846 = vmatprep.subr.bf16.mxu1 %v11127_v50  ;;  %v12101_v34 = vld [vmem:[#allocation46_spill] sm:$0xff]  ;;  %v12102_v50 = vld [vmem:[#allocation49_spill] sm:$0xff] }
 0x91c   :  { %6806 = vmatpush1.bf16.msra.mxu0 %v11131_v55  ;;  %6847 = vmatpush1.bf16.msra.mxu1 %v11133_v57  ;;  %v12103_v55 = vld [vmem:[#allocation48_spill] sm:$0xff]  ;;  %v12104_v57 = vld [vmem:[#allocation50_spill] sm:$0xff] }
 0x91d   :  { %7360 = vmatprep.subr.bf16.mxu0 %v11139_v63  ;;  %7401 = vmatprep.subr.bf16.mxu1 %v11141_v51  ;;  %v12105_v63 = vld [vmem:[#allocation51_spill] sm:$0xff]  ;;  %v12106_v51 = vld [vmem:[#allocation52_spill] sm:$0xff] }
 0x91f   :  { %6824 = vmatmul.mubr.bf16.vlgmr.msra.gmra.mrb[60].mxu0 %v6598_v28  ;;  %6865 = vmatmul.mubr.bf16.vlgmr.msra.gmra.mrb[60].mxu1 %v6598_v28  ;;  %v12133_v28 = vld [vmem:[#allocation79_spill] sm:$0xff] }
 0x920   :  { %7361 = vmatpush1.bf16.msra.mxu0 %v11143_v52  ;;  %7402 = vmatpush1.bf16.msra.mxu1 %v11145_v13  ;;  %v12107_v52 = vld [vmem:[#allocation53_spill] sm:$0xff]  ;;  %v12108_v13 = vld [vmem:[#allocation54_spill] sm:$0xff] }
 0x921   :  { %7362 = vmatprep.subr.bf16.mxu0 %v11151_v9  ;;  %7403 = vmatprep.subr.bf16.mxu1 %v11153_v22  ;;  %v12109_v9 = vld [vmem:[#allocation55_spill] sm:$0xff]  ;;  %v12110_v22 = vld [vmem:[#allocation56_spill] sm:$0xff] }
 0x924   :  { %7363 = vmatpush1.bf16.msra.mxu0 %v12077_v30  ;;  %7404 = vmatpush1.bf16.msra.mxu1 %v12078_v31  ;;  %v12134_v30 = vld [vmem:[#allocation80_spill] sm:$0xff]  ;;  %v8409_v31 = vld [vmem:[%s11517_s3 + $0x4] sm:$0xf] }
 0x925   :  { %7364 = vmatprep.subr.bf16.mxu0 %v12079_v32  ;;  %7405 = vmatprep.subr.bf16.mxu1 %v12080_v33  ;;  %v6468_v32 = vrot.slane %v8409_v31, %v10092_v21  ;;  %v6472_v33 = vrot.slane %v8409_v31, %v10099_v0 }
 0x928   :  { %7365 = vmatpush1.bf16.msra.mxu0 %v12081_v35  ;;  %7406 = vmatpush1.bf16.msra.mxu1 %v12082_v36 }
 0x929   :  { %7366 = vmatprep.subr.bf16.mxu0 %v12083_v8  ;;  %7407 = vmatprep.subr.bf16.mxu1 %v12084_v25 }
 0x92c   :  { %7367 = vmatpush1.bf16.msra.mxu0 %v12085_v44  ;;  %7408 = vmatpush1.bf16.msra.mxu1 %v12086_v47 }
 0x92d   :  { %7368 = vmatprep.subr.bf16.mxu0 %v12087_v42  ;;  %7409 = vmatprep.subr.bf16.mxu1 %v12088_v45 }
 0x930   :  { %7369 = vmatpush1.bf16.msra.mxu0 %v12089_v40  ;;  %7410 = vmatpush1.bf16.msra.mxu1 %v12090_v48 }
 0x931   :  { %7370 = vmatprep.subr.bf16.mxu0 %v12091_v56  ;;  %7411 = vmatprep.subr.bf16.mxu1 %v12092_v41 }
 0x934   :  { %7371 = vmatpush1.bf16.msra.mxu0 %v12093_v26  ;;  %7412 = vmatpush1.bf16.msra.mxu1 %v12094_v49  ;;  %v6480_v26 = vrot.slane %v8409_v31, %v11785_v24 }
 0x935   :  { %7372 = vmatprep.subr.bf16.mxu0 %v12095_v39  ;;  %7413 = vmatprep.subr.bf16.mxu1 %v12096_v43  ;;  %v6476_v39 = vrot.slane %v8409_v31, %v11786_v14 }
 0x938   :  { %7373 = vmatpush1.bf16.msra.mxu0 %v12097_v46  ;;  %7414 = vmatpush1.bf16.msra.mxu1 %v12098_v38 }
 0x939   :  { %7374 = vmatprep.subr.bf16.mxu0 %v12099_v37  ;;  %7415 = vmatprep.subr.bf16.mxu1 %v12100_v27 }
 0x93c   :  { %7375 = vmatpush1.bf16.msra.mxu0 %v12101_v34  ;;  %7416 = vmatpush1.bf16.msra.mxu1 %v12102_v50 }
 0x93d   :  { %7376 = vmatprep.subr.bf16.mxu0 %v12103_v55  ;;  %7417 = vmatprep.subr.bf16.mxu1 %v12104_v57 }
 0x940   :  { %7377 = vmatpush1.bf16.msra.mxu0 %v12105_v63  ;;  %7418 = vmatpush1.bf16.msra.mxu1 %v12106_v51 }
 0x941   :  { %7378 = vmatprep.subr.bf16.mxu0 %v12107_v52  ;;  %7419 = vmatprep.subr.bf16.mxu1 %v12108_v13  ;;  %v6062_v52 = vld [vmem:[#allocation17 + $0x1] sm:$0x1] }
 0x944   :  { %7379 = vmatpush1.bf16.msra.mxu0 %v12109_v9  ;;  %7420 = vmatpush1.bf16.msra.mxu1 %v12110_v22 }
 0x945   :  { %7380 = vmatprep.subr.bf16.mxu0 %v12111_v16  ;;  %7421 = vmatprep.subr.bf16.mxu1 %v12112_v6 }
 0x948   :  { %7381 = vmatpush1.bf16.msra.mxu0 %v12113_v58  ;;  %7422 = vmatpush1.bf16.msra.mxu1 %v12114_v59 }
 0x949   :  { %7382 = vmatprep.subr.bf16.mxu0 %v12115_v1  ;;  %7423 = vmatprep.subr.bf16.mxu1 %v12116_v61 }
 0x94c   :  { %7383 = vmatpush1.bf16.msra.mxu0 %v12117_v17  ;;  %7424 = vmatpush1.bf16.msra.mxu1 %v12118_v2 }
 0x94d   :  { %7384 = vmatprep.subr.bf16.mxu0 %v12119_v5  ;;  %7425 = vmatprep.subr.bf16.mxu1 %v12120_v12 }
 0x950   :  { %7385 = vmatpush1.bf16.msra.mxu0 %v12121_v29  ;;  %7426 = vmatpush1.bf16.msra.mxu1 %v12122_v11 }
 0x951   :  { %7386 = vmatprep.subr.bf16.mxu0 %v12123_v60  ;;  %7427 = vmatprep.subr.bf16.mxu1 %v12124_v4 }
 0x954   :  { %7387 = vmatpush1.bf16.msra.mxu0 %v12125_v53  ;;  %7428 = vmatpush1.bf16.msra.mxu1 %v12126_v23  ;;  %v6597_v53 = vld [vmem:[#allocation3 + $0x7] ss:$8 sm:$0xf] }
 0x955   :  { %7388 = vmatprep.subr.bf16.mxu0 %v12127_v54  ;;  %7429 = vmatprep.subr.bf16.mxu1 %v12128_v19 }
 0x958   :  { %7389 = vmatpush1.bf16.msra.mxu0 %v12129_v3  ;;  %7430 = vmatpush1.bf16.msra.mxu1 %v12130_v62 }
 0x959   :  { %7390 = vmatprep.subr.bf16.mxu0 %v12131_v20  ;;  %7431 = vmatprep.subr.bf16.mxu1 %v12132_v7 }
 0x95c   :  { %7391 = vmatpush1.bf16.msra.mxu0 %v12133_v28  ;;  %7432 = vmatpush1.bf16.msra.mxu1 %v12134_v30 }
 0x9d2   :  { %v6519_v35 = vpop.f32.mrb[56].mxu0  ;;  %v6560_v36 = vpop.f32.mrb[56].mxu1 }
 0x9d3   :  { %v6520_v8 = vadd.f32 %v6519_v35, %v6468_v32  ;;  %v6521_v25 = vpop.f32.mrb[57].mxu0  ;;  %v6562_v44 = vpop.f32.mrb[57].mxu1  ;;  %v6561_v46 = vadd.f32 %v6560_v36, %v6476_v39 }
 0x9d4   :  { %v6522_v47 = vadd.f32 %v6521_v25, %v6472_v33  ;;  %v6523_v42 = vpop.f32.mrb[58].mxu0  ;;  %v6564_v45 = vpop.f32.mrb[58].mxu1  ;;  %v6563_v49 = vadd.f32 %v6562_v44, %v6480_v26 }
 0x9d5   :  { %v8474_v40 = vmul.f32 -1.442695, %v6520_v8  ;;  %v6524_v48 = vpop.f32.mrb[59].mxu0  ;;  %v6565_v56 = vpop.f32.mrb[59].mxu1  ;;  %v6595_v42 = vld [vmem:[#allocation17] sm:$0x1] }
 0x9d6   :  { %v8475_v41 = vmul.f32 -1.442695, %v6522_v47  ;;  %v8476_v43 = vmul.f32 -1.442695, %v6563_v49 }
 0x9d7   :  { %9483 = vpow2.f32 %v8474_v40 }
 0x9d8   :  { %9485 = vpow2.f32 %v8475_v41 }
 0x9d9   :  { %9487 = vpow2.f32 %v8476_v43 }
 0x9da   :  { %9489 = vtanh.f32 %v6561_v46 }
 0x9e1   :  { %v9484_v38 = vpop.eup %9483 }
 0x9e2   :  { %v9486_v37 = vpop.eup %9485  ;;  %v6570_v27 = vadd.f32 1.0, %v9484_v38 }
 0x9e3   :  { %v6576_v34 = vadd.f32 1.0, %v9486_v37  ;;  %v9488_v50 = vpop.eup %9487 }
 0x9e4   :  { %9491 = vrcp.f32 %v6570_v27  ;;  %v9490_v55 = vpop.eup %9489  ;;  %v6583_v13 = vadd.f32 1.0, %v9488_v50  ;;  %v9253_v27 = vld [vmem:[#allocation13 + $0x4] ss:$8 sps:$4 sm:$0xff]   ;;  %v9256_v50 = vld [vmem:[#allocation13 + $0x14] ss:$8 sps:$4 sm:$0xff]  }
 0x9e5   :  { %9493 = vrcp.f32 %v6576_v34  ;;  %v9251_v34 = vld [vmem:[#allocation13] ss:$8 sps:$4 sm:$0xff]   ;;  %7579 = vmatprep.subr.bf16.mxu0 %v9253_v27 }
 0x9e6   :  { %9495 = vrcp.f32 %v6583_v13  ;;  %v9263_v13 = vld [vmem:[#allocation13 + $0x40] ss:$8 sps:$4 sm:$0xff]  }
 0x9ee   :  { %v9492_v57 = vpop.eup %9491 }
 0x9ef   :  { %v9494_v63 = vpop.eup %9493  ;;  %v6587_v51 = vmul.f32 %v9492_v57, %v9490_v55  ;;  %v9259_v55 = vld [vmem:[#allocation13 + $0x24] ss:$8 sps:$4 sm:$0xff]   ;;  %v9257_v57 = vld [vmem:[#allocation13 + $0x20] ss:$8 sps:$4 sm:$0xff]  }
 0x9f0   :  { %v6586_v9 = vmul.f32 %v9494_v63, %v6062_v52  ;;  %v9496_v54 = vpop.eup %9495  ;;  %v9262_v63 = vld [vmem:[#allocation13 + $0x34] ss:$8 sps:$4 sm:$0xff]   ;;  %v9265_v52 = vld [vmem:[#allocation13 + $0x44] ss:$8 sps:$4 sm:$0xff]  }
 0x9f2   :  { %v6588_v22 = vadd.f32 %v6587_v51, %v6586_v9  ;;  %v6825_v16 = vpop.f32.mrb[60].mxu0  ;;  %v6866_v6 = vpop.f32.mrb[60].mxu1  ;;  %v9260_v51 = vld [vmem:[#allocation13 + $0x30] ss:$8 sps:$4 sm:$0xff]  }
 0x9f3   :  { %v6827_v58 = vpop.f32.mrb[61].mxu0  ;;  %v6868_v59 = vpop.f32.mrb[61].mxu1  ;;  %v9266_v9 = vld [vmem:[#allocation13 + $0x50] ss:$8 sps:$4 sm:$0xff]  }
 0x9f4   :  { %9497 = vtanh.f32 %v6588_v22  ;;  %6592 = vst [vmem:[#allocation17 + $0x1] sm:$0x1] %v6588_v22  ;;  %v6877_v1 = vcombine.low %v6825_v16, %v6827_v58  ;;  %v6878_v61 = vcombine.low %v6866_v6, %v6868_v59  ;;  %v6829_v17 = vpop.f32.mrb[62].mxu0  ;;  %v6870_v2 = vpop.f32.mrb[62].mxu1  ;;  %v9269_v22 = vld [vmem:[#allocation13 + $0x60] ss:$8 sps:$4 sm:$0xff]  }
 0x9f5   :  { %v6830_v5 = vpop.f32.mrb[63].mxu0  ;;  %v6871_v12 = vpop.f32.mrb[63].mxu1  ;;  %v9271_v16 = vld [vmem:[#allocation13 + $0x64] ss:$8 sps:$4 sm:$0xff]   ;;  %v9274_v6 = vld [vmem:[#allocation13 + $0x74] ss:$8 sps:$4 sm:$0xff]  }
 0x9f6   :  { %v6885_v29 = vrot.slane %v6877_v1, %v10107_v15  ;;  %v6892_v11 = vrot.slane %v6878_v61, %v10107_v15  ;;  %v9272_v58 = vld [vmem:[#allocation13 + $0x70] ss:$8 sps:$4 sm:$0xff]   ;;  %v8512_v59 = vld [vmem:[%s11517_s3 + $0x4] sm:$0xf]  ;;  %s9726_s3 = smov [#allocation15]  }
 0x9f7   :  { %v7343_v1 = vrot.slane %v8512_v59, %v10092_v21  ;;  %v7347_v61 = vrot.slane %v8512_v59, %v10099_v0  ;;  %s7637_s1 = sshll.u32 %s9726_s3, 4  ;;  %s7638_s1 = int_to_ptr.vmem [resolvable:$true] %s7637_s1 }
 0x9f8   :  { %v6893_v60 = vcombine.low %v6885_v29, %v6892_v11  ;;  %s9639_s17 = scalar_lea.vmem %s7638_s1, 32  ;;  %p9644_p2 = scmp.lt.s32.totalorder %s7638_s1, %s7638_s1 }
 0x9f9   :  { %p9640_p1 = scmp.ne.s32.totalorder %s7638_s1, %s9639_s17  ;;  %p9645_p3 = scmp.lt.s32.totalorder %s9639_s17, %s9639_s17 }
 0x9fa   :  { %v6900_v4 = vrot.slane %v6893_v60, %v10107_v15 }
 0x9fb   :  { %p9646_p4 = por %p9645_p3, %p9644_p2 }
 0x9fc   :  { %v6902_v23 = vadd.f32 %v6900_v4, %v6597_v53 }
 0x9fd   :  { %p9647_p5 = pnand %p9646_p4, %p9640_p1 }
 0x9fe   :  { %v9498_v19 = vpop.eup %9497  ;;  %v8509_v3 = vmul.f32 -1.442695, %v6902_v23  ;;  %v6910_v62 = vrot.slane %v6902_v23, 1  ;;  %v6921_v28 = vrot.slane %v6902_v23, 3  ;;  %v6918_v15 = vrot.slane %v6902_v23, 2 }
 0x9ff   :  { %v6590_v20 = vmul.f32 %v9498_v19, %v9496_v54 }
 0xa00   :  { %9499 = vpow2.f32 %v8509_v3  ;;  %v8510_v7 = vmul.f32 -1.442695, %v6910_v62  ;;  %v8511_v30 = vmul.f32 -1.442695, %v6921_v28  ;;  %v7355_v3 = vrot.slane %v8512_v59, %v11785_v24 }
 0xa01   :  { %6591 = vst [vmem:[#allocation15 + $0x1] sm:$0x1] %v6590_v20  ;;  %6593 = vst [vmem:[#allocation4 + $0x6] sm:$0x1] %v6590_v20  ;;  %v7351_v20 = vrot.slane %v8512_v59, %v11786_v14 }
 0xa02   :  { %9501 = vpow2.f32 %v8510_v7 }
 0xa03   :  { %9503 = vpow2.f32 %v8511_v30 }
 0xa08   :  { %v6936_v31 = vld [vmem:[#allocation15 + $0x1] sm:$0x1] }
 0xa09   :  { %6939 = vst.msk [vmem:[#allocation5 + $0x1] sm:$0x1] %vm10054_vm0, %v6936_v31 }
 0xa0a   :  { %v9500_v32 = vpop.eup %9499 }
 0xa0b   :  { %v6906_v33 = vadd.f32 1.0, %v9500_v32 }
 0xa0c   :  { %v9502_v35 = vpop.eup %9501 }
 0xa0d   :  { %9505 = vrcp.f32 %v6906_v33  ;;  %v6915_v36 = vadd.f32 1.0, %v9502_v35  ;;  %v9504_v8 = vpop.eup %9503 }
 0xa0e   :  { %9507 = vtanh.f32 %v6918_v15  ;;  %v6926_v45 = vadd.f32 1.0, %v9504_v8 }
 0xa0f   :  { %9509 = vrcp.f32 %v6915_v36 }
 0xa10   :  { %9511 = vrcp.f32 %v6926_v45 }
 0xa17   :  { %v9506_v25 = vpop.eup %9505 }
 0xa18   :  { %v9508_v44 = vpop.eup %9507 }
 0xa19   :  { %v9510_v47 = vpop.eup %9509  ;;  %v6930_v48 = vmul.f32 %v9508_v44, %v9506_v25  ;;  %v6937_v25 = vld [vmem:[#allocation17 + $0x1] sm:$0x1] }
 0xa1a   :  { %v6929_v40 = vmul.f32 %v9510_v47, %v6595_v42  ;;  %v9512_v41 = vpop.eup %9511 }
 0xa1c   :  { %v6931_v56 = vadd.f32 %v6930_v48, %v6929_v40 }
 0xa1e   :  { %9513 = vtanh.f32 %v6931_v56  ;;  %6935 = vst [vmem:[#allocation17] sm:$0x1] %v6931_v56 }
 0xa28   :  { %v9514_v26 = vpop.eup %9513 }
 0xa29   :  { %v6933_v49 = vmul.f32 %v9514_v26, %v9512_v41 }
 0xa2b   :  { %6934 = vst [vmem:[#allocation15] sm:$0x1] %v6933_v49  ;;  %6938 = vst.msk [vmem:[#allocation5] sm:$0x1] %vm10054_vm0, %v6933_v49 }
 0xa32   :  { %v6940_v39 = vld [vmem:[#allocation5] sm:$0x3] }
 0xa33   :  { %v6945_v43 = vrot.slane %v6940_v39, %v10092_v21  ;;  %v6949_v46 = vrot.slane %v6940_v39, %v10099_v0 }
 0xa35   :  { %v6952_v38 = vpack.c.bf16 %v6945_v43, %v6945_v43  ;;  %v6953_v37 = vpack.c.bf16 %v6949_v46, %v6949_v46 }
 0xa37   :  { %7392 = vmatprep.mubr.bf16.mxu0 %v6953_v37  ;;  %7433 = vmatprep.mubr.bf16.mxu1 %v6953_v37 }
 0xa38   :  { %7393 = vmatmul.mubr.bf16.vlgmr.msra.gmra.mrb[64].mxu0 %v6952_v38  ;;  %7434 = vmatmul.mubr.bf16.vlgmr.msra.gmra.mrb[64].mxu1 %v6952_v38 }
 0xa39   :  { %7611 = vmatprep.mubr.bf16.mxu0 %v11759_v10  ;;  %7580 = vmatpush1.bf16.msra.mxu0 %v9251_v34  ;;  %v9268_v10 = vld [vmem:[#allocation13 + $0x54] ss:$8 sps:$4 sm:$0xff]  }
 0xa3a   :  { %7581 = vmatprep.subr.bf16.mxu0 %v9256_v50 }
 0xa3d   :  { %7582 = vmatpush1.bf16.msra.mxu0 %v9254_v18 }
 0xa3e   :  { %7583 = vmatprep.subr.bf16.mxu0 %v9259_v55 }
 0xa41   :  { %7584 = vmatpush1.bf16.msra.mxu0 %v9257_v57 }
 0xa42   :  { %7585 = vmatprep.subr.bf16.mxu0 %v9262_v63 }
 0xa45   :  { %7586 = vmatpush1.bf16.msra.mxu0 %v9260_v51 }
 0xa46   :  { %7587 = vmatprep.subr.bf16.mxu0 %v9265_v52 }
 0xa49   :  { %7588 = vmatpush1.bf16.msra.mxu0 %v9263_v13 }
 0xa4a   :  { %7589 = vmatprep.subr.bf16.mxu0 %v9268_v10 }
 0xa4d   :  { %7590 = vmatpush1.bf16.msra.mxu0 %v9266_v9 }
 0xa4e   :  { %7591 = vmatprep.subr.bf16.mxu0 %v9271_v16 }
 0xa51   :  { %7592 = vmatpush1.bf16.msra.mxu0 %v9269_v22 }
 0xa52   :  { %7593 = vmatprep.subr.bf16.mxu0 %v9274_v6 }
 0xa55   :  { %7594 = vmatpush1.bf16.msra.mxu0 %v9272_v58 }
 0xb0b   :  { %v7394_v17 = vpop.f32.mrb[64].mxu0  ;;  %v7435_v2 = vpop.f32.mrb[64].mxu1 }
 0xb0c   :  { %v7395_v5 = vadd.f32 %v7394_v17, %v7343_v1  ;;  %v7396_v12 = vpop.f32.mrb[65].mxu0  ;;  %v7437_v29 = vpop.f32.mrb[65].mxu1  ;;  %v7436_v28 = vadd.f32 %v7435_v2, %v7351_v20 }
 0xb0d   :  { %v7397_v11 = vadd.f32 %v7396_v12, %v7347_v61  ;;  %v7398_v60 = vpop.f32.mrb[66].mxu0  ;;  %v7439_v4 = vpop.f32.mrb[66].mxu1  ;;  %v7438_v62 = vadd.f32 %v7437_v29, %v7355_v3 }
 0xb0e   :  { %v8577_v53 = vmul.f32 -1.442695, %v7395_v5  ;;  %v7399_v23 = vpop.f32.mrb[67].mxu0  ;;  %v7440_v54 = vpop.f32.mrb[67].mxu1 }
 0xb0f   :  { %v8578_v19 = vmul.f32 -1.442695, %v7397_v11  ;;  %v8579_v7 = vmul.f32 -1.442695, %v7438_v62 }
 0xb10   :  { %9515 = vpow2.f32 %v8577_v53 }
 0xb11   :  { %9517 = vpow2.f32 %v8578_v19 }
 0xb12   :  { %9519 = vpow2.f32 %v8579_v7 }
 0xb13   :  { %9521 = vtanh.f32 %v7436_v28 }
 0xb1a   :  { %v9516_v30 = vpop.eup %9515 }
 0xb1b   :  { %v9518_v31 = vpop.eup %9517  ;;  %v7445_v32 = vadd.f32 1.0, %v9516_v30 }
 0xb1c   :  { %v7451_v15 = vadd.f32 1.0, %v9518_v31  ;;  %v9520_v33 = vpop.eup %9519 }
 0xb1d   :  { %9523 = vrcp.f32 %v7445_v32  ;;  %v9522_v35 = vpop.eup %9521  ;;  %v7458_v44 = vadd.f32 1.0, %v9520_v33 }
 0xb1e   :  { %9525 = vrcp.f32 %v7451_v15 }
 0xb1f   :  { %9527 = vrcp.f32 %v7458_v44 }
 0xb27   :  { %v9524_v36 = vpop.eup %9523 }
 0xb28   :  { %v9526_v8 = vpop.eup %9525  ;;  %v7462_v24 = vmul.f32 %v9524_v36, %v9522_v35 }
 0xb29   :  { %v7461_v47 = vmul.f32 %v9526_v8, %v6937_v25  ;;  %v9528_v14 = vpop.eup %9527 }
 0xb2b   :  { %v7463_v42 = vadd.f32 %v7462_v24, %v7461_v47 }
 0xb2d   :  { %9529 = vtanh.f32 %v7463_v42  ;;  %7467 = vst [vmem:[#allocation17 + $0x1] sm:$0x1] %v7463_v42 }
 0xb37   :  { %v9530_v45 = vpop.eup %9529 }
 0xb38   :  { %v7465_v40 = vmul.f32 %v9530_v45, %v9528_v14 }
 0xb3a   :  { %7468 = vst [vmem:[#allocation4 + $0x7] sm:$0x1] %v7465_v40  ;;  %7466 = vst [vmem:[#allocation15 + $0x1] sm:$0x1] %v7465_v40 }
 0xb41   :  { %v7469_v48 = vld [vmem:[#allocation4] sm:$0xff] }
 0xb42   :  { %v7470_v56 = vpack.c.bf16 %v7469_v48, %v7469_v48 }
 0xb44   :  { %7612 = vmatmul.mubr.bf16.vlgmr.msra.gmra.mrb[68].mxu0 %v7470_v56 }
 0xb45   :  { %9650 = shalt.err (!%p9647_p5)
}
 0xb46   :  { %s9651_s21 = scalar_lea.hbm %s11523_s9, 32 }
 0xb47   :  { %p9652_p6 = scmp.ne.s32.totalorder %s11523_s9, %s9651_s21  ;;  %p9655_p7 = scmp.lt.u32.totalorder %s9651_s21, %s11523_s9 }
 0xb49   :  { %p9657_p8 = pnand %p9655_p7, %p9652_p6 }
 0xb4b   :  { %9660 = shalt.err (!%p9657_p8)
}
 0xb4c   :  { %s9727_s26 = smov 1   ;;  %s9728_s24 = smov [#allocation17]  }
 0xb4d   :  { %7643 = dma.vmem_to_hbm [thread:$0]  %s7638_s1, 32, %s11523_s9, [#allocation16], %s9718_s13, %s9718_s13, %s9727_s26  }
 0xb4e   :  { %s7649_s27 = sshll.u32 %s9728_s24, 4  ;;  %s7650_s27 = int_to_ptr.vmem [resolvable:$true] %s7649_s27 }
 0xb4f   :  { %s9661_s28 = scalar_lea.vmem %s7650_s27, 32  ;;  %p9666_p10 = scmp.lt.s32.totalorder %s7650_s27, %s7650_s27 }
 0xb50   :  { %p9662_p9 = scmp.ne.s32.totalorder %s7650_s27, %s9661_s28  ;;  %p9667_p11 = scmp.lt.s32.totalorder %s9661_s28, %s9661_s28 }
 0xb52   :  { %p9668_p12 = por %p9667_p11, %p9666_p10 }
 0xb54   :  { %p9669_p13 = pnand %p9668_p12, %p9662_p9 }
 0xb56   :  { %9672 = shalt.err (!%p9669_p13)
}
 0xb57   :  { %s9673_s0 = scalar_lea.hbm %s11524_s10, 32 }
 0xb58   :  { %p9674_p0 = scmp.ne.s32.totalorder %s11524_s10, %s9673_s0  ;;  %p9677_p1 = scmp.lt.u32.totalorder %s9673_s0, %s11524_s10 }
 0xb5a   :  { %p9679_p2 = pnand %p9677_p1, %p9674_p0 }
 0xb5c   :  { %9682 = shalt.err (!%p9679_p2)
}
 0xb5d   :  { %7655 = dma.vmem_to_hbm [thread:$0]  %s7650_s27, 32, %s11524_s10, [#allocation16], %s9718_s13, %s9718_s13, %s9727_s26  }
 0xb5e   :  { %v7487_v41 = vld [vmem:[%s11521_s7] sm:$0x3]  ;;  %s9729_s3 = smov [#allocation14]  }
 0xb5f   :  { %v7492_v26 = vrot.slane %v7487_v41, %v10092_v21  ;;  %v7496_v49 = vrot.slane %v7487_v41, %v10099_v0  ;;  %s7628_s1 = sshll.u32 %s9729_s3, 4  ;;  %s7629_s1 = int_to_ptr.vmem [resolvable:$true] %s7628_s1 }
 0xb60   :  { %s9683_s10 = scalar_lea.vmem %s7629_s1, 256  ;;  %p9688_p4 = scmp.lt.s32.totalorder %s7629_s1, %s7629_s1 }
 0xb61   :  { %p9684_p3 = scmp.ne.s32.totalorder %s7629_s1, %s9683_s10  ;;  %p9689_p5 = scmp.lt.s32.totalorder %s9683_s10, %s9683_s10 }
 0xb63   :  { %p9690_p6 = por %p9689_p5, %p9688_p4 }
 0xb65   :  { %p9691_p7 = pnand %p9690_p6, %p9684_p3 }
 0xc17   :  { %v7613_v39 = vpop.f32.mrb[68].mxu0 }
 0xc18   :  { %v7614_v43 = vadd.f32 %v7613_v39, %v7492_v26  ;;  %v7615_v46 = vpop.f32.mrb[69].mxu0 }
 0xc19   :  { %v7616_v38 = vadd.f32 %v7615_v46, %v7496_v49  ;;  %v7617_v37 = vpop.f32.mrb[70].mxu0 }
 0xc1a   :  { %7620 = vst [vmem:[#allocation14] sm:$0xff] %v7614_v43  ;;  %v7618_v27 = vpop.f32.mrb[71].mxu0 }
 0xc1b   :  { %7621 = vst [vmem:[#allocation14 + $0x8] sm:$0xff] %v7616_v38 }
 0xc1c   :  { %9694 = shalt.err (!%p9691_p7)
}
 0xc1d   :  { %s9695_s17 = scalar_lea.hbm %s11522_s8, 256 }
 0xc1e   :  { %p9696_p8 = scmp.ne.s32.totalorder %s11522_s8, %s9695_s17  ;;  %p9699_p9 = scmp.lt.u32.totalorder %s9695_s17, %s11522_s8 }
 0xc20   :  { %p9701_p10 = pnand %p9699_p9, %p9696_p8 }
 0xc22   :  { %9704 = shalt.err (!%p9701_p10)
}
 0xc23   :  { %7631 = dma.vmem_to_hbm [thread:$0]  %s7629_s1, 256, %s11522_s8, [#allocation10]  }
 0xc24   :  { %9711 = dma.done.wait [#allocation10], 256  }
 0xc25   :  { %9712 = vsyncadd [#allocation10], 4294967040 }
 0xc26   :  { %9713 = dma.done.wait [#allocation16], 64  }
 0xc27   :  { %9714 = vsyncadd [#allocation16], 4294967232 }
 0xc28   :  { %7665 = vsyncpa [#allocation9], 1 }
 0xc29   :  { %7666 = vsyncpa [#allocation12], 1 }
 0xc2a   :  { %7667 = vsyncpa [#allocation10], 1 }
 0xc2b   :  { %7668 = vsyncpa [#allocation16], 1 }

</bundles_post_ra>
